<compile_context>
chip_gen: v7x
topology: tpu7x:2x2x1
jax: 0.10.0
libtpu: 0.0.40
codegen_flags: <defaults>
</compile_context>

<pallas_src>
import math

import jax
import jax.numpy as jnp
from jax.experimental import pallas as pl
from jax.experimental.pallas import tpu as pltpu


# ---------------------------------------------------------------------------
# Tiled matmul + affine (+ fused elementwise epilogue) Pallas kernel
# ---------------------------------------------------------------------------

def _make_mm_kernel(n_mul, has_residual):
    """Kernel: acc += P @ W over K tiles; on the last K tile apply the folded
    BN affine, optional elementwise products and optional residual-add+ReLU,
    then store (bf16)."""

    def kernel(*refs):
        p_ref, w_ref, s_ref, b_ref = refs[:4]
        rest = refs[4:]
        mul_refs = rest[:n_mul]
        rest = rest[n_mul:]
        if has_residual:
            res_ref, o_ref, acc_ref = rest
        else:
            res_ref = None
            o_ref, acc_ref = rest

        k = pl.program_id(2)

        @pl.when(k == 0)
        def _init():
            acc_ref[...] = jnp.zeros_like(acc_ref)

        acc_ref[...] += jnp.dot(p_ref[...], w_ref[...],
                                preferred_element_type=jnp.float32)

        @pl.when(k == pl.num_programs(2) - 1)
        def _finalize():
            y = acc_ref[...] * s_ref[...] + b_ref[...]      # f32 epilogue math
            for m_ref in mul_refs:
                y = y * m_ref[...].astype(jnp.float32)
            if res_ref is not None:
                y = jnp.maximum(y + res_ref[...].astype(jnp.float32), 0.0)
            o_ref[...] = y.astype(o_ref.dtype)

    return kernel


def _round_up(x, m):
    return -(-x // m) * m


def _tile(dim, base, cap, sublane16=False):
    """Pick a tile (multiple of `base`, <= cap) and the padded dim it divides,
    minimizing zero padding.  If `sublane16`, non-full tiles are rounded to a
    multiple of 16 (friendly for bf16 sublane packing)."""
    dp = _round_up(dim, base)
    nblk = -(-dp // cap)
    t = _round_up(-(-dp // nblk), base)
    if sublane16 and t < dp and t % 16:
        t = _round_up(t, 16)
    return t, _round_up(dp, t)


def mm_affine(patches, wmat, scale, bias, mul_ops=(), residual=None):
    """(M, K) @ (K, Cout) with fused per-output-channel affine (folded BN /
    conv bias) and optional fused elementwise epilogue.  bf16 in / bf16 out,
    f32 accumulation in a VMEM scratch."""
    M, K = patches.shape
    Cout = wmat.shape[1]

    tm, Mp = _tile(M, 8, 512, sublane16=True)
    tk, Kp = _tile(K, 128, 2048)
    tn, Cp = _tile(Cout, 128, 256)

    # v7x megacore: expose >=2 blocks on the parallel (M, Cout) axes when we
    # can split without extra padding (otherwise one TensorCore idles).
    if (Mp // tm) * (Cp // tn) < 2:
        if Mp >= 32 and Mp % 32 == 0:
            tm = Mp // 2
        elif Cp >= 256 and Cp % 256 == 0:
            tn = Cp // 2

    def _pad2(a, rpad, cpad):
        return jnp.pad(a, ((0, rpad), (0, cpad))) if (rpad or cpad) else a

    p = _pad2(patches.astype(jnp.bfloat16), Mp - M, Kp - K)
    w = _pad2(wmat.astype(jnp.bfloat16), Kp - K, Cp - Cout)
    s = jnp.pad(scale.astype(jnp.float32), (0, Cp - Cout)).reshape(1, Cp)
    b = jnp.pad(bias.astype(jnp.float32), (0, Cp - Cout)).reshape(1, Cp)

    extra_list = list(mul_ops) + ([residual] if residual is not None else [])
    extras = [_pad2(e.astype(jnp.bfloat16), Mp - M, Cp - Cout)
              for e in extra_list]

    grid = (Mp // tm, Cp // tn, Kp // tk)

    mn_spec = pl.BlockSpec((tm, tn), lambda i, j, k: (i, j))
    in_specs = [
        pl.BlockSpec((tm, tk), lambda i, j, k: (i, k)),   # patches
        pl.BlockSpec((tk, tn), lambda i, j, k: (k, j)),   # weights
        pl.BlockSpec((1, tn), lambda i, j, k: (0, j)),    # scale
        pl.BlockSpec((1, tn), lambda i, j, k: (0, j)),    # bias
    ] + [mn_spec] * len(extras)                           # epilogue operands

    flops = 2 * Mp * Kp * Cp
    bytes_accessed = (p.size * 2 + w.size * 2 + (s.size + b.size) * 4
                      + sum(e.size for e in extras) * 2 + Mp * Cp * 2)

    out = pl.pallas_call(
        _make_mm_kernel(len(mul_ops), residual is not None),
        out_shape=jax.ShapeDtypeStruct((Mp, Cp), jnp.bfloat16),
        grid=grid,
        in_specs=in_specs,
        out_specs=mn_spec,
        scratch_shapes=[pltpu.VMEM((tm, tn), jnp.float32)],
        compiler_params=pltpu.CompilerParams(
            dimension_semantics=("parallel", "parallel", "arbitrary")),
        cost_estimate=pl.CostEstimate(flops=flops, transcendentals=0,
                                      bytes_accessed=bytes_accessed),
    )(p, w, s, b, *extras)

    if Mp != M or Cp != Cout:
        out = out[:M, :Cout]
    return out


# --------------------------- conv + BN (BasicConv2d) ------------------------

def conv_affine(x, w, scale, bias, padding=(0, 0), dilation=(1, 1),
                mul_with=(), residual=None):
    """x: [N,H,W,Cin], w: [kh,kw,Cin,Cout], stride 1.
    im2col gather (bf16) + tiled Pallas matmul with fused BN affine and
    optional fused elementwise epilogue."""
    N, H, W, Cin = x.shape
    kh, kw, _, Cout = w.shape
    ph, pw = padding
    dh, dw = dilation
    Hout = H + 2 * ph - dh * (kh - 1)
    Wout = W + 2 * pw - dw * (kw - 1)
    M = N * Hout * Wout

    if kh == 1 and kw == 1 and ph == 0 and pw == 0:
        patches = x.reshape(M, Cin)
    else:
        xp = jnp.pad(x.astype(jnp.bfloat16),
                     ((0, 0), (ph, ph), (pw, pw), (0, 0)))
        cols = []
        for i in range(kh):
            for j in range(kw):
                cols.append(xp[:, i * dh:i * dh + Hout, j * dw:j * dw + Wout, :])
        patches = jnp.concatenate(cols, axis=-1).reshape(M, kh * kw * Cin)

    wmat = w.reshape(kh * kw * Cin, Cout)
    mul_ops = [m.reshape(M, Cout) for m in mul_with]
    res = residual.reshape(M, Cout) if residual is not None else None
    out = mm_affine(patches, wmat, scale, bias, mul_ops, res)
    return out.reshape(N, Hout, Wout, Cout)


def apply_conv(x, p, mul_with=(), residual=None):
    return conv_affine(x, p["w"], p["scale"], p["bias"], p["pad"], p["dil"],
                       mul_with=mul_with, residual=residual)


# ------------------------------ bilinear resize -----------------------------

def _interp_matrix(h_in, h_out, align_corners):
    if h_in == 1:
        return jnp.ones((h_out, 1), jnp.float32)
    if align_corners:
        src = jnp.arange(h_out, dtype=jnp.float32) * (h_in - 1) / (h_out - 1)
    else:
        scale = h_in / h_out
        src = (jnp.arange(h_out, dtype=jnp.float32) + 0.5) * scale - 0.5
        src = jnp.clip(src, 0.0, float(h_in - 1))
    i0 = jnp.clip(jnp.floor(src).astype(jnp.int32), 0, h_in - 2)
    frac = src - i0.astype(jnp.float32)
    rows = jnp.arange(h_out)
    M = jnp.zeros((h_out, h_in), jnp.float32)
    M = M.at[rows, i0].add(1.0 - frac)
    M = M.at[rows, i0 + 1].add(frac)
    return M


def bilinear_resize(x, h_out, w_out, align_corners):
    # x: [N,H,W,C] -- tiny separable matmuls; kept as plain-JAX glue.
    _, H, W, _ = x.shape
    A = _interp_matrix(H, h_out, align_corners)
    B = _interp_matrix(W, w_out, align_corners)
    t = jnp.einsum("oh,nhwc->nowc", A, x.astype(jnp.float32))
    return jnp.einsum("pw,nowc->nopc", B, t).astype(x.dtype)


def up2(x):  # nn.Upsample(scale_factor=2, mode='bilinear', align_corners=True)
    _, H, W, _ = x.shape
    return bilinear_resize(x, 2 * H, 2 * W, align_corners=True)


# ------------------------------- parameters --------------------------------

class ParamGen:
    def __init__(self, key):
        self._key = key
        self._n = 0

    def _next(self):
        self._n += 1
        return jax.random.fold_in(self._key, self._n)

    def conv(self, cin, cout, ksize, padding=0, dilation=1, bn=True, bias=False):
        kh, kw = (ksize, ksize) if isinstance(ksize, int) else ksize
        ph, pw = (padding, padding) if isinstance(padding, int) else padding
        dh, dw = (dilation, dilation) if isinstance(dilation, int) else dilation
        fan_in = kh * kw * cin
        w = jax.random.normal(self._next(), (kh, kw, cin, cout), jnp.float32) \
            * math.sqrt(2.0 / fan_in)
        if bn:  # eval-mode BatchNorm folded into per-channel (scale, bias)
            gamma = 1.0 + 0.1 * jax.random.normal(self._next(), (cout,), jnp.float32)
            beta = 0.1 * jax.random.normal(self._next(), (cout,), jnp.float32)
            mean = 0.1 * jax.random.normal(self._next(), (cout,), jnp.float32)
            var = jnp.abs(1.0 + 0.1 * jax.random.normal(self._next(), (cout,), jnp.float32))
            scale = gamma / jnp.sqrt(var + 1e-5)
            bias_v = beta - mean * scale
        else:
            scale = jnp.ones((cout,), jnp.float32)
            bias_v = (0.1 * jax.random.normal(self._next(), (cout,), jnp.float32)
                      if bias else jnp.zeros((cout,), jnp.float32))
        return dict(w=w, scale=scale, bias=bias_v, pad=(ph, pw), dil=(dh, dw))


def _fuse_cout(convs):
    """Concatenate convs that share the same input and geometry along Cout."""
    c0 = convs[0]
    return dict(
        w=jnp.concatenate([c["w"] for c in convs], axis=-1),
        scale=jnp.concatenate([c["scale"] for c in convs]),
        bias=jnp.concatenate([c["bias"] for c in convs]),
        pad=c0["pad"], dil=c0["dil"],
    )


def _fuse_blockdiag(convs, KH, KW):
    """Fuse convs acting on disjoint channel slices of one concatenated input
    into a single block-diagonal conv with kernel (KH, KW), pad (KH//2, KW//2).
    Each conv's (kh, kw) kernel is centered inside the (KH, KW) frame; extra
    taps are zero, so the fused conv equals running them separately."""
    cins = [c["w"].shape[2] for c in convs]
    couts = [c["w"].shape[3] for c in convs]
    W = jnp.zeros((KH, KW, sum(cins), sum(couts)), jnp.float32)
    ci = co = 0
    for c, cin, cout in zip(convs, cins, couts):
        kh, kw = c["w"].shape[0], c["w"].shape[1]
        W = W.at[(KH - kh) // 2:(KH + kh) // 2,
                 (KW - kw) // 2:(KW + kw) // 2,
                 ci:ci + cin, co:co + cout].set(c["w"])
        ci += cin
        co += cout
    return dict(
        w=W,
        scale=jnp.concatenate([c["scale"] for c in convs]),
        bias=jnp.concatenate([c["bias"] for c in convs]),
        pad=(KH // 2, KW // 2), dil=(1, 1),
    )


# ---------------------------------- RFB -------------------------------------

def make_rfb(pg, cin, cout):
    b0 = pg.conv(cin, cout, 1)
    b1_0 = pg.conv(cin, cout, 1)
    b1_h = pg.conv(cout, cout, (1, 3), (0, 1))
    b1_v = pg.conv(cout, cout, (3, 1), (1, 0))
    b1_d = pg.conv(cout, cout, 3, 3, 3)
    b2_0 = pg.conv(cin, cout, 1)
    b2_h = pg.conv(cout, cout, (1, 5), (0, 2))
    b2_v = pg.conv(cout, cout, (5, 1), (2, 0))
    b2_d = pg.conv(cout, cout, 3, 5, 5)
    b3_0 = pg.conv(cin, cout, 1)
    b3_h = pg.conv(cout, cout, (1, 7), (0, 3))
    b3_v = pg.conv(cout, cout, (7, 1), (3, 0))
    b3_d = pg.conv(cout, cout, 3, 7, 7)
    conv_cat = pg.conv(4 * cout, cout, 3, 1)
    conv_res = pg.conv(cin, cout, 1)
    return dict(
        n_out=cout,
        # Five shared-input 1x1 convs fused into one Cout=5*cout matmul.
        in_fused=_fuse_cout([b0, b1_0, b2_0, b3_0, conv_res]),
        # Three (1,k) convs on [x1|x2|x3] fused into ONE block-diagonal (1,7)
        # conv (shared im2col, one pallas_call, Cout=3*cout); same for (k,1).
        fused_h=_fuse_blockdiag([b1_h, b2_h, b3_h], 1, 7),
        fused_v=_fuse_blockdiag([b1_v, b2_v, b3_v], 7, 1),
        dil=[b1_d, b2_d, b3_d],
        conv_cat=conv_cat,
    )


def rfb_forward(p, x):
    c = p["n_out"]
    y = apply_conv(x, p["in_fused"])          # (N,H,W,5c): [x0|x1|x2|x3|x_res]
    x0 = y[..., 0 * c:1 * c]
    x123 = y[..., 1 * c:4 * c]
    x_res = y[..., 4 * c:5 * c]

    h = apply_conv(x123, p["fused_h"])        # block-diag (1,k) stage, 3c->3c
    v = apply_conv(h, p["fused_v"])           # block-diag (k,1) stage, 3c->3c
    d = [apply_conv(v[..., i * c:(i + 1) * c], p["dil"][i]) for i in range(3)]

    x_cat = jnp.concatenate([x0] + d, axis=-1)
    # conv_cat with the residual add + ReLU fused into its epilogue.
    return apply_conv(x_cat, p["conv_cat"], residual=x_res)


# ------------------------------- Aggregation --------------------------------

def make_agg(pg, ch):
    cu1 = pg.conv(ch, ch, 3, 1)
    cu2 = pg.conv(ch, ch, 3, 1)
    cu3 = pg.conv(ch, ch, 3, 1)
    cu4 = pg.conv(ch, ch, 3, 1)
    return dict(
        ch=ch,
        cu14=_fuse_cout([cu1, cu4]),   # both consume up2(x1): one fused call
        cu2=cu2, cu3=cu3,
        cu5=pg.conv(2 * ch, 2 * ch, 3, 1),
        cc2=pg.conv(2 * ch, 2 * ch, 3, 1),
        cc3=pg.conv(3 * ch, 3 * ch, 3, 1),
        conv4=pg.conv(3 * ch, 3 * ch, 3, 1),
        conv5=pg.conv(3 * ch, 1, 1, 0, 1, bn=False, bias=True),
    )


def agg_forward(p, x1, x2, x3):
    c = p["ch"]
    up_x1 = up2(x1)
    # conv_upsample1 / conv_upsample4 share the same input -> one fused conv.
    f14 = apply_conv(up_x1, p["cu14"])              # [cu1(up x1) | cu4(up x1)]
    x2_1 = f14[..., :c] * x2
    # x3_1 = cu2(up(up x1)) * cu3(up x2) * x3 -> products fused into cu3's
    # matmul epilogue.
    a = apply_conv(up2(up_x1), p["cu2"])
    x3_1 = apply_conv(up2(x2), p["cu3"], mul_with=(a, x3))

    x2_2 = jnp.concatenate([x2_1, f14[..., c:]], axis=-1)
    x2_2 = apply_conv(x2_2, p["cc2"])
    x3_2 = jnp.concatenate([x3_1, apply_conv(up2(x2_2), p["cu5"])], axis=-1)
    x3_2 = apply_conv(x3_2, p["cc3"])
    x = apply_conv(x3_2, p["conv4"])
    return apply_conv(x, p["conv5"])


# --------------------------------- HarDMSEG ---------------------------------

def make_hardmseg(key, channel=32):
    pg = ParamGen(key)
    # TODO(synk): the HarDNet-68 backbone (`hardnet(arch=68)`) is not among the
    # provided dependent classes; it is stubbed with deterministic avg-pool +
    # 1x1-conv projections producing features with the documented channel
    # counts (320 / 640 / 1024) at strides (8 / 16 / 32).
    backbone = dict(
        p2=pg.conv(3, 320, 1),
        p3=pg.conv(3, 640, 1),
        p4=pg.conv(3, 1024, 1),
    )
    return dict(
        backbone=backbone,
        rfb2_1=make_rfb(pg, 320, channel),
        rfb3_1=make_rfb(pg, 640, channel),
        rfb4_1=make_rfb(pg, 1024, channel),
        agg1=make_agg(pg, 32),
    )


def _avg_pool(x, s):
    N, H, W, C = x.shape
    return x.reshape(N, H // s, s, W // s, s, C).mean(axis=(2, 4))


def hardmseg_forward(params, x_nchw):
    x = jnp.transpose(x_nchw, (0, 2, 3, 1)).astype(jnp.float32)  # NCHW -> NHWC
    bp = params["backbone"]
    x2 = apply_conv(_avg_pool(x, 8), bp["p2"])     # [N, H/8,  W/8,  320]
    x3 = apply_conv(_avg_pool(x, 16), bp["p3"])    # [N, H/16, W/16, 640]
    x4 = apply_conv(_avg_pool(x, 32), bp["p4"])    # [N, H/32, W/32, 1024]

    x2_rfb = rfb_forward(params["rfb2_1"], x2)
    x3_rfb = rfb_forward(params["rfb3_1"], x3)
    x4_rfb = rfb_forward(params["rfb4_1"], x4)

    ra5 = agg_forward(params["agg1"], x4_rfb, x3_rfb, x2_rfb)   # [N, H/8, W/8, 1]
    _, H, W, _ = ra5.shape
    # F.interpolate(scale_factor=8, mode='bilinear') -> align_corners=False
    out = bilinear_resize(ra5.astype(jnp.float32), 8 * H, 8 * W,
                          align_corners=False)
    return jnp.transpose(out, (0, 3, 1, 2))  # NHWC -> NCHW, f32


# ----------------------------------- main ------------------------------------

if __name__ == "__main__":
    key = jax.random.PRNGKey(0)
    params = make_hardmseg(jax.random.fold_in(key, 1), channel=32)
    x = jax.random.normal(jax.random.fold_in(key, 2), (2, 3, 64, 64), jnp.float32)

    fwd = jax.jit(lambda xx: hardmseg_forward(params, xx))
    out = fwd(x)
    jax.block_until_ready(out)
    assert out.shape == (2, 1, 64, 64), out.shape
    assert bool(jnp.all(jnp.isfinite(out)))
    print("KERNEL_OK")
</pallas_src>

<mosaic_0001>
module attributes {stable_mosaic.version = 11 : i64} {
  func.func private @main(%arg0: i32) attributes {dimension_semantics = [#tpu.dimension_semantics<core_parallel>], iteration_bounds = array<i64: 2>, tpu.core_type = #tpu.core_type<sc_scalar_subcore>, window_params = []} {
    return
  }
}

module attributes {stable_mosaic.version = 11 : i64} {
  func.func private @main(%arg0: i32) attributes {dimension_semantics = [#tpu.dimension_semantics<core_parallel>], iteration_bounds = array<i64: 2>, tpu.core_type = #tpu.core_type<sc_scalar_subcore>, window_params = []} {
    return
  }
}

module attributes {stable_mosaic.version = 11 : i64} {
  func.func @kernel(%arg0: i32, %arg1: i32, %arg2: i32, %arg3: memref<8x128xbf16, #tpu.memory_space<vmem>>, %arg4: memref<128x256xbf16, #tpu.memory_space<vmem>>, %arg5: memref<1x256xf32, #tpu.memory_space<vmem>>, %arg6: memref<1x256xf32, #tpu.memory_space<vmem>>, %arg7: memref<8x256xbf16, #tpu.memory_space<vmem>>, %arg8: memref<8x256xf32, #tpu.memory_space<vmem>>) attributes {dimension_semantics = [#tpu.dimension_semantics<parallel>, #tpu.dimension_semantics<parallel>, #tpu.dimension_semantics<arbitrary>], iteration_bounds = array<i64: 1, 4, 1>, scalar_prefetch = 0 : i64, scratch_operands = 1 : i64, tpu.core_type = #tpu.core_type<tc>, window_params = [{transform_indices = @transform_0, window_bounds = array<i64: 8, 128>}, {transform_indices = @transform_1, window_bounds = array<i64: 128, 256>}, {transform_indices = @transform_2, window_bounds = array<i64: 1, 256>}, {transform_indices = @transform_3, window_bounds = array<i64: 1, 256>}, {transform_indices = @transform_4, window_bounds = array<i64: 8, 256>}]} {
    %c0_i32 = arith.constant 0 : i32
    %0 = arith.cmpi eq, %arg2, %c0_i32 : i32
    %1 = arith.extui %0 : i1 to i32
    %c0_i32_0 = arith.constant 0 : i32
    %2 = arith.cmpi ne, %1, %c0_i32_0 : i32
    scf.if %2 {
      %cst_10 = arith.constant 0.000000e+00 : f32
      %12 = vector.broadcast %cst_10 : f32 to vector<8x256xf32>
      %c0_11 = arith.constant 0 : index
      %c0_12 = arith.constant 0 : index
      %13 = vector.load %arg8[%c0_11, %c0_12] : memref<8x256xf32, #tpu.memory_space<vmem>>, vector<8x256xf32>
      tpu.vector_store %arg8[%c0_11, %c0_12], %12 {strides = array<i32>} : memref<8x256xf32, #tpu.memory_space<vmem>>, vector<8x256xf32>,
    } else {
    }
    %c0 = arith.constant 0 : index
    %c0_1 = arith.constant 0 : index
    %3 = vector.load %arg8[%c0, %c0_1] : memref<8x256xf32, #tpu.memory_space<vmem>>, vector<8x256xf32>
    %c0_2 = arith.constant 0 : index
    %c0_3 = arith.constant 0 : index
    %4 = vector.load %arg3[%c0_2, %c0_3] : memref<8x128xbf16, #tpu.memory_space<vmem>>, vector<8x128xbf16>
    %c0_4 = arith.constant 0 : index
    %c0_5 = arith.constant 0 : index
    %5 = vector.load %arg4[%c0_4, %c0_5] : memref<128x256xbf16, #tpu.memory_space<vmem>>, vector<128x256xbf16>
    %cst = arith.constant dense<0.000000e+00> : vector<8x256xf32>
    %6 = tpu.matmul %4, %5, %cst {dimension_numbers = #tpu.dot_dimension_numbers<[1], [0], [0], [1], [0, 0, 1, 1], [], []>} : vector<8x128xbf16>, vector<128x256xbf16>, vector<8x256xf32> -> vector<8x256xf32>
    %7 = arith.addf %3, %6 : vector<8x256xf32>
    %c0_6 = arith.constant 0 : index
    %c0_7 = arith.constant 0 : index
    %8 = vector.load %arg8[%c0_6, %c0_7] : memref<8x256xf32, #tpu.memory_space<vmem>>, vector<8x256xf32>
    tpu.vector_store %arg8[%c0_6, %c0_7], %7 {strides = array<i32>} : memref<8x256xf32, #tpu.memory_space<vmem>>, vector<8x256xf32>,
    %c0_i32_8 = arith.constant 0 : i32
    %9 = arith.cmpi eq, %arg2, %c0_i32_8 : i32
    %10 = arith.extui %9 : i1 to i32
    %c0_i32_9 = arith.constant 0 : i32
    %11 = arith.cmpi ne, %10, %c0_i32_9 : i32
    scf.if %11 {
      %c0_10 = arith.constant 0 : index
      %c0_11 = arith.constant 0 : index
      %12 = vector.load %arg8[%c0_10, %c0_11] : memref<8x256xf32, #tpu.memory_space<vmem>>, vector<8x256xf32>
      %c0_12 = arith.constant 0 : index
      %c0_13 = arith.constant 0 : index
      %13 = vector.load %arg5[%c0_12, %c0_13] : memref<1x256xf32, #tpu.memory_space<vmem>>, vector<1x256xf32>
      %14 = vector.broadcast %13 : vector<1x256xf32> to vector<8x256xf32>
      %15 = arith.mulf %12, %14 : vector<8x256xf32>
      %c0_14 = arith.constant 0 : index
      %c0_15 = arith.constant 0 : index
      %16 = vector.load %arg6[%c0_14, %c0_15] : memref<1x256xf32, #tpu.memory_space<vmem>>, vector<1x256xf32>
      %17 = vector.broadcast %16 : vector<1x256xf32> to vector<8x256xf32>
      %18 = arith.addf %15, %17 : vector<8x256xf32>
      %19 = arith.truncf %18 : vector<8x256xf32> to vector<8x256xbf16>
      %c0_16 = arith.constant 0 : index
      %c0_17 = arith.constant 0 : index
      %20 = vector.load %arg7[%c0_16, %c0_17] : memref<8x256xbf16, #tpu.memory_space<vmem>>, vector<8x256xbf16>
      tpu.vector_store %arg7[%c0_16, %c0_17], %19 {strides = array<i32>} : memref<8x256xbf16, #tpu.memory_space<vmem>>, vector<8x256xbf16>,
    } else {
    }
    return
  }
  func.func @transform_0(%arg0: i32, %arg1: i32, %arg2: i32) -> (i32, i32) {
    %c0_i32 = arith.constant 0 : i32
    return %arg0, %arg2 : i32, i32
  }
  func.func @transform_1(%arg0: i32, %arg1: i32, %arg2: i32) -> (i32, i32) {
    %c0_i32 = arith.constant 0 : i32
    return %arg2, %arg1 : i32, i32
  }
  func.func @transform_2(%arg0: i32, %arg1: i32, %arg2: i32) -> (i32, i32) {
    %c0_i32 = arith.constant 0 : i32
    %c0_i32_0 = arith.constant 0 : i32
    return %c0_i32, %arg1 : i32, i32
  }
  func.func @transform_3(%arg0: i32, %arg1: i32, %arg2: i32) -> (i32, i32) {
    %c0_i32 = arith.constant 0 : i32
    %c0_i32_0 = arith.constant 0 : i32
    return %c0_i32, %arg1 : i32, i32
  }
  func.func @transform_4(%arg0: i32, %arg1: i32, %arg2: i32) -> (i32, i32) {
    %c0_i32 = arith.constant 0 : i32
    return %arg0, %arg1 : i32, i32
  }
}

module attributes {stable_mosaic.version = 11 : i64} {
  func.func @kernel(%arg0: i32, %arg1: i32, %arg2: i32, %arg3: memref<8x1024xbf16, #tpu.memory_space<vmem>>, %arg4: memref<1024x128xbf16, #tpu.memory_space<vmem>>, %arg5: memref<1x128xf32, #tpu.memory_space<vmem>>, %arg6: memref<1x128xf32, #tpu.memory_space<vmem>>, %arg7: memref<8x128xbf16, #tpu.memory_space<vmem>>, %arg8: memref<8x128xf32, #tpu.memory_space<vmem>>) attributes {dimension_semantics = [#tpu.dimension_semantics<parallel>, #tpu.dimension_semantics<parallel>, #tpu.dimension_semantics<arbitrary>], iteration_bounds = array<i64: 1, 2, 1>, scalar_prefetch = 0 : i64, scratch_operands = 1 : i64, tpu.core_type = #tpu.core_type<tc>, window_params = [{transform_indices = @transform_0, window_bounds = array<i64: 8, 1024>}, {transform_indices = @transform_1, window_bounds = array<i64: 1024, 128>}, {transform_indices = @transform_2, window_bounds = array<i64: 1, 128>}, {transform_indices = @transform_3, window_bounds = array<i64: 1, 128>}, {transform_indices = @transform_4, window_bounds = array<i64: 8, 128>}]} {
    %c0_i32 = arith.constant 0 : i32
    %0 = arith.cmpi eq, %arg2, %c0_i32 : i32
    %1 = arith.extui %0 : i1 to i32
    %c0_i32_0 = arith.constant 0 : i32
    %2 = arith.cmpi ne, %1, %c0_i32_0 : i32
    scf.if %2 {
      %cst_10 = arith.constant 0.000000e+00 : f32
      %12 = vector.broadcast %cst_10 : f32 to vector<8x128xf32>
      %c0_11 = arith.constant 0 : index
      %c0_12 = arith.constant 0 : index
      %13 = vector.load %arg8[%c0_11, %c0_12] : memref<8x128xf32, #tpu.memory_space<vmem>>, vector<8x128xf32>
      tpu.vector_store %arg8[%c0_11, %c0_12], %12 {strides = array<i32>} : memref<8x128xf32, #tpu.memory_space<vmem>>, vector<8x128xf32>,
    } else {
    }
    %c0 = arith.constant 0 : index
    %c0_1 = arith.constant 0 : index
    %3 = vector.load %arg8[%c0, %c0_1] : memref<8x128xf32, #tpu.memory_space<vmem>>, vector<8x128xf32>
    %c0_2 = arith.constant 0 : index
    %c0_3 = arith.constant 0 : index
    %4 = vector.load %arg3[%c0_2, %c0_3] : memref<8x1024xbf16, #tpu.memory_space<vmem>>, vector<8x1024xbf16>
    %c0_4 = arith.constant 0 : index
    %c0_5 = arith.constant 0 : index
    %5 = vector.load %arg4[%c0_4, %c0_5] : memref<1024x128xbf16, #tpu.memory_space<vmem>>, vector<1024x128xbf16>
    %cst = arith.constant dense<0.000000e+00> : vector<8x128xf32>
    %6 = tpu.matmul %4, %5, %cst {dimension_numbers = #tpu.dot_dimension_numbers<[1], [0], [0], [1], [0, 0, 1, 1], [], []>} : vector<8x1024xbf16>, vector<1024x128xbf16>, vector<8x128xf32> -> vector<8x128xf32>
    %7 = arith.addf %3, %6 : vector<8x128xf32>
    %c0_6 = arith.constant 0 : index
    %c0_7 = arith.constant 0 : index
    %8 = vector.load %arg8[%c0_6, %c0_7] : memref<8x128xf32, #tpu.memory_space<vmem>>, vector<8x128xf32>
    tpu.vector_store %arg8[%c0_6, %c0_7], %7 {strides = array<i32>} : memref<8x128xf32, #tpu.memory_space<vmem>>, vector<8x128xf32>,
    %c0_i32_8 = arith.constant 0 : i32
    %9 = arith.cmpi eq, %arg2, %c0_i32_8 : i32
    %10 = arith.extui %9 : i1 to i32
    %c0_i32_9 = arith.constant 0 : i32
    %11 = arith.cmpi ne, %10, %c0_i32_9 : i32
    scf.if %11 {
      %c0_10 = arith.constant 0 : index
      %c0_11 = arith.constant 0 : index
      %12 = vector.load %arg8[%c0_10, %c0_11] : memref<8x128xf32, #tpu.memory_space<vmem>>, vector<8x128xf32>
      %c0_12 = arith.constant 0 : index
      %c0_13 = arith.constant 0 : index
      %13 = vector.load %arg5[%c0_12, %c0_13] : memref<1x128xf32, #tpu.memory_space<vmem>>, vector<1x128xf32>
      %14 = vector.broadcast %13 : vector<1x128xf32> to vector<8x128xf32>
      %15 = arith.mulf %12, %14 : vector<8x128xf32>
      %c0_14 = arith.constant 0 : index
      %c0_15 = arith.constant 0 : index
      %16 = vector.load %arg6[%c0_14, %c0_15] : memref<1x128xf32, #tpu.memory_space<vmem>>, vector<1x128xf32>
      %17 = vector.broadcast %16 : vector<1x128xf32> to vector<8x128xf32>
      %18 = arith.addf %15, %17 : vector<8x128xf32>
      %19 = arith.truncf %18 : vector<8x128xf32> to vector<8x128xbf16>
      %c0_16 = arith.constant 0 : index
      %c0_17 = arith.constant 0 : index
      %20 = vector.load %arg7[%c0_16, %c0_17] : memref<8x128xbf16, #tpu.memory_space<vmem>>, vector<8x128xbf16>
      tpu.vector_store %arg7[%c0_16, %c0_17], %19 {strides = array<i32>} : memref<8x128xbf16, #tpu.memory_space<vmem>>, vector<8x128xbf16>,
    } else {
    }
    return
  }
  func.func @transform_0(%arg0: i32, %arg1: i32, %arg2: i32) -> (i32, i32) {
    %c0_i32 = arith.constant 0 : i32
    return %arg0, %arg2 : i32, i32
  }
  func.func @transform_1(%arg0: i32, %arg1: i32, %arg2: i32) -> (i32, i32) {
    %c0_i32 = arith.constant 0 : i32
    return %arg2, %arg1 : i32, i32
  }
  func.func @transform_2(%arg0: i32, %arg1: i32, %arg2: i32) -> (i32, i32) {
    %c0_i32 = arith.constant 0 : i32
    %c0_i32_0 = arith.constant 0 : i32
    return %c0_i32, %arg1 : i32, i32
  }
  func.func @transform_3(%arg0: i32, %arg1: i32, %arg2: i32) -> (i32, i32) {
    %c0_i32 = arith.constant 0 : i32
    %c0_i32_0 = arith.constant 0 : i32
    return %c0_i32, %arg1 : i32, i32
  }
  func.func @transform_4(%arg0: i32, %arg1: i32, %arg2: i32) -> (i32, i32) {
    %c0_i32 = arith.constant 0 : i32
    return %arg0, %arg1 : i32, i32
  }
}

module attributes {stable_mosaic.version = 11 : i64} {
  func.func @kernel(%arg0: i32, %arg1: i32, %arg2: i32, %arg3: memref<128x128xbf16, #tpu.memory_space<vmem>>, %arg4: memref<128x256xbf16, #tpu.memory_space<vmem>>, %arg5: memref<1x256xf32, #tpu.memory_space<vmem>>, %arg6: memref<1x256xf32, #tpu.memory_space<vmem>>, %arg7: memref<128x256xbf16, #tpu.memory_space<vmem>>, %arg8: memref<128x256xf32, #tpu.memory_space<vmem>>) attributes {dimension_semantics = [#tpu.dimension_semantics<parallel>, #tpu.dimension_semantics<parallel>, #tpu.dimension_semantics<arbitrary>], iteration_bounds = array<i64: 1, 2, 1>, scalar_prefetch = 0 : i64, scratch_operands = 1 : i64, tpu.core_type = #tpu.core_type<tc>, window_params = [{transform_indices = @transform_0, window_bounds = array<i64: 128, 128>}, {transform_indices = @transform_1, window_bounds = array<i64: 128, 256>}, {transform_indices = @transform_2, window_bounds = array<i64: 1, 256>}, {transform_indices = @transform_3, window_bounds = array<i64: 1, 256>}, {transform_indices = @transform_4, window_bounds = array<i64: 128, 256>}]} {
    %c0_i32 = arith.constant 0 : i32
    %0 = arith.cmpi eq, %arg2, %c0_i32 : i32
    %1 = arith.extui %0 : i1 to i32
    %c0_i32_0 = arith.constant 0 : i32
    %2 = arith.cmpi ne, %1, %c0_i32_0 : i32
    scf.if %2 {
      %cst_10 = arith.constant 0.000000e+00 : f32
      %12 = vector.broadcast %cst_10 : f32 to vector<128x256xf32>
      %c0_11 = arith.constant 0 : index
      %c0_12 = arith.constant 0 : index
      %13 = vector.load %arg8[%c0_11, %c0_12] : memref<128x256xf32, #tpu.memory_space<vmem>>, vector<128x256xf32>
      tpu.vector_store %arg8[%c0_11, %c0_12], %12 {strides = array<i32>} : memref<128x256xf32, #tpu.memory_space<vmem>>, vector<128x256xf32>,
    } else {
    }
    %c0 = arith.constant 0 : index
    %c0_1 = arith.constant 0 : index
    %3 = vector.load %arg8[%c0, %c0_1] : memref<128x256xf32, #tpu.memory_space<vmem>>, vector<128x256xf32>
    %c0_2 = arith.constant 0 : index
    %c0_3 = arith.constant 0 : index
    %4 = vector.load %arg3[%c0_2, %c0_3] : memref<128x128xbf16, #tpu.memory_space<vmem>>, vector<128x128xbf16>
    %c0_4 = arith.constant 0 : index
    %c0_5 = arith.constant 0 : index
    %5 = vector.load %arg4[%c0_4, %c0_5] : memref<128x256xbf16, #tpu.memory_space<vmem>>, vector<128x256xbf16>
    %cst = arith.constant dense<0.000000e+00> : vector<128x256xf32>
    %6 = tpu.matmul %4, %5, %cst {dimension_numbers = #tpu.dot_dimension_numbers<[1], [0], [0], [1], [0, 0, 1, 1], [], []>} : vector<128x128xbf16>, vector<128x256xbf16>, vector<128x256xf32> -> vector<128x256xf32>
    %7 = arith.addf %3, %6 : vector<128x256xf32>
    %c0_6 = arith.constant 0 : index
    %c0_7 = arith.constant 0 : index
    %8 = vector.load %arg8[%c0_6, %c0_7] : memref<128x256xf32, #tpu.memory_space<vmem>>, vector<128x256xf32>
    tpu.vector_store %arg8[%c0_6, %c0_7], %7 {strides = array<i32>} : memref<128x256xf32, #tpu.memory_space<vmem>>, vector<128x256xf32>,
    %c0_i32_8 = arith.constant 0 : i32
    %9 = arith.cmpi eq, %arg2, %c0_i32_8 : i32
    %10 = arith.extui %9 : i1 to i32
    %c0_i32_9 = arith.constant 0 : i32
    %11 = arith.cmpi ne, %10, %c0_i32_9 : i32
    scf.if %11 {
      %c0_10 = arith.constant 0 : index
      %c0_11 = arith.constant 0 : index
      %12 = vector.load %arg8[%c0_10, %c0_11] : memref<128x256xf32, #tpu.memory_space<vmem>>, vector<128x256xf32>
      %c0_12 = arith.constant 0 : index
      %c0_13 = arith.constant 0 : index
      %13 = vector.load %arg5[%c0_12, %c0_13] : memref<1x256xf32, #tpu.memory_space<vmem>>, vector<1x256xf32>
      %14 = vector.broadcast %13 : vector<1x256xf32> to vector<128x256xf32>
      %15 = arith.mulf %12, %14 : vector<128x256xf32>
      %c0_14 = arith.constant 0 : index
      %c0_15 = arith.constant 0 : index
      %16 = vector.load %arg6[%c0_14, %c0_15] : memref<1x256xf32, #tpu.memory_space<vmem>>, vector<1x256xf32>
      %17 = vector.broadcast %16 : vector<1x256xf32> to vector<128x256xf32>
      %18 = arith.addf %15, %17 : vector<128x256xf32>
      %19 = arith.truncf %18 : vector<128x256xf32> to vector<128x256xbf16>
      %c0_16 = arith.constant 0 : index
      %c0_17 = arith.constant 0 : index
      %20 = vector.load %arg7[%c0_16, %c0_17] : memref<128x256xbf16, #tpu.memory_space<vmem>>, vector<128x256xbf16>
      tpu.vector_store %arg7[%c0_16, %c0_17], %19 {strides = array<i32>} : memref<128x256xbf16, #tpu.memory_space<vmem>>, vector<128x256xbf16>,
    } else {
    }
    return
  }
  func.func @transform_0(%arg0: i32, %arg1: i32, %arg2: i32) -> (i32, i32) {
    %c0_i32 = arith.constant 0 : i32
    return %arg0, %arg2 : i32, i32
  }
  func.func @transform_1(%arg0: i32, %arg1: i32, %arg2: i32) -> (i32, i32) {
    %c0_i32 = arith.constant 0 : i32
    return %arg2, %arg1 : i32, i32
  }
  func.func @transform_2(%arg0: i32, %arg1: i32, %arg2: i32) -> (i32, i32) {
    %c0_i32 = arith.constant 0 : i32
    %c0_i32_0 = arith.constant 0 : i32
    return %c0_i32, %arg1 : i32, i32
  }
  func.func @transform_3(%arg0: i32, %arg1: i32, %arg2: i32) -> (i32, i32) {
    %c0_i32 = arith.constant 0 : i32
    %c0_i32_0 = arith.constant 0 : i32
    return %c0_i32, %arg1 : i32, i32
  }
  func.func @transform_4(%arg0: i32, %arg1: i32, %arg2: i32) -> (i32, i32) {
    %c0_i32 = arith.constant 0 : i32
    return %arg0, %arg1 : i32, i32
  }
}

module attributes {stable_mosaic.version = 11 : i64} {
  func.func @kernel(%arg0: i32, %arg1: i32, %arg2: i32, %arg3: memref<64x384xbf16, #tpu.memory_space<vmem>>, %arg4: memref<384x256xbf16, #tpu.memory_space<vmem>>, %arg5: memref<1x256xf32, #tpu.memory_space<vmem>>, %arg6: memref<1x256xf32, #tpu.memory_space<vmem>>, %arg7: memref<64x256xbf16, #tpu.memory_space<vmem>>, %arg8: memref<64x256xf32, #tpu.memory_space<vmem>>) attributes {dimension_semantics = [#tpu.dimension_semantics<parallel>, #tpu.dimension_semantics<parallel>, #tpu.dimension_semantics<arbitrary>], iteration_bounds = array<i64: 2, 1, 1>, scalar_prefetch = 0 : i64, scratch_operands = 1 : i64, tpu.core_type = #tpu.core_type<tc>, window_params = [{transform_indices = @transform_0, window_bounds = array<i64: 64, 384>}, {transform_indices = @transform_1, window_bounds = array<i64: 384, 256>}, {transform_indices = @transform_2, window_bounds = array<i64: 1, 256>}, {transform_indices = @transform_3, window_bounds = array<i64: 1, 256>}, {transform_indices = @transform_4, window_bounds = array<i64: 64, 256>}]} {
    %c0_i32 = arith.constant 0 : i32
    %0 = arith.cmpi eq, %arg2, %c0_i32 : i32
    %1 = arith.extui %0 : i1 to i32
    %c0_i32_0 = arith.constant 0 : i32
    %2 = arith.cmpi ne, %1, %c0_i32_0 : i32
    scf.if %2 {
      %cst_10 = arith.constant 0.000000e+00 : f32
      %12 = vector.broadcast %cst_10 : f32 to vector<64x256xf32>
      %c0_11 = arith.constant 0 : index
      %c0_12 = arith.constant 0 : index
      %13 = vector.load %arg8[%c0_11, %c0_12] : memref<64x256xf32, #tpu.memory_space<vmem>>, vector<64x256xf32>
      tpu.vector_store %arg8[%c0_11, %c0_12], %12 {strides = array<i32>} : memref<64x256xf32, #tpu.memory_space<vmem>>, vector<64x256xf32>,
    } else {
    }
    %c0 = arith.constant 0 : index
    %c0_1 = arith.constant 0 : index
    %3 = vector.load %arg8[%c0, %c0_1] : memref<64x256xf32, #tpu.memory_space<vmem>>, vector<64x256xf32>
    %c0_2 = arith.constant 0 : index
    %c0_3 = arith.constant 0 : index
    %4 = vector.load %arg3[%c0_2, %c0_3] : memref<64x384xbf16, #tpu.memory_space<vmem>>, vector<64x384xbf16>
    %c0_4 = arith.constant 0 : index
    %c0_5 = arith.constant 0 : index
    %5 = vector.load %arg4[%c0_4, %c0_5] : memref<384x256xbf16, #tpu.memory_space<vmem>>, vector<384x256xbf16>
    %cst = arith.constant dense<0.000000e+00> : vector<64x256xf32>
    %6 = tpu.matmul %4, %5, %cst {dimension_numbers = #tpu.dot_dimension_numbers<[1], [0], [0], [1], [0, 0, 1, 1], [], []>} : vector<64x384xbf16>, vector<384x256xbf16>, vector<64x256xf32> -> vector<64x256xf32>
    %7 = arith.addf %3, %6 : vector<64x256xf32>
    %c0_6 = arith.constant 0 : index
    %c0_7 = arith.constant 0 : index
    %8 = vector.load %arg8[%c0_6, %c0_7] : memref<64x256xf32, #tpu.memory_space<vmem>>, vector<64x256xf32>
    tpu.vector_store %arg8[%c0_6, %c0_7], %7 {strides = array<i32>} : memref<64x256xf32, #tpu.memory_space<vmem>>, vector<64x256xf32>,
    %c0_i32_8 = arith.constant 0 : i32
    %9 = arith.cmpi eq, %arg2, %c0_i32_8 : i32
    %10 = arith.extui %9 : i1 to i32
    %c0_i32_9 = arith.constant 0 : i32
    %11 = arith.cmpi ne, %10, %c0_i32_9 : i32
    scf.if %11 {
      %c0_10 = arith.constant 0 : index
      %c0_11 = arith.constant 0 : index
      %12 = vector.load %arg8[%c0_10, %c0_11] : memref<64x256xf32, #tpu.memory_space<vmem>>, vector<64x256xf32>
      %c0_12 = arith.constant 0 : index
      %c0_13 = arith.constant 0 : index
      %13 = vector.load %arg5[%c0_12, %c0_13] : memref<1x256xf32, #tpu.memory_space<vmem>>, vector<1x256xf32>
      %14 = vector.broadcast %13 : vector<1x256xf32> to vector<64x256xf32>
      %15 = arith.mulf %12, %14 : vector<64x256xf32>
      %c0_14 = arith.constant 0 : index
      %c0_15 = arith.constant 0 : index
      %16 = vector.load %arg6[%c0_14, %c0_15] : memref<1x256xf32, #tpu.memory_space<vmem>>, vector<1x256xf32>
      %17 = vector.broadcast %16 : vector<1x256xf32> to vector<64x256xf32>
      %18 = arith.addf %15, %17 : vector<64x256xf32>
      %19 = arith.truncf %18 : vector<64x256xf32> to vector<64x256xbf16>
      %c0_16 = arith.constant 0 : index
      %c0_17 = arith.constant 0 : index
      %20 = vector.load %arg7[%c0_16, %c0_17] : memref<64x256xbf16, #tpu.memory_space<vmem>>, vector<64x256xbf16>
      tpu.vector_store %arg7[%c0_16, %c0_17], %19 {strides = array<i32>} : memref<64x256xbf16, #tpu.memory_space<vmem>>, vector<64x256xbf16>,
    } else {
    }
    return
  }
  func.func @transform_0(%arg0: i32, %arg1: i32, %arg2: i32) -> (i32, i32) {
    %c0_i32 = arith.constant 0 : i32
    return %arg0, %arg2 : i32, i32
  }
  func.func @transform_1(%arg0: i32, %arg1: i32, %arg2: i32) -> (i32, i32) {
    %c0_i32 = arith.constant 0 : i32
    return %arg2, %arg1 : i32, i32
  }
  func.func @transform_2(%arg0: i32, %arg1: i32, %arg2: i32) -> (i32, i32) {
    %c0_i32 = arith.constant 0 : i32
    %c0_i32_0 = arith.constant 0 : i32
    return %c0_i32, %arg1 : i32, i32
  }
  func.func @transform_3(%arg0: i32, %arg1: i32, %arg2: i32) -> (i32, i32) {
    %c0_i32 = arith.constant 0 : i32
    %c0_i32_0 = arith.constant 0 : i32
    return %c0_i32, %arg1 : i32, i32
  }
  func.func @transform_4(%arg0: i32, %arg1: i32, %arg2: i32) -> (i32, i32) {
    %c0_i32 = arith.constant 0 : i32
    return %arg0, %arg1 : i32, i32
  }
}

module attributes {stable_mosaic.version = 11 : i64} {
  func.func @kernel(%arg0: i32, %arg1: i32, %arg2: i32, %arg3: memref<32x128xbf16, #tpu.memory_space<vmem>>, %arg4: memref<128x256xbf16, #tpu.memory_space<vmem>>, %arg5: memref<1x256xf32, #tpu.memory_space<vmem>>, %arg6: memref<1x256xf32, #tpu.memory_space<vmem>>, %arg7: memref<32x256xbf16, #tpu.memory_space<vmem>>, %arg8: memref<32x256xf32, #tpu.memory_space<vmem>>) attributes {dimension_semantics = [#tpu.dimension_semantics<parallel>, #tpu.dimension_semantics<parallel>, #tpu.dimension_semantics<arbitrary>], iteration_bounds = array<i64: 1, 3, 1>, scalar_prefetch = 0 : i64, scratch_operands = 1 : i64, tpu.core_type = #tpu.core_type<tc>, window_params = [{transform_indices = @transform_0, window_bounds = array<i64: 32, 128>}, {transform_indices = @transform_1, window_bounds = array<i64: 128, 256>}, {transform_indices = @transform_2, window_bounds = array<i64: 1, 256>}, {transform_indices = @transform_3, window_bounds = array<i64: 1, 256>}, {transform_indices = @transform_4, window_bounds = array<i64: 32, 256>}]} {
    %c0_i32 = arith.constant 0 : i32
    %0 = arith.cmpi eq, %arg2, %c0_i32 : i32
    %1 = arith.extui %0 : i1 to i32
    %c0_i32_0 = arith.constant 0 : i32
    %2 = arith.cmpi ne, %1, %c0_i32_0 : i32
    scf.if %2 {
      %cst_10 = arith.constant 0.000000e+00 : f32
      %12 = vector.broadcast %cst_10 : f32 to vector<32x256xf32>
      %c0_11 = arith.constant 0 : index
      %c0_12 = arith.constant 0 : index
      %13 = vector.load %arg8[%c0_11, %c0_12] : memref<32x256xf32, #tpu.memory_space<vmem>>, vector<32x256xf32>
      tpu.vector_store %arg8[%c0_11, %c0_12], %12 {strides = array<i32>} : memref<32x256xf32, #tpu.memory_space<vmem>>, vector<32x256xf32>,
    } else {
    }
    %c0 = arith.constant 0 : index
    %c0_1 = arith.constant 0 : index
    %3 = vector.load %arg8[%c0, %c0_1] : memref<32x256xf32, #tpu.memory_space<vmem>>, vector<32x256xf32>
    %c0_2 = arith.constant 0 : index
    %c0_3 = arith.constant 0 : index
    %4 = vector.load %arg3[%c0_2, %c0_3] : memref<32x128xbf16, #tpu.memory_space<vmem>>, vector<32x128xbf16>
    %c0_4 = arith.constant 0 : index
    %c0_5 = arith.constant 0 : index
    %5 = vector.load %arg4[%c0_4, %c0_5] : memref<128x256xbf16, #tpu.memory_space<vmem>>, vector<128x256xbf16>
    %cst = arith.constant dense<0.000000e+00> : vector<32x256xf32>
    %6 = tpu.matmul %4, %5, %cst {dimension_numbers = #tpu.dot_dimension_numbers<[1], [0], [0], [1], [0, 0, 1, 1], [], []>} : vector<32x128xbf16>, vector<128x256xbf16>, vector<32x256xf32> -> vector<32x256xf32>
    %7 = arith.addf %3, %6 : vector<32x256xf32>
    %c0_6 = arith.constant 0 : index
    %c0_7 = arith.constant 0 : index
    %8 = vector.load %arg8[%c0_6, %c0_7] : memref<32x256xf32, #tpu.memory_space<vmem>>, vector<32x256xf32>
    tpu.vector_store %arg8[%c0_6, %c0_7], %7 {strides = array<i32>} : memref<32x256xf32, #tpu.memory_space<vmem>>, vector<32x256xf32>,
    %c0_i32_8 = arith.constant 0 : i32
    %9 = arith.cmpi eq, %arg2, %c0_i32_8 : i32
    %10 = arith.extui %9 : i1 to i32
    %c0_i32_9 = arith.constant 0 : i32
    %11 = arith.cmpi ne, %10, %c0_i32_9 : i32
    scf.if %11 {
      %c0_10 = arith.constant 0 : index
      %c0_11 = arith.constant 0 : index
      %12 = vector.load %arg8[%c0_10, %c0_11] : memref<32x256xf32, #tpu.memory_space<vmem>>, vector<32x256xf32>
      %c0_12 = arith.constant 0 : index
      %c0_13 = arith.constant 0 : index
      %13 = vector.load %arg5[%c0_12, %c0_13] : memref<1x256xf32, #tpu.memory_space<vmem>>, vector<1x256xf32>
      %14 = vector.broadcast %13 : vector<1x256xf32> to vector<32x256xf32>
      %15 = arith.mulf %12, %14 : vector<32x256xf32>
      %c0_14 = arith.constant 0 : index
      %c0_15 = arith.constant 0 : index
      %16 = vector.load %arg6[%c0_14, %c0_15] : memref<1x256xf32, #tpu.memory_space<vmem>>, vector<1x256xf32>
      %17 = vector.broadcast %16 : vector<1x256xf32> to vector<32x256xf32>
      %18 = arith.addf %15, %17 : vector<32x256xf32>
      %19 = arith.truncf %18 : vector<32x256xf32> to vector<32x256xbf16>
      %c0_16 = arith.constant 0 : index
      %c0_17 = arith.constant 0 : index
      %20 = vector.load %arg7[%c0_16, %c0_17] : memref<32x256xbf16, #tpu.memory_space<vmem>>, vector<32x256xbf16>
      tpu.vector_store %arg7[%c0_16, %c0_17], %19 {strides = array<i32>} : memref<32x256xbf16, #tpu.memory_space<vmem>>, vector<32x256xbf16>,
    } else {
    }
    return
  }
  func.func @transform_0(%arg0: i32, %arg1: i32, %arg2: i32) -> (i32, i32) {
    %c0_i32 = arith.constant 0 : i32
    return %arg0, %arg2 : i32, i32
  }
  func.func @transform_1(%arg0: i32, %arg1: i32, %arg2: i32) -> (i32, i32) {
    %c0_i32 = arith.constant 0 : i32
    return %arg2, %arg1 : i32, i32
  }
  func.func @transform_2(%arg0: i32, %arg1: i32, %arg2: i32) -> (i32, i32) {
    %c0_i32 = arith.constant 0 : i32
    %c0_i32_0 = arith.constant 0 : i32
    return %c0_i32, %arg1 : i32, i32
  }
  func.func @transform_3(%arg0: i32, %arg1: i32, %arg2: i32) -> (i32, i32) {
    %c0_i32 = arith.constant 0 : i32
    %c0_i32_0 = arith.constant 0 : i32
    return %c0_i32, %arg1 : i32, i32
  }
  func.func @transform_4(%arg0: i32, %arg1: i32, %arg2: i32) -> (i32, i32) {
    %c0_i32 = arith.constant 0 : i32
    return %arg0, %arg1 : i32, i32
  }
}

module attributes {stable_mosaic.version = 11 : i64} {
  func.func @kernel(%arg0: i32, %arg1: i32, %arg2: i32, %arg3: memref<16x640xbf16, #tpu.memory_space<vmem>>, %arg4: memref<640x256xbf16, #tpu.memory_space<vmem>>, %arg5: memref<1x256xf32, #tpu.memory_space<vmem>>, %arg6: memref<1x256xf32, #tpu.memory_space<vmem>>, %arg7: memref<16x256xbf16, #tpu.memory_space<vmem>>, %arg8: memref<16x256xf32, #tpu.memory_space<vmem>>) attributes {dimension_semantics = [#tpu.dimension_semantics<parallel>, #tpu.dimension_semantics<parallel>, #tpu.dimension_semantics<arbitrary>], iteration_bounds = array<i64: 2, 1, 1>, scalar_prefetch = 0 : i64, scratch_operands = 1 : i64, tpu.core_type = #tpu.core_type<tc>, window_params = [{transform_indices = @transform_0, window_bounds = array<i64: 16, 640>}, {transform_indices = @transform_1, window_bounds = array<i64: 640, 256>}, {transform_indices = @transform_2, window_bounds = array<i64: 1, 256>}, {transform_indices = @transform_3, window_bounds = array<i64: 1, 256>}, {transform_indices = @transform_4, window_bounds = array<i64: 16, 256>}]} {
    %c0_i32 = arith.constant 0 : i32
    %0 = arith.cmpi eq, %arg2, %c0_i32 : i32
    %1 = arith.extui %0 : i1 to i32
    %c0_i32_0 = arith.constant 0 : i32
    %2 = arith.cmpi ne, %1, %c0_i32_0 : i32
    scf.if %2 {
      %cst_10 = arith.constant 0.000000e+00 : f32
      %12 = vector.broadcast %cst_10 : f32 to vector<16x256xf32>
      %c0_11 = arith.constant 0 : index
      %c0_12 = arith.constant 0 : index
      %13 = vector.load %arg8[%c0_11, %c0_12] : memref<16x256xf32, #tpu.memory_space<vmem>>, vector<16x256xf32>
      tpu.vector_store %arg8[%c0_11, %c0_12], %12 {strides = array<i32>} : memref<16x256xf32, #tpu.memory_space<vmem>>, vector<16x256xf32>,
    } else {
    }
    %c0 = arith.constant 0 : index
    %c0_1 = arith.constant 0 : index
    %3 = vector.load %arg8[%c0, %c0_1] : memref<16x256xf32, #tpu.memory_space<vmem>>, vector<16x256xf32>
    %c0_2 = arith.constant 0 : index
    %c0_3 = arith.constant 0 : index
    %4 = vector.load %arg3[%c0_2, %c0_3] : memref<16x640xbf16, #tpu.memory_space<vmem>>, vector<16x640xbf16>
    %c0_4 = arith.constant 0 : index
    %c0_5 = arith.constant 0 : index
    %5 = vector.load %arg4[%c0_4, %c0_5] : memref<640x256xbf16, #tpu.memory_space<vmem>>, vector<640x256xbf16>
    %cst = arith.constant dense<0.000000e+00> : vector<16x256xf32>
    %6 = tpu.matmul %4, %5, %cst {dimension_numbers = #tpu.dot_dimension_numbers<[1], [0], [0], [1], [0, 0, 1, 1], [], []>} : vector<16x640xbf16>, vector<640x256xbf16>, vector<16x256xf32> -> vector<16x256xf32>
    %7 = arith.addf %3, %6 : vector<16x256xf32>
    %c0_6 = arith.constant 0 : index
    %c0_7 = arith.constant 0 : index
    %8 = vector.load %arg8[%c0_6, %c0_7] : memref<16x256xf32, #tpu.memory_space<vmem>>, vector<16x256xf32>
    tpu.vector_store %arg8[%c0_6, %c0_7], %7 {strides = array<i32>} : memref<16x256xf32, #tpu.memory_space<vmem>>, vector<16x256xf32>,
    %c0_i32_8 = arith.constant 0 : i32
    %9 = arith.cmpi eq, %arg2, %c0_i32_8 : i32
    %10 = arith.extui %9 : i1 to i32
    %c0_i32_9 = arith.constant 0 : i32
    %11 = arith.cmpi ne, %10, %c0_i32_9 : i32
    scf.if %11 {
      %c0_10 = arith.constant 0 : index
      %c0_11 = arith.constant 0 : index
      %12 = vector.load %arg8[%c0_10, %c0_11] : memref<16x256xf32, #tpu.memory_space<vmem>>, vector<16x256xf32>
      %c0_12 = arith.constant 0 : index
      %c0_13 = arith.constant 0 : index
      %13 = vector.load %arg5[%c0_12, %c0_13] : memref<1x256xf32, #tpu.memory_space<vmem>>, vector<1x256xf32>
      %14 = vector.broadcast %13 : vector<1x256xf32> to vector<16x256xf32>
      %15 = arith.mulf %12, %14 : vector<16x256xf32>
      %c0_14 = arith.constant 0 : index
      %c0_15 = arith.constant 0 : index
      %16 = vector.load %arg6[%c0_14, %c0_15] : memref<1x256xf32, #tpu.memory_space<vmem>>, vector<1x256xf32>
      %17 = vector.broadcast %16 : vector<1x256xf32> to vector<16x256xf32>
      %18 = arith.addf %15, %17 : vector<16x256xf32>
      %19 = arith.truncf %18 : vector<16x256xf32> to vector<16x256xbf16>
      %c0_16 = arith.constant 0 : index
      %c0_17 = arith.constant 0 : index
      %20 = vector.load %arg7[%c0_16, %c0_17] : memref<16x256xbf16, #tpu.memory_space<vmem>>, vector<16x256xbf16>
      tpu.vector_store %arg7[%c0_16, %c0_17], %19 {strides = array<i32>} : memref<16x256xbf16, #tpu.memory_space<vmem>>, vector<16x256xbf16>,
    } else {
    }
    return
  }
  func.func @transform_0(%arg0: i32, %arg1: i32, %arg2: i32) -> (i32, i32) {
    %c0_i32 = arith.constant 0 : i32
    return %arg0, %arg2 : i32, i32
  }
  func.func @transform_1(%arg0: i32, %arg1: i32, %arg2: i32) -> (i32, i32) {
    %c0_i32 = arith.constant 0 : i32
    return %arg2, %arg1 : i32, i32
  }
  func.func @transform_2(%arg0: i32, %arg1: i32, %arg2: i32) -> (i32, i32) {
    %c0_i32 = arith.constant 0 : i32
    %c0_i32_0 = arith.constant 0 : i32
    return %c0_i32, %arg1 : i32, i32
  }
  func.func @transform_3(%arg0: i32, %arg1: i32, %arg2: i32) -> (i32, i32) {
    %c0_i32 = arith.constant 0 : i32
    %c0_i32_0 = arith.constant 0 : i32
    return %c0_i32, %arg1 : i32, i32
  }
  func.func @transform_4(%arg0: i32, %arg1: i32, %arg2: i32) -> (i32, i32) {
    %c0_i32 = arith.constant 0 : i32
    return %arg0, %arg1 : i32, i32
  }
}

module attributes {stable_mosaic.version = 11 : i64} {
  func.func @kernel(%arg0: i32, %arg1: i32, %arg2: i32, %arg3: memref<8x768xbf16, #tpu.memory_space<vmem>>, %arg4: memref<768x128xbf16, #tpu.memory_space<vmem>>, %arg5: memref<1x128xf32, #tpu.memory_space<vmem>>, %arg6: memref<1x128xf32, #tpu.memory_space<vmem>>, %arg7: memref<8x128xbf16, #tpu.memory_space<vmem>>, %arg8: memref<8x128xf32, #tpu.memory_space<vmem>>) attributes {dimension_semantics = [#tpu.dimension_semantics<parallel>, #tpu.dimension_semantics<parallel>, #tpu.dimension_semantics<arbitrary>], iteration_bounds = array<i64: 1, 1, 1>, scalar_prefetch = 0 : i64, scratch_operands = 1 : i64, tpu.core_type = #tpu.core_type<tc>, window_params = [{transform_indices = @transform_0, window_bounds = array<i64: 8, 768>}, {transform_indices = @transform_1, window_bounds = array<i64: 768, 128>}, {transform_indices = @transform_2, window_bounds = array<i64: 1, 128>}, {transform_indices = @transform_3, window_bounds = array<i64: 1, 128>}, {transform_indices = @transform_4, window_bounds = array<i64: 8, 128>}]} {
    %c0_i32 = arith.constant 0 : i32
    %0 = arith.cmpi eq, %arg2, %c0_i32 : i32
    %1 = arith.extui %0 : i1 to i32
    %c0_i32_0 = arith.constant 0 : i32
    %2 = arith.cmpi ne, %1, %c0_i32_0 : i32
    scf.if %2 {
      %cst_10 = arith.constant 0.000000e+00 : f32
      %12 = vector.broadcast %cst_10 : f32 to vector<8x128xf32>
      %c0_11 = arith.constant 0 : index
      %c0_12 = arith.constant 0 : index
      %13 = vector.load %arg8[%c0_11, %c0_12] : memref<8x128xf32, #tpu.memory_space<vmem>>, vector<8x128xf32>
      tpu.vector_store %arg8[%c0_11, %c0_12], %12 {strides = array<i32>} : memref<8x128xf32, #tpu.memory_space<vmem>>, vector<8x128xf32>,
    } else {
    }
    %c0 = arith.constant 0 : index
    %c0_1 = arith.constant 0 : index
    %3 = vector.load %arg8[%c0, %c0_1] : memref<8x128xf32, #tpu.memory_space<vmem>>, vector<8x128xf32>
    %c0_2 = arith.constant 0 : index
    %c0_3 = arith.constant 0 : index
    %4 = vector.load %arg3[%c0_2, %c0_3] : memref<8x768xbf16, #tpu.memory_space<vmem>>, vector<8x768xbf16>
    %c0_4 = arith.constant 0 : index
    %c0_5 = arith.constant 0 : index
    %5 = vector.load %arg4[%c0_4, %c0_5] : memref<768x128xbf16, #tpu.memory_space<vmem>>, vector<768x128xbf16>
    %cst = arith.constant dense<0.000000e+00> : vector<8x128xf32>
    %6 = tpu.matmul %4, %5, %cst {dimension_numbers = #tpu.dot_dimension_numbers<[1], [0], [0], [1], [0, 0, 1, 1], [], []>} : vector<8x768xbf16>, vector<768x128xbf16>, vector<8x128xf32> -> vector<8x128xf32>
    %7 = arith.addf %3, %6 : vector<8x128xf32>
    %c0_6 = arith.constant 0 : index
    %c0_7 = arith.constant 0 : index
    %8 = vector.load %arg8[%c0_6, %c0_7] : memref<8x128xf32, #tpu.memory_space<vmem>>, vector<8x128xf32>
    tpu.vector_store %arg8[%c0_6, %c0_7], %7 {strides = array<i32>} : memref<8x128xf32, #tpu.memory_space<vmem>>, vector<8x128xf32>,
    %c0_i32_8 = arith.constant 0 : i32
    %9 = arith.cmpi eq, %arg2, %c0_i32_8 : i32
    %10 = arith.extui %9 : i1 to i32
    %c0_i32_9 = arith.constant 0 : i32
    %11 = arith.cmpi ne, %10, %c0_i32_9 : i32
    scf.if %11 {
      %c0_10 = arith.constant 0 : index
      %c0_11 = arith.constant 0 : index
      %12 = vector.load %arg8[%c0_10, %c0_11] : memref<8x128xf32, #tpu.memory_space<vmem>>, vector<8x128xf32>
      %c0_12 = arith.constant 0 : index
      %c0_13 = arith.constant 0 : index
      %13 = vector.load %arg5[%c0_12, %c0_13] : memref<1x128xf32, #tpu.memory_space<vmem>>, vector<1x128xf32>
      %14 = vector.broadcast %13 : vector<1x128xf32> to vector<8x128xf32>
      %15 = arith.mulf %12, %14 : vector<8x128xf32>
      %c0_14 = arith.constant 0 : index
      %c0_15 = arith.constant 0 : index
      %16 = vector.load %arg6[%c0_14, %c0_15] : memref<1x128xf32, #tpu.memory_space<vmem>>, vector<1x128xf32>
      %17 = vector.broadcast %16 : vector<1x128xf32> to vector<8x128xf32>
      %18 = arith.addf %15, %17 : vector<8x128xf32>
      %19 = arith.truncf %18 : vector<8x128xf32> to vector<8x128xbf16>
      %c0_16 = arith.constant 0 : index
      %c0_17 = arith.constant 0 : index
      %20 = vector.load %arg7[%c0_16, %c0_17] : memref<8x128xbf16, #tpu.memory_space<vmem>>, vector<8x128xbf16>
      tpu.vector_store %arg7[%c0_16, %c0_17], %19 {strides = array<i32>} : memref<8x128xbf16, #tpu.memory_space<vmem>>, vector<8x128xbf16>,
    } else {
    }
    return
  }
  func.func @transform_0(%arg0: i32, %arg1: i32, %arg2: i32) -> (i32, i32) {
    %c0_i32 = arith.constant 0 : i32
    return %arg0, %arg2 : i32, i32
  }
  func.func @transform_1(%arg0: i32, %arg1: i32, %arg2: i32) -> (i32, i32) {
    %c0_i32 = arith.constant 0 : i32
    return %arg2, %arg1 : i32, i32
  }
  func.func @transform_2(%arg0: i32, %arg1: i32, %arg2: i32) -> (i32, i32) {
    %c0_i32 = arith.constant 0 : i32
    %c0_i32_0 = arith.constant 0 : i32
    return %c0_i32, %arg1 : i32, i32
  }
  func.func @transform_3(%arg0: i32, %arg1: i32, %arg2: i32) -> (i32, i32) {
    %c0_i32 = arith.constant 0 : i32
    %c0_i32_0 = arith.constant 0 : i32
    return %c0_i32, %arg1 : i32, i32
  }
  func.func @transform_4(%arg0: i32, %arg1: i32, %arg2: i32) -> (i32, i32) {
    %c0_i32 = arith.constant 0 : i32
    return %arg0, %arg1 : i32, i32
  }
}

module attributes {stable_mosaic.version = 11 : i64} {
  func.func @kernel(%arg0: i32, %arg1: i32, %arg2: i32, %arg3: memref<8x384xbf16, #tpu.memory_space<vmem>>, %arg4: memref<384x128xbf16, #tpu.memory_space<vmem>>, %arg5: memref<1x128xf32, #tpu.memory_space<vmem>>, %arg6: memref<1x128xf32, #tpu.memory_space<vmem>>, %arg7: memref<8x128xbf16, #tpu.memory_space<vmem>>, %arg8: memref<8x128xf32, #tpu.memory_space<vmem>>) attributes {dimension_semantics = [#tpu.dimension_semantics<parallel>, #tpu.dimension_semantics<parallel>, #tpu.dimension_semantics<arbitrary>], iteration_bounds = array<i64: 1, 1, 1>, scalar_prefetch = 0 : i64, scratch_operands = 1 : i64, tpu.core_type = #tpu.core_type<tc>, window_params = [{transform_indices = @transform_0, window_bounds = array<i64: 8, 384>}, {transform_indices = @transform_1, window_bounds = array<i64: 384, 128>}, {transform_indices = @transform_2, window_bounds = array<i64: 1, 128>}, {transform_indices = @transform_3, window_bounds = array<i64: 1, 128>}, {transform_indices = @transform_4, window_bounds = array<i64: 8, 128>}]} {
    %c0_i32 = arith.constant 0 : i32
    %0 = arith.cmpi eq, %arg2, %c0_i32 : i32
    %1 = arith.extui %0 : i1 to i32
    %c0_i32_0 = arith.constant 0 : i32
    %2 = arith.cmpi ne, %1, %c0_i32_0 : i32
    scf.if %2 {
      %cst_10 = arith.constant 0.000000e+00 : f32
      %12 = vector.broadcast %cst_10 : f32 to vector<8x128xf32>
      %c0_11 = arith.constant 0 : index
      %c0_12 = arith.constant 0 : index
      %13 = vector.load %arg8[%c0_11, %c0_12] : memref<8x128xf32, #tpu.memory_space<vmem>>, vector<8x128xf32>
      tpu.vector_store %arg8[%c0_11, %c0_12], %12 {strides = array<i32>} : memref<8x128xf32, #tpu.memory_space<vmem>>, vector<8x128xf32>,
    } else {
    }
    %c0 = arith.constant 0 : index
    %c0_1 = arith.constant 0 : index
    %3 = vector.load %arg8[%c0, %c0_1] : memref<8x128xf32, #tpu.memory_space<vmem>>, vector<8x128xf32>
    %c0_2 = arith.constant 0 : index
    %c0_3 = arith.constant 0 : index
    %4 = vector.load %arg3[%c0_2, %c0_3] : memref<8x384xbf16, #tpu.memory_space<vmem>>, vector<8x384xbf16>
    %c0_4 = arith.constant 0 : index
    %c0_5 = arith.constant 0 : index
    %5 = vector.load %arg4[%c0_4, %c0_5] : memref<384x128xbf16, #tpu.memory_space<vmem>>, vector<384x128xbf16>
    %cst = arith.constant dense<0.000000e+00> : vector<8x128xf32>
    %6 = tpu.matmul %4, %5, %cst {dimension_numbers = #tpu.dot_dimension_numbers<[1], [0], [0], [1], [0, 0, 1, 1], [], []>} : vector<8x384xbf16>, vector<384x128xbf16>, vector<8x128xf32> -> vector<8x128xf32>
    %7 = arith.addf %3, %6 : vector<8x128xf32>
    %c0_6 = arith.constant 0 : index
    %c0_7 = arith.constant 0 : index
    %8 = vector.load %arg8[%c0_6, %c0_7] : memref<8x128xf32, #tpu.memory_space<vmem>>, vector<8x128xf32>
    tpu.vector_store %arg8[%c0_6, %c0_7], %7 {strides = array<i32>} : memref<8x128xf32, #tpu.memory_space<vmem>>, vector<8x128xf32>,
    %c0_i32_8 = arith.constant 0 : i32
    %9 = arith.cmpi eq, %arg2, %c0_i32_8 : i32
    %10 = arith.extui %9 : i1 to i32
    %c0_i32_9 = arith.constant 0 : i32
    %11 = arith.cmpi ne, %10, %c0_i32_9 : i32
    scf.if %11 {
      %c0_10 = arith.constant 0 : index
      %c0_11 = arith.constant 0 : index
      %12 = vector.load %arg8[%c0_10, %c0_11] : memref<8x128xf32, #tpu.memory_space<vmem>>, vector<8x128xf32>
      %c0_12 = arith.constant 0 : index
      %c0_13 = arith.constant 0 : index
      %13 = vector.load %arg5[%c0_12, %c0_13] : memref<1x128xf32, #tpu.memory_space<vmem>>, vector<1x128xf32>
      %14 = vector.broadcast %13 : vector<1x128xf32> to vector<8x128xf32>
      %15 = arith.mulf %12, %14 : vector<8x128xf32>
      %c0_14 = arith.constant 0 : index
      %c0_15 = arith.constant 0 : index
      %16 = vector.load %arg6[%c0_14, %c0_15] : memref<1x128xf32, #tpu.memory_space<vmem>>, vector<1x128xf32>
      %17 = vector.broadcast %16 : vector<1x128xf32> to vector<8x128xf32>
      %18 = arith.addf %15, %17 : vector<8x128xf32>
      %19 = arith.truncf %18 : vector<8x128xf32> to vector<8x128xbf16>
      %c0_16 = arith.constant 0 : index
      %c0_17 = arith.constant 0 : index
      %20 = vector.load %arg7[%c0_16, %c0_17] : memref<8x128xbf16, #tpu.memory_space<vmem>>, vector<8x128xbf16>
      tpu.vector_store %arg7[%c0_16, %c0_17], %19 {strides = array<i32>} : memref<8x128xbf16, #tpu.memory_space<vmem>>, vector<8x128xbf16>,
    } else {
    }
    return
  }
  func.func @transform_0(%arg0: i32, %arg1: i32, %arg2: i32) -> (i32, i32) {
    %c0_i32 = arith.constant 0 : i32
    return %arg0, %arg2 : i32, i32
  }
  func.func @transform_1(%arg0: i32, %arg1: i32, %arg2: i32) -> (i32, i32) {
    %c0_i32 = arith.constant 0 : i32
    return %arg2, %arg1 : i32, i32
  }
  func.func @transform_2(%arg0: i32, %arg1: i32, %arg2: i32) -> (i32, i32) {
    %c0_i32 = arith.constant 0 : i32
    %c0_i32_0 = arith.constant 0 : i32
    return %c0_i32, %arg1 : i32, i32
  }
  func.func @transform_3(%arg0: i32, %arg1: i32, %arg2: i32) -> (i32, i32) {
    %c0_i32 = arith.constant 0 : i32
    %c0_i32_0 = arith.constant 0 : i32
    return %c0_i32, %arg1 : i32, i32
  }
  func.func @transform_4(%arg0: i32, %arg1: i32, %arg2: i32) -> (i32, i32) {
    %c0_i32 = arith.constant 0 : i32
    return %arg0, %arg1 : i32, i32
  }
}

module attributes {stable_mosaic.version = 11 : i64} {
  func.func @kernel(%arg0: i32, %arg1: i32, %arg2: i32, %arg3: memref<8x1152xbf16, #tpu.memory_space<vmem>>, %arg4: memref<1152x128xbf16, #tpu.memory_space<vmem>>, %arg5: memref<1x128xf32, #tpu.memory_space<vmem>>, %arg6: memref<1x128xf32, #tpu.memory_space<vmem>>, %arg7: memref<8x128xbf16, #tpu.memory_space<vmem>>, %arg8: memref<8x128xbf16, #tpu.memory_space<vmem>>, %arg9: memref<8x128xf32, #tpu.memory_space<vmem>>) attributes {dimension_semantics = [#tpu.dimension_semantics<parallel>, #tpu.dimension_semantics<parallel>, #tpu.dimension_semantics<arbitrary>], iteration_bounds = array<i64: 1, 1, 1>, scalar_prefetch = 0 : i64, scratch_operands = 1 : i64, tpu.core_type = #tpu.core_type<tc>, window_params = [{transform_indices = @transform_0, window_bounds = array<i64: 8, 1152>}, {transform_indices = @transform_1, window_bounds = array<i64: 1152, 128>}, {transform_indices = @transform_2, window_bounds = array<i64: 1, 128>}, {transform_indices = @transform_3, window_bounds = array<i64: 1, 128>}, {transform_indices = @transform_4, window_bounds = array<i64: 8, 128>}, {transform_indices = @transform_5, window_bounds = array<i64: 8, 128>}]} {
    %c0_i32 = arith.constant 0 : i32
    %0 = arith.cmpi eq, %arg2, %c0_i32 : i32
    %1 = arith.extui %0 : i1 to i32
    %c0_i32_0 = arith.constant 0 : i32
    %2 = arith.cmpi ne, %1, %c0_i32_0 : i32
    scf.if %2 {
      %cst_10 = arith.constant 0.000000e+00 : f32
      %12 = vector.broadcast %cst_10 : f32 to vector<8x128xf32>
      %c0_11 = arith.constant 0 : index
      %c0_12 = arith.constant 0 : index
      %13 = vector.load %arg9[%c0_11, %c0_12] : memref<8x128xf32, #tpu.memory_space<vmem>>, vector<8x128xf32>
      tpu.vector_store %arg9[%c0_11, %c0_12], %12 {strides = array<i32>} : memref<8x128xf32, #tpu.memory_space<vmem>>, vector<8x128xf32>,
    } else {
    }
    %c0 = arith.constant 0 : index
    %c0_1 = arith.constant 0 : index
    %3 = vector.load %arg9[%c0, %c0_1] : memref<8x128xf32, #tpu.memory_space<vmem>>, vector<8x128xf32>
    %c0_2 = arith.constant 0 : index
    %c0_3 = arith.constant 0 : index
    %4 = vector.load %arg3[%c0_2, %c0_3] : memref<8x1152xbf16, #tpu.memory_space<vmem>>, vector<8x1152xbf16>
    %c0_4 = arith.constant 0 : index
    %c0_5 = arith.constant 0 : index
    %5 = vector.load %arg4[%c0_4, %c0_5] : memref<1152x128xbf16, #tpu.memory_space<vmem>>, vector<1152x128xbf16>
    %cst = arith.constant dense<0.000000e+00> : vector<8x128xf32>
    %6 = tpu.matmul %4, %5, %cst {dimension_numbers = #tpu.dot_dimension_numbers<[1], [0], [0], [1], [0, 0, 1, 1], [], []>} : vector<8x1152xbf16>, vector<1152x128xbf16>, vector<8x128xf32> -> vector<8x128xf32>
    %7 = arith.addf %3, %6 : vector<8x128xf32>
    %c0_6 = arith.constant 0 : index
    %c0_7 = arith.constant 0 : index
    %8 = vector.load %arg9[%c0_6, %c0_7] : memref<8x128xf32, #tpu.memory_space<vmem>>, vector<8x128xf32>
    tpu.vector_store %arg9[%c0_6, %c0_7], %7 {strides = array<i32>} : memref<8x128xf32, #tpu.memory_space<vmem>>, vector<8x128xf32>,
    %c0_i32_8 = arith.constant 0 : i32
    %9 = arith.cmpi eq, %arg2, %c0_i32_8 : i32
    %10 = arith.extui %9 : i1 to i32
    %c0_i32_9 = arith.constant 0 : i32
    %11 = arith.cmpi ne, %10, %c0_i32_9 : i32
    scf.if %11 {
      %c0_10 = arith.constant 0 : index
      %c0_11 = arith.constant 0 : index
      %12 = vector.load %arg9[%c0_10, %c0_11] : memref<8x128xf32, #tpu.memory_space<vmem>>, vector<8x128xf32>
      %c0_12 = arith.constant 0 : index
      %c0_13 = arith.constant 0 : index
      %13 = vector.load %arg5[%c0_12, %c0_13] : memref<1x128xf32, #tpu.memory_space<vmem>>, vector<1x128xf32>
      %14 = vector.broadcast %13 : vector<1x128xf32> to vector<8x128xf32>
      %15 = arith.mulf %12, %14 : vector<8x128xf32>
      %c0_14 = arith.constant 0 : index
      %c0_15 = arith.constant 0 : index
      %16 = vector.load %arg6[%c0_14, %c0_15] : memref<1x128xf32, #tpu.memory_space<vmem>>, vector<1x128xf32>
      %17 = vector.broadcast %16 : vector<1x128xf32> to vector<8x128xf32>
      %18 = arith.addf %15, %17 : vector<8x128xf32>
      %c0_16 = arith.constant 0 : index
      %c0_17 = arith.constant 0 : index
      %19 = vector.load %arg7[%c0_16, %c0_17] : memref<8x128xbf16, #tpu.memory_space<vmem>>, vector<8x128xbf16>
      %20 = arith.extf %19 : vector<8x128xbf16> to vector<8x128xf32>
      %21 = arith.addf %18, %20 : vector<8x128xf32>
      %cst_18 = arith.constant 0.000000e+00 : f32
      %22 = vector.broadcast %cst_18 : f32 to vector<8x128xf32>
      %23 = arith.maximumf %21, %22 : vector<8x128xf32>
      %24 = arith.truncf %23 : vector<8x128xf32> to vector<8x128xbf16>
      %c0_19 = arith.constant 0 : index
      %c0_20 = arith.constant 0 : index
      %25 = vector.load %arg8[%c0_19, %c0_20] : memref<8x128xbf16, #tpu.memory_space<vmem>>, vector<8x128xbf16>
      tpu.vector_store %arg8[%c0_19, %c0_20], %24 {strides = array<i32>} : memref<8x128xbf16, #tpu.memory_space<vmem>>, vector<8x128xbf16>,
    } else {
    }
    return
  }
  func.func @transform_0(%arg0: i32, %arg1: i32, %arg2: i32) -> (i32, i32) {
    %c0_i32 = arith.constant 0 : i32
    return %arg0, %arg2 : i32, i32
  }
  func.func @transform_1(%arg0: i32, %arg1: i32, %arg2: i32) -> (i32, i32) {
    %c0_i32 = arith.constant 0 : i32
    return %arg2, %arg1 : i32, i32
  }
  func.func @transform_2(%arg0: i32, %arg1: i32, %arg2: i32) -> (i32, i32) {
    %c0_i32 = arith.constant 0 : i32
    %c0_i32_0 = arith.constant 0 : i32
    return %c0_i32, %arg1 : i32, i32
  }
  func.func @transform_3(%arg0: i32, %arg1: i32, %arg2: i32) -> (i32, i32) {
    %c0_i32 = arith.constant 0 : i32
    %c0_i32_0 = arith.constant 0 : i32
    return %c0_i32, %arg1 : i32, i32
  }
  func.func @transform_4(%arg0: i32, %arg1: i32, %arg2: i32) -> (i32, i32) {
    %c0_i32 = arith.constant 0 : i32
    return %arg0, %arg1 : i32, i32
  }
  func.func @transform_5(%arg0: i32, %arg1: i32, %arg2: i32) -> (i32, i32) {
    %c0_i32 = arith.constant 0 : i32
    return %arg0, %arg1 : i32, i32
  }
}

module attributes {stable_mosaic.version = 11 : i64} {
  func.func @kernel(%arg0: i32, %arg1: i32, %arg2: i32, %arg3: memref<64x768xbf16, #tpu.memory_space<vmem>>, %arg4: memref<768x128xbf16, #tpu.memory_space<vmem>>, %arg5: memref<1x128xf32, #tpu.memory_space<vmem>>, %arg6: memref<1x128xf32, #tpu.memory_space<vmem>>, %arg7: memref<64x128xbf16, #tpu.memory_space<vmem>>, %arg8: memref<64x128xf32, #tpu.memory_space<vmem>>) attributes {dimension_semantics = [#tpu.dimension_semantics<parallel>, #tpu.dimension_semantics<parallel>, #tpu.dimension_semantics<arbitrary>], iteration_bounds = array<i64: 2, 1, 1>, scalar_prefetch = 0 : i64, scratch_operands = 1 : i64, tpu.core_type = #tpu.core_type<tc>, window_params = [{transform_indices = @transform_0, window_bounds = array<i64: 64, 768>}, {transform_indices = @transform_1, window_bounds = array<i64: 768, 128>}, {transform_indices = @transform_2, window_bounds = array<i64: 1, 128>}, {transform_indices = @transform_3, window_bounds = array<i64: 1, 128>}, {transform_indices = @transform_4, window_bounds = array<i64: 64, 128>}]} {
    %c0_i32 = arith.constant 0 : i32
    %0 = arith.cmpi eq, %arg2, %c0_i32 : i32
    %1 = arith.extui %0 : i1 to i32
    %c0_i32_0 = arith.constant 0 : i32
    %2 = arith.cmpi ne, %1, %c0_i32_0 : i32
    scf.if %2 {
      %cst_10 = arith.constant 0.000000e+00 : f32
      %12 = vector.broadcast %cst_10 : f32 to vector<64x128xf32>
      %c0_11 = arith.constant 0 : index
      %c0_12 = arith.constant 0 : index
      %13 = vector.load %arg8[%c0_11, %c0_12] : memref<64x128xf32, #tpu.memory_space<vmem>>, vector<64x128xf32>
      tpu.vector_store %arg8[%c0_11, %c0_12], %12 {strides = array<i32>} : memref<64x128xf32, #tpu.memory_space<vmem>>, vector<64x128xf32>,
    } else {
    }
    %c0 = arith.constant 0 : index
    %c0_1 = arith.constant 0 : index
    %3 = vector.load %arg8[%c0, %c0_1] : memref<64x128xf32, #tpu.memory_space<vmem>>, vector<64x128xf32>
    %c0_2 = arith.constant 0 : index
    %c0_3 = arith.constant 0 : index
    %4 = vector.load %arg3[%c0_2, %c0_3] : memref<64x768xbf16, #tpu.memory_space<vmem>>, vector<64x768xbf16>
    %c0_4 = arith.constant 0 : index
    %c0_5 = arith.constant 0 : index
    %5 = vector.load %arg4[%c0_4, %c0_5] : memref<768x128xbf16, #tpu.memory_space<vmem>>, vector<768x128xbf16>
    %cst = arith.constant dense<0.000000e+00> : vector<64x128xf32>
    %6 = tpu.matmul %4, %5, %cst {dimension_numbers = #tpu.dot_dimension_numbers<[1], [0], [0], [1], [0, 0, 1, 1], [], []>} : vector<64x768xbf16>, vector<768x128xbf16>, vector<64x128xf32> -> vector<64x128xf32>
    %7 = arith.addf %3, %6 : vector<64x128xf32>
    %c0_6 = arith.constant 0 : index
    %c0_7 = arith.constant 0 : index
    %8 = vector.load %arg8[%c0_6, %c0_7] : memref<64x128xf32, #tpu.memory_space<vmem>>, vector<64x128xf32>
    tpu.vector_store %arg8[%c0_6, %c0_7], %7 {strides = array<i32>} : memref<64x128xf32, #tpu.memory_space<vmem>>, vector<64x128xf32>,
    %c0_i32_8 = arith.constant 0 : i32
    %9 = arith.cmpi eq, %arg2, %c0_i32_8 : i32
    %10 = arith.extui %9 : i1 to i32
    %c0_i32_9 = arith.constant 0 : i32
    %11 = arith.cmpi ne, %10, %c0_i32_9 : i32
    scf.if %11 {
      %c0_10 = arith.constant 0 : index
      %c0_11 = arith.constant 0 : index
      %12 = vector.load %arg8[%c0_10, %c0_11] : memref<64x128xf32, #tpu.memory_space<vmem>>, vector<64x128xf32>
      %c0_12 = arith.constant 0 : index
      %c0_13 = arith.constant 0 : index
      %13 = vector.load %arg5[%c0_12, %c0_13] : memref<1x128xf32, #tpu.memory_space<vmem>>, vector<1x128xf32>
      %14 = vector.broadcast %13 : vector<1x128xf32> to vector<64x128xf32>
      %15 = arith.mulf %12, %14 : vector<64x128xf32>
      %c0_14 = arith.constant 0 : index
      %c0_15 = arith.constant 0 : index
      %16 = vector.load %arg6[%c0_14, %c0_15] : memref<1x128xf32, #tpu.memory_space<vmem>>, vector<1x128xf32>
      %17 = vector.broadcast %16 : vector<1x128xf32> to vector<64x128xf32>
      %18 = arith.addf %15, %17 : vector<64x128xf32>
      %19 = arith.truncf %18 : vector<64x128xf32> to vector<64x128xbf16>
      %c0_16 = arith.constant 0 : index
      %c0_17 = arith.constant 0 : index
      %20 = vector.load %arg7[%c0_16, %c0_17] : memref<64x128xbf16, #tpu.memory_space<vmem>>, vector<64x128xbf16>
      tpu.vector_store %arg7[%c0_16, %c0_17], %19 {strides = array<i32>} : memref<64x128xbf16, #tpu.memory_space<vmem>>, vector<64x128xbf16>,
    } else {
    }
    return
  }
  func.func @transform_0(%arg0: i32, %arg1: i32, %arg2: i32) -> (i32, i32) {
    %c0_i32 = arith.constant 0 : i32
    return %arg0, %arg2 : i32, i32
  }
  func.func @transform_1(%arg0: i32, %arg1: i32, %arg2: i32) -> (i32, i32) {
    %c0_i32 = arith.constant 0 : i32
    return %arg2, %arg1 : i32, i32
  }
  func.func @transform_2(%arg0: i32, %arg1: i32, %arg2: i32) -> (i32, i32) {
    %c0_i32 = arith.constant 0 : i32
    %c0_i32_0 = arith.constant 0 : i32
    return %c0_i32, %arg1 : i32, i32
  }
  func.func @transform_3(%arg0: i32, %arg1: i32, %arg2: i32) -> (i32, i32) {
    %c0_i32 = arith.constant 0 : i32
    %c0_i32_0 = arith.constant 0 : i32
    return %c0_i32, %arg1 : i32, i32
  }
  func.func @transform_4(%arg0: i32, %arg1: i32, %arg2: i32) -> (i32, i32) {
    %c0_i32 = arith.constant 0 : i32
    return %arg0, %arg1 : i32, i32
  }
}

module attributes {stable_mosaic.version = 11 : i64} {
  func.func @kernel(%arg0: i32, %arg1: i32, %arg2: i32, %arg3: memref<64x384xbf16, #tpu.memory_space<vmem>>, %arg4: memref<384x128xbf16, #tpu.memory_space<vmem>>, %arg5: memref<1x128xf32, #tpu.memory_space<vmem>>, %arg6: memref<1x128xf32, #tpu.memory_space<vmem>>, %arg7: memref<64x128xbf16, #tpu.memory_space<vmem>>, %arg8: memref<64x128xf32, #tpu.memory_space<vmem>>) attributes {dimension_semantics = [#tpu.dimension_semantics<parallel>, #tpu.dimension_semantics<parallel>, #tpu.dimension_semantics<arbitrary>], iteration_bounds = array<i64: 2, 1, 1>, scalar_prefetch = 0 : i64, scratch_operands = 1 : i64, tpu.core_type = #tpu.core_type<tc>, window_params = [{transform_indices = @transform_0, window_bounds = array<i64: 64, 384>}, {transform_indices = @transform_1, window_bounds = array<i64: 384, 128>}, {transform_indices = @transform_2, window_bounds = array<i64: 1, 128>}, {transform_indices = @transform_3, window_bounds = array<i64: 1, 128>}, {transform_indices = @transform_4, window_bounds = array<i64: 64, 128>}]} {
    %c0_i32 = arith.constant 0 : i32
    %0 = arith.cmpi eq, %arg2, %c0_i32 : i32
    %1 = arith.extui %0 : i1 to i32
    %c0_i32_0 = arith.constant 0 : i32
    %2 = arith.cmpi ne, %1, %c0_i32_0 : i32
    scf.if %2 {
      %cst_10 = arith.constant 0.000000e+00 : f32
      %12 = vector.broadcast %cst_10 : f32 to vector<64x128xf32>
      %c0_11 = arith.constant 0 : index
      %c0_12 = arith.constant 0 : index
      %13 = vector.load %arg8[%c0_11, %c0_12] : memref<64x128xf32, #tpu.memory_space<vmem>>, vector<64x128xf32>
      tpu.vector_store %arg8[%c0_11, %c0_12], %12 {strides = array<i32>} : memref<64x128xf32, #tpu.memory_space<vmem>>, vector<64x128xf32>,
    } else {
    }
    %c0 = arith.constant 0 : index
    %c0_1 = arith.constant 0 : index
    %3 = vector.load %arg8[%c0, %c0_1] : memref<64x128xf32, #tpu.memory_space<vmem>>, vector<64x128xf32>
    %c0_2 = arith.constant 0 : index
    %c0_3 = arith.constant 0 : index
    %4 = vector.load %arg3[%c0_2, %c0_3] : memref<64x384xbf16, #tpu.memory_space<vmem>>, vector<64x384xbf16>
    %c0_4 = arith.constant 0 : index
    %c0_5 = arith.constant 0 : index
    %5 = vector.load %arg4[%c0_4, %c0_5] : memref<384x128xbf16, #tpu.memory_space<vmem>>, vector<384x128xbf16>
    %cst = arith.constant dense<0.000000e+00> : vector<64x128xf32>
    %6 = tpu.matmul %4, %5, %cst {dimension_numbers = #tpu.dot_dimension_numbers<[1], [0], [0], [1], [0, 0, 1, 1], [], []>} : vector<64x384xbf16>, vector<384x128xbf16>, vector<64x128xf32> -> vector<64x128xf32>
    %7 = arith.addf %3, %6 : vector<64x128xf32>
    %c0_6 = arith.constant 0 : index
    %c0_7 = arith.constant 0 : index
    %8 = vector.load %arg8[%c0_6, %c0_7] : memref<64x128xf32, #tpu.memory_space<vmem>>, vector<64x128xf32>
    tpu.vector_store %arg8[%c0_6, %c0_7], %7 {strides = array<i32>} : memref<64x128xf32, #tpu.memory_space<vmem>>, vector<64x128xf32>,
    %c0_i32_8 = arith.constant 0 : i32
    %9 = arith.cmpi eq, %arg2, %c0_i32_8 : i32
    %10 = arith.extui %9 : i1 to i32
    %c0_i32_9 = arith.constant 0 : i32
    %11 = arith.cmpi ne, %10, %c0_i32_9 : i32
    scf.if %11 {
      %c0_10 = arith.constant 0 : index
      %c0_11 = arith.constant 0 : index
      %12 = vector.load %arg8[%c0_10, %c0_11] : memref<64x128xf32, #tpu.memory_space<vmem>>, vector<64x128xf32>
      %c0_12 = arith.constant 0 : index
      %c0_13 = arith.constant 0 : index
      %13 = vector.load %arg5[%c0_12, %c0_13] : memref<1x128xf32, #tpu.memory_space<vmem>>, vector<1x128xf32>
      %14 = vector.broadcast %13 : vector<1x128xf32> to vector<64x128xf32>
      %15 = arith.mulf %12, %14 : vector<64x128xf32>
      %c0_14 = arith.constant 0 : index
      %c0_15 = arith.constant 0 : index
      %16 = vector.load %arg6[%c0_14, %c0_15] : memref<1x128xf32, #tpu.memory_space<vmem>>, vector<1x128xf32>
      %17 = vector.broadcast %16 : vector<1x128xf32> to vector<64x128xf32>
      %18 = arith.addf %15, %17 : vector<64x128xf32>
      %19 = arith.truncf %18 : vector<64x128xf32> to vector<64x128xbf16>
      %c0_16 = arith.constant 0 : index
      %c0_17 = arith.constant 0 : index
      %20 = vector.load %arg7[%c0_16, %c0_17] : memref<64x128xbf16, #tpu.memory_space<vmem>>, vector<64x128xbf16>
      tpu.vector_store %arg7[%c0_16, %c0_17], %19 {strides = array<i32>} : memref<64x128xbf16, #tpu.memory_space<vmem>>, vector<64x128xbf16>,
    } else {
    }
    return
  }
  func.func @transform_0(%arg0: i32, %arg1: i32, %arg2: i32) -> (i32, i32) {
    %c0_i32 = arith.constant 0 : i32
    return %arg0, %arg2 : i32, i32
  }
  func.func @transform_1(%arg0: i32, %arg1: i32, %arg2: i32) -> (i32, i32) {
    %c0_i32 = arith.constant 0 : i32
    return %arg2, %arg1 : i32, i32
  }
  func.func @transform_2(%arg0: i32, %arg1: i32, %arg2: i32) -> (i32, i32) {
    %c0_i32 = arith.constant 0 : i32
    %c0_i32_0 = arith.constant 0 : i32
    return %c0_i32, %arg1 : i32, i32
  }
  func.func @transform_3(%arg0: i32, %arg1: i32, %arg2: i32) -> (i32, i32) {
    %c0_i32 = arith.constant 0 : i32
    %c0_i32_0 = arith.constant 0 : i32
    return %c0_i32, %arg1 : i32, i32
  }
  func.func @transform_4(%arg0: i32, %arg1: i32, %arg2: i32) -> (i32, i32) {
    %c0_i32 = arith.constant 0 : i32
    return %arg0, %arg1 : i32, i32
  }
}

module attributes {stable_mosaic.version = 11 : i64} {
  func.func @kernel(%arg0: i32, %arg1: i32, %arg2: i32, %arg3: memref<16x768xbf16, #tpu.memory_space<vmem>>, %arg4: memref<768x128xbf16, #tpu.memory_space<vmem>>, %arg5: memref<1x128xf32, #tpu.memory_space<vmem>>, %arg6: memref<1x128xf32, #tpu.memory_space<vmem>>, %arg7: memref<16x128xbf16, #tpu.memory_space<vmem>>, %arg8: memref<16x128xf32, #tpu.memory_space<vmem>>) attributes {dimension_semantics = [#tpu.dimension_semantics<parallel>, #tpu.dimension_semantics<parallel>, #tpu.dimension_semantics<arbitrary>], iteration_bounds = array<i64: 2, 1, 1>, scalar_prefetch = 0 : i64, scratch_operands = 1 : i64, tpu.core_type = #tpu.core_type<tc>, window_params = [{transform_indices = @transform_0, window_bounds = array<i64: 16, 768>}, {transform_indices = @transform_1, window_bounds = array<i64: 768, 128>}, {transform_indices = @transform_2, window_bounds = array<i64: 1, 128>}, {transform_indices = @transform_3, window_bounds = array<i64: 1, 128>}, {transform_indices = @transform_4, window_bounds = array<i64: 16, 128>}]} {
    %c0_i32 = arith.constant 0 : i32
    %0 = arith.cmpi eq, %arg2, %c0_i32 : i32
    %1 = arith.extui %0 : i1 to i32
    %c0_i32_0 = arith.constant 0 : i32
    %2 = arith.cmpi ne, %1, %c0_i32_0 : i32
    scf.if %2 {
      %cst_10 = arith.constant 0.000000e+00 : f32
      %12 = vector.broadcast %cst_10 : f32 to vector<16x128xf32>
      %c0_11 = arith.constant 0 : index
      %c0_12 = arith.constant 0 : index
      %13 = vector.load %arg8[%c0_11, %c0_12] : memref<16x128xf32, #tpu.memory_space<vmem>>, vector<16x128xf32>
      tpu.vector_store %arg8[%c0_11, %c0_12], %12 {strides = array<i32>} : memref<16x128xf32, #tpu.memory_space<vmem>>, vector<16x128xf32>,
    } else {
    }
    %c0 = arith.constant 0 : index
    %c0_1 = arith.constant 0 : index
    %3 = vector.load %arg8[%c0, %c0_1] : memref<16x128xf32, #tpu.memory_space<vmem>>, vector<16x128xf32>
    %c0_2 = arith.constant 0 : index
    %c0_3 = arith.constant 0 : index
    %4 = vector.load %arg3[%c0_2, %c0_3] : memref<16x768xbf16, #tpu.memory_space<vmem>>, vector<16x768xbf16>
    %c0_4 = arith.constant 0 : index
    %c0_5 = arith.constant 0 : index
    %5 = vector.load %arg4[%c0_4, %c0_5] : memref<768x128xbf16, #tpu.memory_space<vmem>>, vector<768x128xbf16>
    %cst = arith.constant dense<0.000000e+00> : vector<16x128xf32>
    %6 = tpu.matmul %4, %5, %cst {dimension_numbers = #tpu.dot_dimension_numbers<[1], [0], [0], [1], [0, 0, 1, 1], [], []>} : vector<16x768xbf16>, vector<768x128xbf16>, vector<16x128xf32> -> vector<16x128xf32>
    %7 = arith.addf %3, %6 : vector<16x128xf32>
    %c0_6 = arith.constant 0 : index
    %c0_7 = arith.constant 0 : index
    %8 = vector.load %arg8[%c0_6, %c0_7] : memref<16x128xf32, #tpu.memory_space<vmem>>, vector<16x128xf32>
    tpu.vector_store %arg8[%c0_6, %c0_7], %7 {strides = array<i32>} : memref<16x128xf32, #tpu.memory_space<vmem>>, vector<16x128xf32>,
    %c0_i32_8 = arith.constant 0 : i32
    %9 = arith.cmpi eq, %arg2, %c0_i32_8 : i32
    %10 = arith.extui %9 : i1 to i32
    %c0_i32_9 = arith.constant 0 : i32
    %11 = arith.cmpi ne, %10, %c0_i32_9 : i32
    scf.if %11 {
      %c0_10 = arith.constant 0 : index
      %c0_11 = arith.constant 0 : index
      %12 = vector.load %arg8[%c0_10, %c0_11] : memref<16x128xf32, #tpu.memory_space<vmem>>, vector<16x128xf32>
      %c0_12 = arith.constant 0 : index
      %c0_13 = arith.constant 0 : index
      %13 = vector.load %arg5[%c0_12, %c0_13] : memref<1x128xf32, #tpu.memory_space<vmem>>, vector<1x128xf32>
      %14 = vector.broadcast %13 : vector<1x128xf32> to vector<16x128xf32>
      %15 = arith.mulf %12, %14 : vector<16x128xf32>
      %c0_14 = arith.constant 0 : index
      %c0_15 = arith.constant 0 : index
      %16 = vector.load %arg6[%c0_14, %c0_15] : memref<1x128xf32, #tpu.memory_space<vmem>>, vector<1x128xf32>
      %17 = vector.broadcast %16 : vector<1x128xf32> to vector<16x128xf32>
      %18 = arith.addf %15, %17 : vector<16x128xf32>
      %19 = arith.truncf %18 : vector<16x128xf32> to vector<16x128xbf16>
      %c0_16 = arith.constant 0 : index
      %c0_17 = arith.constant 0 : index
      %20 = vector.load %arg7[%c0_16, %c0_17] : memref<16x128xbf16, #tpu.memory_space<vmem>>, vector<16x128xbf16>
      tpu.vector_store %arg7[%c0_16, %c0_17], %19 {strides = array<i32>} : memref<16x128xbf16, #tpu.memory_space<vmem>>, vector<16x128xbf16>,
    } else {
    }
    return
  }
  func.func @transform_0(%arg0: i32, %arg1: i32, %arg2: i32) -> (i32, i32) {
    %c0_i32 = arith.constant 0 : i32
    return %arg0, %arg2 : i32, i32
  }
  func.func @transform_1(%arg0: i32, %arg1: i32, %arg2: i32) -> (i32, i32) {
    %c0_i32 = arith.constant 0 : i32
    return %arg2, %arg1 : i32, i32
  }
  func.func @transform_2(%arg0: i32, %arg1: i32, %arg2: i32) -> (i32, i32) {
    %c0_i32 = arith.constant 0 : i32
    %c0_i32_0 = arith.constant 0 : i32
    return %c0_i32, %arg1 : i32, i32
  }
  func.func @transform_3(%arg0: i32, %arg1: i32, %arg2: i32) -> (i32, i32) {
    %c0_i32 = arith.constant 0 : i32
    %c0_i32_0 = arith.constant 0 : i32
    return %c0_i32, %arg1 : i32, i32
  }
  func.func @transform_4(%arg0: i32, %arg1: i32, %arg2: i32) -> (i32, i32) {
    %c0_i32 = arith.constant 0 : i32
    return %arg0, %arg1 : i32, i32
  }
}

module attributes {stable_mosaic.version = 11 : i64} {
  func.func @kernel(%arg0: i32, %arg1: i32, %arg2: i32, %arg3: memref<16x384xbf16, #tpu.memory_space<vmem>>, %arg4: memref<384x128xbf16, #tpu.memory_space<vmem>>, %arg5: memref<1x128xf32, #tpu.memory_space<vmem>>, %arg6: memref<1x128xf32, #tpu.memory_space<vmem>>, %arg7: memref<16x128xbf16, #tpu.memory_space<vmem>>, %arg8: memref<16x128xf32, #tpu.memory_space<vmem>>) attributes {dimension_semantics = [#tpu.dimension_semantics<parallel>, #tpu.dimension_semantics<parallel>, #tpu.dimension_semantics<arbitrary>], iteration_bounds = array<i64: 2, 1, 1>, scalar_prefetch = 0 : i64, scratch_operands = 1 : i64, tpu.core_type = #tpu.core_type<tc>, window_params = [{transform_indices = @transform_0, window_bounds = array<i64: 16, 384>}, {transform_indices = @transform_1, window_bounds = array<i64: 384, 128>}, {transform_indices = @transform_2, window_bounds = array<i64: 1, 128>}, {transform_indices = @transform_3, window_bounds = array<i64: 1, 128>}, {transform_indices = @transform_4, window_bounds = array<i64: 16, 128>}]} {
    %c0_i32 = arith.constant 0 : i32
    %0 = arith.cmpi eq, %arg2, %c0_i32 : i32
    %1 = arith.extui %0 : i1 to i32
    %c0_i32_0 = arith.constant 0 : i32
    %2 = arith.cmpi ne, %1, %c0_i32_0 : i32
    scf.if %2 {
      %cst_10 = arith.constant 0.000000e+00 : f32
      %12 = vector.broadcast %cst_10 : f32 to vector<16x128xf32>
      %c0_11 = arith.constant 0 : index
      %c0_12 = arith.constant 0 : index
      %13 = vector.load %arg8[%c0_11, %c0_12] : memref<16x128xf32, #tpu.memory_space<vmem>>, vector<16x128xf32>
      tpu.vector_store %arg8[%c0_11, %c0_12], %12 {strides = array<i32>} : memref<16x128xf32, #tpu.memory_space<vmem>>, vector<16x128xf32>,
    } else {
    }
    %c0 = arith.constant 0 : index
    %c0_1 = arith.constant 0 : index
    %3 = vector.load %arg8[%c0, %c0_1] : memref<16x128xf32, #tpu.memory_space<vmem>>, vector<16x128xf32>
    %c0_2 = arith.constant 0 : index
    %c0_3 = arith.constant 0 : index
    %4 = vector.load %arg3[%c0_2, %c0_3] : memref<16x384xbf16, #tpu.memory_space<vmem>>, vector<16x384xbf16>
    %c0_4 = arith.constant 0 : index
    %c0_5 = arith.constant 0 : index
    %5 = vector.load %arg4[%c0_4, %c0_5] : memref<384x128xbf16, #tpu.memory_space<vmem>>, vector<384x128xbf16>
    %cst = arith.constant dense<0.000000e+00> : vector<16x128xf32>
    %6 = tpu.matmul %4, %5, %cst {dimension_numbers = #tpu.dot_dimension_numbers<[1], [0], [0], [1], [0, 0, 1, 1], [], []>} : vector<16x384xbf16>, vector<384x128xbf16>, vector<16x128xf32> -> vector<16x128xf32>
    %7 = arith.addf %3, %6 : vector<16x128xf32>
    %c0_6 = arith.constant 0 : index
    %c0_7 = arith.constant 0 : index
    %8 = vector.load %arg8[%c0_6, %c0_7] : memref<16x128xf32, #tpu.memory_space<vmem>>, vector<16x128xf32>
    tpu.vector_store %arg8[%c0_6, %c0_7], %7 {strides = array<i32>} : memref<16x128xf32, #tpu.memory_space<vmem>>, vector<16x128xf32>,
    %c0_i32_8 = arith.constant 0 : i32
    %9 = arith.cmpi eq, %arg2, %c0_i32_8 : i32
    %10 = arith.extui %9 : i1 to i32
    %c0_i32_9 = arith.constant 0 : i32
    %11 = arith.cmpi ne, %10, %c0_i32_9 : i32
    scf.if %11 {
      %c0_10 = arith.constant 0 : index
      %c0_11 = arith.constant 0 : index
      %12 = vector.load %arg8[%c0_10, %c0_11] : memref<16x128xf32, #tpu.memory_space<vmem>>, vector<16x128xf32>
      %c0_12 = arith.constant 0 : index
      %c0_13 = arith.constant 0 : index
      %13 = vector.load %arg5[%c0_12, %c0_13] : memref<1x128xf32, #tpu.memory_space<vmem>>, vector<1x128xf32>
      %14 = vector.broadcast %13 : vector<1x128xf32> to vector<16x128xf32>
      %15 = arith.mulf %12, %14 : vector<16x128xf32>
      %c0_14 = arith.constant 0 : index
      %c0_15 = arith.constant 0 : index
      %16 = vector.load %arg6[%c0_14, %c0_15] : memref<1x128xf32, #tpu.memory_space<vmem>>, vector<1x128xf32>
      %17 = vector.broadcast %16 : vector<1x128xf32> to vector<16x128xf32>
      %18 = arith.addf %15, %17 : vector<16x128xf32>
      %19 = arith.truncf %18 : vector<16x128xf32> to vector<16x128xbf16>
      %c0_16 = arith.constant 0 : index
      %c0_17 = arith.constant 0 : index
      %20 = vector.load %arg7[%c0_16, %c0_17] : memref<16x128xbf16, #tpu.memory_space<vmem>>, vector<16x128xbf16>
      tpu.vector_store %arg7[%c0_16, %c0_17], %19 {strides = array<i32>} : memref<16x128xbf16, #tpu.memory_space<vmem>>, vector<16x128xbf16>,
    } else {
    }
    return
  }
  func.func @transform_0(%arg0: i32, %arg1: i32, %arg2: i32) -> (i32, i32) {
    %c0_i32 = arith.constant 0 : i32
    return %arg0, %arg2 : i32, i32
  }
  func.func @transform_1(%arg0: i32, %arg1: i32, %arg2: i32) -> (i32, i32) {
    %c0_i32 = arith.constant 0 : i32
    return %arg2, %arg1 : i32, i32
  }
  func.func @transform_2(%arg0: i32, %arg1: i32, %arg2: i32) -> (i32, i32) {
    %c0_i32 = arith.constant 0 : i32
    %c0_i32_0 = arith.constant 0 : i32
    return %c0_i32, %arg1 : i32, i32
  }
  func.func @transform_3(%arg0: i32, %arg1: i32, %arg2: i32) -> (i32, i32) {
    %c0_i32 = arith.constant 0 : i32
    %c0_i32_0 = arith.constant 0 : i32
    return %c0_i32, %arg1 : i32, i32
  }
  func.func @transform_4(%arg0: i32, %arg1: i32, %arg2: i32) -> (i32, i32) {
    %c0_i32 = arith.constant 0 : i32
    return %arg0, %arg1 : i32, i32
  }
}

module attributes {stable_mosaic.version = 11 : i64} {
  func.func @kernel(%arg0: i32, %arg1: i32, %arg2: i32, %arg3: memref<16x1152xbf16, #tpu.memory_space<vmem>>, %arg4: memref<1152x128xbf16, #tpu.memory_space<vmem>>, %arg5: memref<1x128xf32, #tpu.memory_space<vmem>>, %arg6: memref<1x128xf32, #tpu.memory_space<vmem>>, %arg7: memref<16x128xbf16, #tpu.memory_space<vmem>>, %arg8: memref<16x128xbf16, #tpu.memory_space<vmem>>, %arg9: memref<16x128xf32, #tpu.memory_space<vmem>>) attributes {dimension_semantics = [#tpu.dimension_semantics<parallel>, #tpu.dimension_semantics<parallel>, #tpu.dimension_semantics<arbitrary>], iteration_bounds = array<i64: 2, 1, 1>, scalar_prefetch = 0 : i64, scratch_operands = 1 : i64, tpu.core_type = #tpu.core_type<tc>, window_params = [{transform_indices = @transform_0, window_bounds = array<i64: 16, 1152>}, {transform_indices = @transform_1, window_bounds = array<i64: 1152, 128>}, {transform_indices = @transform_2, window_bounds = array<i64: 1, 128>}, {transform_indices = @transform_3, window_bounds = array<i64: 1, 128>}, {transform_indices = @transform_4, window_bounds = array<i64: 16, 128>}, {transform_indices = @transform_5, window_bounds = array<i64: 16, 128>}]} {
    %c0_i32 = arith.constant 0 : i32
    %0 = arith.cmpi eq, %arg2, %c0_i32 : i32
    %1 = arith.extui %0 : i1 to i32
    %c0_i32_0 = arith.constant 0 : i32
    %2 = arith.cmpi ne, %1, %c0_i32_0 : i32
    scf.if %2 {
      %cst_10 = arith.constant 0.000000e+00 : f32
      %12 = vector.broadcast %cst_10 : f32 to vector<16x128xf32>
      %c0_11 = arith.constant 0 : index
      %c0_12 = arith.constant 0 : index
      %13 = vector.load %arg9[%c0_11, %c0_12] : memref<16x128xf32, #tpu.memory_space<vmem>>, vector<16x128xf32>
      tpu.vector_store %arg9[%c0_11, %c0_12], %12 {strides = array<i32>} : memref<16x128xf32, #tpu.memory_space<vmem>>, vector<16x128xf32>,
    } else {
    }
    %c0 = arith.constant 0 : index
    %c0_1 = arith.constant 0 : index
    %3 = vector.load %arg9[%c0, %c0_1] : memref<16x128xf32, #tpu.memory_space<vmem>>, vector<16x128xf32>
    %c0_2 = arith.constant 0 : index
    %c0_3 = arith.constant 0 : index
    %4 = vector.load %arg3[%c0_2, %c0_3] : memref<16x1152xbf16, #tpu.memory_space<vmem>>, vector<16x1152xbf16>
    %c0_4 = arith.constant 0 : index
    %c0_5 = arith.constant 0 : index
    %5 = vector.load %arg4[%c0_4, %c0_5] : memref<1152x128xbf16, #tpu.memory_space<vmem>>, vector<1152x128xbf16>
    %cst = arith.constant dense<0.000000e+00> : vector<16x128xf32>
    %6 = tpu.matmul %4, %5, %cst {dimension_numbers = #tpu.dot_dimension_numbers<[1], [0], [0], [1], [0, 0, 1, 1], [], []>} : vector<16x1152xbf16>, vector<1152x128xbf16>, vector<16x128xf32> -> vector<16x128xf32>
    %7 = arith.addf %3, %6 : vector<16x128xf32>
    %c0_6 = arith.constant 0 : index
    %c0_7 = arith.constant 0 : index
    %8 = vector.load %arg9[%c0_6, %c0_7] : memref<16x128xf32, #tpu.memory_space<vmem>>, vector<16x128xf32>
    tpu.vector_store %arg9[%c0_6, %c0_7], %7 {strides = array<i32>} : memref<16x128xf32, #tpu.memory_space<vmem>>, vector<16x128xf32>,
    %c0_i32_8 = arith.constant 0 : i32
    %9 = arith.cmpi eq, %arg2, %c0_i32_8 : i32
    %10 = arith.extui %9 : i1 to i32
    %c0_i32_9 = arith.constant 0 : i32
    %11 = arith.cmpi ne, %10, %c0_i32_9 : i32
    scf.if %11 {
      %c0_10 = arith.constant 0 : index
      %c0_11 = arith.constant 0 : index
      %12 = vector.load %arg9[%c0_10, %c0_11] : memref<16x128xf32, #tpu.memory_space<vmem>>, vector<16x128xf32>
      %c0_12 = arith.constant 0 : index
      %c0_13 = arith.constant 0 : index
      %13 = vector.load %arg5[%c0_12, %c0_13] : memref<1x128xf32, #tpu.memory_space<vmem>>, vector<1x128xf32>
      %14 = vector.broadcast %13 : vector<1x128xf32> to vector<16x128xf32>
      %15 = arith.mulf %12, %14 : vector<16x128xf32>
      %c0_14 = arith.constant 0 : index
      %c0_15 = arith.constant 0 : index
      %16 = vector.load %arg6[%c0_14, %c0_15] : memref<1x128xf32, #tpu.memory_space<vmem>>, vector<1x128xf32>
      %17 = vector.broadcast %16 : vector<1x128xf32> to vector<16x128xf32>
      %18 = arith.addf %15, %17 : vector<16x128xf32>
      %c0_16 = arith.constant 0 : index
      %c0_17 = arith.constant 0 : index
      %19 = vector.load %arg7[%c0_16, %c0_17] : memref<16x128xbf16, #tpu.memory_space<vmem>>, vector<16x128xbf16>
      %20 = arith.extf %19 : vector<16x128xbf16> to vector<16x128xf32>
      %21 = arith.addf %18, %20 : vector<16x128xf32>
      %cst_18 = arith.constant 0.000000e+00 : f32
      %22 = vector.broadcast %cst_18 : f32 to vector<16x128xf32>
      %23 = arith.maximumf %21, %22 : vector<16x128xf32>
      %24 = arith.truncf %23 : vector<16x128xf32> to vector<16x128xbf16>
      %c0_19 = arith.constant 0 : index
      %c0_20 = arith.constant 0 : index
      %25 = vector.load %arg8[%c0_19, %c0_20] : memref<16x128xbf16, #tpu.memory_space<vmem>>, vector<16x128xbf16>
      tpu.vector_store %arg8[%c0_19, %c0_20], %24 {strides = array<i32>} : memref<16x128xbf16, #tpu.memory_space<vmem>>, vector<16x128xbf16>,
    } else {
    }
    return
  }
  func.func @transform_0(%arg0: i32, %arg1: i32, %arg2: i32) -> (i32, i32) {
    %c0_i32 = arith.constant 0 : i32
    return %arg0, %arg2 : i32, i32
  }
  func.func @transform_1(%arg0: i32, %arg1: i32, %arg2: i32) -> (i32, i32) {
    %c0_i32 = arith.constant 0 : i32
    return %arg2, %arg1 : i32, i32
  }
  func.func @transform_2(%arg0: i32, %arg1: i32, %arg2: i32) -> (i32, i32) {
    %c0_i32 = arith.constant 0 : i32
    %c0_i32_0 = arith.constant 0 : i32
    return %c0_i32, %arg1 : i32, i32
  }
  func.func @transform_3(%arg0: i32, %arg1: i32, %arg2: i32) -> (i32, i32) {
    %c0_i32 = arith.constant 0 : i32
    %c0_i32_0 = arith.constant 0 : i32
    return %c0_i32, %arg1 : i32, i32
  }
  func.func @transform_4(%arg0: i32, %arg1: i32, %arg2: i32) -> (i32, i32) {
    %c0_i32 = arith.constant 0 : i32
    return %arg0, %arg1 : i32, i32
  }
  func.func @transform_5(%arg0: i32, %arg1: i32, %arg2: i32) -> (i32, i32) {
    %c0_i32 = arith.constant 0 : i32
    return %arg0, %arg1 : i32, i32
  }
}

module attributes {stable_mosaic.version = 11 : i64} {
  func.func @kernel(%arg0: i32, %arg1: i32, %arg2: i32, %arg3: memref<16x640xbf16, #tpu.memory_space<vmem>>, %arg4: memref<640x128xbf16, #tpu.memory_space<vmem>>, %arg5: memref<1x128xf32, #tpu.memory_space<vmem>>, %arg6: memref<1x128xf32, #tpu.memory_space<vmem>>, %arg7: memref<16x128xbf16, #tpu.memory_space<vmem>>, %arg8: memref<16x128xf32, #tpu.memory_space<vmem>>) attributes {dimension_semantics = [#tpu.dimension_semantics<parallel>, #tpu.dimension_semantics<parallel>, #tpu.dimension_semantics<arbitrary>], iteration_bounds = array<i64: 2, 1, 1>, scalar_prefetch = 0 : i64, scratch_operands = 1 : i64, tpu.core_type = #tpu.core_type<tc>, window_params = [{transform_indices = @transform_0, window_bounds = array<i64: 16, 640>}, {transform_indices = @transform_1, window_bounds = array<i64: 640, 128>}, {transform_indices = @transform_2, window_bounds = array<i64: 1, 128>}, {transform_indices = @transform_3, window_bounds = array<i64: 1, 128>}, {transform_indices = @transform_4, window_bounds = array<i64: 16, 128>}]} {
    %c0_i32 = arith.constant 0 : i32
    %0 = arith.cmpi eq, %arg2, %c0_i32 : i32
    %1 = arith.extui %0 : i1 to i32
    %c0_i32_0 = arith.constant 0 : i32
    %2 = arith.cmpi ne, %1, %c0_i32_0 : i32
    scf.if %2 {
      %cst_10 = arith.constant 0.000000e+00 : f32
      %12 = vector.broadcast %cst_10 : f32 to vector<16x128xf32>
      %c0_11 = arith.constant 0 : index
      %c0_12 = arith.constant 0 : index
      %13 = vector.load %arg8[%c0_11, %c0_12] : memref<16x128xf32, #tpu.memory_space<vmem>>, vector<16x128xf32>
      tpu.vector_store %arg8[%c0_11, %c0_12], %12 {strides = array<i32>} : memref<16x128xf32, #tpu.memory_space<vmem>>, vector<16x128xf32>,
    } else {
    }
    %c0 = arith.constant 0 : index
    %c0_1 = arith.constant 0 : index
    %3 = vector.load %arg8[%c0, %c0_1] : memref<16x128xf32, #tpu.memory_space<vmem>>, vector<16x128xf32>
    %c0_2 = arith.constant 0 : index
    %c0_3 = arith.constant 0 : index
    %4 = vector.load %arg3[%c0_2, %c0_3] : memref<16x640xbf16, #tpu.memory_space<vmem>>, vector<16x640xbf16>
    %c0_4 = arith.constant 0 : index
    %c0_5 = arith.constant 0 : index
    %5 = vector.load %arg4[%c0_4, %c0_5] : memref<640x128xbf16, #tpu.memory_space<vmem>>, vector<640x128xbf16>
    %cst = arith.constant dense<0.000000e+00> : vector<16x128xf32>
    %6 = tpu.matmul %4, %5, %cst {dimension_numbers = #tpu.dot_dimension_numbers<[1], [0], [0], [1], [0, 0, 1, 1], [], []>} : vector<16x640xbf16>, vector<640x128xbf16>, vector<16x128xf32> -> vector<16x128xf32>
    %7 = arith.addf %3, %6 : vector<16x128xf32>
    %c0_6 = arith.constant 0 : index
    %c0_7 = arith.constant 0 : index
    %8 = vector.load %arg8[%c0_6, %c0_7] : memref<16x128xf32, #tpu.memory_space<vmem>>, vector<16x128xf32>
    tpu.vector_store %arg8[%c0_6, %c0_7], %7 {strides = array<i32>} : memref<16x128xf32, #tpu.memory_space<vmem>>, vector<16x128xf32>,
    %c0_i32_8 = arith.constant 0 : i32
    %9 = arith.cmpi eq, %arg2, %c0_i32_8 : i32
    %10 = arith.extui %9 : i1 to i32
    %c0_i32_9 = arith.constant 0 : i32
    %11 = arith.cmpi ne, %10, %c0_i32_9 : i32
    scf.if %11 {
      %c0_10 = arith.constant 0 : index
      %c0_11 = arith.constant 0 : index
      %12 = vector.load %arg8[%c0_10, %c0_11] : memref<16x128xf32, #tpu.memory_space<vmem>>, vector<16x128xf32>
      %c0_12 = arith.constant 0 : index
      %c0_13 = arith.constant 0 : index
      %13 = vector.load %arg5[%c0_12, %c0_13] : memref<1x128xf32, #tpu.memory_space<vmem>>, vector<1x128xf32>
      %14 = vector.broadcast %13 : vector<1x128xf32> to vector<16x128xf32>
      %15 = arith.mulf %12, %14 : vector<16x128xf32>
      %c0_14 = arith.constant 0 : index
      %c0_15 = arith.constant 0 : index
      %16 = vector.load %arg6[%c0_14, %c0_15] : memref<1x128xf32, #tpu.memory_space<vmem>>, vector<1x128xf32>
      %17 = vector.broadcast %16 : vector<1x128xf32> to vector<16x128xf32>
      %18 = arith.addf %15, %17 : vector<16x128xf32>
      %19 = arith.truncf %18 : vector<16x128xf32> to vector<16x128xbf16>
      %c0_16 = arith.constant 0 : index
      %c0_17 = arith.constant 0 : index
      %20 = vector.load %arg7[%c0_16, %c0_17] : memref<16x128xbf16, #tpu.memory_space<vmem>>, vector<16x128xbf16>
      tpu.vector_store %arg7[%c0_16, %c0_17], %19 {strides = array<i32>} : memref<16x128xbf16, #tpu.memory_space<vmem>>, vector<16x128xbf16>,
    } else {
    }
    return
  }
  func.func @transform_0(%arg0: i32, %arg1: i32, %arg2: i32) -> (i32, i32) {
    %c0_i32 = arith.constant 0 : i32
    return %arg0, %arg2 : i32, i32
  }
  func.func @transform_1(%arg0: i32, %arg1: i32, %arg2: i32) -> (i32, i32) {
    %c0_i32 = arith.constant 0 : i32
    return %arg2, %arg1 : i32, i32
  }
  func.func @transform_2(%arg0: i32, %arg1: i32, %arg2: i32) -> (i32, i32) {
    %c0_i32 = arith.constant 0 : i32
    %c0_i32_0 = arith.constant 0 : i32
    return %c0_i32, %arg1 : i32, i32
  }
  func.func @transform_3(%arg0: i32, %arg1: i32, %arg2: i32) -> (i32, i32) {
    %c0_i32 = arith.constant 0 : i32
    %c0_i32_0 = arith.constant 0 : i32
    return %c0_i32, %arg1 : i32, i32
  }
  func.func @transform_4(%arg0: i32, %arg1: i32, %arg2: i32) -> (i32, i32) {
    %c0_i32 = arith.constant 0 : i32
    return %arg0, %arg1 : i32, i32
  }
}

module attributes {stable_mosaic.version = 11 : i64} {
  func.func @kernel(%arg0: i32, %arg1: i32, %arg2: i32, %arg3: memref<64x1152xbf16, #tpu.memory_space<vmem>>, %arg4: memref<1152x128xbf16, #tpu.memory_space<vmem>>, %arg5: memref<1x128xf32, #tpu.memory_space<vmem>>, %arg6: memref<1x128xf32, #tpu.memory_space<vmem>>, %arg7: memref<64x128xbf16, #tpu.memory_space<vmem>>, %arg8: memref<64x128xbf16, #tpu.memory_space<vmem>>, %arg9: memref<64x128xf32, #tpu.memory_space<vmem>>) attributes {dimension_semantics = [#tpu.dimension_semantics<parallel>, #tpu.dimension_semantics<parallel>, #tpu.dimension_semantics<arbitrary>], iteration_bounds = array<i64: 2, 1, 1>, scalar_prefetch = 0 : i64, scratch_operands = 1 : i64, tpu.core_type = #tpu.core_type<tc>, window_params = [{transform_indices = @transform_0, window_bounds = array<i64: 64, 1152>}, {transform_indices = @transform_1, window_bounds = array<i64: 1152, 128>}, {transform_indices = @transform_2, window_bounds = array<i64: 1, 128>}, {transform_indices = @transform_3, window_bounds = array<i64: 1, 128>}, {transform_indices = @transform_4, window_bounds = array<i64: 64, 128>}, {transform_indices = @transform_5, window_bounds = array<i64: 64, 128>}]} {
    %c0_i32 = arith.constant 0 : i32
    %0 = arith.cmpi eq, %arg2, %c0_i32 : i32
    %1 = arith.extui %0 : i1 to i32
    %c0_i32_0 = arith.constant 0 : i32
    %2 = arith.cmpi ne, %1, %c0_i32_0 : i32
    scf.if %2 {
      %cst_10 = arith.constant 0.000000e+00 : f32
      %12 = vector.broadcast %cst_10 : f32 to vector<64x128xf32>
      %c0_11 = arith.constant 0 : index
      %c0_12 = arith.constant 0 : index
      %13 = vector.load %arg9[%c0_11, %c0_12] : memref<64x128xf32, #tpu.memory_space<vmem>>, vector<64x128xf32>
      tpu.vector_store %arg9[%c0_11, %c0_12], %12 {strides = array<i32>} : memref<64x128xf32, #tpu.memory_space<vmem>>, vector<64x128xf32>,
    } else {
    }
    %c0 = arith.constant 0 : index
    %c0_1 = arith.constant 0 : index
    %3 = vector.load %arg9[%c0, %c0_1] : memref<64x128xf32, #tpu.memory_space<vmem>>, vector<64x128xf32>
    %c0_2 = arith.constant 0 : index
    %c0_3 = arith.constant 0 : index
    %4 = vector.load %arg3[%c0_2, %c0_3] : memref<64x1152xbf16, #tpu.memory_space<vmem>>, vector<64x1152xbf16>
    %c0_4 = arith.constant 0 : index
    %c0_5 = arith.constant 0 : index
    %5 = vector.load %arg4[%c0_4, %c0_5] : memref<1152x128xbf16, #tpu.memory_space<vmem>>, vector<1152x128xbf16>
    %cst = arith.constant dense<0.000000e+00> : vector<64x128xf32>
    %6 = tpu.matmul %4, %5, %cst {dimension_numbers = #tpu.dot_dimension_numbers<[1], [0], [0], [1], [0, 0, 1, 1], [], []>} : vector<64x1152xbf16>, vector<1152x128xbf16>, vector<64x128xf32> -> vector<64x128xf32>
    %7 = arith.addf %3, %6 : vector<64x128xf32>
    %c0_6 = arith.constant 0 : index
    %c0_7 = arith.constant 0 : index
    %8 = vector.load %arg9[%c0_6, %c0_7] : memref<64x128xf32, #tpu.memory_space<vmem>>, vector<64x128xf32>
    tpu.vector_store %arg9[%c0_6, %c0_7], %7 {strides = array<i32>} : memref<64x128xf32, #tpu.memory_space<vmem>>, vector<64x128xf32>,
    %c0_i32_8 = arith.constant 0 : i32
    %9 = arith.cmpi eq, %arg2, %c0_i32_8 : i32
    %10 = arith.extui %9 : i1 to i32
    %c0_i32_9 = arith.constant 0 : i32
    %11 = arith.cmpi ne, %10, %c0_i32_9 : i32
    scf.if %11 {
      %c0_10 = arith.constant 0 : index
      %c0_11 = arith.constant 0 : index
      %12 = vector.load %arg9[%c0_10, %c0_11] : memref<64x128xf32, #tpu.memory_space<vmem>>, vector<64x128xf32>
      %c0_12 = arith.constant 0 : index
      %c0_13 = arith.constant 0 : index
      %13 = vector.load %arg5[%c0_12, %c0_13] : memref<1x128xf32, #tpu.memory_space<vmem>>, vector<1x128xf32>
      %14 = vector.broadcast %13 : vector<1x128xf32> to vector<64x128xf32>
      %15 = arith.mulf %12, %14 : vector<64x128xf32>
      %c0_14 = arith.constant 0 : index
      %c0_15 = arith.constant 0 : index
      %16 = vector.load %arg6[%c0_14, %c0_15] : memref<1x128xf32, #tpu.memory_space<vmem>>, vector<1x128xf32>
      %17 = vector.broadcast %16 : vector<1x128xf32> to vector<64x128xf32>
      %18 = arith.addf %15, %17 : vector<64x128xf32>
      %c0_16 = arith.constant 0 : index
      %c0_17 = arith.constant 0 : index
      %19 = vector.load %arg7[%c0_16, %c0_17] : memref<64x128xbf16, #tpu.memory_space<vmem>>, vector<64x128xbf16>
      %20 = arith.extf %19 : vector<64x128xbf16> to vector<64x128xf32>
      %21 = arith.addf %18, %20 : vector<64x128xf32>
      %cst_18 = arith.constant 0.000000e+00 : f32
      %22 = vector.broadcast %cst_18 : f32 to vector<64x128xf32>
      %23 = arith.maximumf %21, %22 : vector<64x128xf32>
      %24 = arith.truncf %23 : vector<64x128xf32> to vector<64x128xbf16>
      %c0_19 = arith.constant 0 : index
      %c0_20 = arith.constant 0 : index
      %25 = vector.load %arg8[%c0_19, %c0_20] : memref<64x128xbf16, #tpu.memory_space<vmem>>, vector<64x128xbf16>
      tpu.vector_store %arg8[%c0_19, %c0_20], %24 {strides = array<i32>} : memref<64x128xbf16, #tpu.memory_space<vmem>>, vector<64x128xbf16>,
    } else {
    }
    return
  }
  func.func @transform_0(%arg0: i32, %arg1: i32, %arg2: i32) -> (i32, i32) {
    %c0_i32 = arith.constant 0 : i32
    return %arg0, %arg2 : i32, i32
  }
  func.func @transform_1(%arg0: i32, %arg1: i32, %arg2: i32) -> (i32, i32) {
    %c0_i32 = arith.constant 0 : i32
    return %arg2, %arg1 : i32, i32
  }
  func.func @transform_2(%arg0: i32, %arg1: i32, %arg2: i32) -> (i32, i32) {
    %c0_i32 = arith.constant 0 : i32
    %c0_i32_0 = arith.constant 0 : i32
    return %c0_i32, %arg1 : i32, i32
  }
  func.func @transform_3(%arg0: i32, %arg1: i32, %arg2: i32) -> (i32, i32) {
    %c0_i32 = arith.constant 0 : i32
    %c0_i32_0 = arith.constant 0 : i32
    return %c0_i32, %arg1 : i32, i32
  }
  func.func @transform_4(%arg0: i32, %arg1: i32, %arg2: i32) -> (i32, i32) {
    %c0_i32 = arith.constant 0 : i32
    return %arg0, %arg1 : i32, i32
  }
  func.func @transform_5(%arg0: i32, %arg1: i32, %arg2: i32) -> (i32, i32) {
    %c0_i32 = arith.constant 0 : i32
    return %arg0, %arg1 : i32, i32
  }
}

module attributes {stable_mosaic.version = 11 : i64} {
  func.func @kernel(%arg0: i32, %arg1: i32, %arg2: i32, %arg3: memref<64x640xbf16, #tpu.memory_space<vmem>>, %arg4: memref<640x128xbf16, #tpu.memory_space<vmem>>, %arg5: memref<1x128xf32, #tpu.memory_space<vmem>>, %arg6: memref<1x128xf32, #tpu.memory_space<vmem>>, %arg7: memref<64x128xbf16, #tpu.memory_space<vmem>>, %arg8: memref<64x128xf32, #tpu.memory_space<vmem>>) attributes {dimension_semantics = [#tpu.dimension_semantics<parallel>, #tpu.dimension_semantics<parallel>, #tpu.dimension_semantics<arbitrary>], iteration_bounds = array<i64: 2, 1, 1>, scalar_prefetch = 0 : i64, scratch_operands = 1 : i64, tpu.core_type = #tpu.core_type<tc>, window_params = [{transform_indices = @transform_0, window_bounds = array<i64: 64, 640>}, {transform_indices = @transform_1, window_bounds = array<i64: 640, 128>}, {transform_indices = @transform_2, window_bounds = array<i64: 1, 128>}, {transform_indices = @transform_3, window_bounds = array<i64: 1, 128>}, {transform_indices = @transform_4, window_bounds = array<i64: 64, 128>}]} {
    %c0_i32 = arith.constant 0 : i32
    %0 = arith.cmpi eq, %arg2, %c0_i32 : i32
    %1 = arith.extui %0 : i1 to i32
    %c0_i32_0 = arith.constant 0 : i32
    %2 = arith.cmpi ne, %1, %c0_i32_0 : i32
    scf.if %2 {
      %cst_10 = arith.constant 0.000000e+00 : f32
      %12 = vector.broadcast %cst_10 : f32 to vector<64x128xf32>
      %c0_11 = arith.constant 0 : index
      %c0_12 = arith.constant 0 : index
      %13 = vector.load %arg8[%c0_11, %c0_12] : memref<64x128xf32, #tpu.memory_space<vmem>>, vector<64x128xf32>
      tpu.vector_store %arg8[%c0_11, %c0_12], %12 {strides = array<i32>} : memref<64x128xf32, #tpu.memory_space<vmem>>, vector<64x128xf32>,
    } else {
    }
    %c0 = arith.constant 0 : index
    %c0_1 = arith.constant 0 : index
    %3 = vector.load %arg8[%c0, %c0_1] : memref<64x128xf32, #tpu.memory_space<vmem>>, vector<64x128xf32>
    %c0_2 = arith.constant 0 : index
    %c0_3 = arith.constant 0 : index
    %4 = vector.load %arg3[%c0_2, %c0_3] : memref<64x640xbf16, #tpu.memory_space<vmem>>, vector<64x640xbf16>
    %c0_4 = arith.constant 0 : index
    %c0_5 = arith.constant 0 : index
    %5 = vector.load %arg4[%c0_4, %c0_5] : memref<640x128xbf16, #tpu.memory_space<vmem>>, vector<640x128xbf16>
    %cst = arith.constant dense<0.000000e+00> : vector<64x128xf32>
    %6 = tpu.matmul %4, %5, %cst {dimension_numbers = #tpu.dot_dimension_numbers<[1], [0], [0], [1], [0, 0, 1, 1], [], []>} : vector<64x640xbf16>, vector<640x128xbf16>, vector<64x128xf32> -> vector<64x128xf32>
    %7 = arith.addf %3, %6 : vector<64x128xf32>
    %c0_6 = arith.constant 0 : index
    %c0_7 = arith.constant 0 : index
    %8 = vector.load %arg8[%c0_6, %c0_7] : memref<64x128xf32, #tpu.memory_space<vmem>>, vector<64x128xf32>
    tpu.vector_store %arg8[%c0_6, %c0_7], %7 {strides = array<i32>} : memref<64x128xf32, #tpu.memory_space<vmem>>, vector<64x128xf32>,
    %c0_i32_8 = arith.constant 0 : i32
    %9 = arith.cmpi eq, %arg2, %c0_i32_8 : i32
    %10 = arith.extui %9 : i1 to i32
    %c0_i32_9 = arith.constant 0 : i32
    %11 = arith.cmpi ne, %10, %c0_i32_9 : i32
    scf.if %11 {
      %c0_10 = arith.constant 0 : index
      %c0_11 = arith.constant 0 : index
      %12 = vector.load %arg8[%c0_10, %c0_11] : memref<64x128xf32, #tpu.memory_space<vmem>>, vector<64x128xf32>
      %c0_12 = arith.constant 0 : index
      %c0_13 = arith.constant 0 : index
      %13 = vector.load %arg5[%c0_12, %c0_13] : memref<1x128xf32, #tpu.memory_space<vmem>>, vector<1x128xf32>
      %14 = vector.broadcast %13 : vector<1x128xf32> to vector<64x128xf32>
      %15 = arith.mulf %12, %14 : vector<64x128xf32>
      %c0_14 = arith.constant 0 : index
      %c0_15 = arith.constant 0 : index
      %16 = vector.load %arg6[%c0_14, %c0_15] : memref<1x128xf32, #tpu.memory_space<vmem>>, vector<1x128xf32>
      %17 = vector.broadcast %16 : vector<1x128xf32> to vector<64x128xf32>
      %18 = arith.addf %15, %17 : vector<64x128xf32>
      %19 = arith.truncf %18 : vector<64x128xf32> to vector<64x128xbf16>
      %c0_16 = arith.constant 0 : index
      %c0_17 = arith.constant 0 : index
      %20 = vector.load %arg7[%c0_16, %c0_17] : memref<64x128xbf16, #tpu.memory_space<vmem>>, vector<64x128xbf16>
      tpu.vector_store %arg7[%c0_16, %c0_17], %19 {strides = array<i32>} : memref<64x128xbf16, #tpu.memory_space<vmem>>, vector<64x128xbf16>,
    } else {
    }
    return
  }
  func.func @transform_0(%arg0: i32, %arg1: i32, %arg2: i32) -> (i32, i32) {
    %c0_i32 = arith.constant 0 : i32
    return %arg0, %arg2 : i32, i32
  }
  func.func @transform_1(%arg0: i32, %arg1: i32, %arg2: i32) -> (i32, i32) {
    %c0_i32 = arith.constant 0 : i32
    return %arg2, %arg1 : i32, i32
  }
  func.func @transform_2(%arg0: i32, %arg1: i32, %arg2: i32) -> (i32, i32) {
    %c0_i32 = arith.constant 0 : i32
    %c0_i32_0 = arith.constant 0 : i32
    return %c0_i32, %arg1 : i32, i32
  }
  func.func @transform_3(%arg0: i32, %arg1: i32, %arg2: i32) -> (i32, i32) {
    %c0_i32 = arith.constant 0 : i32
    %c0_i32_0 = arith.constant 0 : i32
    return %c0_i32, %arg1 : i32, i32
  }
  func.func @transform_4(%arg0: i32, %arg1: i32, %arg2: i32) -> (i32, i32) {
    %c0_i32 = arith.constant 0 : i32
    return %arg0, %arg1 : i32, i32
  }
}

module attributes {stable_mosaic.version = 11 : i64} {
  func.func @kernel(%arg0: i32, %arg1: i32, %arg2: i32, %arg3: memref<64x384xbf16, #tpu.memory_space<vmem>>, %arg4: memref<384x128xbf16, #tpu.memory_space<vmem>>, %arg5: memref<1x128xf32, #tpu.memory_space<vmem>>, %arg6: memref<1x128xf32, #tpu.memory_space<vmem>>, %arg7: memref<64x128xbf16, #tpu.memory_space<vmem>>, %arg8: memref<64x128xbf16, #tpu.memory_space<vmem>>, %arg9: memref<64x128xbf16, #tpu.memory_space<vmem>>, %arg10: memref<64x128xf32, #tpu.memory_space<vmem>>) attributes {dimension_semantics = [#tpu.dimension_semantics<parallel>, #tpu.dimension_semantics<parallel>, #tpu.dimension_semantics<arbitrary>], iteration_bounds = array<i64: 2, 1, 1>, scalar_prefetch = 0 : i64, scratch_operands = 1 : i64, tpu.core_type = #tpu.core_type<tc>, window_params = [{transform_indices = @transform_0, window_bounds = array<i64: 64, 384>}, {transform_indices = @transform_1, window_bounds = array<i64: 384, 128>}, {transform_indices = @transform_2, window_bounds = array<i64: 1, 128>}, {transform_indices = @transform_3, window_bounds = array<i64: 1, 128>}, {transform_indices = @transform_4, window_bounds = array<i64: 64, 128>}, {transform_indices = @transform_5, window_bounds = array<i64: 64, 128>}, {transform_indices = @transform_6, window_bounds = array<i64: 64, 128>}]} {
    %c0_i32 = arith.constant 0 : i32
    %0 = arith.cmpi eq, %arg2, %c0_i32 : i32
    %1 = arith.extui %0 : i1 to i32
    %c0_i32_0 = arith.constant 0 : i32
    %2 = arith.cmpi ne, %1, %c0_i32_0 : i32
    scf.if %2 {
      %cst_10 = arith.constant 0.000000e+00 : f32
      %12 = vector.broadcast %cst_10 : f32 to vector<64x128xf32>
      %c0_11 = arith.constant 0 : index
      %c0_12 = arith.constant 0 : index
      %13 = vector.load %arg10[%c0_11, %c0_12] : memref<64x128xf32, #tpu.memory_space<vmem>>, vector<64x128xf32>
      tpu.vector_store %arg10[%c0_11, %c0_12], %12 {strides = array<i32>} : memref<64x128xf32, #tpu.memory_space<vmem>>, vector<64x128xf32>,
    } else {
    }
    %c0 = arith.constant 0 : index
    %c0_1 = arith.constant 0 : index
    %3 = vector.load %arg10[%c0, %c0_1] : memref<64x128xf32, #tpu.memory_space<vmem>>, vector<64x128xf32>
    %c0_2 = arith.constant 0 : index
    %c0_3 = arith.constant 0 : index
    %4 = vector.load %arg3[%c0_2, %c0_3] : memref<64x384xbf16, #tpu.memory_space<vmem>>, vector<64x384xbf16>
    %c0_4 = arith.constant 0 : index
    %c0_5 = arith.constant 0 : index
    %5 = vector.load %arg4[%c0_4, %c0_5] : memref<384x128xbf16, #tpu.memory_space<vmem>>, vector<384x128xbf16>
    %cst = arith.constant dense<0.000000e+00> : vector<64x128xf32>
    %6 = tpu.matmul %4, %5, %cst {dimension_numbers = #tpu.dot_dimension_numbers<[1], [0], [0], [1], [0, 0, 1, 1], [], []>} : vector<64x384xbf16>, vector<384x128xbf16>, vector<64x128xf32> -> vector<64x128xf32>
    %7 = arith.addf %3, %6 : vector<64x128xf32>
    %c0_6 = arith.constant 0 : index
    %c0_7 = arith.constant 0 : index
    %8 = vector.load %arg10[%c0_6, %c0_7] : memref<64x128xf32, #tpu.memory_space<vmem>>, vector<64x128xf32>
    tpu.vector_store %arg10[%c0_6, %c0_7], %7 {strides = array<i32>} : memref<64x128xf32, #tpu.memory_space<vmem>>, vector<64x128xf32>,
    %c0_i32_8 = arith.constant 0 : i32
    %9 = arith.cmpi eq, %arg2, %c0_i32_8 : i32
    %10 = arith.extui %9 : i1 to i32
    %c0_i32_9 = arith.constant 0 : i32
    %11 = arith.cmpi ne, %10, %c0_i32_9 : i32
    scf.if %11 {
      %c0_10 = arith.constant 0 : index
      %c0_11 = arith.constant 0 : index
      %12 = vector.load %arg10[%c0_10, %c0_11] : memref<64x128xf32, #tpu.memory_space<vmem>>, vector<64x128xf32>
      %c0_12 = arith.constant 0 : index
      %c0_13 = arith.constant 0 : index
      %13 = vector.load %arg5[%c0_12, %c0_13] : memref<1x128xf32, #tpu.memory_space<vmem>>, vector<1x128xf32>
      %14 = vector.broadcast %13 : vector<1x128xf32> to vector<64x128xf32>
      %15 = arith.mulf %12, %14 : vector<64x128xf32>
      %c0_14 = arith.constant 0 : index
      %c0_15 = arith.constant 0 : index
      %16 = vector.load %arg6[%c0_14, %c0_15] : memref<1x128xf32, #tpu.memory_space<vmem>>, vector<1x128xf32>
      %17 = vector.broadcast %16 : vector<1x128xf32> to vector<64x128xf32>
      %18 = arith.addf %15, %17 : vector<64x128xf32>
      %c0_16 = arith.constant 0 : index
      %c0_17 = arith.constant 0 : index
      %19 = vector.load %arg7[%c0_16, %c0_17] : memref<64x128xbf16, #tpu.memory_space<vmem>>, vector<64x128xbf16>
      %20 = arith.extf %19 : vector<64x128xbf16> to vector<64x128xf32>
      %21 = arith.mulf %18, %20 : vector<64x128xf32>
      %c0_18 = arith.constant 0 : index
      %c0_19 = arith.constant 0 : index
      %22 = vector.load %arg8[%c0_18, %c0_19] : memref<64x128xbf16, #tpu.memory_space<vmem>>, vector<64x128xbf16>
      %23 = arith.extf %22 : vector<64x128xbf16> to vector<64x128xf32>
      %24 = arith.mulf %21, %23 : vector<64x128xf32>
      %25 = arith.truncf %24 : vector<64x128xf32> to vector<64x128xbf16>
      %c0_20 = arith.constant 0 : index
      %c0_21 = arith.constant 0 : index
      %26 = vector.load %arg9[%c0_20, %c0_21] : memref<64x128xbf16, #tpu.memory_space<vmem>>, vector<64x128xbf16>
      tpu.vector_store %arg9[%c0_20, %c0_21], %25 {strides = array<i32>} : memref<64x128xbf16, #tpu.memory_space<vmem>>, vector<64x128xbf16>,
    } else {
    }
    return
  }
  func.func @transform_0(%arg0: i32, %arg1: i32, %arg2: i32) -> (i32, i32) {
    %c0_i32 = arith.constant 0 : i32
    return %arg0, %arg2 : i32, i32
  }
  func.func @transform_1(%arg0: i32, %arg1: i32, %arg2: i32) -> (i32, i32) {
    %c0_i32 = arith.constant 0 : i32
    return %arg2, %arg1 : i32, i32
  }
  func.func @transform_2(%arg0: i32, %arg1: i32, %arg2: i32) -> (i32, i32) {
    %c0_i32 = arith.constant 0 : i32
    %c0_i32_0 = arith.constant 0 : i32
    return %c0_i32, %arg1 : i32, i32
  }
  func.func @transform_3(%arg0: i32, %arg1: i32, %arg2: i32) -> (i32, i32) {
    %c0_i32 = arith.constant 0 : i32
    %c0_i32_0 = arith.constant 0 : i32
    return %c0_i32, %arg1 : i32, i32
  }
  func.func @transform_4(%arg0: i32, %arg1: i32, %arg2: i32) -> (i32, i32) {
    %c0_i32 = arith.constant 0 : i32
    return %arg0, %arg1 : i32, i32
  }
  func.func @transform_5(%arg0: i32, %arg1: i32, %arg2: i32) -> (i32, i32) {
    %c0_i32 = arith.constant 0 : i32
    return %arg0, %arg1 : i32, i32
  }
  func.func @transform_6(%arg0: i32, %arg1: i32, %arg2: i32) -> (i32, i32) {
    %c0_i32 = arith.constant 0 : i32
    return %arg0, %arg1 : i32, i32
  }
}

module attributes {stable_mosaic.version = 11 : i64} {
  func.func @kernel(%arg0: i32, %arg1: i32, %arg2: i32, %arg3: memref<64x896xbf16, #tpu.memory_space<vmem>>, %arg4: memref<896x128xbf16, #tpu.memory_space<vmem>>, %arg5: memref<1x128xf32, #tpu.memory_space<vmem>>, %arg6: memref<1x128xf32, #tpu.memory_space<vmem>>, %arg7: memref<64x128xbf16, #tpu.memory_space<vmem>>, %arg8: memref<64x128xf32, #tpu.memory_space<vmem>>) attributes {dimension_semantics = [#tpu.dimension_semantics<parallel>, #tpu.dimension_semantics<parallel>, #tpu.dimension_semantics<arbitrary>], iteration_bounds = array<i64: 2, 1, 1>, scalar_prefetch = 0 : i64, scratch_operands = 1 : i64, tpu.core_type = #tpu.core_type<tc>, window_params = [{transform_indices = @transform_0, window_bounds = array<i64: 64, 896>}, {transform_indices = @transform_1, window_bounds = array<i64: 896, 128>}, {transform_indices = @transform_2, window_bounds = array<i64: 1, 128>}, {transform_indices = @transform_3, window_bounds = array<i64: 1, 128>}, {transform_indices = @transform_4, window_bounds = array<i64: 64, 128>}]} {
    %c0_i32 = arith.constant 0 : i32
    %0 = arith.cmpi eq, %arg2, %c0_i32 : i32
    %1 = arith.extui %0 : i1 to i32
    %c0_i32_0 = arith.constant 0 : i32
    %2 = arith.cmpi ne, %1, %c0_i32_0 : i32
    scf.if %2 {
      %cst_10 = arith.constant 0.000000e+00 : f32
      %12 = vector.broadcast %cst_10 : f32 to vector<64x128xf32>
      %c0_11 = arith.constant 0 : index
      %c0_12 = arith.constant 0 : index
      %13 = vector.load %arg8[%c0_11, %c0_12] : memref<64x128xf32, #tpu.memory_space<vmem>>, vector<64x128xf32>
      tpu.vector_store %arg8[%c0_11, %c0_12], %12 {strides = array<i32>} : memref<64x128xf32, #tpu.memory_space<vmem>>, vector<64x128xf32>,
    } else {
    }
    %c0 = arith.constant 0 : index
    %c0_1 = arith.constant 0 : index
    %3 = vector.load %arg8[%c0, %c0_1] : memref<64x128xf32, #tpu.memory_space<vmem>>, vector<64x128xf32>
    %c0_2 = arith.constant 0 : index
    %c0_3 = arith.constant 0 : index
    %4 = vector.load %arg3[%c0_2, %c0_3] : memref<64x896xbf16, #tpu.memory_space<vmem>>, vector<64x896xbf16>
    %c0_4 = arith.constant 0 : index
    %c0_5 = arith.constant 0 : index
    %5 = vector.load %arg4[%c0_4, %c0_5] : memref<896x128xbf16, #tpu.memory_space<vmem>>, vector<896x128xbf16>
    %cst = arith.constant dense<0.000000e+00> : vector<64x128xf32>
    %6 = tpu.matmul %4, %5, %cst {dimension_numbers = #tpu.dot_dimension_numbers<[1], [0], [0], [1], [0, 0, 1, 1], [], []>} : vector<64x896xbf16>, vector<896x128xbf16>, vector<64x128xf32> -> vector<64x128xf32>
    %7 = arith.addf %3, %6 : vector<64x128xf32>
    %c0_6 = arith.constant 0 : index
    %c0_7 = arith.constant 0 : index
    %8 = vector.load %arg8[%c0_6, %c0_7] : memref<64x128xf32, #tpu.memory_space<vmem>>, vector<64x128xf32>
    tpu.vector_store %arg8[%c0_6, %c0_7], %7 {strides = array<i32>} : memref<64x128xf32, #tpu.memory_space<vmem>>, vector<64x128xf32>,
    %c0_i32_8 = arith.constant 0 : i32
    %9 = arith.cmpi eq, %arg2, %c0_i32_8 : i32
    %10 = arith.extui %9 : i1 to i32
    %c0_i32_9 = arith.constant 0 : i32
    %11 = arith.cmpi ne, %10, %c0_i32_9 : i32
    scf.if %11 {
      %c0_10 = arith.constant 0 : index
      %c0_11 = arith.constant 0 : index
      %12 = vector.load %arg8[%c0_10, %c0_11] : memref<64x128xf32, #tpu.memory_space<vmem>>, vector<64x128xf32>
      %c0_12 = arith.constant 0 : index
      %c0_13 = arith.constant 0 : index
      %13 = vector.load %arg5[%c0_12, %c0_13] : memref<1x128xf32, #tpu.memory_space<vmem>>, vector<1x128xf32>
      %14 = vector.broadcast %13 : vector<1x128xf32> to vector<64x128xf32>
      %15 = arith.mulf %12, %14 : vector<64x128xf32>
      %c0_14 = arith.constant 0 : index
      %c0_15 = arith.constant 0 : index
      %16 = vector.load %arg6[%c0_14, %c0_15] : memref<1x128xf32, #tpu.memory_space<vmem>>, vector<1x128xf32>
      %17 = vector.broadcast %16 : vector<1x128xf32> to vector<64x128xf32>
      %18 = arith.addf %15, %17 : vector<64x128xf32>
      %19 = arith.truncf %18 : vector<64x128xf32> to vector<64x128xbf16>
      %c0_16 = arith.constant 0 : index
      %c0_17 = arith.constant 0 : index
      %20 = vector.load %arg7[%c0_16, %c0_17] : memref<64x128xbf16, #tpu.memory_space<vmem>>, vector<64x128xbf16>
      tpu.vector_store %arg7[%c0_16, %c0_17], %19 {strides = array<i32>} : memref<64x128xbf16, #tpu.memory_space<vmem>>, vector<64x128xbf16>,
    } else {
    }
    return
  }
  func.func @transform_0(%arg0: i32, %arg1: i32, %arg2: i32) -> (i32, i32) {
    %c0_i32 = arith.constant 0 : i32
    return %arg0, %arg2 : i32, i32
  }
  func.func @transform_1(%arg0: i32, %arg1: i32, %arg2: i32) -> (i32, i32) {
    %c0_i32 = arith.constant 0 : i32
    return %arg2, %arg1 : i32, i32
  }
  func.func @transform_2(%arg0: i32, %arg1: i32, %arg2: i32) -> (i32, i32) {
    %c0_i32 = arith.constant 0 : i32
    %c0_i32_0 = arith.constant 0 : i32
    return %c0_i32, %arg1 : i32, i32
  }
  func.func @transform_3(%arg0: i32, %arg1: i32, %arg2: i32) -> (i32, i32) {
    %c0_i32 = arith.constant 0 : i32
    %c0_i32_0 = arith.constant 0 : i32
    return %c0_i32, %arg1 : i32, i32
  }
  func.func @transform_4(%arg0: i32, %arg1: i32, %arg2: i32) -> (i32, i32) {
    %c0_i32 = arith.constant 0 : i32
    return %arg0, %arg1 : i32, i32
  }
}

module attributes {stable_mosaic.version = 11 : i64} {
  func.func @kernel(%arg0: i32, %arg1: i32, %arg2: i32, %arg3: memref<64x128xbf16, #tpu.memory_space<vmem>>, %arg4: memref<128x128xbf16, #tpu.memory_space<vmem>>, %arg5: memref<1x128xf32, #tpu.memory_space<vmem>>, %arg6: memref<1x128xf32, #tpu.memory_space<vmem>>, %arg7: memref<64x128xbf16, #tpu.memory_space<vmem>>, %arg8: memref<64x128xf32, #tpu.memory_space<vmem>>) attributes {dimension_semantics = [#tpu.dimension_semantics<parallel>, #tpu.dimension_semantics<parallel>, #tpu.dimension_semantics<arbitrary>], iteration_bounds = array<i64: 2, 1, 1>, scalar_prefetch = 0 : i64, scratch_operands = 1 : i64, tpu.core_type = #tpu.core_type<tc>, window_params = [{transform_indices = @transform_0, window_bounds = array<i64: 64, 128>}, {transform_indices = @transform_1, window_bounds = array<i64: 128, 128>}, {transform_indices = @transform_2, window_bounds = array<i64: 1, 128>}, {transform_indices = @transform_3, window_bounds = array<i64: 1, 128>}, {transform_indices = @transform_4, window_bounds = array<i64: 64, 128>}]} {
    %c0_i32 = arith.constant 0 : i32
    %0 = arith.cmpi eq, %arg2, %c0_i32 : i32
    %1 = arith.extui %0 : i1 to i32
    %c0_i32_0 = arith.constant 0 : i32
    %2 = arith.cmpi ne, %1, %c0_i32_0 : i32
    scf.if %2 {
      %cst_10 = arith.constant 0.000000e+00 : f32
      %12 = vector.broadcast %cst_10 : f32 to vector<64x128xf32>
      %c0_11 = arith.constant 0 : index
      %c0_12 = arith.constant 0 : index
      %13 = vector.load %arg8[%c0_11, %c0_12] : memref<64x128xf32, #tpu.memory_space<vmem>>, vector<64x128xf32>
      tpu.vector_store %arg8[%c0_11, %c0_12], %12 {strides = array<i32>} : memref<64x128xf32, #tpu.memory_space<vmem>>, vector<64x128xf32>,
    } else {
    }
    %c0 = arith.constant 0 : index
    %c0_1 = arith.constant 0 : index
    %3 = vector.load %arg8[%c0, %c0_1] : memref<64x128xf32, #tpu.memory_space<vmem>>, vector<64x128xf32>
    %c0_2 = arith.constant 0 : index
    %c0_3 = arith.constant 0 : index
    %4 = vector.load %arg3[%c0_2, %c0_3] : memref<64x128xbf16, #tpu.memory_space<vmem>>, vector<64x128xbf16>
    %c0_4 = arith.constant 0 : index
    %c0_5 = arith.constant 0 : index
    %5 = vector.load %arg4[%c0_4, %c0_5] : memref<128x128xbf16, #tpu.memory_space<vmem>>, vector<128x128xbf16>
    %cst = arith.constant dense<0.000000e+00> : vector<64x128xf32>
    %6 = tpu.matmul %4, %5, %cst {dimension_numbers = #tpu.dot_dimension_numbers<[1], [0], [0], [1], [0, 0, 1, 1], [], []>} : vector<64x128xbf16>, vector<128x128xbf16>, vector<64x128xf32> -> vector<64x128xf32>
    %7 = arith.addf %3, %6 : vector<64x128xf32>
    %c0_6 = arith.constant 0 : index
    %c0_7 = arith.constant 0 : index
    %8 = vector.load %arg8[%c0_6, %c0_7] : memref<64x128xf32, #tpu.memory_space<vmem>>, vector<64x128xf32>
    tpu.vector_store %arg8[%c0_6, %c0_7], %7 {strides = array<i32>} : memref<64x128xf32, #tpu.memory_space<vmem>>, vector<64x128xf32>,
    %c0_i32_8 = arith.constant 0 : i32
    %9 = arith.cmpi eq, %arg2, %c0_i32_8 : i32
    %10 = arith.extui %9 : i1 to i32
    %c0_i32_9 = arith.constant 0 : i32
    %11 = arith.cmpi ne, %10, %c0_i32_9 : i32
    scf.if %11 {
      %c0_10 = arith.constant 0 : index
      %c0_11 = arith.constant 0 : index
      %12 = vector.load %arg8[%c0_10, %c0_11] : memref<64x128xf32, #tpu.memory_space<vmem>>, vector<64x128xf32>
      %c0_12 = arith.constant 0 : index
      %c0_13 = arith.constant 0 : index
      %13 = vector.load %arg5[%c0_12, %c0_13] : memref<1x128xf32, #tpu.memory_space<vmem>>, vector<1x128xf32>
      %14 = vector.broadcast %13 : vector<1x128xf32> to vector<64x128xf32>
      %15 = arith.mulf %12, %14 : vector<64x128xf32>
      %c0_14 = arith.constant 0 : index
      %c0_15 = arith.constant 0 : index
      %16 = vector.load %arg6[%c0_14, %c0_15] : memref<1x128xf32, #tpu.memory_space<vmem>>, vector<1x128xf32>
      %17 = vector.broadcast %16 : vector<1x128xf32> to vector<64x128xf32>
      %18 = arith.addf %15, %17 : vector<64x128xf32>
      %19 = arith.truncf %18 : vector<64x128xf32> to vector<64x128xbf16>
      %c0_16 = arith.constant 0 : index
      %c0_17 = arith.constant 0 : index
      %20 = vector.load %arg7[%c0_16, %c0_17] : memref<64x128xbf16, #tpu.memory_space<vmem>>, vector<64x128xbf16>
      tpu.vector_store %arg7[%c0_16, %c0_17], %19 {strides = array<i32>} : memref<64x128xbf16, #tpu.memory_space<vmem>>, vector<64x128xbf16>,
    } else {
    }
    return
  }
  func.func @transform_0(%arg0: i32, %arg1: i32, %arg2: i32) -> (i32, i32) {
    %c0_i32 = arith.constant 0 : i32
    return %arg0, %arg2 : i32, i32
  }
  func.func @transform_1(%arg0: i32, %arg1: i32, %arg2: i32) -> (i32, i32) {
    %c0_i32 = arith.constant 0 : i32
    return %arg2, %arg1 : i32, i32
  }
  func.func @transform_2(%arg0: i32, %arg1: i32, %arg2: i32) -> (i32, i32) {
    %c0_i32 = arith.constant 0 : i32
    %c0_i32_0 = arith.constant 0 : i32
    return %c0_i32, %arg1 : i32, i32
  }
  func.func @transform_3(%arg0: i32, %arg1: i32, %arg2: i32) -> (i32, i32) {
    %c0_i32 = arith.constant 0 : i32
    %c0_i32_0 = arith.constant 0 : i32
    return %c0_i32, %arg1 : i32, i32
  }
  func.func @transform_4(%arg0: i32, %arg1: i32, %arg2: i32) -> (i32, i32) {
    %c0_i32 = arith.constant 0 : i32
    return %arg0, %arg1 : i32, i32
  }
}

</mosaic_0001>

<bundles_post_ra>
// kernel: _lambda_.34
= control target key start
LH: loop header
LB: loop body
LE: loop exit
PB: predicated region body
PF: predicated region fallthrough
CT: control target
= control target key end

     0   :  { %s884_s15 = smov 0   ;;  %s886_s16 = smov 0   ;;  %s976_s0 = inlined_call_operand.vmem [shape: bf16[8,128], index: 0, kind: input, shape index: {}]   ;;  %s977_s1 = inlined_call_operand.vmem [shape: bf16[128,1024], index: 1, kind: input, shape index: {}]   ;;  %s978_s2 = inlined_call_operand.vmem [shape: f32[1,1024], index: 2, kind: input, shape index: {}]   ;;  %s979_s3 = inlined_call_operand.vmem [shape: f32[1,1024], index: 3, kind: input, shape index: {}]   ;;  %s980_s4 = inlined_call_operand.vmem [shape: bf16[8,1024], index: 4, kind: output, shape index: {}]  }
   0x1   :  { %s888_s17 = smov 0   ;;  %s890_s18 = smov 0  }
   0x2   :  { %s892_s19 = smov 0  }
   0x3 LB: > { %s29_s20 = sadd.s32 1, %s852_s18  ;;  %p77_p1 = scmp.ne.s32.totalorder %s844_s16, %s840_s15  ;;  %s856_s19 = sphi %s892_s19, %s14_s19   ;;  %s852_s18 = sphi %s890_s18, %s984_s18   ;;  %s848_s17 = sphi %s888_s17, %s983_s17   ;;  %s844_s16 = sphi %s886_s16, %s982_s16   ;;  %s840_s15 = sphi %s884_s15, %s981_s15  }
   0x4   : > { %p31_p0 = scmp.ge.s32.totalorder %s29_s20, 4  ;;  %p78_p2 = scmp.eq.s32.totalorder %s856_s19, 0 }
   0x5   : > { %s70_s22 = sadd.s32 1, %s844_s16  ;;  %p722_p5 = scmp.ge.s32.totalorder %s856_s19, 4 }
   0x6   : > { %s986_s20 = smov (%p31_p0, %s29_s20), 0  ;;  %p79_p3 = por %p78_p2, %p77_p1 }
   0x7   : > { %s66_s21 = ssub.s32 %s852_s18, %s986_s20  ;;  %193 = sbr.rel (%p722_p5) target bundleno = 34 (0x22), region = 20 }
   0x8   : > { %p68_p4 = scmp.eq.s32.totalorder %s66_s21, 0 }
   0xa   : > { %s919_s23 = scalar_select %p68_p4, %s844_s16, %s70_s22  }
   0xe   : > { %196 = sbr.rel (!%p79_p3) target bundleno = 34 (0x22), region = 24  ;;  %s198_s24 = sand.u32 (%p79_p3), 1, %s844_s16  }
   0xf   : > { %s751_s25 = sshll.u32 (%p79_p3), %s852_s18, 3  ;;  %s723_s26 = sshll.u32 (%p79_p3), %s198_s24, 7 }
  0x10   : > { %s927_s29 = scalar_lea.vmem (%p79_p3), %s977_s1, %s751_s25  ;;  %s200_s30 = scalar_lea.vmem (%p79_p3), [#allocation3], %s723_s26 }
  0x11   : > { %v264_v0 = vld [vmem:[%s927_s29] sm:$0xff] (%p79_p3) }
  0x12   : > { %v266_v1 = vld [vmem:[%s927_s29 + $0x20] sm:$0xff] (%p79_p3)  ;;  %265 = vst [vmem:[%s200_s30] sm:$0xff] (%p79_p3), %v264_v0 }
  0x13   : > { %v268_v2 = vld [vmem:[%s927_s29 + $0x40] sm:$0xff] (%p79_p3)  ;;  %267 = vst [vmem:[%s200_s30 + $0x8] sm:$0xff] (%p79_p3), %v266_v1 }
  0x14   : > { %269 = vst [vmem:[%s200_s30 + $0x10] sm:$0xff] (%p79_p3), %v268_v2  ;;  %v270_v3 = vld [vmem:[%s927_s29 + $0x60] sm:$0xff] (%p79_p3) }
  0x15   : > { %v272_v4 = vld [vmem:[%s927_s29 + $0x80] sm:$0xff]  ;;  %271 = vst [vmem:[%s200_s30 + $0x18] sm:$0xff] %v270_v3 }
  0x16   : > { %v274_v5 = vld [vmem:[%s927_s29 + $0xa0] sm:$0xff]  ;;  %273 = vst [vmem:[%s200_s30 + $0x20] sm:$0xff] %v272_v4 }
  0x17   : > { %275 = vst [vmem:[%s200_s30 + $0x28] sm:$0xff] %v274_v5  ;;  %v276_v6 = vld [vmem:[%s927_s29 + $0xc0] sm:$0xff] }
  0x18   : > { %v278_v7 = vld [vmem:[%s927_s29 + $0xe0] sm:$0xff]  ;;  %277 = vst [vmem:[%s200_s30 + $0x30] sm:$0xff] %v276_v6 }
  0x19   : > { %v280_v8 = vld [vmem:[%s927_s29 + $0x100] sm:$0xff]  ;;  %279 = vst [vmem:[%s200_s30 + $0x38] sm:$0xff] %v278_v7 }
  0x1a   : > { %281 = vst [vmem:[%s200_s30 + $0x40] sm:$0xff] %v280_v8  ;;  %v282_v9 = vld [vmem:[%s927_s29 + $0x120] sm:$0xff] }
  0x1b   : > { %v284_v10 = vld [vmem:[%s927_s29 + $0x140] sm:$0xff]  ;;  %283 = vst [vmem:[%s200_s30 + $0x48] sm:$0xff] %v282_v9 }
  0x1c   : > { %v286_v11 = vld [vmem:[%s927_s29 + $0x160] sm:$0xff]  ;;  %285 = vst [vmem:[%s200_s30 + $0x50] sm:$0xff] %v284_v10 }
  0x1d   : > { %287 = vst [vmem:[%s200_s30 + $0x58] sm:$0xff] %v286_v11  ;;  %v288_v12 = vld [vmem:[%s927_s29 + $0x180] sm:$0xff] }
  0x1e   : > { %v290_v13 = vld [vmem:[%s927_s29 + $0x1a0] sm:$0xff]  ;;  %289 = vst [vmem:[%s200_s30 + $0x60] sm:$0xff] %v288_v12 }
  0x1f   : > { %v292_v14 = vld [vmem:[%s927_s29 + $0x1c0] sm:$0xff]  ;;  %291 = vst [vmem:[%s200_s30 + $0x68] sm:$0xff] %v290_v13 }
  0x20   : > { %293 = vst [vmem:[%s200_s30 + $0x70] sm:$0xff] %v292_v14  ;;  %v294_v15 = vld [vmem:[%s927_s29 + $0x1e0] sm:$0xff] }
  0x21   : > { %295 = vst [vmem:[%s200_s30 + $0x78] sm:$0xff] %v294_v15 }
  0x22 PF: > { %p726_p6 = scmp.ge.s32.totalorder %s856_s19, 1  ;;  %p316_p7 = scmp.lt.s32.totalorder %s856_s19, 5 }
  0x24   : > { %p317_p8 = pnand %p726_p6, %p316_p7 }
  0x25   : > { %s323_s5 = sand.u32 (!%p317_p8), 1, %s840_s15   ;;  %v858_v16 = vmov (!%p317_p8), 0   ;;  %v405_v33 = vld [vmem:[%s976_s0] sm:$0xf] (!%p317_p8)  ;;  %s728_s10 = sshll.u32 (!%p317_p8), %s848_s17, 1  ;;  %v554_v34 = vlaneseq (!%p317_p8) }
  0x26   : > { %320 = sbr.rel (%p317_p8) target bundleno = 293 (0x125), region = 70  ;;  %s727_s6 = sshll.u32 (!%p317_p8), %s323_s5, 7  ;;  %534 = vmatprep.mubr.bf16.mxu0 (!%p317_p8), %v858_v16 }
  0x27   : > { %s325_s7 = scalar_lea.vmem (!%p317_p8), [#allocation3], %s727_s6  ;;  %p377_p9 = scmp.lt.s32.totalorder (!%p317_p8), %s728_s10, 7  ;;  %v555_v35 = vshrl.u32 (!%p317_p8), %v554_v34, 7 }
  0x28   : > { %v794_v17 = vld [vmem:[%s325_s7 + $0x4] ss:$8 sps:$4 sm:$0xff] (!%p317_p8)   ;;  %v796_v18 = vld [vmem:[%s325_s7] ss:$8 sps:$4 sm:$0xff] (!%p317_p8)   ;;  %v797_v19 = vld [vmem:[%s325_s7 + $0x14] ss:$8 sps:$4 sm:$0xff] (!%p317_p8)  }
  0x29   : > { %502 = vmatprep.subr.bf16.mxu0 (!%p317_p8), %v794_v17  ;;  %v799_v20 = vld [vmem:[%s325_s7 + $0x10] ss:$8 sps:$4 sm:$0xff] (!%p317_p8)   ;;  %v800_v21 = vld [vmem:[%s325_s7 + $0x24] ss:$8 sps:$4 sm:$0xff] (!%p317_p8)   ;;  %v802_v22 = vld [vmem:[%s325_s7 + $0x20] ss:$8 sps:$4 sm:$0xff] (!%p317_p8)  }
  0x2a   : > { %503 = vmatpush1.bf16.msra.mxu0 (!%p317_p8), %v796_v18  ;;  %v803_v23 = vld [vmem:[%s325_s7 + $0x34] ss:$8 sps:$4 sm:$0xff] (!%p317_p8)   ;;  %v805_v24 = vld [vmem:[%s325_s7 + $0x30] ss:$8 sps:$4 sm:$0xff] (!%p317_p8)   ;;  %v806_v25 = vld [vmem:[%s325_s7 + $0x44] ss:$8 sps:$4 sm:$0xff] (!%p317_p8)  }
  0x2b   : > { %504 = vmatprep.subr.bf16.mxu0 (!%p317_p8), %v797_v19  ;;  %v808_v26 = vld [vmem:[%s325_s7 + $0x40] ss:$8 sps:$4 sm:$0xff] (!%p317_p8)   ;;  %v809_v27 = vld [vmem:[%s325_s7 + $0x54] ss:$8 sps:$4 sm:$0xff] (!%p317_p8)   ;;  %v811_v28 = vld [vmem:[%s325_s7 + $0x50] ss:$8 sps:$4 sm:$0xff] (!%p317_p8)  }
  0x2c   : > { %v812_v29 = vld [vmem:[%s325_s7 + $0x64] ss:$8 sps:$4 sm:$0xff] (!%p317_p8)   ;;  %v814_v30 = vld [vmem:[%s325_s7 + $0x60] ss:$8 sps:$4 sm:$0xff] (!%p317_p8)   ;;  %v815_v31 = vld [vmem:[%s325_s7 + $0x74] ss:$8 sps:$4 sm:$0xff] (!%p317_p8)  }
  0x2d   : > { %v817_v32 = vld [vmem:[%s325_s7 + $0x70] ss:$8 sps:$4 sm:$0xff]   ;;  %s988_s10 = smov (!%p377_p9, %s728_s10), 7  ;;  %v556_v36 = vsub.s32 0, %v555_v35  ;;  %v560_v38 = vsub.s32 1, %v555_v35 }
  0x2e   : > { %505 = vmatpush1.bf16.msra.mxu0 %v799_v20  ;;  %s379_s13 = scalar_lea.vmem %s978_s2, %s988_s10  ;;  %s384_s21 = scalar_lea.vmem %s979_s3, %s988_s10 }
  0x2f   : > { %506 = vmatprep.subr.bf16.mxu0 %v800_v21  ;;  %v552_v37 = vld [vmem:[%s379_s13] sm:$0x3]  ;;  %s731_s17 = sshll.u32 %s988_s10, 2 }
  0x30   : > { %v566_v39 = vld [vmem:[%s384_s21] sm:$0x3]  ;;  %v557_v40 = vrot.slane %v552_v37, %v556_v36  ;;  %v561_v41 = vrot.slane %v552_v37, %v560_v38  ;;  %s394_s25 = scalar_lea.vmem %s980_s4, %s731_s17 }
  0x31   : > { %v571_v42 = vrot.slane %v566_v39, %v556_v36  ;;  %v575_v44 = vrot.slane %v566_v39, %v560_v38 }
  0x32   : > { %507 = vmatpush1.bf16.msra.mxu0 %v802_v22 }
  0x33   : > { %508 = vmatprep.subr.bf16.mxu0 %v803_v23 }
  0x36   : > { %509 = vmatpush1.bf16.msra.mxu0 %v805_v24 }
  0x37   : > { %510 = vmatprep.subr.bf16.mxu0 %v806_v25 }
  0x3a   : > { %511 = vmatpush1.bf16.msra.mxu0 %v808_v26 }
  0x3b   : > { %512 = vmatprep.subr.bf16.mxu0 %v809_v27 }
  0x3e   : > { %513 = vmatpush1.bf16.msra.mxu0 %v811_v28 }
  0x3f   : > { %514 = vmatprep.subr.bf16.mxu0 %v812_v29 }
  0x42   : > { %515 = vmatpush1.bf16.msra.mxu0 %v814_v30 }
  0x43   : > { %516 = vmatprep.subr.bf16.mxu0 %v815_v31 }
  0x46   : > { %517 = vmatpush1.bf16.msra.mxu0 %v817_v32 }
  0x49   : > { %535 = vmatmul.mubr.bf16.vlgmr.msra.gmra.mrb[0].mxu0 %v405_v33 }
 0x11c   : > { %v536_v43 = vpop.f32.mrb[0].mxu0 }
 0x11d   : > { %v564_v45 = vmul.f32 %v557_v40, %v536_v43  ;;  %v538_v46 = vpop.f32.mrb[1].mxu0 }
 0x11e   : > { %v565_v47 = vmul.f32 %v561_v41, %v538_v46  ;;  %v540_v48 = vpop.f32.mrb[2].mxu0 }
 0x11f   : > { %v578_v49 = vadd.f32 %v571_v42, %v564_v45  ;;  %v541_v50 = vpop.f32.mrb[3].mxu0 }
 0x120   : > { %v579_v51 = vadd.f32 %v575_v44, %v565_v47 }
 0x122   : > { %v752_v52 = vpack.c.bf16 %v579_v51, %v578_v49 }
 0x124   : > { %588 = vst [vmem:[%s394_s25] sm:$0xff] %v752_v52 }
 0x125 PF: > { %s14_s19 = sadd.s32 1, %s856_s19   ;;  %s981_s15 = smov %s844_s16 }
 0x126   : > { %p11_p10 = scmp.ge.s32.totalorder %s14_s19, 6   ;;  %s982_s16 = smov %s919_s23 }
 0x127   : > { %s983_s17 = smov %s852_s18  ;;  %s984_s18 = smov %s986_s20 }
 0x128   :  { %13 = sbr.rel (!%p11_p10) target bundleno = 3 (0x3), region = 126 }

// kernel: _lambda_.49
= control target key start
LH: loop header
LB: loop body
LE: loop exit
PB: predicated region body
PF: predicated region fallthrough
CT: control target
= control target key end

     0   :  { %s2058_s15 = smov 0   ;;  %s2060_s16 = smov 0   ;;  %s2492_s0 = inlined_call_operand.vmem [shape: bf16[8,1024], index: 0, kind: input, shape index: {}]   ;;  %s2493_s1 = inlined_call_operand.vmem [shape: bf16[1024,256], index: 1, kind: input, shape index: {}]   ;;  %s2494_s2 = inlined_call_operand.vmem [shape: f32[1,256], index: 2, kind: input, shape index: {}]   ;;  %s2495_s3 = inlined_call_operand.vmem [shape: f32[1,256], index: 3, kind: input, shape index: {}]   ;;  %s2496_s4 = inlined_call_operand.vmem [shape: bf16[8,256], index: 4, kind: output, shape index: {}]  }
   0x1   :  { %s2062_s17 = smov 0   ;;  %s2064_s18 = smov 0  }
   0x2   :  { %s2066_s19 = smov 0  }
   0x3 LB: > { %s29_s20 = sadd.s32 1, %s2027_s18  ;;  %p77_p1 = scmp.ne.s32.totalorder %s2019_s16, %s2015_s15  ;;  %s2031_s19 = sphi %s2066_s19, %s14_s19   ;;  %s2027_s18 = sphi %s2064_s18, %s2500_s18   ;;  %s2023_s17 = sphi %s2062_s17, %s2499_s17   ;;  %s2019_s16 = sphi %s2060_s16, %s2498_s16   ;;  %s2015_s15 = sphi %s2058_s15, %s2497_s15  }
   0x4   : > { %p31_p0 = scmp.ge.s32.totalorder %s29_s20, 2  ;;  %p78_p2 = scmp.eq.s32.totalorder %s2031_s19, 0 }
   0x5   : > { %s70_s22 = sadd.s32 1, %s2019_s16  ;;  %p1711_p5 = scmp.ge.s32.totalorder %s2031_s19, 2 }
   0x6   : > { %s2502_s20 = smov (%p31_p0, %s29_s20), 0  ;;  %p79_p3 = por %p78_p2, %p77_p1 }
   0x7   : > { %s66_s21 = ssub.s32 %s2027_s18, %s2502_s20  ;;  %196 = sbr.rel (%p1711_p5) target bundleno = 103 (0x67), region = 20 }
   0x8   : > { %p68_p4 = scmp.eq.s32.totalorder %s66_s21, 0 }
   0xa   : > { %s2093_s23 = scalar_select %p68_p4, %s2019_s16, %s70_s22  }
   0xe   : > { %199 = sbr.rel (!%p79_p3) target bundleno = 103 (0x67), region = 24  ;;  %s201_s24 = sand.u32 (%p79_p3), 1, %s2019_s16  }
   0xf   : > { %s1713_s25 = sshll.u32 (%p79_p3), %s2027_s18, 2  ;;  %s1712_s26 = sshll.u32 (%p79_p3), %s201_s24, 9 }
  0x10   : > { %s2101_s29 = scalar_lea.vmem (%p79_p3), %s2493_s1, %s1713_s25  ;;  %s2105_s30 = scalar_lea.vmem (%p79_p3), [#allocation3], %s1712_s26 }
  0x11   : > { %v224_v0 = vld [vmem:[%s2101_s29] sm:$0xf] (%p79_p3)  ;;  %v226_v1 = vld [vmem:[%s2101_s29 + $0x8] sm:$0xf] (%p79_p3)  ;;  %v228_v2 = vld [vmem:[%s2101_s29 + $0x10] sm:$0xf] (%p79_p3) }
  0x12   : > { %225 = vst [vmem:[%s2105_s30] sm:$0xf] (%p79_p3), %v224_v0  ;;  %227 = vst [vmem:[%s2105_s30 + $0x4] sm:$0xf] (%p79_p3), %v226_v1  ;;  %v230_v3 = vld [vmem:[%s2101_s29 + $0x18] sm:$0xf] (%p79_p3) }
  0x13   : > { %v232_v4 = vld [vmem:[%s2101_s29 + $0x20] sm:$0xf] (%p79_p3)  ;;  %229 = vst [vmem:[%s2105_s30 + $0x8] sm:$0xf] (%p79_p3), %v228_v2  ;;  %231 = vst [vmem:[%s2105_s30 + $0xc] sm:$0xf] (%p79_p3), %v230_v3 }
  0x14   : > { %233 = vst [vmem:[%s2105_s30 + $0x10] sm:$0xf] (%p79_p3), %v232_v4  ;;  %v234_v5 = vld [vmem:[%s2101_s29 + $0x28] sm:$0xf] (%p79_p3)  ;;  %v236_v6 = vld [vmem:[%s2101_s29 + $0x30] sm:$0xf] (%p79_p3) }
  0x15   : > { %v238_v7 = vld [vmem:[%s2101_s29 + $0x38] sm:$0xf]  ;;  %235 = vst [vmem:[%s2105_s30 + $0x14] sm:$0xf] %v234_v5  ;;  %237 = vst [vmem:[%s2105_s30 + $0x18] sm:$0xf] %v236_v6 }
  0x16   : > { %239 = vst [vmem:[%s2105_s30 + $0x1c] sm:$0xf] %v238_v7  ;;  %v240_v8 = vld [vmem:[%s2101_s29 + $0x40] sm:$0xf]  ;;  %v242_v9 = vld [vmem:[%s2101_s29 + $0x48] sm:$0xf] }
  0x17   : > { %v244_v10 = vld [vmem:[%s2101_s29 + $0x50] sm:$0xf]  ;;  %241 = vst [vmem:[%s2105_s30 + $0x20] sm:$0xf] %v240_v8  ;;  %243 = vst [vmem:[%s2105_s30 + $0x24] sm:$0xf] %v242_v9 }
  0x18   : > { %245 = vst [vmem:[%s2105_s30 + $0x28] sm:$0xf] %v244_v10  ;;  %v246_v11 = vld [vmem:[%s2101_s29 + $0x58] sm:$0xf]  ;;  %v248_v12 = vld [vmem:[%s2101_s29 + $0x60] sm:$0xf] }
  0x19   : > { %v250_v13 = vld [vmem:[%s2101_s29 + $0x68] sm:$0xf]  ;;  %247 = vst [vmem:[%s2105_s30 + $0x2c] sm:$0xf] %v246_v11  ;;  %249 = vst [vmem:[%s2105_s30 + $0x30] sm:$0xf] %v248_v12 }
  0x1a   : > { %251 = vst [vmem:[%s2105_s30 + $0x34] sm:$0xf] %v250_v13  ;;  %v252_v14 = vld [vmem:[%s2101_s29 + $0x70] sm:$0xf]  ;;  %v254_v15 = vld [vmem:[%s2101_s29 + $0x78] sm:$0xf] }
  0x1b   : > { %v256_v16 = vld [vmem:[%s2101_s29 + $0x80] sm:$0xf]  ;;  %253 = vst [vmem:[%s2105_s30 + $0x38] sm:$0xf] %v252_v14  ;;  %255 = vst [vmem:[%s2105_s30 + $0x3c] sm:$0xf] %v254_v15 }
  0x1c   : > { %257 = vst [vmem:[%s2105_s30 + $0x40] sm:$0xf] %v256_v16  ;;  %v258_v17 = vld [vmem:[%s2101_s29 + $0x88] sm:$0xf]  ;;  %v260_v18 = vld [vmem:[%s2101_s29 + $0x90] sm:$0xf] }
  0x1d   : > { %v262_v19 = vld [vmem:[%s2101_s29 + $0x98] sm:$0xf]  ;;  %259 = vst [vmem:[%s2105_s30 + $0x44] sm:$0xf] %v258_v17  ;;  %261 = vst [vmem:[%s2105_s30 + $0x48] sm:$0xf] %v260_v18 }
  0x1e   : > { %263 = vst [vmem:[%s2105_s30 + $0x4c] sm:$0xf] %v262_v19  ;;  %v264_v20 = vld [vmem:[%s2101_s29 + $0xa0] sm:$0xf]  ;;  %v266_v21 = vld [vmem:[%s2101_s29 + $0xa8] sm:$0xf] }
  0x1f   : > { %v268_v22 = vld [vmem:[%s2101_s29 + $0xb0] sm:$0xf]  ;;  %265 = vst [vmem:[%s2105_s30 + $0x50] sm:$0xf] %v264_v20  ;;  %267 = vst [vmem:[%s2105_s30 + $0x54] sm:$0xf] %v266_v21 }
  0x20   : > { %269 = vst [vmem:[%s2105_s30 + $0x58] sm:$0xf] %v268_v22  ;;  %v270_v23 = vld [vmem:[%s2101_s29 + $0xb8] sm:$0xf]  ;;  %v272_v24 = vld [vmem:[%s2101_s29 + $0xc0] sm:$0xf] }
  0x21   : > { %v274_v25 = vld [vmem:[%s2101_s29 + $0xc8] sm:$0xf]  ;;  %271 = vst [vmem:[%s2105_s30 + $0x5c] sm:$0xf] %v270_v23  ;;  %273 = vst [vmem:[%s2105_s30 + $0x60] sm:$0xf] %v272_v24 }
  0x22   : > { %275 = vst [vmem:[%s2105_s30 + $0x64] sm:$0xf] %v274_v25  ;;  %v276_v26 = vld [vmem:[%s2101_s29 + $0xd0] sm:$0xf]  ;;  %v278_v27 = vld [vmem:[%s2101_s29 + $0xd8] sm:$0xf] }
  0x23   : > { %v280_v28 = vld [vmem:[%s2101_s29 + $0xe0] sm:$0xf]  ;;  %277 = vst [vmem:[%s2105_s30 + $0x68] sm:$0xf] %v276_v26  ;;  %279 = vst [vmem:[%s2105_s30 + $0x6c] sm:$0xf] %v278_v27 }
  0x24   : > { %281 = vst [vmem:[%s2105_s30 + $0x70] sm:$0xf] %v280_v28  ;;  %v282_v29 = vld [vmem:[%s2101_s29 + $0xe8] sm:$0xf]  ;;  %v284_v30 = vld [vmem:[%s2101_s29 + $0xf0] sm:$0xf] }
  0x25   : > { %v286_v31 = vld [vmem:[%s2101_s29 + $0xf8] sm:$0xf]  ;;  %283 = vst [vmem:[%s2105_s30 + $0x74] sm:$0xf] %v282_v29  ;;  %285 = vst [vmem:[%s2105_s30 + $0x78] sm:$0xf] %v284_v30 }
  0x26   : > { %287 = vst [vmem:[%s2105_s30 + $0x7c] sm:$0xf] %v286_v31  ;;  %v288_v32 = vld [vmem:[%s2101_s29 + $0x100] sm:$0xf]  ;;  %v290_v33 = vld [vmem:[%s2101_s29 + $0x108] sm:$0xf] }
  0x27   : > { %v292_v34 = vld [vmem:[%s2101_s29 + $0x110] sm:$0xf]  ;;  %289 = vst [vmem:[%s2105_s30 + $0x80] sm:$0xf] %v288_v32  ;;  %291 = vst [vmem:[%s2105_s30 + $0x84] sm:$0xf] %v290_v33 }
  0x28   : > { %293 = vst [vmem:[%s2105_s30 + $0x88] sm:$0xf] %v292_v34  ;;  %v294_v35 = vld [vmem:[%s2101_s29 + $0x118] sm:$0xf]  ;;  %v296_v36 = vld [vmem:[%s2101_s29 + $0x120] sm:$0xf] }
  0x29   : > { %v298_v37 = vld [vmem:[%s2101_s29 + $0x128] sm:$0xf]  ;;  %295 = vst [vmem:[%s2105_s30 + $0x8c] sm:$0xf] %v294_v35  ;;  %297 = vst [vmem:[%s2105_s30 + $0x90] sm:$0xf] %v296_v36 }
  0x2a   : > { %299 = vst [vmem:[%s2105_s30 + $0x94] sm:$0xf] %v298_v37  ;;  %v300_v38 = vld [vmem:[%s2101_s29 + $0x130] sm:$0xf]  ;;  %v302_v39 = vld [vmem:[%s2101_s29 + $0x138] sm:$0xf] }
  0x2b   : > { %v304_v40 = vld [vmem:[%s2101_s29 + $0x140] sm:$0xf]  ;;  %301 = vst [vmem:[%s2105_s30 + $0x98] sm:$0xf] %v300_v38  ;;  %303 = vst [vmem:[%s2105_s30 + $0x9c] sm:$0xf] %v302_v39 }
  0x2c   : > { %305 = vst [vmem:[%s2105_s30 + $0xa0] sm:$0xf] %v304_v40  ;;  %v306_v41 = vld [vmem:[%s2101_s29 + $0x148] sm:$0xf]  ;;  %v308_v42 = vld [vmem:[%s2101_s29 + $0x150] sm:$0xf] }
  0x2d   : > { %v310_v43 = vld [vmem:[%s2101_s29 + $0x158] sm:$0xf]  ;;  %307 = vst [vmem:[%s2105_s30 + $0xa4] sm:$0xf] %v306_v41  ;;  %309 = vst [vmem:[%s2105_s30 + $0xa8] sm:$0xf] %v308_v42 }
  0x2e   : > { %311 = vst [vmem:[%s2105_s30 + $0xac] sm:$0xf] %v310_v43  ;;  %v312_v44 = vld [vmem:[%s2101_s29 + $0x160] sm:$0xf]  ;;  %v314_v45 = vld [vmem:[%s2101_s29 + $0x168] sm:$0xf] }
  0x2f   : > { %v316_v46 = vld [vmem:[%s2101_s29 + $0x170] sm:$0xf]  ;;  %313 = vst [vmem:[%s2105_s30 + $0xb0] sm:$0xf] %v312_v44  ;;  %315 = vst [vmem:[%s2105_s30 + $0xb4] sm:$0xf] %v314_v45 }
  0x30   : > { %317 = vst [vmem:[%s2105_s30 + $0xb8] sm:$0xf] %v316_v46  ;;  %v318_v47 = vld [vmem:[%s2101_s29 + $0x178] sm:$0xf]  ;;  %v320_v48 = vld [vmem:[%s2101_s29 + $0x180] sm:$0xf] }
  0x31   : > { %v322_v49 = vld [vmem:[%s2101_s29 + $0x188] sm:$0xf]  ;;  %319 = vst [vmem:[%s2105_s30 + $0xbc] sm:$0xf] %v318_v47  ;;  %321 = vst [vmem:[%s2105_s30 + $0xc0] sm:$0xf] %v320_v48 }
  0x32   : > { %323 = vst [vmem:[%s2105_s30 + $0xc4] sm:$0xf] %v322_v49  ;;  %v324_v50 = vld [vmem:[%s2101_s29 + $0x190] sm:$0xf]  ;;  %v326_v51 = vld [vmem:[%s2101_s29 + $0x198] sm:$0xf] }
  0x33   : > { %v328_v52 = vld [vmem:[%s2101_s29 + $0x1a0] sm:$0xf]  ;;  %325 = vst [vmem:[%s2105_s30 + $0xc8] sm:$0xf] %v324_v50  ;;  %327 = vst [vmem:[%s2105_s30 + $0xcc] sm:$0xf] %v326_v51 }
  0x34   : > { %329 = vst [vmem:[%s2105_s30 + $0xd0] sm:$0xf] %v328_v52  ;;  %v330_v53 = vld [vmem:[%s2101_s29 + $0x1a8] sm:$0xf]  ;;  %v332_v54 = vld [vmem:[%s2101_s29 + $0x1b0] sm:$0xf] }
  0x35   : > { %v334_v55 = vld [vmem:[%s2101_s29 + $0x1b8] sm:$0xf]  ;;  %331 = vst [vmem:[%s2105_s30 + $0xd4] sm:$0xf] %v330_v53  ;;  %333 = vst [vmem:[%s2105_s30 + $0xd8] sm:$0xf] %v332_v54 }
  0x36   : > { %335 = vst [vmem:[%s2105_s30 + $0xdc] sm:$0xf] %v334_v55  ;;  %v336_v56 = vld [vmem:[%s2101_s29 + $0x1c0] sm:$0xf]  ;;  %v338_v57 = vld [vmem:[%s2101_s29 + $0x1c8] sm:$0xf] }
  0x37   : > { %v340_v58 = vld [vmem:[%s2101_s29 + $0x1d0] sm:$0xf]  ;;  %337 = vst [vmem:[%s2105_s30 + $0xe0] sm:$0xf] %v336_v56  ;;  %339 = vst [vmem:[%s2105_s30 + $0xe4] sm:$0xf] %v338_v57 }
  0x38   : > { %341 = vst [vmem:[%s2105_s30 + $0xe8] sm:$0xf] %v340_v58  ;;  %v342_v59 = vld [vmem:[%s2101_s29 + $0x1d8] sm:$0xf]  ;;  %v344_v60 = vld [vmem:[%s2101_s29 + $0x1e0] sm:$0xf] }
  0x39   : > { %v346_v61 = vld [vmem:[%s2101_s29 + $0x1e8] sm:$0xf]  ;;  %343 = vst [vmem:[%s2105_s30 + $0xec] sm:$0xf] %v342_v59  ;;  %345 = vst [vmem:[%s2105_s30 + $0xf0] sm:$0xf] %v344_v60 }
  0x3a   : > { %347 = vst [vmem:[%s2105_s30 + $0xf4] sm:$0xf] %v346_v61  ;;  %v348_v62 = vld [vmem:[%s2101_s29 + $0x1f0] sm:$0xf]  ;;  %v350_v63 = vld [vmem:[%s2101_s29 + $0x1f8] sm:$0xf] }
  0x3b   : > { %v352_v0 = vld [vmem:[%s2101_s29 + $0x200] sm:$0xf]  ;;  %349 = vst [vmem:[%s2105_s30 + $0xf8] sm:$0xf] %v348_v62  ;;  %351 = vst [vmem:[%s2105_s30 + $0xfc] sm:$0xf] %v350_v63 }
  0x3c   : > { %353 = vst [vmem:[%s2105_s30 + $0x100] sm:$0xf] %v352_v0  ;;  %v354_v1 = vld [vmem:[%s2101_s29 + $0x208] sm:$0xf]  ;;  %v356_v2 = vld [vmem:[%s2101_s29 + $0x210] sm:$0xf] }
  0x3d   : > { %v358_v3 = vld [vmem:[%s2101_s29 + $0x218] sm:$0xf]  ;;  %355 = vst [vmem:[%s2105_s30 + $0x104] sm:$0xf] %v354_v1  ;;  %357 = vst [vmem:[%s2105_s30 + $0x108] sm:$0xf] %v356_v2 }
  0x3e   : > { %359 = vst [vmem:[%s2105_s30 + $0x10c] sm:$0xf] %v358_v3  ;;  %v360_v4 = vld [vmem:[%s2101_s29 + $0x220] sm:$0xf]  ;;  %v362_v5 = vld [vmem:[%s2101_s29 + $0x228] sm:$0xf] }
  0x3f   : > { %v364_v6 = vld [vmem:[%s2101_s29 + $0x230] sm:$0xf]  ;;  %361 = vst [vmem:[%s2105_s30 + $0x110] sm:$0xf] %v360_v4  ;;  %363 = vst [vmem:[%s2105_s30 + $0x114] sm:$0xf] %v362_v5 }
  0x40   : > { %365 = vst [vmem:[%s2105_s30 + $0x118] sm:$0xf] %v364_v6  ;;  %v366_v7 = vld [vmem:[%s2101_s29 + $0x238] sm:$0xf]  ;;  %v368_v8 = vld [vmem:[%s2101_s29 + $0x240] sm:$0xf] }
  0x41   : > { %v370_v9 = vld [vmem:[%s2101_s29 + $0x248] sm:$0xf]  ;;  %367 = vst [vmem:[%s2105_s30 + $0x11c] sm:$0xf] %v366_v7  ;;  %369 = vst [vmem:[%s2105_s30 + $0x120] sm:$0xf] %v368_v8 }
  0x42   : > { %371 = vst [vmem:[%s2105_s30 + $0x124] sm:$0xf] %v370_v9  ;;  %v372_v10 = vld [vmem:[%s2101_s29 + $0x250] sm:$0xf]  ;;  %v374_v11 = vld [vmem:[%s2101_s29 + $0x258] sm:$0xf] }
  0x43   : > { %v376_v12 = vld [vmem:[%s2101_s29 + $0x260] sm:$0xf]  ;;  %373 = vst [vmem:[%s2105_s30 + $0x128] sm:$0xf] %v372_v10  ;;  %375 = vst [vmem:[%s2105_s30 + $0x12c] sm:$0xf] %v374_v11 }
  0x44   : > { %377 = vst [vmem:[%s2105_s30 + $0x130] sm:$0xf] %v376_v12  ;;  %v378_v13 = vld [vmem:[%s2101_s29 + $0x268] sm:$0xf]  ;;  %v380_v14 = vld [vmem:[%s2101_s29 + $0x270] sm:$0xf] }
  0x45   : > { %v382_v15 = vld [vmem:[%s2101_s29 + $0x278] sm:$0xf]  ;;  %379 = vst [vmem:[%s2105_s30 + $0x134] sm:$0xf] %v378_v13  ;;  %381 = vst [vmem:[%s2105_s30 + $0x138] sm:$0xf] %v380_v14 }
  0x46   : > { %383 = vst [vmem:[%s2105_s30 + $0x13c] sm:$0xf] %v382_v15  ;;  %v384_v16 = vld [vmem:[%s2101_s29 + $0x280] sm:$0xf]  ;;  %v386_v17 = vld [vmem:[%s2101_s29 + $0x288] sm:$0xf] }
  0x47   : > { %v388_v18 = vld [vmem:[%s2101_s29 + $0x290] sm:$0xf]  ;;  %385 = vst [vmem:[%s2105_s30 + $0x140] sm:$0xf] %v384_v16  ;;  %387 = vst [vmem:[%s2105_s30 + $0x144] sm:$0xf] %v386_v17 }
  0x48   : > { %389 = vst [vmem:[%s2105_s30 + $0x148] sm:$0xf] %v388_v18  ;;  %v390_v19 = vld [vmem:[%s2101_s29 + $0x298] sm:$0xf]  ;;  %v392_v20 = vld [vmem:[%s2101_s29 + $0x2a0] sm:$0xf] }
  0x49   : > { %v394_v21 = vld [vmem:[%s2101_s29 + $0x2a8] sm:$0xf]  ;;  %391 = vst [vmem:[%s2105_s30 + $0x14c] sm:$0xf] %v390_v19  ;;  %393 = vst [vmem:[%s2105_s30 + $0x150] sm:$0xf] %v392_v20 }
  0x4a   : > { %395 = vst [vmem:[%s2105_s30 + $0x154] sm:$0xf] %v394_v21  ;;  %v396_v22 = vld [vmem:[%s2101_s29 + $0x2b0] sm:$0xf]  ;;  %v398_v23 = vld [vmem:[%s2101_s29 + $0x2b8] sm:$0xf] }
  0x4b   : > { %v400_v24 = vld [vmem:[%s2101_s29 + $0x2c0] sm:$0xf]  ;;  %397 = vst [vmem:[%s2105_s30 + $0x158] sm:$0xf] %v396_v22  ;;  %399 = vst [vmem:[%s2105_s30 + $0x15c] sm:$0xf] %v398_v23 }
  0x4c   : > { %401 = vst [vmem:[%s2105_s30 + $0x160] sm:$0xf] %v400_v24  ;;  %v402_v25 = vld [vmem:[%s2101_s29 + $0x2c8] sm:$0xf]  ;;  %v404_v26 = vld [vmem:[%s2101_s29 + $0x2d0] sm:$0xf] }
  0x4d   : > { %v406_v27 = vld [vmem:[%s2101_s29 + $0x2d8] sm:$0xf]  ;;  %403 = vst [vmem:[%s2105_s30 + $0x164] sm:$0xf] %v402_v25  ;;  %405 = vst [vmem:[%s2105_s30 + $0x168] sm:$0xf] %v404_v26 }
  0x4e   : > { %407 = vst [vmem:[%s2105_s30 + $0x16c] sm:$0xf] %v406_v27  ;;  %v408_v28 = vld [vmem:[%s2101_s29 + $0x2e0] sm:$0xf]  ;;  %v410_v29 = vld [vmem:[%s2101_s29 + $0x2e8] sm:$0xf] }
  0x4f   : > { %v412_v30 = vld [vmem:[%s2101_s29 + $0x2f0] sm:$0xf]  ;;  %409 = vst [vmem:[%s2105_s30 + $0x170] sm:$0xf] %v408_v28  ;;  %411 = vst [vmem:[%s2105_s30 + $0x174] sm:$0xf] %v410_v29 }
  0x50   : > { %413 = vst [vmem:[%s2105_s30 + $0x178] sm:$0xf] %v412_v30  ;;  %v414_v31 = vld [vmem:[%s2101_s29 + $0x2f8] sm:$0xf]  ;;  %v416_v32 = vld [vmem:[%s2101_s29 + $0x300] sm:$0xf] }
  0x51   : > { %v418_v33 = vld [vmem:[%s2101_s29 + $0x308] sm:$0xf]  ;;  %415 = vst [vmem:[%s2105_s30 + $0x17c] sm:$0xf] %v414_v31  ;;  %417 = vst [vmem:[%s2105_s30 + $0x180] sm:$0xf] %v416_v32 }
  0x52   : > { %419 = vst [vmem:[%s2105_s30 + $0x184] sm:$0xf] %v418_v33  ;;  %v420_v34 = vld [vmem:[%s2101_s29 + $0x310] sm:$0xf]  ;;  %v422_v35 = vld [vmem:[%s2101_s29 + $0x318] sm:$0xf] }
  0x53   : > { %v424_v36 = vld [vmem:[%s2101_s29 + $0x320] sm:$0xf]  ;;  %421 = vst [vmem:[%s2105_s30 + $0x188] sm:$0xf] %v420_v34  ;;  %423 = vst [vmem:[%s2105_s30 + $0x18c] sm:$0xf] %v422_v35 }
  0x54   : > { %425 = vst [vmem:[%s2105_s30 + $0x190] sm:$0xf] %v424_v36  ;;  %v426_v37 = vld [vmem:[%s2101_s29 + $0x328] sm:$0xf]  ;;  %v428_v38 = vld [vmem:[%s2101_s29 + $0x330] sm:$0xf] }
  0x55   : > { %v430_v39 = vld [vmem:[%s2101_s29 + $0x338] sm:$0xf]  ;;  %427 = vst [vmem:[%s2105_s30 + $0x194] sm:$0xf] %v426_v37  ;;  %429 = vst [vmem:[%s2105_s30 + $0x198] sm:$0xf] %v428_v38 }
  0x56   : > { %431 = vst [vmem:[%s2105_s30 + $0x19c] sm:$0xf] %v430_v39  ;;  %v432_v40 = vld [vmem:[%s2101_s29 + $0x340] sm:$0xf]  ;;  %v434_v41 = vld [vmem:[%s2101_s29 + $0x348] sm:$0xf] }
  0x57   : > { %v436_v42 = vld [vmem:[%s2101_s29 + $0x350] sm:$0xf]  ;;  %433 = vst [vmem:[%s2105_s30 + $0x1a0] sm:$0xf] %v432_v40  ;;  %435 = vst [vmem:[%s2105_s30 + $0x1a4] sm:$0xf] %v434_v41 }
  0x58   : > { %437 = vst [vmem:[%s2105_s30 + $0x1a8] sm:$0xf] %v436_v42  ;;  %v438_v43 = vld [vmem:[%s2101_s29 + $0x358] sm:$0xf]  ;;  %v440_v44 = vld [vmem:[%s2101_s29 + $0x360] sm:$0xf] }
  0x59   : > { %v442_v45 = vld [vmem:[%s2101_s29 + $0x368] sm:$0xf]  ;;  %439 = vst [vmem:[%s2105_s30 + $0x1ac] sm:$0xf] %v438_v43  ;;  %441 = vst [vmem:[%s2105_s30 + $0x1b0] sm:$0xf] %v440_v44 }
  0x5a   : > { %443 = vst [vmem:[%s2105_s30 + $0x1b4] sm:$0xf] %v442_v45  ;;  %v444_v46 = vld [vmem:[%s2101_s29 + $0x370] sm:$0xf]  ;;  %v446_v47 = vld [vmem:[%s2101_s29 + $0x378] sm:$0xf] }
  0x5b   : > { %v448_v48 = vld [vmem:[%s2101_s29 + $0x380] sm:$0xf]  ;;  %445 = vst [vmem:[%s2105_s30 + $0x1b8] sm:$0xf] %v444_v46  ;;  %447 = vst [vmem:[%s2105_s30 + $0x1bc] sm:$0xf] %v446_v47 }
  0x5c   : > { %449 = vst [vmem:[%s2105_s30 + $0x1c0] sm:$0xf] %v448_v48  ;;  %v450_v49 = vld [vmem:[%s2101_s29 + $0x388] sm:$0xf]  ;;  %v452_v50 = vld [vmem:[%s2101_s29 + $0x390] sm:$0xf] }
  0x5d   : > { %v454_v51 = vld [vmem:[%s2101_s29 + $0x398] sm:$0xf]  ;;  %451 = vst [vmem:[%s2105_s30 + $0x1c4] sm:$0xf] %v450_v49  ;;  %453 = vst [vmem:[%s2105_s30 + $0x1c8] sm:$0xf] %v452_v50 }
  0x5e   : > { %455 = vst [vmem:[%s2105_s30 + $0x1cc] sm:$0xf] %v454_v51  ;;  %v456_v52 = vld [vmem:[%s2101_s29 + $0x3a0] sm:$0xf]  ;;  %v458_v53 = vld [vmem:[%s2101_s29 + $0x3a8] sm:$0xf] }
  0x5f   : > { %v460_v54 = vld [vmem:[%s2101_s29 + $0x3b0] sm:$0xf]  ;;  %457 = vst [vmem:[%s2105_s30 + $0x1d0] sm:$0xf] %v456_v52  ;;  %459 = vst [vmem:[%s2105_s30 + $0x1d4] sm:$0xf] %v458_v53 }
  0x60   : > { %461 = vst [vmem:[%s2105_s30 + $0x1d8] sm:$0xf] %v460_v54  ;;  %v462_v55 = vld [vmem:[%s2101_s29 + $0x3b8] sm:$0xf]  ;;  %v464_v56 = vld [vmem:[%s2101_s29 + $0x3c0] sm:$0xf] }
  0x61   : > { %v466_v57 = vld [vmem:[%s2101_s29 + $0x3c8] sm:$0xf]  ;;  %463 = vst [vmem:[%s2105_s30 + $0x1dc] sm:$0xf] %v462_v55  ;;  %465 = vst [vmem:[%s2105_s30 + $0x1e0] sm:$0xf] %v464_v56 }
  0x62   : > { %467 = vst [vmem:[%s2105_s30 + $0x1e4] sm:$0xf] %v466_v57  ;;  %v468_v58 = vld [vmem:[%s2101_s29 + $0x3d0] sm:$0xf]  ;;  %v470_v59 = vld [vmem:[%s2101_s29 + $0x3d8] sm:$0xf] }
  0x63   : > { %v472_v60 = vld [vmem:[%s2101_s29 + $0x3e0] sm:$0xf]  ;;  %469 = vst [vmem:[%s2105_s30 + $0x1e8] sm:$0xf] %v468_v58  ;;  %471 = vst [vmem:[%s2105_s30 + $0x1ec] sm:$0xf] %v470_v59 }
  0x64   : > { %473 = vst [vmem:[%s2105_s30 + $0x1f0] sm:$0xf] %v472_v60  ;;  %v474_v61 = vld [vmem:[%s2101_s29 + $0x3e8] sm:$0xf]  ;;  %v476_v62 = vld [vmem:[%s2101_s29 + $0x3f0] sm:$0xf] }
  0x65   : > { %v478_v63 = vld [vmem:[%s2101_s29 + $0x3f8] sm:$0xf]  ;;  %475 = vst [vmem:[%s2105_s30 + $0x1f4] sm:$0xf] %v474_v61  ;;  %477 = vst [vmem:[%s2105_s30 + $0x1f8] sm:$0xf] %v476_v62 }
  0x66   : > { %479 = vst [vmem:[%s2105_s30 + $0x1fc] sm:$0xf] %v478_v63 }
  0x67 PF: > { %p1714_p6 = scmp.ge.s32.totalorder %s2031_s19, 1  ;;  %p769_p7 = scmp.lt.s32.totalorder %s2031_s19, 3 }
  0x69   : > { %p770_p8 = pnand %p1714_p6, %p769_p7 }
  0x6a   : > { %s776_s5 = sand.u32 (!%p770_p8), 1, %s2015_s15   ;;  %v2367_v0 = vld [vmem:[%s2492_s0] sm:$0xff] (!%p770_p8)  ;;  %v2372_v1 = vld [vmem:[%s2492_s0 + $0x8] sm:$0xff] (!%p770_p8)  ;;  %v2412_v33 = vld [vmem:[%s2492_s0 + $0x10] sm:$0xff] (!%p770_p8)  ;;  %p830_p9 = scmp.lt.s32.totalorder (!%p770_p8), %s2023_s17, 1 }
  0x6b   : > { %773 = sbr.rel (%p770_p8) target bundleno = 401 (0x191), region = 73  ;;  %s1715_s10 = sshll.u32 (!%p770_p8), %s776_s5, 9  ;;  %v1718_v2 = vcombine.high (!%p770_p8), %v2367_v0, %v2367_v0  ;;  %v1720_v3 = vcombine.high (!%p770_p8), %v2372_v1, %v2372_v1  ;;  %v2418_v35 = vld [vmem:[%s2492_s0 + $0x18] sm:$0xff] (!%p770_p8)  ;;  %v1717_v38 = vcombine.low (!%p770_p8), %v2367_v0, %v2367_v0  ;;  %v1719_v39 = vcombine.low (!%p770_p8), %v2372_v1, %v2372_v1 }
  0x6c   : > { %s2378_s11 = scalar_lea.vmem (!%p770_p8), [#allocation3], %s1715_s10  ;;  %v1722_v42 = vcombine.high (!%p770_p8), %v2412_v33, %v2412_v33  ;;  %v1724_v44 = vcombine.high (!%p770_p8), %v2418_v35, %v2418_v35 }
  0x6d   : > { %v1921_v4 = vld [vmem:[%s2378_s11 + $0x40] sm:$0xff] (!%p770_p8)   ;;  %1427 = vmatprep.mubr.bf16.mxu0 (!%p770_p8), %v1718_v2  ;;  %1467 = vmatprep.mubr.bf16.mxu1 (!%p770_p8), %v1720_v3  ;;  %v1925_v8 = vld [vmem:[%s2378_s11 + $0x48] sm:$0xff] (!%p770_p8)   ;;  %v1929_v12 = vld [vmem:[%s2378_s11 + $0x50] sm:$0xff] (!%p770_p8)  }
  0x6e   : > { %v1922_v5 = vld [vmem:[%s2378_s11 + $0xc0] sm:$0xff] (!%p770_p8)   ;;  %1793 = vmatprep.subr.bf16.mxu0 (!%p770_p8), %v1921_v4  ;;  %v1926_v9 = vld [vmem:[%s2378_s11 + $0xc8] sm:$0xff] (!%p770_p8)   ;;  %v1930_v13 = vld [vmem:[%s2378_s11 + $0xd0] sm:$0xff] (!%p770_p8)  }
  0x6f   : > { %v1923_v6 = vld [vmem:[%s2378_s11] sm:$0xff] (!%p770_p8)   ;;  %1815 = vmatprep.subr.bf16.mxu1 (!%p770_p8), %v1922_v5  ;;  %v1927_v10 = vld [vmem:[%s2378_s11 + $0x8] sm:$0xff] (!%p770_p8)   ;;  %v1931_v14 = vld [vmem:[%s2378_s11 + $0x10] sm:$0xff] (!%p770_p8)  }
  0x70   : > { %v1924_v7 = vld [vmem:[%s2378_s11 + $0x80] sm:$0xff] (!%p770_p8)   ;;  %1794 = vmatpush3.bf16.msra.mxu0 (!%p770_p8), %v1923_v6  ;;  %v1928_v11 = vld [vmem:[%s2378_s11 + $0x88] sm:$0xff] (!%p770_p8)   ;;  %v1932_v15 = vld [vmem:[%s2378_s11 + $0x90] sm:$0xff] (!%p770_p8)  }
  0x71   : > { %1816 = vmatpush3.bf16.msra.mxu1 (!%p770_p8), %v1924_v7  ;;  %1795 = vmatprep.subr.bf16.mxu0 (!%p770_p8), %v1925_v8  ;;  %v1933_v16 = vld [vmem:[%s2378_s11 + $0x58] sm:$0xff] (!%p770_p8)   ;;  %v1937_v20 = vld [vmem:[%s2378_s11 + $0x60] sm:$0xff] (!%p770_p8)   ;;  %v1941_v24 = vld [vmem:[%s2378_s11 + $0x68] sm:$0xff] (!%p770_p8)  }
  0x72   : > { %1817 = vmatprep.subr.bf16.mxu1 %v1926_v9  ;;  %v1934_v17 = vld [vmem:[%s2378_s11 + $0xd8] sm:$0xff]   ;;  %v1938_v21 = vld [vmem:[%s2378_s11 + $0xe0] sm:$0xff]   ;;  %v1942_v25 = vld [vmem:[%s2378_s11 + $0xe8] sm:$0xff]   ;;  %s2504_s17 = smov (!%p830_p9, %s2023_s17), 1 }
  0x73   : > { %v1935_v18 = vld [vmem:[%s2378_s11 + $0x18] sm:$0xff]   ;;  %v1939_v22 = vld [vmem:[%s2378_s11 + $0x20] sm:$0xff]   ;;  %v1943_v26 = vld [vmem:[%s2378_s11 + $0x28] sm:$0xff]   ;;  %s832_s24 = scalar_lea.vmem %s2494_s2, %s2504_s17  ;;  %s835_s27 = scalar_lea.vmem %s2495_s3, %s2504_s17 }
  0x74   : > { %1796 = vmatpush3.bf16.msra.mxu0 %v1927_v10  ;;  %v1936_v19 = vld [vmem:[%s2378_s11 + $0x98] sm:$0xff]   ;;  %v1940_v23 = vld [vmem:[%s2378_s11 + $0xa0] sm:$0xff]   ;;  %v1944_v27 = vld [vmem:[%s2378_s11 + $0xa8] sm:$0xff]   ;;  %v1721_v10 = vcombine.low %v2412_v33, %v2412_v33  ;;  %s1716_s28 = sshll.u32 %s2504_s17, 2 }
  0x75   : > { %1818 = vmatpush3.bf16.msra.mxu1 %v1928_v11  ;;  %1797 = vmatprep.subr.bf16.mxu0 %v1929_v12  ;;  %v1945_v28 = vld [vmem:[%s2378_s11 + $0x70] sm:$0xff]   ;;  %v1949_v32 = vld [vmem:[%s2378_s11 + $0x78] sm:$0xff]   ;;  %v1957_v40 = vld [vmem:[%s2378_s11 + $0x140] sm:$0xff]   ;;  %v1723_v11 = vcombine.low %v2418_v35, %v2418_v35  ;;  %s843_s5 = scalar_lea.vmem %s2496_s4, %s1716_s28 }
  0x76   : > { %1819 = vmatprep.subr.bf16.mxu1 %v1930_v13  ;;  %v1946_v29 = vld [vmem:[%s2378_s11 + $0xf0] sm:$0xff]   ;;  %v1950_v34 = vld [vmem:[%s2378_s11 + $0xf8] sm:$0xff]   ;;  %v1958_v41 = vld [vmem:[%s2378_s11 + $0x1c0] sm:$0xff]  }
  0x77   : > { %v1947_v30 = vld [vmem:[%s2378_s11 + $0x30] sm:$0xff]   ;;  %v1951_v36 = vld [vmem:[%s2378_s11 + $0x38] sm:$0xff]   ;;  %v1959_v43 = vld [vmem:[%s2378_s11 + $0x100] sm:$0xff]  }
  0x78   : > { %1798 = vmatpush3.bf16.msra.mxu0 %v1931_v14  ;;  %v1948_v31 = vld [vmem:[%s2378_s11 + $0xb0] sm:$0xff]   ;;  %v1952_v37 = vld [vmem:[%s2378_s11 + $0xb8] sm:$0xff]   ;;  %v1960_v45 = vld [vmem:[%s2378_s11 + $0x180] sm:$0xff]  }
  0x79   : > { %1820 = vmatpush3.bf16.msra.mxu1 %v1932_v15  ;;  %1799 = vmatprep.subr.bf16.mxu0 %v1933_v16  ;;  %v1961_v46 = vld [vmem:[%s2378_s11 + $0x148] sm:$0xff]   ;;  %v1965_v50 = vld [vmem:[%s2378_s11 + $0x150] sm:$0xff]   ;;  %v1969_v54 = vld [vmem:[%s2378_s11 + $0x158] sm:$0xff]  }
  0x7a   : > { %1821 = vmatprep.subr.bf16.mxu1 %v1934_v17  ;;  %v1962_v47 = vld [vmem:[%s2378_s11 + $0x1c8] sm:$0xff]   ;;  %v1966_v51 = vld [vmem:[%s2378_s11 + $0x1d0] sm:$0xff]   ;;  %v1970_v55 = vld [vmem:[%s2378_s11 + $0x1d8] sm:$0xff]  }
  0x7b   : > { %v1963_v48 = vld [vmem:[%s2378_s11 + $0x108] sm:$0xff]   ;;  %v1967_v52 = vld [vmem:[%s2378_s11 + $0x110] sm:$0xff]   ;;  %v1971_v56 = vld [vmem:[%s2378_s11 + $0x118] sm:$0xff]  }
  0x7c   : > { %1800 = vmatpush3.bf16.msra.mxu0 %v1935_v18  ;;  %v1964_v49 = vld [vmem:[%s2378_s11 + $0x188] sm:$0xff]   ;;  %v1968_v53 = vld [vmem:[%s2378_s11 + $0x190] sm:$0xff]   ;;  %v1972_v57 = vld [vmem:[%s2378_s11 + $0x198] sm:$0xff]  }
  0x7d   : > { %1822 = vmatpush3.bf16.msra.mxu1 %v1936_v19  ;;  %1801 = vmatprep.subr.bf16.mxu0 %v1937_v20  ;;  %v1973_v58 = vld [vmem:[%s2378_s11 + $0x160] sm:$0xff]   ;;  %v1977_v62 = vld [vmem:[%s2378_s11 + $0x168] sm:$0xff]   ;;  %v1981_v2 = vld [vmem:[%s2378_s11 + $0x170] sm:$0xff]  }
  0x7e   : > { %1823 = vmatprep.subr.bf16.mxu1 %v1938_v21  ;;  %v1974_v59 = vld [vmem:[%s2378_s11 + $0x1e0] sm:$0xff]   ;;  %v1978_v63 = vld [vmem:[%s2378_s11 + $0x1e8] sm:$0xff]   ;;  %v1982_v3 = vld [vmem:[%s2378_s11 + $0x1f0] sm:$0xff]  }
  0x7f   : > { %v1975_v60 = vld [vmem:[%s2378_s11 + $0x120] sm:$0xff]   ;;  %v1979_v0 = vld [vmem:[%s2378_s11 + $0x128] sm:$0xff]   ;;  %v1983_v4 = vld [vmem:[%s2378_s11 + $0x130] sm:$0xff]  }
  0x80   : > { %1802 = vmatpush3.bf16.msra.mxu0 %v1939_v22  ;;  %v1976_v61 = vld [vmem:[%s2378_s11 + $0x1a0] sm:$0xff]   ;;  %v1980_v1 = vld [vmem:[%s2378_s11 + $0x1a8] sm:$0xff]   ;;  %v1984_v5 = vld [vmem:[%s2378_s11 + $0x1b0] sm:$0xff]  }
  0x81   : > { %1824 = vmatpush3.bf16.msra.mxu1 %v1940_v23  ;;  %1803 = vmatprep.subr.bf16.mxu0 %v1941_v24  ;;  %v1985_v6 = vld [vmem:[%s2378_s11 + $0x178] sm:$0xff]  }
  0x82   : > { %1825 = vmatprep.subr.bf16.mxu1 %v1942_v25  ;;  %v1986_v7 = vld [vmem:[%s2378_s11 + $0x1f8] sm:$0xff]  }
  0x83   : > { %v1987_v8 = vld [vmem:[%s2378_s11 + $0x138] sm:$0xff]  }
  0x84   : > { %1804 = vmatpush3.bf16.msra.mxu0 %v1943_v26  ;;  %v1988_v9 = vld [vmem:[%s2378_s11 + $0x1b8] sm:$0xff]  }
  0x85   : > { %1826 = vmatpush3.bf16.msra.mxu1 %v1944_v27  ;;  %1805 = vmatprep.subr.bf16.mxu0 %v1945_v28 }
  0x86   : > { %1827 = vmatprep.subr.bf16.mxu1 %v1946_v29 }
  0x88   : > { %1806 = vmatpush3.bf16.msra.mxu0 %v1947_v30 }
  0x89   : > { %1828 = vmatpush3.bf16.msra.mxu1 %v1948_v31  ;;  %1807 = vmatprep.subr.bf16.mxu0 %v1949_v32 }
  0x8a   : > { %1829 = vmatprep.subr.bf16.mxu1 %v1950_v34  ;;  %v1789_v34 = vld [vmem:[%s832_s24] ss:$0 sm:$0xff] }
  0x8c   : > { %1808 = vmatpush3.bf16.msra.mxu0 %v1951_v36  ;;  %v1790_v36 = vld [vmem:[%s835_s27] ss:$0 sm:$0xff] }
  0x8d   : > { %1830 = vmatpush3.bf16.msra.mxu1 %v1952_v37  ;;  %1837 = vmatprep.subr.bf16.mxu0 %v1957_v40 }
  0x8e   : > { %1859 = vmatprep.subr.bf16.mxu1 %v1958_v41 }
  0x8f   : > { %1428 = vmatmul.mubr.bf16.vlgmr.msra.gmra.mrb[0].mxu0 %v1717_v38 }
  0x90   : > { %1468 = vmatmul.mubr.bf16.vlgmr.msra.gmra.mrb[0].mxu1 %v1719_v39  ;;  %1838 = vmatpush3.bf16.msra.mxu0 %v1959_v43 }
  0x91   : > { %1860 = vmatpush3.bf16.msra.mxu1 %v1960_v45  ;;  %1507 = vmatprep.mubr.bf16.mxu0 %v1722_v42 }
  0x92   : > { %1839 = vmatprep.subr.bf16.mxu0 %v1961_v46  ;;  %1547 = vmatprep.mubr.bf16.mxu1 %v1724_v44 }
  0x93   : > { %1861 = vmatprep.subr.bf16.mxu1 %v1962_v47 }
  0x94   : > { %1840 = vmatpush3.bf16.msra.mxu0 %v1963_v48 }
  0x95   : > { %1862 = vmatpush3.bf16.msra.mxu1 %v1964_v49  ;;  %1841 = vmatprep.subr.bf16.mxu0 %v1965_v50 }
  0x96   : > { %1863 = vmatprep.subr.bf16.mxu1 %v1966_v51 }
  0x98   : > { %1842 = vmatpush3.bf16.msra.mxu0 %v1967_v52 }
  0x99   : > { %1864 = vmatpush3.bf16.msra.mxu1 %v1968_v53  ;;  %1843 = vmatprep.subr.bf16.mxu0 %v1969_v54 }
  0x9a   : > { %1865 = vmatprep.subr.bf16.mxu1 %v1970_v55 }
  0x9c   : > { %1844 = vmatpush3.bf16.msra.mxu0 %v1971_v56 }
  0x9d   : > { %1866 = vmatpush3.bf16.msra.mxu1 %v1972_v57  ;;  %1845 = vmatprep.subr.bf16.mxu0 %v1973_v58 }
  0x9e   : > { %1867 = vmatprep.subr.bf16.mxu1 %v1974_v59 }
  0xa0   : > { %1846 = vmatpush3.bf16.msra.mxu0 %v1975_v60 }
  0xa1   : > { %1868 = vmatpush3.bf16.msra.mxu1 %v1976_v61  ;;  %1847 = vmatprep.subr.bf16.mxu0 %v1977_v62 }
  0xa2   : > { %1869 = vmatprep.subr.bf16.mxu1 %v1978_v63 }
  0xa4   : > { %1848 = vmatpush3.bf16.msra.mxu0 %v1979_v0 }
  0xa5   : > { %1870 = vmatpush3.bf16.msra.mxu1 %v1980_v1  ;;  %1849 = vmatprep.subr.bf16.mxu0 %v1981_v2 }
  0xa6   : > { %1871 = vmatprep.subr.bf16.mxu1 %v1982_v3 }
  0xa8   : > { %1850 = vmatpush3.bf16.msra.mxu0 %v1983_v4 }
  0xa9   : > { %1872 = vmatpush3.bf16.msra.mxu1 %v1984_v5  ;;  %1851 = vmatprep.subr.bf16.mxu0 %v1985_v6 }
  0xaa   : > { %1873 = vmatprep.subr.bf16.mxu1 %v1986_v7 }
  0xac   : > { %1852 = vmatpush3.bf16.msra.mxu0 %v1987_v8 }
  0xad   : > { %1874 = vmatpush3.bf16.msra.mxu1 %v1988_v9 }
  0xaf   : > { %1508 = vmatmul.mubr.bf16.vlgmr.msra.gmra.mrb[4].mxu0 %v1721_v10 }
  0xb0   : > { %1548 = vmatmul.mubr.bf16.vlgmr.msra.gmra.mrb[4].mxu1 %v1723_v11 }
 0x162   : > { %v1809_v12 = vpop.f32.mrb[0].mxu0 }
 0x163   : > { %v1831_v13 = vpop.f32.mrb[0].mxu1  ;;  %v1810_v14 = vpop.f32.mrb[1].mxu0 }
 0x164   : > { %v1811_v15 = vadd.f32 %v1810_v14, %v1809_v12  ;;  %v1832_v16 = vpop.f32.mrb[1].mxu1  ;;  %v1812_v17 = vpop.f32.mrb[2].mxu0 }
 0x165   : > { %v1833_v18 = vadd.f32 %v1832_v16, %v1831_v13  ;;  %v1834_v19 = vpop.f32.mrb[2].mxu1  ;;  %v1813_v20 = vpop.f32.mrb[3].mxu0 }
 0x166   : > { %v1835_v21 = vpop.f32.mrb[3].mxu1 }
 0x167   : > { %v1470_v22 = vadd.f32 %v1833_v18, %v1811_v15 }
 0x182   : > { %v1853_v23 = vpop.f32.mrb[4].mxu0 }
 0x183   : > { %v1875_v24 = vpop.f32.mrb[4].mxu1  ;;  %v1854_v25 = vpop.f32.mrb[5].mxu0 }
 0x184   : > { %v1855_v26 = vadd.f32 %v1854_v25, %v1853_v23  ;;  %v1876_v27 = vpop.f32.mrb[5].mxu1  ;;  %v1856_v28 = vpop.f32.mrb[6].mxu0 }
 0x185   : > { %v1877_v29 = vadd.f32 %v1876_v27, %v1875_v24  ;;  %v1878_v30 = vpop.f32.mrb[6].mxu1  ;;  %v1857_v31 = vpop.f32.mrb[7].mxu0 }
 0x186   : > { %v1510_v32 = vadd.f32 %v1855_v26, %v1470_v22  ;;  %v1879_v33 = vpop.f32.mrb[7].mxu1 }
 0x188   : > { %v1550_v35 = vadd.f32 %v1877_v29, %v1510_v32 }
 0x18a   : > { %v1568_v37 = vmul.f32 %v1789_v34, %v1550_v35 }
 0x18c   : > { %v1576_v38 = vadd.f32 %v1790_v36, %v1568_v37 }
 0x18e   : > { %v1577_v39 = vpack.c.bf16 %v1576_v38, %v1576_v38 }
 0x190   : > { %1578 = vst [vmem:[%s843_s5] sm:$0xf] %v1577_v39 }
 0x191 PF: > { %s14_s19 = sadd.s32 1, %s2031_s19   ;;  %s2497_s15 = smov %s2019_s16 }
 0x192   : > { %p11_p10 = scmp.ge.s32.totalorder %s14_s19, 4   ;;  %s2498_s16 = smov %s2093_s23 }
 0x193   : > { %s2499_s17 = smov %s2027_s18  ;;  %s2500_s18 = smov %s2502_s20 }
 0x194   :  { %13 = sbr.rel (!%p11_p10) target bundleno = 3 (0x3), region = 129 }

// kernel: _lambda_.35
= control target key start
LH: loop header
LB: loop body
LE: loop exit
PB: predicated region body
PF: predicated region fallthrough
CT: control target
= control target key end

     0   :  { %s1455_s15 = smov 0   ;;  %s1457_s16 = smov 0   ;;  %s1713_s0 = inlined_call_operand.vmem [shape: bf16[128,384], index: 0, kind: input, shape index: {}]   ;;  %s1714_s1 = inlined_call_operand.vmem [shape: bf16[384,256], index: 1, kind: input, shape index: {}]   ;;  %s1715_s2 = inlined_call_operand.vmem [shape: f32[1,256], index: 2, kind: input, shape index: {}]   ;;  %s1716_s3 = inlined_call_operand.vmem [shape: f32[1,256], index: 3, kind: input, shape index: {}]   ;;  %s1717_s4 = inlined_call_operand.vmem [shape: bf16[128,256], index: 4, kind: output, shape index: {}]  }
   0x1   :  { %s1459_s17 = smov 0  }
   0x2 LB: > { %s33_s18 = sadd.s32 1, %s1423_s16  ;;  %p1190_p0 = scmp.ge.s32.totalorder %s1427_s17, 1  ;;  %s1427_s17 = sphi %s1459_s17, %s14_s17   ;;  %s1423_s16 = sphi %s1457_s16, %s1719_s16   ;;  %s1419_s15 = sphi %s1455_s15, %s1718_s15  }
   0x3   : > { %p35_p1 = scmp.ge.s32.totalorder %s33_s18, 2  ;;  %p231_p2 = scmp.lt.s32.totalorder %s1427_s17, 3 }
   0x5   : > { %s1721_s18 = smov (%p35_p1, %s33_s18), 0  ;;  %p232_p3 = pnand %p1190_p0, %p231_p2 }
   0x6   : > { %v1317_v0 = vld [vmem:[%s1714_s1 + $0x4] ss:$8 sps:$4 sm:$0xff] (!%p232_p3)   ;;  %v1319_v1 = vld [vmem:[%s1714_s1] ss:$8 sps:$4 sm:$0xff] (!%p232_p3)   ;;  %v1429_v2 = vmov (!%p232_p3), 0   ;;  %s1191_s29 = sshll.u32 (!%p232_p3), %s1419_s15, 3 }
   0x7   : > { %235 = sbr.rel (%p232_p3) target bundleno = 319 (0x13f), region = 36  ;;  %841 = vmatprep.mubr.bf16.mxu0 (!%p232_p3), %v1429_v2  ;;  %736 = vmatprep.subr.bf16.mxu1 (!%p232_p3), %v1317_v0  ;;  %v1320_v3 = vld [vmem:[%s1714_s1 + $0x14] ss:$8 sps:$4 sm:$0xff] (!%p232_p3)   ;;  %v1322_v4 = vld [vmem:[%s1714_s1 + $0x10] ss:$8 sps:$4 sm:$0xff] (!%p232_p3)   ;;  %p287_p4 = scmp.lt.s32.totalorder (!%p232_p3), %s1191_s29, 15 }
   0x8   : > { %737 = vmatpush1.bf16.msra.mxu1 (!%p232_p3), %v1319_v1  ;;  %v1323_v5 = vld [vmem:[%s1714_s1 + $0x24] ss:$8 sps:$4 sm:$0xff] (!%p232_p3)   ;;  %v1325_v6 = vld [vmem:[%s1714_s1 + $0x20] ss:$8 sps:$4 sm:$0xff] (!%p232_p3)   ;;  %v1326_v7 = vld [vmem:[%s1714_s1 + $0x34] ss:$8 sps:$4 sm:$0xff] (!%p232_p3)   ;;  %v935_v1 = vlaneseq (!%p232_p3) }
   0x9   : > { %738 = vmatprep.subr.bf16.mxu1 (!%p232_p3), %v1320_v3  ;;  %v1328_v8 = vld [vmem:[%s1714_s1 + $0x30] ss:$8 sps:$4 sm:$0xff] (!%p232_p3)   ;;  %v1341_v9 = vld [vmem:[%s1714_s1 + $0x104] ss:$8 sps:$4 sm:$0xff] (!%p232_p3)   ;;  %v1343_v10 = vld [vmem:[%s1714_s1 + $0x100] ss:$8 sps:$4 sm:$0xff] (!%p232_p3)  }
   0xa   : > { %v1329_v11 = vld [vmem:[%s1714_s1 + $0x44] ss:$8 sps:$4 sm:$0xff] (!%p232_p3)   ;;  %809 = vmatprep.subr.bf16.mxu0 (!%p232_p3), %v1341_v9  ;;  %v1347_v12 = vld [vmem:[%s1714_s1 + $0x114] ss:$8 sps:$4 sm:$0xff] (!%p232_p3)   ;;  %v1349_v13 = vld [vmem:[%s1714_s1 + $0x110] ss:$8 sps:$4 sm:$0xff] (!%p232_p3)  }
   0xb   : > { %810 = vmatpush1.bf16.msra.mxu0 (!%p232_p3), %v1343_v10  ;;  %v1331_v14 = vld [vmem:[%s1714_s1 + $0x40] ss:$8 sps:$4 sm:$0xff] (!%p232_p3)   ;;  %v1332_v15 = vld [vmem:[%s1714_s1 + $0x54] ss:$8 sps:$4 sm:$0xff] (!%p232_p3)   ;;  %v1353_v16 = vld [vmem:[%s1714_s1 + $0x124] ss:$8 sps:$4 sm:$0xff] (!%p232_p3)  }
   0xc   : > { %739 = vmatpush1.bf16.msra.mxu1 (!%p232_p3), %v1322_v4  ;;  %811 = vmatprep.subr.bf16.mxu0 (!%p232_p3), %v1347_v12  ;;  %v1355_v17 = vld [vmem:[%s1714_s1 + $0x120] ss:$8 sps:$4 sm:$0xff] (!%p232_p3)   ;;  %v1334_v18 = vld [vmem:[%s1714_s1 + $0x50] ss:$8 sps:$4 sm:$0xff] (!%p232_p3)   ;;  %v1359_v19 = vld [vmem:[%s1714_s1 + $0x134] ss:$8 sps:$4 sm:$0xff] (!%p232_p3)  }
   0xd   : > { %740 = vmatprep.subr.bf16.mxu1 (!%p232_p3), %v1323_v5  ;;  %v1335_v20 = vld [vmem:[%s1714_s1 + $0x64] ss:$8 sps:$4 sm:$0xff] (!%p232_p3)   ;;  %v1361_v21 = vld [vmem:[%s1714_s1 + $0x130] ss:$8 sps:$4 sm:$0xff] (!%p232_p3)   ;;  %v1337_v22 = vld [vmem:[%s1714_s1 + $0x60] ss:$8 sps:$4 sm:$0xff] (!%p232_p3)  }
   0xe   : > { %v1365_v23 = vld [vmem:[%s1714_s1 + $0x144] ss:$8 sps:$4 sm:$0xff]   ;;  %s1723_s29 = smov (!%p287_p4, %s1191_s29), 15  ;;  %v1338_v24 = vld [vmem:[%s1714_s1 + $0x74] ss:$8 sps:$4 sm:$0xff]  }
   0xf   : > { %812 = vmatpush1.bf16.msra.mxu0 %v1349_v13  ;;  %v1367_v25 = vld [vmem:[%s1714_s1 + $0x140] ss:$8 sps:$4 sm:$0xff]   ;;  %v1340_v26 = vld [vmem:[%s1714_s1 + $0x70] ss:$8 sps:$4 sm:$0xff]   ;;  %v1371_v27 = vld [vmem:[%s1714_s1 + $0x154] ss:$8 sps:$4 sm:$0xff]  }
  0x10   : > { %741 = vmatpush1.bf16.msra.mxu1 %v1325_v6  ;;  %813 = vmatprep.subr.bf16.mxu0 %v1353_v16  ;;  %s1291_s30 = smul.u32 12, %s1723_s29  ;;  %v1344_v28 = vld [vmem:[%s1714_s1 + $0x84] ss:$8 sps:$4 sm:$0xff]   ;;  %v1373_v29 = vld [vmem:[%s1714_s1 + $0x150] ss:$8 sps:$4 sm:$0xff]   ;;  %v936_v6 = vshrl.u32 %v935_v1, 7 }
  0x11   : > { %742 = vmatprep.subr.bf16.mxu1 %v1326_v7  ;;  %v1346_v30 = vld [vmem:[%s1714_s1 + $0x80] ss:$8 sps:$4 sm:$0xff]   ;;  %v1377_v31 = vld [vmem:[%s1714_s1 + $0x164] ss:$8 sps:$4 sm:$0xff]   ;;  %v1350_v32 = vld [vmem:[%s1714_s1 + $0x94] ss:$8 sps:$4 sm:$0xff]  }
  0x12   : > { %s1576_s14 = scalar_lea.vmem %s1713_s0, %s1291_s30  ;;  %v1352_v33 = vld [vmem:[%s1714_s1 + $0x90] ss:$8 sps:$4 sm:$0xff]   ;;  %v1379_v34 = vld [vmem:[%s1714_s1 + $0x160] ss:$8 sps:$4 sm:$0xff]   ;;  %v1383_v36 = vld [vmem:[%s1714_s1 + $0x174] ss:$8 sps:$4 sm:$0xff]  }
  0x13   : > { %814 = vmatpush1.bf16.msra.mxu0 %v1355_v17  ;;  %v1392_v35 = vld [vmem:[%s1576_s14 + $0x4] ss:$12 sps:$4 sm:$0xff]   ;;  %v1358_v39 = vld [vmem:[%s1714_s1 + $0xa0] ss:$8 sps:$4 sm:$0xff]   ;;  %v1362_v40 = vld [vmem:[%s1714_s1 + $0xb4] ss:$8 sps:$4 sm:$0xff]  }
  0x14   : > { %743 = vmatpush1.bf16.msra.mxu1 %v1328_v8  ;;  %815 = vmatprep.subr.bf16.mxu0 %v1359_v19  ;;  %v1356_v37 = vld [vmem:[%s1714_s1 + $0xa4] ss:$8 sps:$4 sm:$0xff]   ;;  %v1385_v38 = vld [vmem:[%s1714_s1 + $0x170] ss:$8 sps:$4 sm:$0xff]   ;;  %v1389_v41 = vld [vmem:[%s1576_s14 + $0x8] ss:$12 sps:$4 sm:$0xff]  }
  0x15   : > { %744 = vmatprep.subr.bf16.mxu1 %v1329_v11  ;;  %768 = vmatprep.mubr.bf16.mxu1 %v1392_v35  ;;  %v1364_v42 = vld [vmem:[%s1714_s1 + $0xb0] ss:$8 sps:$4 sm:$0xff]   ;;  %v1368_v43 = vld [vmem:[%s1714_s1 + $0xc4] ss:$8 sps:$4 sm:$0xff]   ;;  %v1370_v44 = vld [vmem:[%s1714_s1 + $0xc0] ss:$8 sps:$4 sm:$0xff]  }
  0x16   : > { %v1374_v45 = vld [vmem:[%s1714_s1 + $0xd4] ss:$8 sps:$4 sm:$0xff]   ;;  %v1393_v46 = vld [vmem:[%s1576_s14 + $0x20] ss:$12 sps:$4 sm:$0xff]   ;;  %v1376_v47 = vld [vmem:[%s1714_s1 + $0xd0] ss:$8 sps:$4 sm:$0xff]  }
  0x17   : > { %816 = vmatpush1.bf16.msra.mxu0 %v1361_v21  ;;  %v1380_v48 = vld [vmem:[%s1714_s1 + $0xe4] ss:$8 sps:$4 sm:$0xff]   ;;  %v1382_v49 = vld [vmem:[%s1714_s1 + $0xe0] ss:$8 sps:$4 sm:$0xff]   ;;  %v1386_v50 = vld [vmem:[%s1714_s1 + $0xf4] ss:$8 sps:$4 sm:$0xff]  }
  0x18   : > { %745 = vmatpush1.bf16.msra.mxu1 %v1331_v14  ;;  %817 = vmatprep.subr.bf16.mxu0 %v1365_v23  ;;  %v1397_v51 = vld [vmem:[%s1576_s14 + $0x38] ss:$12 sps:$4 sm:$0xff]   ;;  %v1390_v53 = vld [vmem:[%s1576_s14] ss:$12 sps:$4 sm:$0xff]   ;;  %v1394_v54 = vld [vmem:[%s1576_s14 + $0x1c] ss:$12 sps:$4 sm:$0xff]  }
  0x19   : > { %746 = vmatprep.subr.bf16.mxu1 %v1332_v15  ;;  %v1388_v52 = vld [vmem:[%s1714_s1 + $0xf0] ss:$8 sps:$4 sm:$0xff]   ;;  %v1398_v57 = vld [vmem:[%s1576_s14 + $0x34] ss:$12 sps:$4 sm:$0xff]   ;;  %v937_v7 = vsub.s32 0, %v936_v6  ;;  %v941_v10 = vsub.s32 1, %v936_v6 }
  0x1a   : > { %v1401_v55 = vld [vmem:[%s1576_s14 + $0x50] ss:$12 sps:$4 sm:$0xff]   ;;  %v1396_v56 = vld [vmem:[%s1576_s14 + $0x18] ss:$12 sps:$4 sm:$0xff]   ;;  %v1404_v60 = vld [vmem:[%s1576_s14 + $0x48] ss:$12 sps:$4 sm:$0xff]  }
  0x1b   : > { %818 = vmatpush1.bf16.msra.mxu0 %v1367_v25  ;;  %v1400_v58 = vld [vmem:[%s1576_s14 + $0x30] ss:$12 sps:$4 sm:$0xff]   ;;  %v1402_v59 = vld [vmem:[%s1576_s14 + $0x4c] ss:$12 sps:$4 sm:$0xff]   ;;  %v933_v9 = vld [vmem:[%s1715_s2] sm:$0x3] }
  0x1c   : > { %747 = vmatpush1.bf16.msra.mxu1 %v1334_v18  ;;  %819 = vmatprep.subr.bf16.mxu0 %v1371_v27  ;;  %v961_v13 = vld [vmem:[%s1716_s3] sm:$0x3]  ;;  %v1650_v15 = vrot.slane %v933_v9, %v937_v7  ;;  %v1652_v17 = vrot.slane %v933_v9, %v941_v10  ;;  %s1266_s10 = sshll.u32 %s1723_s29, 3 }
  0x1d   : > { %748 = vmatprep.subr.bf16.mxu1 %v1335_v20  ;;  %v1654_v19 = vrot.slane %v961_v13, %v937_v7  ;;  %s1668_s12 = scalar_lea.vmem %s1717_s4, %s1266_s10 }
  0x1f   : > { %820 = vmatpush1.bf16.msra.mxu0 %v1373_v29 }
  0x20   : > { %749 = vmatpush1.bf16.msra.mxu1 %v1337_v22  ;;  %821 = vmatprep.subr.bf16.mxu0 %v1377_v31  ;;  %v1656_v22 = vrot.slane %v961_v13, %v941_v10 }
  0x21   : > { %750 = vmatprep.subr.bf16.mxu1 %v1338_v24 }
  0x23   : > { %822 = vmatpush1.bf16.msra.mxu0 %v1379_v34 }
  0x24   : > { %751 = vmatpush1.bf16.msra.mxu1 %v1340_v26  ;;  %823 = vmatprep.subr.bf16.mxu0 %v1383_v36 }
  0x25   : > { %752 = vmatprep.subr.bf16.mxu1 %v1344_v28 }
  0x27   : > { %824 = vmatpush1.bf16.msra.mxu0 %v1385_v38 }
  0x28   : > { %753 = vmatpush1.bf16.msra.mxu1 %v1346_v30 }
  0x29   : > { %754 = vmatprep.subr.bf16.mxu1 %v1350_v32 }
  0x2a   : > { %842 = vmatmul.mubr.bf16.vlgmr.msra.gmra.mrb[0].mxu0 %v1389_v41 }
  0x2b   : > { %851 = vmatprep.mubr.bf16.mxu0 %v1429_v2 }
  0x2c   : > { %755 = vmatpush1.bf16.msra.mxu1 %v1352_v33 }
  0x2d   : > { %756 = vmatprep.subr.bf16.mxu1 %v1356_v37 }
  0x30   : > { %757 = vmatpush1.bf16.msra.mxu1 %v1358_v39 }
  0x31   : > { %758 = vmatprep.subr.bf16.mxu1 %v1362_v40 }
  0x32   : > { %852 = vmatmul.mubr.bf16.gmra.mrb[4].mxu0 %v1393_v46 }
  0x33   : > { %861 = vmatprep.mubr.bf16.mxu0 %v1429_v2 }
  0x34   : > { %759 = vmatpush1.bf16.msra.mxu1 %v1364_v42 }
  0x35   : > { %760 = vmatprep.subr.bf16.mxu1 %v1368_v43 }
  0x38   : > { %761 = vmatpush1.bf16.msra.mxu1 %v1370_v44 }
  0x39   : > { %762 = vmatprep.subr.bf16.mxu1 %v1374_v45 }
  0x3a   : > { %862 = vmatmul.mubr.bf16.gmra.mrb[8].mxu0 %v1397_v51 }
  0x3b   : > { %871 = vmatprep.mubr.bf16.mxu0 %v1429_v2 }
  0x3c   : > { %763 = vmatpush1.bf16.msra.mxu1 %v1376_v47 }
  0x3d   : > { %764 = vmatprep.subr.bf16.mxu1 %v1380_v48 }
  0x40   : > { %765 = vmatpush1.bf16.msra.mxu1 %v1382_v49 }
  0x41   : > { %766 = vmatprep.subr.bf16.mxu1 %v1386_v50 }
  0x42   : > { %872 = vmatmul.mubr.bf16.gmra.mrb[12].mxu0 %v1401_v55 }
  0x44   : > { %767 = vmatpush1.bf16.msra.mxu1 %v1388_v52 }
  0x47   : > { %769 = vmatmul.mubr.bf16.vlgmr.msra.gmra.mrb[0].mxu1 %v1390_v53 }
  0x48   : > { %778 = vmatprep.mubr.bf16.mxu1 %v1394_v54 }
  0x4f   : > { %779 = vmatmul.mubr.bf16.gmra.mrb[4].mxu1 %v1396_v56 }
  0x50   : > { %788 = vmatprep.mubr.bf16.mxu1 %v1398_v57 }
  0x57   : > { %789 = vmatmul.mubr.bf16.gmra.mrb[8].mxu1 %v1400_v58 }
  0x58   : > { %798 = vmatprep.mubr.bf16.mxu1 %v1402_v59 }
  0x5f   : > { %799 = vmatmul.mubr.bf16.gmra.mrb[12].mxu1 %v1404_v60 }
  0xfd   : > { %v843_v61 = vpop.f32.mrb[0].mxu0 }
  0xfe   : > { %v845_v62 = vpop.f32.mrb[1].mxu0 }
  0xff   : > { %v847_v63 = vpop.f32.mrb[2].mxu0 }
 0x100   : > { %v849_v0 = vpop.f32.mrb[3].mxu0 }
 0x105   : > { %v853_v2 = vpop.f32.mrb[4].mxu0 }
 0x106   : > { %v855_v3 = vpop.f32.mrb[5].mxu0 }
 0x107   : > { %v857_v4 = vpop.f32.mrb[6].mxu0 }
 0x108   : > { %v859_v5 = vpop.f32.mrb[7].mxu0 }
 0x10d   : > { %v863_v8 = vpop.f32.mrb[8].mxu0 }
 0x10e   : > { %v865_v11 = vpop.f32.mrb[9].mxu0 }
 0x10f   : > { %v867_v12 = vpop.f32.mrb[10].mxu0 }
 0x110   : > { %v869_v14 = vpop.f32.mrb[11].mxu0 }
 0x115   : > { %v873_v27 = vpop.f32.mrb[12].mxu0 }
 0x116   : > { %v875_v30 = vpop.f32.mrb[13].mxu0 }
 0x117   : > { %v877_v33 = vpop.f32.mrb[14].mxu0 }
 0x118   : > { %v879_v36 = vpop.f32.mrb[15].mxu0 }
 0x11a   : > { %v770_v16 = vpop.f32.mrb[0].mxu1 }
 0x11b   : > { %v844_v18 = vadd.f32 %v843_v61, %v770_v16  ;;  %v772_v20 = vpop.f32.mrb[1].mxu1 }
 0x11c   : > { %v846_v21 = vadd.f32 %v845_v62, %v772_v20  ;;  %v774_v23 = vpop.f32.mrb[2].mxu1 }
 0x11d   : > { %v945_v24 = vmul.f32 %v1650_v15, %v844_v18  ;;  %v848_v25 = vadd.f32 %v847_v63, %v774_v23  ;;  %v776_v26 = vpop.f32.mrb[3].mxu1 }
 0x11e   : > { %v946_v28 = vmul.f32 %v1652_v17, %v846_v21  ;;  %v850_v29 = vadd.f32 %v849_v0, %v776_v26 }
 0x11f   : > { %v973_v31 = vadd.f32 %v1654_v19, %v945_v24  ;;  %v947_v32 = vmul.f32 %v1650_v15, %v848_v25 }
 0x120   : > { %v974_v34 = vadd.f32 %v1656_v22, %v946_v28  ;;  %v948_v35 = vmul.f32 %v1652_v17, %v850_v29 }
 0x121   : > { %v975_v37 = vadd.f32 %v1654_v19, %v947_v32 }
 0x122   : > { %v1267_v38 = vpack.c.bf16 %v974_v34, %v973_v31  ;;  %v976_v39 = vadd.f32 %v1656_v22, %v948_v35  ;;  %v780_v40 = vpop.f32.mrb[4].mxu1 }
 0x123   : > { %v854_v41 = vadd.f32 %v853_v2, %v780_v40  ;;  %v782_v42 = vpop.f32.mrb[5].mxu1 }
 0x124   : > { %1037 = vst [vmem:[%s1668_s12] sm:$0xff] %v1267_v38  ;;  %v1268_v43 = vpack.c.bf16 %v976_v39, %v975_v37  ;;  %v856_v44 = vadd.f32 %v855_v3, %v782_v42  ;;  %v784_v45 = vpop.f32.mrb[6].mxu1 }
 0x125   : > { %v949_v46 = vmul.f32 %v1650_v15, %v854_v41  ;;  %v858_v47 = vadd.f32 %v857_v4, %v784_v45  ;;  %v786_v48 = vpop.f32.mrb[7].mxu1 }
 0x126   : > { %1038 = vst [vmem:[%s1668_s12 + $0x8] sm:$0xff] %v1268_v43  ;;  %v950_v49 = vmul.f32 %v1652_v17, %v856_v44  ;;  %v860_v50 = vadd.f32 %v859_v5, %v786_v48 }
 0x127   : > { %v977_v51 = vadd.f32 %v1654_v19, %v949_v46  ;;  %v951_v52 = vmul.f32 %v1650_v15, %v858_v47 }
 0x128   : > { %v978_v53 = vadd.f32 %v1656_v22, %v950_v49  ;;  %v952_v54 = vmul.f32 %v1652_v17, %v860_v50 }
 0x129   : > { %v979_v55 = vadd.f32 %v1654_v19, %v951_v52 }
 0x12a   : > { %v1269_v56 = vpack.c.bf16 %v978_v53, %v977_v51  ;;  %v980_v57 = vadd.f32 %v1656_v22, %v952_v54  ;;  %v790_v58 = vpop.f32.mrb[8].mxu1 }
 0x12b   : > { %v864_v59 = vadd.f32 %v863_v8, %v790_v58  ;;  %v792_v60 = vpop.f32.mrb[9].mxu1 }
 0x12c   : > { %1039 = vst [vmem:[%s1668_s12 + $0x10] sm:$0xff] %v1269_v56  ;;  %v1270_v61 = vpack.c.bf16 %v980_v57, %v979_v55  ;;  %v866_v62 = vadd.f32 %v865_v11, %v792_v60  ;;  %v794_v63 = vpop.f32.mrb[10].mxu1 }
 0x12d   : > { %v953_v0 = vmul.f32 %v1650_v15, %v864_v59  ;;  %v868_v1 = vadd.f32 %v867_v12, %v794_v63  ;;  %v796_v2 = vpop.f32.mrb[11].mxu1 }
 0x12e   : > { %1040 = vst [vmem:[%s1668_s12 + $0x18] sm:$0xff] %v1270_v61  ;;  %v954_v3 = vmul.f32 %v1652_v17, %v866_v62  ;;  %v870_v4 = vadd.f32 %v869_v14, %v796_v2 }
 0x12f   : > { %v981_v5 = vadd.f32 %v1654_v19, %v953_v0  ;;  %v955_v6 = vmul.f32 %v1650_v15, %v868_v1 }
 0x130   : > { %v982_v7 = vadd.f32 %v1656_v22, %v954_v3  ;;  %v956_v8 = vmul.f32 %v1652_v17, %v870_v4 }
 0x131   : > { %v983_v9 = vadd.f32 %v1654_v19, %v955_v6 }
 0x132   : > { %v1271_v10 = vpack.c.bf16 %v982_v7, %v981_v5  ;;  %v984_v11 = vadd.f32 %v1656_v22, %v956_v8  ;;  %v800_v12 = vpop.f32.mrb[12].mxu1 }
 0x133   : > { %v874_v13 = vadd.f32 %v873_v27, %v800_v12  ;;  %v802_v16 = vpop.f32.mrb[13].mxu1 }
 0x134   : > { %1041 = vst [vmem:[%s1668_s12 + $0x20] sm:$0xff] %v1271_v10  ;;  %v1272_v18 = vpack.c.bf16 %v984_v11, %v983_v9  ;;  %v876_v14 = vadd.f32 %v875_v30, %v802_v16  ;;  %v804_v20 = vpop.f32.mrb[14].mxu1 }
 0x135   : > { %v957_v21 = vmul.f32 %v1650_v15, %v874_v13  ;;  %v878_v23 = vadd.f32 %v877_v33, %v804_v20  ;;  %v806_v24 = vpop.f32.mrb[15].mxu1 }
 0x136   : > { %1042 = vst [vmem:[%s1668_s12 + $0x28] sm:$0xff] %v1272_v18  ;;  %v958_v25 = vmul.f32 %v1652_v17, %v876_v14  ;;  %v880_v26 = vadd.f32 %v879_v36, %v806_v24 }
 0x137   : > { %v985_v28 = vadd.f32 %v1654_v19, %v957_v21  ;;  %v959_v29 = vmul.f32 %v1650_v15, %v878_v23 }
 0x138   : > { %v986_v27 = vadd.f32 %v1656_v22, %v958_v25  ;;  %v960_v31 = vmul.f32 %v1652_v17, %v880_v26 }
 0x139   : > { %v987_v30 = vadd.f32 %v1654_v19, %v959_v29 }
 0x13a   : > { %v1273_v32 = vpack.c.bf16 %v986_v27, %v985_v28  ;;  %v988_v34 = vadd.f32 %v1656_v22, %v960_v31 }
 0x13c   : > { %1043 = vst [vmem:[%s1668_s12 + $0x30] sm:$0xff] %v1273_v32  ;;  %v1274_v33 = vpack.c.bf16 %v988_v34, %v987_v30 }
 0x13e   : > { %1044 = vst [vmem:[%s1668_s12 + $0x38] sm:$0xff] %v1274_v33 }
 0x13f PF: > { %s14_s17 = sadd.s32 1, %s1427_s17   ;;  %s1718_s15 = smov %s1423_s16 }
 0x140   : > { %p11_p5 = scmp.ge.s32.totalorder %s14_s17, 4   ;;  %s1719_s16 = smov %s1721_s18 }
 0x142   :  { %13 = sbr.rel (!%p11_p5) target bundleno = 2 (0x2), region = 83 }

// kernel: _lambda_.32
= control target key start
LH: loop header
LB: loop body
LE: loop exit
PB: predicated region body
PF: predicated region fallthrough
CT: control target
= control target key end

     0   :  { %s1475_s15 = smov 0   ;;  %s1477_s16 = smov 0   ;;  %s1732_s0 = inlined_call_operand.vmem [shape: bf16[128,128], index: 0, kind: input, shape index: {}]   ;;  %s1733_s1 = inlined_call_operand.vmem [shape: bf16[128,512], index: 1, kind: input, shape index: {}]   ;;  %s1734_s2 = inlined_call_operand.vmem [shape: f32[1,512], index: 2, kind: input, shape index: {}]   ;;  %s1735_s3 = inlined_call_operand.vmem [shape: f32[1,512], index: 3, kind: input, shape index: {}]   ;;  %s1736_s4 = inlined_call_operand.vmem [shape: bf16[128,512], index: 4, kind: output, shape index: {}]  }
   0x1   :  { %s1479_s17 = smov 0   ;;  %s1481_s18 = smov 0  }
   0x2   :  { %s1483_s19 = smov 0  }
   0x3 LB: > { %s29_s20 = sadd.s32 1, %s1443_s18  ;;  %s1244_s21 = sadd.s32 4294967295, %s1447_s19   ;;  %s1447_s19 = sphi %s1483_s19, %s14_s19   ;;  %s1443_s18 = sphi %s1481_s18, %s1741_s18   ;;  %s1439_s17 = sphi %s1479_s17, %s1740_s17   ;;  %s1435_s16 = sphi %s1477_s16, %s1739_s16   ;;  %s1431_s15 = sphi %s1475_s15, %s1738_s15  }
   0x4   : > { %p31_p0 = scmp.ge.s32.totalorder %s29_s20, 2  ;;  %p77_p1 = scmp.ne.s32.totalorder %s1435_s16, %s1431_s15 }
   0x5   : > { %p78_p2 = scmp.eq.s32.totalorder %s1447_s19, 0  ;;  %p161_p4 = scmp.eq.s32.totalorder %s1244_s21, 1 }
   0x6   : > { %s1743_s20 = smov (%p31_p0, %s29_s20), 0  ;;  %s70_s23 = sadd.s32 1, %s1435_s16 }
   0x7   : > { %p79_p3 = por %p78_p2, %p77_p1  ;;  %s66_s22 = ssub.s32 %s1443_s18, %s1743_s20 }
   0x8   : > { %p68_p5 = scmp.eq.s32.totalorder %s66_s22, 0  ;;  %p1510_p6 = por %p161_p4, %p77_p1 }
   0x9   : > { %p1248_p7 = scmp.ge.s32.totalorder %s1447_s19, 2 }
   0xa   : > { %s1515_s25 = scalar_select %p68_p5, %s1435_s16, %s70_s23  }
   0xb   : > { %195 = sbr.rel (%p1248_p7) target bundleno = 30 (0x1e), region = 20 }
  0x12   : > { %198 = sbr.rel (!%p79_p3) target bundleno = 30 (0x1e), region = 24  ;;  %s200_s26 = sand.u32 (%p79_p3), 1, %s1435_s16  }
  0x13   : > { %s1302_s27 = sshll.u32 (%p79_p3), %s1443_s18, 3  ;;  %s1249_s28 = sshll.u32 (%p79_p3), %s200_s26, 7 }
  0x14   : > { %s1523_s5 = scalar_lea.vmem (%p79_p3), %s1733_s1, %s1302_s27  ;;  %s202_s6 = scalar_lea.vmem (%p79_p3), [#allocation3], %s1249_s28 }
  0x15   : > { %v266_v0 = vld [vmem:[%s1523_s5] sm:$0xff] (%p79_p3)  ;;  %v268_v1 = vld [vmem:[%s1523_s5 + $0x10] sm:$0xff] (%p79_p3) }
  0x16   : > { %v270_v2 = vld [vmem:[%s1523_s5 + $0x20] sm:$0xff] (%p79_p3)  ;;  %267 = vst [vmem:[%s202_s6] sm:$0xff] (%p79_p3), %v266_v0  ;;  %269 = vst [vmem:[%s202_s6 + $0x8] sm:$0xff] (%p79_p3), %v268_v1  ;;  %v272_v3 = vld [vmem:[%s1523_s5 + $0x30] sm:$0xff] (%p79_p3) }
  0x17   : > { %271 = vst [vmem:[%s202_s6 + $0x10] sm:$0xff] (%p79_p3), %v270_v2  ;;  %v274_v4 = vld [vmem:[%s1523_s5 + $0x40] sm:$0xff] (%p79_p3)  ;;  %v276_v5 = vld [vmem:[%s1523_s5 + $0x50] sm:$0xff] (%p79_p3)  ;;  %273 = vst [vmem:[%s202_s6 + $0x18] sm:$0xff] (%p79_p3), %v272_v3 }
  0x18   : > { %275 = vst [vmem:[%s202_s6 + $0x20] sm:$0xff] (%p79_p3), %v274_v4  ;;  %277 = vst [vmem:[%s202_s6 + $0x28] sm:$0xff] (%p79_p3), %v276_v5  ;;  %v278_v6 = vld [vmem:[%s1523_s5 + $0x60] sm:$0xff] (%p79_p3)  ;;  %v280_v7 = vld [vmem:[%s1523_s5 + $0x70] sm:$0xff] (%p79_p3) }
  0x19   : > { %v282_v8 = vld [vmem:[%s1523_s5 + $0x80] sm:$0xff]  ;;  %279 = vst [vmem:[%s202_s6 + $0x30] sm:$0xff] %v278_v6  ;;  %281 = vst [vmem:[%s202_s6 + $0x38] sm:$0xff] %v280_v7  ;;  %v284_v9 = vld [vmem:[%s1523_s5 + $0x90] sm:$0xff] }
  0x1a   : > { %283 = vst [vmem:[%s202_s6 + $0x40] sm:$0xff] %v282_v8  ;;  %v286_v10 = vld [vmem:[%s1523_s5 + $0xa0] sm:$0xff]  ;;  %v288_v11 = vld [vmem:[%s1523_s5 + $0xb0] sm:$0xff]  ;;  %285 = vst [vmem:[%s202_s6 + $0x48] sm:$0xff] %v284_v9 }
  0x1b   : > { %287 = vst [vmem:[%s202_s6 + $0x50] sm:$0xff] %v286_v10  ;;  %289 = vst [vmem:[%s202_s6 + $0x58] sm:$0xff] %v288_v11  ;;  %v290_v12 = vld [vmem:[%s1523_s5 + $0xc0] sm:$0xff]  ;;  %v292_v13 = vld [vmem:[%s1523_s5 + $0xd0] sm:$0xff] }
  0x1c   : > { %v294_v14 = vld [vmem:[%s1523_s5 + $0xe0] sm:$0xff]  ;;  %291 = vst [vmem:[%s202_s6 + $0x60] sm:$0xff] %v290_v12  ;;  %293 = vst [vmem:[%s202_s6 + $0x68] sm:$0xff] %v292_v13  ;;  %v296_v15 = vld [vmem:[%s1523_s5 + $0xf0] sm:$0xff] }
  0x1d   : > { %295 = vst [vmem:[%s202_s6 + $0x70] sm:$0xff] %v294_v14  ;;  %297 = vst [vmem:[%s202_s6 + $0x78] sm:$0xff] %v296_v15 }
  0x1e PF: > { %p1252_p8 = scmp.ge.s32.totalorder %s1447_s19, 1  ;;  %p318_p9 = scmp.lt.s32.totalorder %s1447_s19, 3 }
  0x20   : > { %p319_p10 = pnand %p1252_p8, %p318_p9 }
  0x21   : > { %s325_s7 = sand.u32 (!%p319_p10), 1, %s1431_s15   ;;  %v1449_v16 = vmov (!%p319_p10), 0   ;;  %v1401_v33 = vld [vmem:[%s1732_s0] sm:$0xff] (!%p319_p10)   ;;  %v1403_v35 = vld [vmem:[%s1732_s0 + $0x8] sm:$0xff] (!%p319_p10)   ;;  %v1405_v37 = vld [vmem:[%s1732_s0 + $0x10] sm:$0xff] (!%p319_p10)   ;;  %v831_v41 = vlaneseq (!%p319_p10) }
  0x22   : > { %322 = sbr.rel (%p319_p10) target bundleno = 324 (0x144), region = 70  ;;  %s1544_s8 = sshll.u32 (!%p319_p10), %s325_s7, 7  ;;  %649 = vmatprep.mubr.bf16.mxu0 (!%p319_p10), %v1449_v16  ;;  %689 = vmatprep.mubr.bf16.mxu1 (!%p319_p10), %v1449_v16  ;;  %v1402_v34 = vld [vmem:[%s1732_s0 + $0x20] sm:$0xff] (!%p319_p10)   ;;  %v1404_v36 = vld [vmem:[%s1732_s0 + $0x28] sm:$0xff] (!%p319_p10)   ;;  %v1406_v38 = vld [vmem:[%s1732_s0 + $0x30] sm:$0xff] (!%p319_p10)  }
  0x23   : > { %s1549_s9 = scalar_lea.vmem (!%p319_p10), [#allocation3], %s1544_s8  ;;  %v1407_v39 = vld [vmem:[%s1732_s0 + $0x18] sm:$0xff] (!%p319_p10)   ;;  %s1255_s7 = sshll.u32 (!%p319_p10), %s1439_s17, 1  ;;  %v832_v42 = vshrl.u32 (!%p319_p10), %v831_v41, 7 }
  0x24   : > { %v1377_v17 = vld [vmem:[%s1549_s9 + $0x4] ss:$8 sps:$4 sm:$0xff] (!%p319_p10)   ;;  %v1379_v18 = vld [vmem:[%s1549_s9] ss:$8 sps:$4 sm:$0xff] (!%p319_p10)   ;;  %v1380_v19 = vld [vmem:[%s1549_s9 + $0x14] ss:$8 sps:$4 sm:$0xff] (!%p319_p10)  }
  0x25   : > { %617 = vmatprep.subr.bf16.mxu0 (!%p319_p10), %v1377_v17  ;;  %1320 = vmatprep.subr.bf16.mxu1 (!%p319_p10), %v1377_v17  ;;  %v1382_v20 = vld [vmem:[%s1549_s9 + $0x10] ss:$8 sps:$4 sm:$0xff] (!%p319_p10)   ;;  %v1383_v21 = vld [vmem:[%s1549_s9 + $0x24] ss:$8 sps:$4 sm:$0xff] (!%p319_p10)   ;;  %v1385_v22 = vld [vmem:[%s1549_s9 + $0x20] ss:$8 sps:$4 sm:$0xff] (!%p319_p10)  }
  0x26   : > { %618 = vmatpush1.bf16.msra.mxu0 (!%p319_p10), %v1379_v18  ;;  %1328 = vmatpush1.bf16.msra.mxu1 (!%p319_p10), %v1379_v18  ;;  %v1386_v23 = vld [vmem:[%s1549_s9 + $0x34] ss:$8 sps:$4 sm:$0xff] (!%p319_p10)   ;;  %v1388_v24 = vld [vmem:[%s1549_s9 + $0x30] ss:$8 sps:$4 sm:$0xff] (!%p319_p10)   ;;  %v1389_v25 = vld [vmem:[%s1549_s9 + $0x44] ss:$8 sps:$4 sm:$0xff] (!%p319_p10)  }
  0x27   : > { %619 = vmatprep.subr.bf16.mxu0 (!%p319_p10), %v1380_v19  ;;  %1321 = vmatprep.subr.bf16.mxu1 (!%p319_p10), %v1380_v19  ;;  %v1391_v26 = vld [vmem:[%s1549_s9 + $0x40] ss:$8 sps:$4 sm:$0xff] (!%p319_p10)   ;;  %v1392_v27 = vld [vmem:[%s1549_s9 + $0x54] ss:$8 sps:$4 sm:$0xff] (!%p319_p10)   ;;  %v1394_v28 = vld [vmem:[%s1549_s9 + $0x50] ss:$8 sps:$4 sm:$0xff] (!%p319_p10)  }
  0x28   : > { %v1395_v29 = vld [vmem:[%s1549_s9 + $0x64] ss:$8 sps:$4 sm:$0xff] (!%p319_p10)   ;;  %v1397_v30 = vld [vmem:[%s1549_s9 + $0x60] ss:$8 sps:$4 sm:$0xff] (!%p319_p10)   ;;  %v1398_v31 = vld [vmem:[%s1549_s9 + $0x74] ss:$8 sps:$4 sm:$0xff] (!%p319_p10)  }
  0x29   : > { %v1400_v32 = vld [vmem:[%s1549_s9 + $0x70] ss:$8 sps:$4 sm:$0xff]   ;;  %p377_p11 = scmp.lt.s32.totalorder %s1255_s7, 3  ;;  %v833_v43 = vsub.s32 0, %v832_v42  ;;  %v837_v45 = vsub.s32 1, %v832_v42  ;;  %s1629_s15 = scalar_lea.vmem [#allocation4], %s1544_s8 }
  0x2a   : > { %620 = vmatpush1.bf16.msra.mxu0 %v1382_v20  ;;  %1329 = vmatpush1.bf16.msra.mxu1 %v1382_v20  ;;  %v1408_v40 = vld [vmem:[%s1732_s0 + $0x38] sm:$0xff]   ;;  %s1319_s8 = sshll.u32 (%p1510_p6), %s1439_s17, 3 }
  0x2b   : > { %621 = vmatprep.subr.bf16.mxu0 %v1383_v21  ;;  %1322 = vmatprep.subr.bf16.mxu1 %v1383_v21  ;;  %s1745_s7 = smov (!%p377_p11, %s1255_s7), 3  ;;  %s1041_s23 = scalar_lea.vmem (%p1510_p6), %s1736_s4, %s1319_s8 }
  0x2c   : > { %s379_s11 = scalar_lea.vmem %s1734_s2, %s1745_s7  ;;  %s384_s14 = scalar_lea.vmem %s1735_s3, %s1745_s7 }
  0x2d   : > { %v829_v44 = vld [vmem:[%s379_s11] sm:$0x3] }
  0x2e   : > { %622 = vmatpush1.bf16.msra.mxu0 %v1385_v22  ;;  %1330 = vmatpush1.bf16.msra.mxu1 %v1385_v22  ;;  %v873_v46 = vld [vmem:[%s384_s14] sm:$0x3]  ;;  %v1604_v47 = vrot.slane %v829_v44, %v833_v43  ;;  %v1606_v48 = vrot.slane %v829_v44, %v837_v45 }
  0x2f   : > { %623 = vmatprep.subr.bf16.mxu0 %v1386_v23  ;;  %1323 = vmatprep.subr.bf16.mxu1 %v1386_v23  ;;  %v1608_v49 = vrot.slane %v873_v46, %v833_v43  ;;  %v1610_v52 = vrot.slane %v873_v46, %v837_v45 }
  0x32   : > { %624 = vmatpush1.bf16.msra.mxu0 %v1388_v24  ;;  %1331 = vmatpush1.bf16.msra.mxu1 %v1388_v24 }
  0x33   : > { %625 = vmatprep.subr.bf16.mxu0 %v1389_v25  ;;  %1324 = vmatprep.subr.bf16.mxu1 %v1389_v25 }
  0x36   : > { %626 = vmatpush1.bf16.msra.mxu0 %v1391_v26  ;;  %1332 = vmatpush1.bf16.msra.mxu1 %v1391_v26 }
  0x37   : > { %627 = vmatprep.subr.bf16.mxu0 %v1392_v27  ;;  %1325 = vmatprep.subr.bf16.mxu1 %v1392_v27 }
  0x3a   : > { %628 = vmatpush1.bf16.msra.mxu0 %v1394_v28  ;;  %1333 = vmatpush1.bf16.msra.mxu1 %v1394_v28 }
  0x3b   : > { %629 = vmatprep.subr.bf16.mxu0 %v1395_v29  ;;  %1326 = vmatprep.subr.bf16.mxu1 %v1395_v29 }
  0x3e   : > { %630 = vmatpush1.bf16.msra.mxu0 %v1397_v30  ;;  %1334 = vmatpush1.bf16.msra.mxu1 %v1397_v30 }
  0x3f   : > { %631 = vmatprep.subr.bf16.mxu0 %v1398_v31  ;;  %1327 = vmatprep.subr.bf16.mxu1 %v1398_v31 }
  0x42   : > { %632 = vmatpush1.bf16.msra.mxu0 %v1400_v32  ;;  %1335 = vmatpush1.bf16.msra.mxu1 %v1400_v32 }
  0x45   : > { %650 = vmatmul.mubr.bf16.vlgmr.msra.gmra.mrb[0].mxu0 %v1401_v33  ;;  %690 = vmatmul.mubr.bf16.vlgmr.msra.gmra.mrb[0].mxu1 %v1402_v34 }
  0x46   : > { %659 = vmatprep.mubr.bf16.mxu0 %v1449_v16  ;;  %699 = vmatprep.mubr.bf16.mxu1 %v1449_v16 }
  0x4d   : > { %660 = vmatmul.mubr.bf16.gmra.mrb[4].mxu0 %v1403_v35  ;;  %700 = vmatmul.mubr.bf16.gmra.mrb[4].mxu1 %v1404_v36 }
  0x4e   : > { %669 = vmatprep.mubr.bf16.mxu0 %v1449_v16  ;;  %709 = vmatprep.mubr.bf16.mxu1 %v1449_v16 }
  0x55   : > { %670 = vmatmul.mubr.bf16.gmra.mrb[8].mxu0 %v1405_v37  ;;  %710 = vmatmul.mubr.bf16.gmra.mrb[8].mxu1 %v1406_v38 }
  0x56   : > { %679 = vmatprep.mubr.bf16.mxu0 %v1449_v16  ;;  %719 = vmatprep.mubr.bf16.mxu1 %v1449_v16 }
  0x5d   : > { %680 = vmatmul.mubr.bf16.gmra.mrb[12].mxu0 %v1407_v39  ;;  %720 = vmatmul.mubr.bf16.gmra.mrb[12].mxu1 %v1408_v40 }
 0x118   : > { %v651_v50 = vpop.f32.mrb[0].mxu0  ;;  %v691_v51 = vpop.f32.mrb[0].mxu1 }
 0x119   : > { %v841_v53 = vmul.f32 %v1604_v47, %v651_v50  ;;  %v857_v54 = vmul.f32 %v1604_v47, %v691_v51  ;;  %v653_v55 = vpop.f32.mrb[1].mxu0  ;;  %v693_v56 = vpop.f32.mrb[1].mxu1 }
 0x11a   : > { %v842_v57 = vmul.f32 %v1606_v48, %v653_v55  ;;  %v858_v58 = vmul.f32 %v1606_v48, %v693_v56  ;;  %v655_v59 = vpop.f32.mrb[2].mxu0  ;;  %v695_v60 = vpop.f32.mrb[2].mxu1 }
 0x11b   : > { %v885_v61 = vadd.f32 %v1608_v49, %v841_v53  ;;  %v901_v62 = vadd.f32 %v1608_v49, %v857_v54  ;;  %v843_v63 = vmul.f32 %v1604_v47, %v655_v59  ;;  %v859_v0 = vmul.f32 %v1604_v47, %v695_v60  ;;  %v657_v1 = vpop.f32.mrb[3].mxu0  ;;  %v697_v2 = vpop.f32.mrb[3].mxu1 }
 0x11c   : > { %v886_v3 = vadd.f32 %v1610_v52, %v842_v57  ;;  %v902_v4 = vadd.f32 %v1610_v52, %v858_v58  ;;  %v844_v5 = vmul.f32 %v1606_v48, %v657_v1  ;;  %v860_v6 = vmul.f32 %v1606_v48, %v697_v2 }
 0x11d   : > { %v887_v7 = vadd.f32 %v1608_v49, %v843_v63  ;;  %v903_v8 = vadd.f32 %v1608_v49, %v859_v0 }
 0x11e   : > { %v1303_v9 = vpack.c.bf16 %v886_v3, %v885_v61  ;;  %v1311_v10 = vpack.c.bf16 %v902_v4, %v901_v62  ;;  %v888_v11 = vadd.f32 %v1610_v52, %v844_v5  ;;  %v904_v12 = vadd.f32 %v1610_v52, %v860_v6 }
 0x120   : > { %1013 = vst [vmem:[%s1629_s15] sm:$0xff] %v1303_v9  ;;  %1021 = vst [vmem:[%s1629_s15 + $0x40] sm:$0xff] %v1311_v10  ;;  %v1304_v13 = vpack.c.bf16 %v888_v11, %v887_v7  ;;  %v1312_v14 = vpack.c.bf16 %v904_v12, %v903_v8  ;;  %v661_v15 = vpop.f32.mrb[4].mxu0  ;;  %v701_v16 = vpop.f32.mrb[4].mxu1 }
 0x121   : > { %v845_v17 = vmul.f32 %v1604_v47, %v661_v15  ;;  %v861_v18 = vmul.f32 %v1604_v47, %v701_v16  ;;  %v663_v19 = vpop.f32.mrb[5].mxu0  ;;  %v703_v20 = vpop.f32.mrb[5].mxu1 }
 0x122   : > { %1014 = vst [vmem:[%s1629_s15 + $0x8] sm:$0xff] %v1304_v13  ;;  %1022 = vst [vmem:[%s1629_s15 + $0x48] sm:$0xff] %v1312_v14  ;;  %v846_v21 = vmul.f32 %v1606_v48, %v663_v19  ;;  %v862_v22 = vmul.f32 %v1606_v48, %v703_v20  ;;  %v665_v23 = vpop.f32.mrb[6].mxu0  ;;  %v705_v24 = vpop.f32.mrb[6].mxu1 }
 0x123   : > { %v889_v25 = vadd.f32 %v1608_v49, %v845_v17  ;;  %v905_v26 = vadd.f32 %v1608_v49, %v861_v18  ;;  %v847_v27 = vmul.f32 %v1604_v47, %v665_v23  ;;  %v863_v28 = vmul.f32 %v1604_v47, %v705_v24  ;;  %v667_v29 = vpop.f32.mrb[7].mxu0  ;;  %v707_v30 = vpop.f32.mrb[7].mxu1 }
 0x124   : > { %v890_v31 = vadd.f32 %v1610_v52, %v846_v21  ;;  %v906_v32 = vadd.f32 %v1610_v52, %v862_v22  ;;  %v848_v33 = vmul.f32 %v1606_v48, %v667_v29  ;;  %v864_v34 = vmul.f32 %v1606_v48, %v707_v30 }
 0x125   : > { %v891_v35 = vadd.f32 %v1608_v49, %v847_v27  ;;  %v907_v36 = vadd.f32 %v1608_v49, %v863_v28 }
 0x126   : > { %v1305_v37 = vpack.c.bf16 %v890_v31, %v889_v25  ;;  %v1313_v38 = vpack.c.bf16 %v906_v32, %v905_v26  ;;  %v892_v39 = vadd.f32 %v1610_v52, %v848_v33  ;;  %v908_v40 = vadd.f32 %v1610_v52, %v864_v34 }
 0x128   : > { %1015 = vst [vmem:[%s1629_s15 + $0x10] sm:$0xff] %v1305_v37  ;;  %1023 = vst [vmem:[%s1629_s15 + $0x50] sm:$0xff] %v1313_v38  ;;  %v1306_v41 = vpack.c.bf16 %v892_v39, %v891_v35  ;;  %v1314_v42 = vpack.c.bf16 %v908_v40, %v907_v36  ;;  %v671_v43 = vpop.f32.mrb[8].mxu0  ;;  %v711_v44 = vpop.f32.mrb[8].mxu1 }
 0x129   : > { %v849_v45 = vmul.f32 %v1604_v47, %v671_v43  ;;  %v865_v46 = vmul.f32 %v1604_v47, %v711_v44  ;;  %v673_v50 = vpop.f32.mrb[9].mxu0  ;;  %v713_v51 = vpop.f32.mrb[9].mxu1  ;;  %v1115_v43 = vld [vmem:[%s1629_s15 + $0x40] sm:$0xff] (%p1510_p6)  ;;  %v1117_v44 = vld [vmem:[%s1629_s15 + $0x48] sm:$0xff] (%p1510_p6) }
 0x12a   : > { %1016 = vst [vmem:[%s1629_s15 + $0x18] sm:$0xff] %v1306_v41  ;;  %1024 = vst [vmem:[%s1629_s15 + $0x58] sm:$0xff] %v1314_v42  ;;  %v850_v53 = vmul.f32 %v1606_v48, %v673_v50  ;;  %v866_v54 = vmul.f32 %v1606_v48, %v713_v51  ;;  %v675_v55 = vpop.f32.mrb[10].mxu0  ;;  %v715_v56 = vpop.f32.mrb[10].mxu1 }
 0x12b   : > { %v893_v57 = vadd.f32 %v1608_v49, %v849_v45  ;;  %v909_v58 = vadd.f32 %v1608_v49, %v865_v46  ;;  %v851_v59 = vmul.f32 %v1604_v47, %v675_v55  ;;  %v867_v60 = vmul.f32 %v1604_v47, %v715_v56  ;;  %v677_v61 = vpop.f32.mrb[11].mxu0  ;;  %v717_v62 = vpop.f32.mrb[11].mxu1  ;;  %1116 = vst [vmem:[%s1041_s23 + $0x80] sm:$0xff] (%p1510_p6), %v1115_v43 }
 0x12c   : > { %v894_v63 = vadd.f32 %v1610_v52, %v850_v53  ;;  %v910_v0 = vadd.f32 %v1610_v52, %v866_v54  ;;  %v852_v1 = vmul.f32 %v1606_v48, %v677_v61  ;;  %v868_v2 = vmul.f32 %v1606_v48, %v717_v62  ;;  %1118 = vst [vmem:[%s1041_s23 + $0x90] sm:$0xff] (%p1510_p6), %v1117_v44 }
 0x12d   : > { %v895_v3 = vadd.f32 %v1608_v49, %v851_v59  ;;  %v911_v4 = vadd.f32 %v1608_v49, %v867_v60 }
 0x12e   : > { %v1307_v5 = vpack.c.bf16 %v894_v63, %v893_v57  ;;  %v1315_v6 = vpack.c.bf16 %v910_v0, %v909_v58  ;;  %v896_v7 = vadd.f32 %v1610_v52, %v852_v1  ;;  %v912_v8 = vadd.f32 %v1610_v52, %v868_v2 }
 0x12f   : > { %v1119_v45 = vld [vmem:[%s1629_s15 + $0x50] sm:$0xff] (%p1510_p6) }
 0x130   : > { %1017 = vst [vmem:[%s1629_s15 + $0x20] sm:$0xff] %v1307_v5  ;;  %1025 = vst [vmem:[%s1629_s15 + $0x60] sm:$0xff] %v1315_v6  ;;  %v1308_v9 = vpack.c.bf16 %v896_v7, %v895_v3  ;;  %v1316_v10 = vpack.c.bf16 %v912_v8, %v911_v4  ;;  %v681_v11 = vpop.f32.mrb[12].mxu0  ;;  %v721_v12 = vpop.f32.mrb[12].mxu1 }
 0x131   : > { %v853_v13 = vmul.f32 %v1604_v47, %v681_v11  ;;  %v869_v14 = vmul.f32 %v1604_v47, %v721_v12  ;;  %v683_v15 = vpop.f32.mrb[13].mxu0  ;;  %v723_v16 = vpop.f32.mrb[13].mxu1  ;;  %v1105_v38 = vld [vmem:[%s1629_s15 + $0x18] sm:$0xff] (%p1510_p6)  ;;  %1120 = vst [vmem:[%s1041_s23 + $0xa0] sm:$0xff] (%p1510_p6), %v1119_v45 }
 0x132   : > { %1018 = vst [vmem:[%s1629_s15 + $0x28] sm:$0xff] %v1308_v9  ;;  %1026 = vst [vmem:[%s1629_s15 + $0x68] sm:$0xff] %v1316_v10  ;;  %v854_v17 = vmul.f32 %v1606_v48, %v683_v15  ;;  %v870_v18 = vmul.f32 %v1606_v48, %v723_v16  ;;  %v685_v19 = vpop.f32.mrb[14].mxu0  ;;  %v725_v20 = vpop.f32.mrb[14].mxu1  ;;  %v1121_v46 = vld [vmem:[%s1629_s15 + $0x58] sm:$0xff] (%p1510_p6) }
 0x133   : > { %v897_v21 = vadd.f32 %v1608_v49, %v853_v13  ;;  %v913_v22 = vadd.f32 %v1608_v49, %v869_v14  ;;  %v855_v23 = vmul.f32 %v1604_v47, %v685_v19  ;;  %v871_v24 = vmul.f32 %v1604_v47, %v725_v20  ;;  %v687_v25 = vpop.f32.mrb[15].mxu0  ;;  %v727_v26 = vpop.f32.mrb[15].mxu1  ;;  %1106 = vst [vmem:[%s1041_s23 + $0x30] sm:$0xff] (%p1510_p6), %v1105_v38 }
 0x134   : > { %v898_v27 = vadd.f32 %v1610_v52, %v854_v17  ;;  %v914_v28 = vadd.f32 %v1610_v52, %v870_v18  ;;  %v856_v29 = vmul.f32 %v1606_v48, %v687_v25  ;;  %v872_v30 = vmul.f32 %v1606_v48, %v727_v26  ;;  %1035 = sbr.rel (!%p1510_p6) target bundleno = 324 (0x144), region = 86  ;;  %v1099_v48 = vld [vmem:[%s1629_s15] sm:$0xff] (%p1510_p6)  ;;  %1122 = vst [vmem:[%s1041_s23 + $0xb0] sm:$0xff] (%p1510_p6), %v1121_v46 }
 0x135   : > { %v899_v31 = vadd.f32 %v1608_v49, %v855_v23  ;;  %v915_v32 = vadd.f32 %v1608_v49, %v871_v24  ;;  %v1101_v49 = vld [vmem:[%s1629_s15 + $0x8] sm:$0xff] (%p1510_p6)  ;;  %1100 = vst [vmem:[%s1041_s23] sm:$0xff] (%p1510_p6), %v1099_v48 }
 0x136   : > { %v1309_v33 = vpack.c.bf16 %v898_v27, %v897_v21  ;;  %v1317_v34 = vpack.c.bf16 %v914_v28, %v913_v22  ;;  %v900_v47 = vadd.f32 %v1610_v52, %v856_v29  ;;  %v916_v35 = vadd.f32 %v1610_v52, %v872_v30  ;;  %v1103_v52 = vld [vmem:[%s1629_s15 + $0x10] sm:$0xff] (%p1510_p6)  ;;  %1102 = vst [vmem:[%s1041_s23 + $0x10] sm:$0xff] (%p1510_p6), %v1101_v49 }
 0x137   : > { %v1107_v39 = vld [vmem:[%s1629_s15 + $0x20] sm:$0xff] (%p1510_p6)  ;;  %1104 = vst [vmem:[%s1041_s23 + $0x20] sm:$0xff] (%p1510_p6), %v1103_v52 }
 0x138   : > { %1019 = vst [vmem:[%s1629_s15 + $0x30] sm:$0xff] %v1309_v33  ;;  %1027 = vst [vmem:[%s1629_s15 + $0x70] sm:$0xff] %v1317_v34  ;;  %v1310_v36 = vpack.c.bf16 %v900_v47, %v899_v31  ;;  %v1318_v37 = vpack.c.bf16 %v916_v35, %v915_v32  ;;  %v1123_v50 = vld [vmem:[%s1629_s15 + $0x60] sm:$0xff] (%p1510_p6) }
 0x139   : > { %v1109_v40 = vld [vmem:[%s1629_s15 + $0x28] sm:$0xff] (%p1510_p6)  ;;  %1108 = vst [vmem:[%s1041_s23 + $0x40] sm:$0xff] (%p1510_p6), %v1107_v39  ;;  %1124 = vst [vmem:[%s1041_s23 + $0xc0] sm:$0xff] (%p1510_p6), %v1123_v50 }
 0x13a   : > { %1020 = vst [vmem:[%s1629_s15 + $0x38] sm:$0xff] %v1310_v36  ;;  %1028 = vst [vmem:[%s1629_s15 + $0x78] sm:$0xff] %v1318_v37  ;;  %v1125_v51 = vld [vmem:[%s1629_s15 + $0x68] sm:$0xff] (%p1510_p6) }
 0x13b   : > { %1110 = vst [vmem:[%s1041_s23 + $0x50] sm:$0xff] %v1109_v40  ;;  %1126 = vst [vmem:[%s1041_s23 + $0xd0] sm:$0xff] %v1125_v51 }
 0x13f   : > { %v1111_v41 = vld [vmem:[%s1629_s15 + $0x30] sm:$0xff] }
 0x140   : > { %1112 = vst [vmem:[%s1041_s23 + $0x60] sm:$0xff] %v1111_v41  ;;  %v1127_v53 = vld [vmem:[%s1629_s15 + $0x70] sm:$0xff] }
 0x141   : > { %v1113_v42 = vld [vmem:[%s1629_s15 + $0x38] sm:$0xff]  ;;  %1128 = vst [vmem:[%s1041_s23 + $0xe0] sm:$0xff] %v1127_v53 }
 0x142   : > { %1114 = vst [vmem:[%s1041_s23 + $0x70] sm:$0xff] %v1113_v42  ;;  %v1129_v54 = vld [vmem:[%s1629_s15 + $0x78] sm:$0xff] }
 0x143   : > { %1130 = vst [vmem:[%s1041_s23 + $0xf0] sm:$0xff] %v1129_v54 }
 0x144 PF: > { %s14_s19 = sadd.s32 1, %s1447_s19   ;;  %s1738_s15 = smov %s1435_s16 }
 0x145   : > { %p11_p12 = scmp.ge.s32.totalorder %s14_s19, 4   ;;  %s1739_s16 = smov %s1515_s25 }
 0x146   : > { %s1740_s17 = smov %s1443_s18  ;;  %s1741_s18 = smov %s1743_s20 }
 0x147   :  { %13 = sbr.rel (!%p11_p12) target bundleno = 3 (0x3), region = 164 }

// kernel: _lambda_.33
= control target key start
LH: loop header
LB: loop body
LE: loop exit
PB: predicated region body
PF: predicated region fallthrough
CT: control target
= control target key end

     0   :  { %s1031_s15 = smov 0   ;;  %s1033_s16 = smov 0   ;;  %s1156_s0 = inlined_call_operand.vmem [shape: bf16[32,128], index: 0, kind: input, shape index: {}]   ;;  %s1157_s1 = inlined_call_operand.vmem [shape: bf16[128,768], index: 1, kind: input, shape index: {}]   ;;  %s1158_s2 = inlined_call_operand.vmem [shape: f32[1,768], index: 2, kind: input, shape index: {}]   ;;  %s1159_s3 = inlined_call_operand.vmem [shape: f32[1,768], index: 3, kind: input, shape index: {}]   ;;  %s1160_s4 = inlined_call_operand.vmem [shape: bf16[32,768], index: 4, kind: output, shape index: {}]  }
   0x1   :  { %s1035_s17 = smov 0   ;;  %s1037_s18 = smov 0  }
   0x2   :  { %s1039_s19 = smov 0  }
   0x3 LB: > { %s29_s20 = sadd.s32 1, %s999_s18  ;;  %s836_s21 = sadd.s32 4294967295, %s1003_s19   ;;  %s1003_s19 = sphi %s1039_s19, %s14_s19   ;;  %s999_s18 = sphi %s1037_s18, %s1165_s18   ;;  %s995_s17 = sphi %s1035_s17, %s1164_s17   ;;  %s991_s16 = sphi %s1033_s16, %s1163_s16   ;;  %s987_s15 = sphi %s1031_s15, %s1162_s15  }
   0x4   : > { %p31_p0 = scmp.ge.s32.totalorder %s29_s20, 3  ;;  %p77_p1 = scmp.ne.s32.totalorder %s991_s16, %s987_s15 }
   0x5   : > { %p78_p2 = scmp.eq.s32.totalorder %s1003_s19, 0  ;;  %p161_p4 = scmp.eq.s32.totalorder %s836_s21, 2 }
   0x6   : > { %s1167_s20 = smov (%p31_p0, %s29_s20), 0  ;;  %s70_s23 = sadd.s32 1, %s991_s16 }
   0x7   : > { %p79_p3 = por %p78_p2, %p77_p1  ;;  %s66_s22 = ssub.s32 %s999_s18, %s1167_s20 }
   0x8   : > { %p68_p5 = scmp.eq.s32.totalorder %s66_s22, 0  ;;  %p1066_p6 = por %p161_p4, %p77_p1 }
   0x9   : > { %p840_p7 = scmp.ge.s32.totalorder %s1003_s19, 3 }
   0xa   : > { %s1071_s25 = scalar_select %p68_p5, %s991_s16, %s70_s23  }
   0xb   : > { %195 = sbr.rel (%p840_p7) target bundleno = 30 (0x1e), region = 20 }
  0x12   : > { %198 = sbr.rel (!%p79_p3) target bundleno = 30 (0x1e), region = 24  ;;  %s200_s26 = sand.u32 (%p79_p3), 1, %s991_s16  }
  0x13   : > { %s876_s27 = sshll.u32 (%p79_p3), %s999_s18, 3  ;;  %s841_s28 = sshll.u32 (%p79_p3), %s200_s26, 7 }
  0x14   : > { %s1079_s5 = scalar_lea.vmem (%p79_p3), %s1157_s1, %s876_s27  ;;  %s202_s6 = scalar_lea.vmem (%p79_p3), [#allocation3], %s841_s28 }
  0x15   : > { %v266_v0 = vld [vmem:[%s1079_s5] sm:$0xff] (%p79_p3)  ;;  %v268_v1 = vld [vmem:[%s1079_s5 + $0x18] sm:$0xff] (%p79_p3)  ;;  %v270_v2 = vld [vmem:[%s1079_s5 + $0x30] sm:$0xff] (%p79_p3) }
  0x16   : > { %267 = vst [vmem:[%s202_s6] sm:$0xff] (%p79_p3), %v266_v0  ;;  %269 = vst [vmem:[%s202_s6 + $0x8] sm:$0xff] (%p79_p3), %v268_v1  ;;  %v272_v3 = vld [vmem:[%s1079_s5 + $0x48] sm:$0xff] (%p79_p3)  ;;  %v274_v4 = vld [vmem:[%s1079_s5 + $0x60] sm:$0xff] (%p79_p3) }
  0x17   : > { %271 = vst [vmem:[%s202_s6 + $0x10] sm:$0xff] (%p79_p3), %v270_v2  ;;  %v276_v5 = vld [vmem:[%s1079_s5 + $0x78] sm:$0xff] (%p79_p3)  ;;  %273 = vst [vmem:[%s202_s6 + $0x18] sm:$0xff] (%p79_p3), %v272_v3  ;;  %v278_v6 = vld [vmem:[%s1079_s5 + $0x90] sm:$0xff] (%p79_p3) }
  0x18   : > { %275 = vst [vmem:[%s202_s6 + $0x20] sm:$0xff] (%p79_p3), %v274_v4  ;;  %277 = vst [vmem:[%s202_s6 + $0x28] sm:$0xff] (%p79_p3), %v276_v5  ;;  %v280_v7 = vld [vmem:[%s1079_s5 + $0xa8] sm:$0xff] (%p79_p3)  ;;  %v282_v8 = vld [vmem:[%s1079_s5 + $0xc0] sm:$0xff] (%p79_p3) }
  0x19   : > { %279 = vst [vmem:[%s202_s6 + $0x30] sm:$0xff] %v278_v6  ;;  %281 = vst [vmem:[%s202_s6 + $0x38] sm:$0xff] %v280_v7  ;;  %v284_v9 = vld [vmem:[%s1079_s5 + $0xd8] sm:$0xff]  ;;  %v286_v10 = vld [vmem:[%s1079_s5 + $0xf0] sm:$0xff] }
  0x1a   : > { %283 = vst [vmem:[%s202_s6 + $0x40] sm:$0xff] %v282_v8  ;;  %v288_v11 = vld [vmem:[%s1079_s5 + $0x108] sm:$0xff]  ;;  %285 = vst [vmem:[%s202_s6 + $0x48] sm:$0xff] %v284_v9  ;;  %v290_v12 = vld [vmem:[%s1079_s5 + $0x120] sm:$0xff] }
  0x1b   : > { %287 = vst [vmem:[%s202_s6 + $0x50] sm:$0xff] %v286_v10  ;;  %289 = vst [vmem:[%s202_s6 + $0x58] sm:$0xff] %v288_v11  ;;  %v292_v13 = vld [vmem:[%s1079_s5 + $0x138] sm:$0xff]  ;;  %v294_v14 = vld [vmem:[%s1079_s5 + $0x150] sm:$0xff] }
  0x1c   : > { %291 = vst [vmem:[%s202_s6 + $0x60] sm:$0xff] %v290_v12  ;;  %293 = vst [vmem:[%s202_s6 + $0x68] sm:$0xff] %v292_v13  ;;  %v296_v15 = vld [vmem:[%s1079_s5 + $0x168] sm:$0xff] }
  0x1d   : > { %295 = vst [vmem:[%s202_s6 + $0x70] sm:$0xff] %v294_v14  ;;  %297 = vst [vmem:[%s202_s6 + $0x78] sm:$0xff] %v296_v15 }
  0x1e PF: > { %p844_p8 = scmp.ge.s32.totalorder %s1003_s19, 1  ;;  %p318_p9 = scmp.lt.s32.totalorder %s1003_s19, 4 }
  0x20   : > { %p319_p10 = pnand %p844_p8, %p318_p9 }
  0x21   : > { %s325_s7 = sand.u32 (!%p319_p10), 1, %s987_s15   ;;  %v1005_v16 = vmov (!%p319_p10), 0   ;;  %v963_v33 = vld [vmem:[%s1156_s0] sm:$0xff] (!%p319_p10)   ;;  %v964_v34 = vld [vmem:[%s1156_s0 + $0x8] sm:$0xff] (!%p319_p10)   ;;  %s847_s14 = sshll.u32 (!%p319_p10), %s995_s17, 1  ;;  %v603_v35 = vlaneseq (!%p319_p10) }
  0x22   : > { %322 = sbr.rel (%p319_p10) target bundleno = 299 (0x12b), region = 70  ;;  %s845_s8 = sshll.u32 (!%p319_p10), %s325_s7, 7  ;;  %553 = vmatprep.mubr.bf16.mxu0 (!%p319_p10), %v1005_v16  ;;  %563 = vmatprep.mubr.bf16.mxu1 (!%p319_p10), %v1005_v16 }
  0x23   : > { %s1102_s9 = scalar_lea.vmem (!%p319_p10), [#allocation3], %s845_s8  ;;  %p377_p11 = scmp.lt.s32.totalorder (!%p319_p10), %s847_s14, 5  ;;  %v604_v36 = vshrl.u32 (!%p319_p10), %v603_v35, 7 }
  0x24   : > { %v939_v17 = vld [vmem:[%s1102_s9 + $0x4] ss:$8 sps:$4 sm:$0xff] (!%p319_p10)   ;;  %v941_v18 = vld [vmem:[%s1102_s9] ss:$8 sps:$4 sm:$0xff] (!%p319_p10)   ;;  %v942_v19 = vld [vmem:[%s1102_s9 + $0x14] ss:$8 sps:$4 sm:$0xff] (!%p319_p10)  }
  0x25   : > { %521 = vmatprep.subr.bf16.mxu0 (!%p319_p10), %v939_v17  ;;  %882 = vmatprep.subr.bf16.mxu1 (!%p319_p10), %v939_v17  ;;  %v944_v20 = vld [vmem:[%s1102_s9 + $0x10] ss:$8 sps:$4 sm:$0xff] (!%p319_p10)   ;;  %v945_v21 = vld [vmem:[%s1102_s9 + $0x24] ss:$8 sps:$4 sm:$0xff] (!%p319_p10)   ;;  %v947_v22 = vld [vmem:[%s1102_s9 + $0x20] ss:$8 sps:$4 sm:$0xff] (!%p319_p10)  }
  0x26   : > { %522 = vmatpush1.bf16.msra.mxu0 (!%p319_p10), %v941_v18  ;;  %890 = vmatpush1.bf16.msra.mxu1 (!%p319_p10), %v941_v18  ;;  %v948_v23 = vld [vmem:[%s1102_s9 + $0x34] ss:$8 sps:$4 sm:$0xff] (!%p319_p10)   ;;  %v950_v24 = vld [vmem:[%s1102_s9 + $0x30] ss:$8 sps:$4 sm:$0xff] (!%p319_p10)   ;;  %v951_v25 = vld [vmem:[%s1102_s9 + $0x44] ss:$8 sps:$4 sm:$0xff] (!%p319_p10)  }
  0x27   : > { %523 = vmatprep.subr.bf16.mxu0 (!%p319_p10), %v942_v19  ;;  %883 = vmatprep.subr.bf16.mxu1 (!%p319_p10), %v942_v19  ;;  %v953_v26 = vld [vmem:[%s1102_s9 + $0x40] ss:$8 sps:$4 sm:$0xff] (!%p319_p10)   ;;  %v954_v27 = vld [vmem:[%s1102_s9 + $0x54] ss:$8 sps:$4 sm:$0xff] (!%p319_p10)   ;;  %v956_v28 = vld [vmem:[%s1102_s9 + $0x50] ss:$8 sps:$4 sm:$0xff] (!%p319_p10)  }
  0x28   : > { %v957_v29 = vld [vmem:[%s1102_s9 + $0x64] ss:$8 sps:$4 sm:$0xff] (!%p319_p10)   ;;  %v959_v30 = vld [vmem:[%s1102_s9 + $0x60] ss:$8 sps:$4 sm:$0xff] (!%p319_p10)   ;;  %v960_v31 = vld [vmem:[%s1102_s9 + $0x74] ss:$8 sps:$4 sm:$0xff] (!%p319_p10)  }
  0x29   : > { %v962_v32 = vld [vmem:[%s1102_s9 + $0x70] ss:$8 sps:$4 sm:$0xff]   ;;  %s1169_s14 = smov (!%p377_p11, %s847_s14), 5  ;;  %v605_v37 = vsub.s32 0, %v604_v36  ;;  %v609_v39 = vsub.s32 1, %v604_v36  ;;  %s846_s29 = sshll.u32 %s325_s7, 5 }
  0x2a   : > { %524 = vmatpush1.bf16.msra.mxu0 %v944_v20  ;;  %891 = vmatpush1.bf16.msra.mxu1 %v944_v20  ;;  %s379_s23 = scalar_lea.vmem %s1158_s2, %s1169_s14  ;;  %s384_s28 = scalar_lea.vmem %s1159_s3, %s1169_s14 }
  0x2b   : > { %525 = vmatprep.subr.bf16.mxu0 %v945_v21  ;;  %884 = vmatprep.subr.bf16.mxu1 %v945_v21  ;;  %v601_v38 = vld [vmem:[%s379_s23] sm:$0x3]  ;;  %s364_s15 = scalar_lea.vmem [#allocation4], %s846_s29  ;;  %s881_s30 = sshll.u32 (%p1066_p6), %s995_s17, 3 }
  0x2c   : > { %v621_v40 = vld [vmem:[%s384_s28] sm:$0x3]  ;;  %v606_v41 = vrot.slane %v601_v38, %v605_v37  ;;  %v610_v42 = vrot.slane %v601_v38, %v609_v39  ;;  %s681_s7 = scalar_lea.vmem (%p1066_p6), %s1160_s4, %s881_s30 }
  0x2d   : > { %v626_v43 = vrot.slane %v621_v40, %v605_v37  ;;  %v630_v46 = vrot.slane %v621_v40, %v609_v39 }
  0x2e   : > { %526 = vmatpush1.bf16.msra.mxu0 %v947_v22  ;;  %892 = vmatpush1.bf16.msra.mxu1 %v947_v22 }
  0x2f   : > { %527 = vmatprep.subr.bf16.mxu0 %v948_v23  ;;  %885 = vmatprep.subr.bf16.mxu1 %v948_v23 }
  0x32   : > { %528 = vmatpush1.bf16.msra.mxu0 %v950_v24  ;;  %893 = vmatpush1.bf16.msra.mxu1 %v950_v24 }
  0x33   : > { %529 = vmatprep.subr.bf16.mxu0 %v951_v25  ;;  %886 = vmatprep.subr.bf16.mxu1 %v951_v25 }
  0x36   : > { %530 = vmatpush1.bf16.msra.mxu0 %v953_v26  ;;  %894 = vmatpush1.bf16.msra.mxu1 %v953_v26 }
  0x37   : > { %531 = vmatprep.subr.bf16.mxu0 %v954_v27  ;;  %887 = vmatprep.subr.bf16.mxu1 %v954_v27 }
  0x3a   : > { %532 = vmatpush1.bf16.msra.mxu0 %v956_v28  ;;  %895 = vmatpush1.bf16.msra.mxu1 %v956_v28 }
  0x3b   : > { %533 = vmatprep.subr.bf16.mxu0 %v957_v29  ;;  %888 = vmatprep.subr.bf16.mxu1 %v957_v29 }
  0x3e   : > { %534 = vmatpush1.bf16.msra.mxu0 %v959_v30  ;;  %896 = vmatpush1.bf16.msra.mxu1 %v959_v30 }
  0x3f   : > { %535 = vmatprep.subr.bf16.mxu0 %v960_v31  ;;  %889 = vmatprep.subr.bf16.mxu1 %v960_v31 }
  0x42   : > { %536 = vmatpush1.bf16.msra.mxu0 %v962_v32  ;;  %897 = vmatpush1.bf16.msra.mxu1 %v962_v32 }
  0x45   : > { %554 = vmatmul.mubr.bf16.vlgmr.msra.gmra.mrb[0].mxu0 %v963_v33  ;;  %564 = vmatmul.mubr.bf16.vlgmr.msra.gmra.mrb[0].mxu1 %v964_v34 }
 0x118   : > { %v555_v44 = vpop.f32.mrb[0].mxu0  ;;  %v565_v45 = vpop.f32.mrb[0].mxu1 }
 0x119   : > { %v613_v47 = vmul.f32 %v606_v41, %v555_v44  ;;  %v617_v48 = vmul.f32 %v606_v41, %v565_v45  ;;  %v557_v49 = vpop.f32.mrb[1].mxu0  ;;  %v567_v50 = vpop.f32.mrb[1].mxu1 }
 0x11a   : > { %v614_v51 = vmul.f32 %v610_v42, %v557_v49  ;;  %v618_v52 = vmul.f32 %v610_v42, %v567_v50  ;;  %v559_v53 = vpop.f32.mrb[2].mxu0  ;;  %v569_v54 = vpop.f32.mrb[2].mxu1 }
 0x11b   : > { %v633_v55 = vadd.f32 %v626_v43, %v613_v47  ;;  %v637_v56 = vadd.f32 %v626_v43, %v617_v48  ;;  %v615_v57 = vmul.f32 %v606_v41, %v559_v53  ;;  %v619_v58 = vmul.f32 %v606_v41, %v569_v54  ;;  %v561_v59 = vpop.f32.mrb[3].mxu0  ;;  %v571_v60 = vpop.f32.mrb[3].mxu1 }
 0x11c   : > { %v634_v61 = vadd.f32 %v630_v46, %v614_v51  ;;  %v638_v62 = vadd.f32 %v630_v46, %v618_v52  ;;  %v616_v63 = vmul.f32 %v610_v42, %v561_v59  ;;  %v620_v0 = vmul.f32 %v610_v42, %v571_v60  ;;  %675 = sbr.rel (!%p1066_p6) target bundleno = 299 (0x12b), region = 86 }
 0x11d   : > { %v635_v1 = vadd.f32 %v626_v43, %v615_v57  ;;  %v639_v2 = vadd.f32 %v626_v43, %v619_v58 }
 0x11e   : > { %v877_v3 = vpack.c.bf16 %v634_v61, %v633_v55  ;;  %v879_v4 = vpack.c.bf16 %v638_v62, %v637_v56  ;;  %v636_v5 = vadd.f32 %v630_v46, %v616_v63  ;;  %v640_v6 = vadd.f32 %v630_v46, %v620_v0 }
 0x120   : > { %665 = vst [vmem:[%s364_s15] sm:$0xff] %v877_v3  ;;  %667 = vst [vmem:[%s364_s15 + $0x10] sm:$0xff] %v879_v4  ;;  %v878_v7 = vpack.c.bf16 %v636_v5, %v635_v1  ;;  %v880_v8 = vpack.c.bf16 %v640_v6, %v639_v2 }
 0x122   : > { %666 = vst [vmem:[%s364_s15 + $0x8] sm:$0xff] %v878_v7  ;;  %668 = vst [vmem:[%s364_s15 + $0x18] sm:$0xff] %v880_v8 }
 0x127   : > { %v715_v9 = vld [vmem:[%s364_s15] sm:$0xff]  ;;  %v719_v11 = vld [vmem:[%s364_s15 + $0x10] sm:$0xff] }
 0x128   : > { %716 = vst [vmem:[%s681_s7] sm:$0xff] %v715_v9  ;;  %720 = vst [vmem:[%s681_s7 + $0x30] sm:$0xff] %v719_v11 }
 0x129   : > { %v717_v10 = vld [vmem:[%s364_s15 + $0x8] sm:$0xff]  ;;  %v721_v12 = vld [vmem:[%s364_s15 + $0x18] sm:$0xff] }
 0x12a   : > { %718 = vst [vmem:[%s681_s7 + $0x18] sm:$0xff] %v717_v10  ;;  %722 = vst [vmem:[%s681_s7 + $0x48] sm:$0xff] %v721_v12 }
 0x12b PF: > { %s14_s19 = sadd.s32 1, %s1003_s19   ;;  %s1162_s15 = smov %s991_s16 }
 0x12c   : > { %p11_p12 = scmp.ge.s32.totalorder %s14_s19, 5   ;;  %s1163_s16 = smov %s1071_s25 }
 0x12d   : > { %s1164_s17 = smov %s999_s18  ;;  %s1165_s18 = smov %s1167_s20 }
 0x12e   :  { %13 = sbr.rel (!%p11_p12) target bundleno = 3 (0x3), region = 164 }

// kernel: _lambda_.42
= control target key start
LH: loop header
LB: loop body
LE: loop exit
PB: predicated region body
PF: predicated region fallthrough
CT: control target
= control target key end

     0   :  { %s1500_s15 = smov 0   ;;  %s1502_s16 = smov 0   ;;  %s1793_s0 = inlined_call_operand.vmem [shape: bf16[32,640], index: 0, kind: input, shape index: {}]   ;;  %s1794_s1 = inlined_call_operand.vmem [shape: bf16[640,256], index: 1, kind: input, shape index: {}]   ;;  %s1795_s2 = inlined_call_operand.vmem [shape: f32[1,256], index: 2, kind: input, shape index: {}]   ;;  %s1796_s3 = inlined_call_operand.vmem [shape: f32[1,256], index: 3, kind: input, shape index: {}]   ;;  %s1797_s4 = inlined_call_operand.vmem [shape: bf16[32,256], index: 4, kind: output, shape index: {}]  }
   0x1   :  { %s1504_s17 = smov 0  }
   0x2 LB: > { %s33_s18 = sadd.s32 1, %s1468_s16  ;;  %p1191_p0 = scmp.ge.s32.totalorder %s1472_s17, 1  ;;  %s1472_s17 = sphi %s1504_s17, %s14_s17   ;;  %s1468_s16 = sphi %s1502_s16, %s1799_s16   ;;  %s1464_s15 = sphi %s1500_s15, %s1798_s15  }
   0x3   : > { %p35_p1 = scmp.ge.s32.totalorder %s33_s18, 2  ;;  %p231_p2 = scmp.lt.s32.totalorder %s1472_s17, 3 }
   0x5   : > { %s1801_s18 = smov (%p35_p1, %s33_s18), 0  ;;  %p232_p3 = pnand %p1191_p0, %p231_p2 }
   0x6   : > { %v1323_v0 = vld [vmem:[%s1794_s1 + $0x104] ss:$8 sps:$4 sm:$0xff] (!%p232_p3)   ;;  %v1325_v1 = vld [vmem:[%s1794_s1 + $0x100] ss:$8 sps:$4 sm:$0xff] (!%p232_p3)   ;;  %v1326_v2 = vld [vmem:[%s1794_s1 + $0x114] ss:$8 sps:$4 sm:$0xff] (!%p232_p3)  }
   0x7   : > { %235 = sbr.rel (%p232_p3) target bundleno = 327 (0x147), region = 36  ;;  %899 = vmatprep.subr.bf16.mxu0 (!%p232_p3), %v1323_v0  ;;  %v1328_v3 = vld [vmem:[%s1794_s1 + $0x110] ss:$8 sps:$4 sm:$0xff] (!%p232_p3)   ;;  %v1329_v4 = vld [vmem:[%s1794_s1 + $0x124] ss:$8 sps:$4 sm:$0xff] (!%p232_p3)   ;;  %s1192_s29 = sshll.u32 (!%p232_p3), %s1464_s15, 1 }
   0x8   : > { %900 = vmatpush1.bf16.msra.mxu0 (!%p232_p3), %v1325_v1  ;;  %v1331_v5 = vld [vmem:[%s1794_s1 + $0x120] ss:$8 sps:$4 sm:$0xff] (!%p232_p3)   ;;  %v1332_v6 = vld [vmem:[%s1794_s1 + $0x134] ss:$8 sps:$4 sm:$0xff] (!%p232_p3)   ;;  %v1334_v7 = vld [vmem:[%s1794_s1 + $0x130] ss:$8 sps:$4 sm:$0xff] (!%p232_p3)  }
   0x9   : > { %901 = vmatprep.subr.bf16.mxu0 (!%p232_p3), %v1326_v2  ;;  %v1346_v8 = vld [vmem:[%s1794_s1 + $0x4] ss:$8 sps:$4 sm:$0xff] (!%p232_p3)   ;;  %v1349_v9 = vld [vmem:[%s1794_s1] ss:$8 sps:$4 sm:$0xff] (!%p232_p3)   ;;  %v1352_v11 = vld [vmem:[%s1794_s1 + $0x14] ss:$8 sps:$4 sm:$0xff] (!%p232_p3)  }
   0xa   : > { %v1335_v10 = vld [vmem:[%s1794_s1 + $0x144] ss:$8 sps:$4 sm:$0xff] (!%p232_p3)   ;;  %856 = vmatprep.subr.bf16.mxu1 (!%p232_p3), %v1346_v8  ;;  %v1355_v12 = vld [vmem:[%s1794_s1 + $0x10] ss:$8 sps:$4 sm:$0xff] (!%p232_p3)   ;;  %v1337_v13 = vld [vmem:[%s1794_s1 + $0x140] ss:$8 sps:$4 sm:$0xff] (!%p232_p3)  }
   0xb   : > { %857 = vmatpush1.bf16.msra.mxu1 (!%p232_p3), %v1349_v9  ;;  %v1338_v14 = vld [vmem:[%s1794_s1 + $0x154] ss:$8 sps:$4 sm:$0xff] (!%p232_p3)   ;;  %v1358_v15 = vld [vmem:[%s1794_s1 + $0x24] ss:$8 sps:$4 sm:$0xff] (!%p232_p3)   ;;  %v1361_v16 = vld [vmem:[%s1794_s1 + $0x20] ss:$8 sps:$4 sm:$0xff] (!%p232_p3)  }
   0xc   : > { %902 = vmatpush1.bf16.msra.mxu0 (!%p232_p3), %v1328_v3  ;;  %858 = vmatprep.subr.bf16.mxu1 (!%p232_p3), %v1352_v11  ;;  %v1340_v17 = vld [vmem:[%s1794_s1 + $0x150] ss:$8 sps:$4 sm:$0xff] (!%p232_p3)   ;;  %v1364_v18 = vld [vmem:[%s1794_s1 + $0x34] ss:$8 sps:$4 sm:$0xff] (!%p232_p3)   ;;  %p287_p4 = scmp.lt.s32.totalorder (!%p232_p3), %s1192_s29, 3 }
   0xd   : > { %903 = vmatprep.subr.bf16.mxu0 (!%p232_p3), %v1329_v4  ;;  %v1341_v19 = vld [vmem:[%s1794_s1 + $0x164] ss:$8 sps:$4 sm:$0xff] (!%p232_p3)   ;;  %v1343_v20 = vld [vmem:[%s1794_s1 + $0x160] ss:$8 sps:$4 sm:$0xff] (!%p232_p3)   ;;  %v1367_v21 = vld [vmem:[%s1794_s1 + $0x30] ss:$8 sps:$4 sm:$0xff] (!%p232_p3)  }
   0xe   : > { %v1370_v22 = vld [vmem:[%s1794_s1 + $0x44] ss:$8 sps:$4 sm:$0xff]   ;;  %s1803_s29 = smov (!%p287_p4, %s1192_s29), 3  ;;  %v1344_v23 = vld [vmem:[%s1794_s1 + $0x174] ss:$8 sps:$4 sm:$0xff]  }
   0xf   : > { %859 = vmatpush1.bf16.msra.mxu1 %v1355_v12  ;;  %v1373_v24 = vld [vmem:[%s1794_s1 + $0x40] ss:$8 sps:$4 sm:$0xff]   ;;  %v1348_v25 = vld [vmem:[%s1794_s1 + $0x170] ss:$8 sps:$4 sm:$0xff]   ;;  %v1376_v26 = vld [vmem:[%s1794_s1 + $0x54] ss:$8 sps:$4 sm:$0xff]  }
  0x10   : > { %904 = vmatpush1.bf16.msra.mxu0 %v1331_v5  ;;  %860 = vmatprep.subr.bf16.mxu1 %v1358_v15  ;;  %s1297_s30 = smul.u32 20, %s1803_s29  ;;  %v1350_v27 = vld [vmem:[%s1794_s1 + $0x184] ss:$8 sps:$4 sm:$0xff]   ;;  %v1354_v28 = vld [vmem:[%s1794_s1 + $0x180] ss:$8 sps:$4 sm:$0xff]  }
  0x11   : > { %905 = vmatprep.subr.bf16.mxu0 %v1332_v6  ;;  %v1379_v29 = vld [vmem:[%s1794_s1 + $0x50] ss:$8 sps:$4 sm:$0xff]   ;;  %v1382_v30 = vld [vmem:[%s1794_s1 + $0x64] ss:$8 sps:$4 sm:$0xff]   ;;  %v1356_v31 = vld [vmem:[%s1794_s1 + $0x194] ss:$8 sps:$4 sm:$0xff]  }
  0x12   : > { %s1620_s14 = scalar_lea.vmem %s1793_s0, %s1297_s30  ;;  %v1385_v32 = vld [vmem:[%s1794_s1 + $0x60] ss:$8 sps:$4 sm:$0xff]   ;;  %v1360_v34 = vld [vmem:[%s1794_s1 + $0x190] ss:$8 sps:$4 sm:$0xff]   ;;  %v1388_v35 = vld [vmem:[%s1794_s1 + $0x74] ss:$8 sps:$4 sm:$0xff]  }
  0x13   : > { %861 = vmatpush1.bf16.msra.mxu1 %v1361_v16  ;;  %v1400_v33 = vld [vmem:[%s1620_s14 + $0xc] ss:$20 sps:$4 sm:$0xff]   ;;  %v1391_v37 = vld [vmem:[%s1794_s1 + $0x70] ss:$8 sps:$4 sm:$0xff]   ;;  %v1368_v40 = vld [vmem:[%s1794_s1 + $0x1b4] ss:$8 sps:$4 sm:$0xff]  }
  0x14   : > { %906 = vmatpush1.bf16.msra.mxu0 %v1334_v7  ;;  %862 = vmatprep.subr.bf16.mxu1 %v1364_v18  ;;  %v1362_v36 = vld [vmem:[%s1794_s1 + $0x1a4] ss:$8 sps:$4 sm:$0xff]   ;;  %v1366_v38 = vld [vmem:[%s1794_s1 + $0x1a0] ss:$8 sps:$4 sm:$0xff]   ;;  %v1372_v42 = vld [vmem:[%s1794_s1 + $0x1b0] ss:$8 sps:$4 sm:$0xff]  }
  0x15   : > { %907 = vmatprep.subr.bf16.mxu0 %v1335_v10  ;;  %931 = vmatprep.mubr.bf16.mxu0 %v1400_v33  ;;  %v1394_v39 = vld [vmem:[%s1794_s1 + $0x84] ss:$8 sps:$4 sm:$0xff]   ;;  %v1397_v41 = vld [vmem:[%s1794_s1 + $0x80] ss:$8 sps:$4 sm:$0xff]   ;;  %v1404_v43 = vld [vmem:[%s1794_s1 + $0x94] ss:$8 sps:$4 sm:$0xff]  }
  0x16   : > { %v1374_v44 = vld [vmem:[%s1794_s1 + $0x1c4] ss:$8 sps:$4 sm:$0xff]   ;;  %v1406_v45 = vld [vmem:[%s1794_s1 + $0x90] ss:$8 sps:$4 sm:$0xff]   ;;  %v1378_v46 = vld [vmem:[%s1794_s1 + $0x1c0] ss:$8 sps:$4 sm:$0xff]  }
  0x17   : > { %863 = vmatpush1.bf16.msra.mxu1 %v1367_v21  ;;  %v1410_v47 = vld [vmem:[%s1794_s1 + $0xa4] ss:$8 sps:$4 sm:$0xff]   ;;  %v1380_v48 = vld [vmem:[%s1794_s1 + $0x1d4] ss:$8 sps:$4 sm:$0xff]   ;;  %v1412_v49 = vld [vmem:[%s1794_s1 + $0xa0] ss:$8 sps:$4 sm:$0xff]  }
  0x18   : > { %908 = vmatpush1.bf16.msra.mxu0 %v1337_v13  ;;  %864 = vmatprep.subr.bf16.mxu1 %v1370_v22  ;;  %v1384_v50 = vld [vmem:[%s1794_s1 + $0x1d0] ss:$8 sps:$4 sm:$0xff]   ;;  %v1416_v51 = vld [vmem:[%s1794_s1 + $0xb4] ss:$8 sps:$4 sm:$0xff]   ;;  %v1386_v52 = vld [vmem:[%s1794_s1 + $0x1e4] ss:$8 sps:$4 sm:$0xff]  }
  0x19   : > { %909 = vmatprep.subr.bf16.mxu0 %v1338_v14  ;;  %v1418_v53 = vld [vmem:[%s1794_s1 + $0xb0] ss:$8 sps:$4 sm:$0xff]   ;;  %v1390_v55 = vld [vmem:[%s1794_s1 + $0x1e0] ss:$8 sps:$4 sm:$0xff]   ;;  %v1422_v56 = vld [vmem:[%s1794_s1 + $0xc4] ss:$8 sps:$4 sm:$0xff]  }
  0x1a   : > { %v1445_v54 = vld [vmem:[%s1620_s14 + $0x4] ss:$20 sps:$4 sm:$0xff]   ;;  %v1392_v57 = vld [vmem:[%s1794_s1 + $0x1f4] ss:$8 sps:$4 sm:$0xff]   ;;  %v1424_v58 = vld [vmem:[%s1794_s1 + $0xc0] ss:$8 sps:$4 sm:$0xff]  }
  0x1b   : > { %865 = vmatpush1.bf16.msra.mxu1 %v1373_v24  ;;  %888 = vmatprep.mubr.bf16.mxu1 %v1445_v54  ;;  %v1396_v59 = vld [vmem:[%s1794_s1 + $0x1f0] ss:$8 sps:$4 sm:$0xff]   ;;  %v1428_v60 = vld [vmem:[%s1794_s1 + $0xd4] ss:$8 sps:$4 sm:$0xff]   ;;  %v1403_v61 = vld [vmem:[%s1794_s1 + $0x204] ss:$8 sps:$4 sm:$0xff]  }
  0x1c   : > { %910 = vmatpush1.bf16.msra.mxu0 %v1340_v17  ;;  %866 = vmatprep.subr.bf16.mxu1 %v1376_v26  ;;  %v1398_v62 = vld [vmem:[%s1620_s14 + $0x8] ss:$20 sps:$4 sm:$0xff]   ;;  %v1430_v63 = vld [vmem:[%s1794_s1 + $0xd0] ss:$8 sps:$4 sm:$0xff]   ;;  %v1434_v1 = vld [vmem:[%s1794_s1 + $0xe4] ss:$8 sps:$4 sm:$0xff]   ;;  %v1002_v26 = vlaneseq }
  0x1d   : > { %911 = vmatprep.subr.bf16.mxu0 %v1341_v19  ;;  %v1401_v0 = vld [vmem:[%s1794_s1 + $0x200] ss:$8 sps:$4 sm:$0xff]   ;;  %v1409_v2 = vld [vmem:[%s1794_s1 + $0x214] ss:$8 sps:$4 sm:$0xff]   ;;  %v1407_v4 = vld [vmem:[%s1794_s1 + $0x210] ss:$8 sps:$4 sm:$0xff]  }
  0x1e   : > { %v1436_v3 = vld [vmem:[%s1794_s1 + $0xe0] ss:$8 sps:$4 sm:$0xff]   ;;  %v1440_v5 = vld [vmem:[%s1794_s1 + $0xf4] ss:$8 sps:$4 sm:$0xff]   ;;  %v1415_v6 = vld [vmem:[%s1794_s1 + $0x224] ss:$8 sps:$4 sm:$0xff]  }
  0x1f   : > { %867 = vmatpush1.bf16.msra.mxu1 %v1379_v29  ;;  %v1474_v7 = vmov 0   ;;  %v1442_v8 = vld [vmem:[%s1794_s1 + $0xf0] ss:$8 sps:$4 sm:$0xff]   ;;  %v1413_v9 = vld [vmem:[%s1794_s1 + $0x220] ss:$8 sps:$4 sm:$0xff]  }
  0x20   : > { %912 = vmatpush1.bf16.msra.mxu0 %v1343_v20  ;;  %868 = vmatprep.subr.bf16.mxu1 %v1382_v30  ;;  %v1421_v10 = vld [vmem:[%s1794_s1 + $0x234] ss:$8 sps:$4 sm:$0xff]   ;;  %v1419_v12 = vld [vmem:[%s1794_s1 + $0x230] ss:$8 sps:$4 sm:$0xff]   ;;  %v1427_v13 = vld [vmem:[%s1794_s1 + $0x244] ss:$8 sps:$4 sm:$0xff]  }
  0x21   : > { %913 = vmatprep.subr.bf16.mxu0 %v1344_v23  ;;  %v1443_v11 = vld [vmem:[%s1620_s14] ss:$20 sps:$4 sm:$0xff]   ;;  %v1431_v16 = vld [vmem:[%s1794_s1 + $0x250] ss:$8 sps:$4 sm:$0xff]   ;;  %v1439_v17 = vld [vmem:[%s1794_s1 + $0x264] ss:$8 sps:$4 sm:$0xff]  }
  0x22   : > { %v1425_v14 = vld [vmem:[%s1794_s1 + $0x240] ss:$8 sps:$4 sm:$0xff]   ;;  %v1433_v15 = vld [vmem:[%s1794_s1 + $0x254] ss:$8 sps:$4 sm:$0xff]   ;;  %v1446_v20 = vld [vmem:[%s1794_s1 + $0x270] ss:$8 sps:$4 sm:$0xff]  }
  0x23   : > { %869 = vmatpush1.bf16.msra.mxu1 %v1385_v32  ;;  %v1437_v18 = vld [vmem:[%s1794_s1 + $0x260] ss:$8 sps:$4 sm:$0xff]   ;;  %v1448_v19 = vld [vmem:[%s1794_s1 + $0x274] ss:$8 sps:$4 sm:$0xff]   ;;  %v1449_v21 = vld [vmem:[%s1620_s14 + $0x10] ss:$20 sps:$4 sm:$0xff]  }
  0x24   : > { %914 = vmatpush1.bf16.msra.mxu0 %v1348_v25  ;;  %870 = vmatprep.subr.bf16.mxu1 %v1388_v35  ;;  %v1000_v29 = vld [vmem:[%s1795_s2] sm:$0x3]  ;;  %s1286_s14 = sshll.u32 %s1803_s29, 3 }
  0x25   : > { %915 = vmatprep.subr.bf16.mxu0 %v1350_v27  ;;  %v1003_v27 = vshrl.u32 %v1002_v26, 7  ;;  %s328_s13 = scalar_lea.vmem %s1797_s4, %s1286_s14 }
  0x27   : > { %871 = vmatpush1.bf16.msra.mxu1 %v1391_v37  ;;  %v1008_v30 = vsub.s32 1, %v1003_v27 }
  0x28   : > { %916 = vmatpush1.bf16.msra.mxu0 %v1354_v28  ;;  %872 = vmatprep.subr.bf16.mxu1 %v1394_v39  ;;  %v1004_v28 = vsub.s32 0, %v1003_v27 }
  0x29   : > { %917 = vmatprep.subr.bf16.mxu0 %v1356_v31  ;;  %v1016_v31 = vld [vmem:[%s1796_s3] sm:$0x3] }
  0x2a   : > { %v1005_v32 = vrot.slane %v1000_v29, %v1004_v28  ;;  %v1025_v39 = vrot.slane %v1016_v31, %v1008_v30 }
  0x2b   : > { %873 = vmatpush1.bf16.msra.mxu1 %v1397_v41 }
  0x2c   : > { %918 = vmatpush1.bf16.msra.mxu0 %v1360_v34  ;;  %874 = vmatprep.subr.bf16.mxu1 %v1404_v43  ;;  %v1009_v34 = vrot.slane %v1000_v29, %v1008_v30 }
  0x2d   : > { %919 = vmatprep.subr.bf16.mxu0 %v1362_v36  ;;  %v1021_v36 = vrot.slane %v1016_v31, %v1004_v28 }
  0x2f   : > { %875 = vmatpush1.bf16.msra.mxu1 %v1406_v45 }
  0x30   : > { %920 = vmatpush1.bf16.msra.mxu0 %v1366_v38  ;;  %876 = vmatprep.subr.bf16.mxu1 %v1410_v47 }
  0x31   : > { %921 = vmatprep.subr.bf16.mxu0 %v1368_v40 }
  0x33   : > { %877 = vmatpush1.bf16.msra.mxu1 %v1412_v49 }
  0x34   : > { %922 = vmatpush1.bf16.msra.mxu0 %v1372_v42  ;;  %878 = vmatprep.subr.bf16.mxu1 %v1416_v51 }
  0x35   : > { %923 = vmatprep.subr.bf16.mxu0 %v1374_v44 }
  0x37   : > { %879 = vmatpush1.bf16.msra.mxu1 %v1418_v53 }
  0x38   : > { %924 = vmatpush1.bf16.msra.mxu0 %v1378_v46  ;;  %880 = vmatprep.subr.bf16.mxu1 %v1422_v56 }
  0x39   : > { %925 = vmatprep.subr.bf16.mxu0 %v1380_v48 }
  0x3b   : > { %881 = vmatpush1.bf16.msra.mxu1 %v1424_v58 }
  0x3c   : > { %926 = vmatpush1.bf16.msra.mxu0 %v1384_v50  ;;  %882 = vmatprep.subr.bf16.mxu1 %v1428_v60 }
  0x3d   : > { %927 = vmatprep.subr.bf16.mxu0 %v1386_v52 }
  0x3f   : > { %883 = vmatpush1.bf16.msra.mxu1 %v1430_v63 }
  0x40   : > { %928 = vmatpush1.bf16.msra.mxu0 %v1390_v55  ;;  %884 = vmatprep.subr.bf16.mxu1 %v1434_v1 }
  0x41   : > { %929 = vmatprep.subr.bf16.mxu0 %v1392_v57 }
  0x43   : > { %885 = vmatpush1.bf16.msra.mxu1 %v1436_v3 }
  0x44   : > { %930 = vmatpush1.bf16.msra.mxu0 %v1396_v59  ;;  %886 = vmatprep.subr.bf16.mxu1 %v1440_v5 }
  0x45   : > { %942 = vmatprep.subr.bf16.mxu0 %v1403_v61 }
  0x47   : > { %932 = vmatmul.mubr.bf16.vlgmr.msra.gmra.mrb[0].mxu0 %v1398_v62  ;;  %887 = vmatpush1.bf16.msra.mxu1 %v1442_v8 }
  0x48   : > { %943 = vmatpush1.bf16.msra.mxu0 %v1401_v0  ;;  %974 = vmatprep.mubr.bf16.mxu0 %v1474_v7 }
  0x49   : > { %944 = vmatprep.subr.bf16.mxu0 %v1409_v2 }
  0x4a   : > { %889 = vmatmul.mubr.bf16.vlgmr.msra.gmra.mrb[0].mxu1 %v1443_v11 }
  0x4c   : > { %945 = vmatpush1.bf16.msra.mxu0 %v1407_v4 }
  0x4d   : > { %946 = vmatprep.subr.bf16.mxu0 %v1415_v6 }
  0x50   : > { %947 = vmatpush1.bf16.msra.mxu0 %v1413_v9 }
  0x51   : > { %948 = vmatprep.subr.bf16.mxu0 %v1421_v10 }
  0x54   : > { %949 = vmatpush1.bf16.msra.mxu0 %v1419_v12 }
  0x55   : > { %950 = vmatprep.subr.bf16.mxu0 %v1427_v13 }
  0x58   : > { %951 = vmatpush1.bf16.msra.mxu0 %v1425_v14 }
  0x59   : > { %952 = vmatprep.subr.bf16.mxu0 %v1433_v15 }
  0x5c   : > { %953 = vmatpush1.bf16.msra.mxu0 %v1431_v16 }
  0x5d   : > { %954 = vmatprep.subr.bf16.mxu0 %v1439_v17 }
  0x60   : > { %955 = vmatpush1.bf16.msra.mxu0 %v1437_v18 }
  0x61   : > { %956 = vmatprep.subr.bf16.mxu0 %v1448_v19 }
  0x64   : > { %957 = vmatpush1.bf16.msra.mxu0 %v1446_v20 }
  0x67   : > { %975 = vmatmul.mubr.bf16.vlgmr.msra.gmra.mrb[0].mxu0 %v1449_v21 }
 0x11d   : > { %v890_v22 = vpop.f32.mrb[0].mxu1 }
 0x11e   : > { %v892_v23 = vpop.f32.mrb[1].mxu1 }
 0x11f   : > { %v894_v24 = vpop.f32.mrb[2].mxu1 }
 0x120   : > { %v896_v25 = vpop.f32.mrb[3].mxu1 }
 0x13a   : > { %v976_v33 = vpop.f32.mrb[0].mxu0 }
 0x13b   : > { %v1289_v35 = vadd.f32 %v976_v33, %v890_v22  ;;  %v978_v37 = vpop.f32.mrb[1].mxu0 }
 0x13c   : > { %v1290_v38 = vadd.f32 %v978_v37, %v892_v23  ;;  %v980_v40 = vpop.f32.mrb[2].mxu0 }
 0x13d   : > { %v1012_v41 = vmul.f32 %v1289_v35, %v1005_v32  ;;  %v1291_v42 = vadd.f32 %v980_v40, %v894_v24  ;;  %v982_v43 = vpop.f32.mrb[3].mxu0 }
 0x13e   : > { %v1013_v44 = vmul.f32 %v1290_v38, %v1009_v34  ;;  %v1292_v45 = vadd.f32 %v982_v43, %v896_v25 }
 0x13f   : > { %v1028_v46 = vadd.f32 %v1021_v36, %v1012_v41  ;;  %v1014_v47 = vmul.f32 %v1291_v42, %v1005_v32 }
 0x140   : > { %v1029_v48 = vadd.f32 %v1025_v39, %v1013_v44  ;;  %v1015_v49 = vmul.f32 %v1292_v45, %v1009_v34 }
 0x141   : > { %v1030_v50 = vadd.f32 %v1021_v36, %v1014_v47 }
 0x142   : > { %v1287_v51 = vpack.c.bf16 %v1029_v48, %v1028_v46  ;;  %v1031_v52 = vadd.f32 %v1025_v39, %v1015_v49 }
 0x144   : > { %1044 = vst [vmem:[%s328_s13] sm:$0xff] %v1287_v51  ;;  %v1288_v53 = vpack.c.bf16 %v1031_v52, %v1030_v50 }
 0x146   : > { %1045 = vst [vmem:[%s328_s13 + $0x8] sm:$0xff] %v1288_v53 }
 0x147 PF: > { %s14_s17 = sadd.s32 1, %s1472_s17   ;;  %s1798_s15 = smov %s1468_s16 }
 0x148   : > { %p11_p5 = scmp.ge.s32.totalorder %s14_s17, 4   ;;  %s1799_s16 = smov %s1801_s18 }
 0x14a   :  { %13 = sbr.rel (!%p11_p5) target bundleno = 2 (0x2), region = 83 }

// kernel: _lambda_.50
= control target key start
LH: loop header
LB: loop body
LE: loop exit
PB: predicated region body
PF: predicated region fallthrough
CT: control target
= control target key end

     0   :  { %s943_s1 = inlined_call_operand.vmem [shape: bf16[768,128], index: 1, kind: input, shape index: {}]   ;;  %s944_s0 = inlined_call_operand.vmem [shape: bf16[8,768], index: 0, kind: input, shape index: {}]   ;;  %s945_s2 = inlined_call_operand.vmem [shape: f32[1,128], index: 2, kind: input, shape index: {}]   ;;  %s946_s3 = inlined_call_operand.vmem [shape: f32[1,128], index: 3, kind: input, shape index: {}]   ;;  %s947_s4 = inlined_call_operand.vmem [shape: bf16[8,128], index: 4, kind: output, shape index: {}]  }
   0x1   :  { %v702_v0 = vld [vmem:[%s943_s1 + $0x40] sm:$0xff]   ;;  %v706_v4 = vld [vmem:[%s943_s1 + $0x48] sm:$0xff]   ;;  %v710_v8 = vld [vmem:[%s943_s1 + $0x50] sm:$0xff]  }
   0x2   :  { %v703_v1 = vld [vmem:[%s943_s1 + $0xc0] sm:$0xff]   ;;  %636 = vmatprep.subr.bf16.mxu0 %v702_v0  ;;  %v707_v5 = vld [vmem:[%s943_s1 + $0xc8] sm:$0xff]   ;;  %v711_v9 = vld [vmem:[%s943_s1 + $0xd0] sm:$0xff]  }
   0x3   :  { %v704_v2 = vld [vmem:[%s943_s1] sm:$0xff]   ;;  %658 = vmatprep.subr.bf16.mxu1 %v703_v1  ;;  %v708_v6 = vld [vmem:[%s943_s1 + $0x8] sm:$0xff]   ;;  %v712_v10 = vld [vmem:[%s943_s1 + $0x10] sm:$0xff]  }
   0x4   :  { %v705_v3 = vld [vmem:[%s943_s1 + $0x80] sm:$0xff]   ;;  %637 = vmatpush3.bf16.msra.mxu0 %v704_v2  ;;  %v709_v7 = vld [vmem:[%s943_s1 + $0x88] sm:$0xff]   ;;  %v713_v11 = vld [vmem:[%s943_s1 + $0x90] sm:$0xff]  }
   0x5   :  { %659 = vmatpush3.bf16.msra.mxu1 %v705_v3  ;;  %638 = vmatprep.subr.bf16.mxu0 %v706_v4  ;;  %v714_v12 = vld [vmem:[%s943_s1 + $0x58] sm:$0xff]   ;;  %v718_v16 = vld [vmem:[%s943_s1 + $0x60] sm:$0xff]   ;;  %v722_v20 = vld [vmem:[%s943_s1 + $0x68] sm:$0xff]  }
   0x6   :  { %660 = vmatprep.subr.bf16.mxu1 %v707_v5  ;;  %v715_v13 = vld [vmem:[%s943_s1 + $0xd8] sm:$0xff]   ;;  %v719_v17 = vld [vmem:[%s943_s1 + $0xe0] sm:$0xff]   ;;  %v723_v21 = vld [vmem:[%s943_s1 + $0xe8] sm:$0xff]  }
   0x7   :  { %v716_v14 = vld [vmem:[%s943_s1 + $0x18] sm:$0xff]   ;;  %v720_v18 = vld [vmem:[%s943_s1 + $0x20] sm:$0xff]   ;;  %v724_v22 = vld [vmem:[%s943_s1 + $0x28] sm:$0xff]  }
   0x8   :  { %639 = vmatpush3.bf16.msra.mxu0 %v708_v6  ;;  %v717_v15 = vld [vmem:[%s943_s1 + $0x98] sm:$0xff]   ;;  %v721_v19 = vld [vmem:[%s943_s1 + $0xa0] sm:$0xff]   ;;  %v725_v23 = vld [vmem:[%s943_s1 + $0xa8] sm:$0xff]  }
   0x9   :  { %661 = vmatpush3.bf16.msra.mxu1 %v709_v7  ;;  %640 = vmatprep.subr.bf16.mxu0 %v710_v8  ;;  %v726_v24 = vld [vmem:[%s943_s1 + $0x70] sm:$0xff]   ;;  %v730_v28 = vld [vmem:[%s943_s1 + $0x78] sm:$0xff]   ;;  %v24_v32 = vld [vmem:[%s944_s0] sm:$0xff] }
   0xa   :  { %662 = vmatprep.subr.bf16.mxu1 %v711_v9  ;;  %v727_v25 = vld [vmem:[%s943_s1 + $0xf0] sm:$0xff]   ;;  %v731_v29 = vld [vmem:[%s943_s1 + $0xf8] sm:$0xff]   ;;  %v25_v33 = vld [vmem:[%s944_s0 + $0x8] sm:$0xff]  ;;  %v580_v34 = vcombine.low %v24_v32, %v24_v32  ;;  %v581_v35 = vcombine.high %v24_v32, %v24_v32 }
   0xb   :  { %v728_v26 = vld [vmem:[%s943_s1 + $0x30] sm:$0xff]   ;;  %v732_v30 = vld [vmem:[%s943_s1 + $0x38] sm:$0xff]   ;;  %v582_v36 = vcombine.low %v25_v33, %v25_v33  ;;  %v583_v37 = vcombine.high %v25_v33, %v25_v33  ;;  %v738_v38 = vld [vmem:[%s943_s1 + $0x140] sm:$0xff]  }
   0xc   :  { %641 = vmatpush3.bf16.msra.mxu0 %v712_v10  ;;  %v729_v27 = vld [vmem:[%s943_s1 + $0xb0] sm:$0xff]   ;;  %v733_v31 = vld [vmem:[%s943_s1 + $0xb8] sm:$0xff]   ;;  %v739_v39 = vld [vmem:[%s943_s1 + $0x100] sm:$0xff]   ;;  %464 = vmatprep.mubr.bf16.mxu0 %v581_v35 }
   0xd   :  { %663 = vmatpush3.bf16.msra.mxu1 %v713_v11  ;;  %642 = vmatprep.subr.bf16.mxu0 %v714_v12  ;;  %v740_v40 = vld [vmem:[%s943_s1 + $0x148] sm:$0xff]   ;;  %v742_v42 = vld [vmem:[%s943_s1 + $0x150] sm:$0xff]   ;;  %v744_v44 = vld [vmem:[%s943_s1 + $0x158] sm:$0xff]  }
   0xe   :  { %664 = vmatprep.subr.bf16.mxu1 %v715_v13  ;;  %504 = vmatprep.mubr.bf16.mxu1 %v583_v37  ;;  %v741_v41 = vld [vmem:[%s943_s1 + $0x108] sm:$0xff]   ;;  %v743_v43 = vld [vmem:[%s943_s1 + $0x110] sm:$0xff]   ;;  %v745_v45 = vld [vmem:[%s943_s1 + $0x118] sm:$0xff]  }
   0xf   :  { %v746_v46 = vld [vmem:[%s943_s1 + $0x160] sm:$0xff]   ;;  %v26_v47 = vld [vmem:[%s944_s0 + $0x10] sm:$0xff]  ;;  %v748_v50 = vld [vmem:[%s943_s1 + $0x168] sm:$0xff]  }
  0x10   :  { %643 = vmatpush3.bf16.msra.mxu0 %v716_v14  ;;  %v585_v48 = vcombine.high %v26_v47, %v26_v47  ;;  %v747_v49 = vld [vmem:[%s943_s1 + $0x120] sm:$0xff]   ;;  %v749_v51 = vld [vmem:[%s943_s1 + $0x128] sm:$0xff]   ;;  %v750_v52 = vld [vmem:[%s943_s1 + $0x170] sm:$0xff]   ;;  %v584_v56 = vcombine.low %v26_v47, %v26_v47 }
  0x11   :  { %665 = vmatpush3.bf16.msra.mxu1 %v717_v15  ;;  %644 = vmatprep.subr.bf16.mxu0 %v718_v16  ;;  %v751_v53 = vld [vmem:[%s943_s1 + $0x130] sm:$0xff]   ;;  %v752_v54 = vld [vmem:[%s943_s1 + $0x178] sm:$0xff]   ;;  %v634_v8 = vld [vmem:[%s945_s2] ss:$0 sm:$0xff] }
  0x12   :  { %666 = vmatprep.subr.bf16.mxu1 %v719_v17  ;;  %v753_v55 = vld [vmem:[%s943_s1 + $0x138] sm:$0xff]   ;;  %v635_v11 = vld [vmem:[%s946_s3] ss:$0 sm:$0xff] }
  0x14   :  { %645 = vmatpush3.bf16.msra.mxu0 %v720_v18 }
  0x15   :  { %667 = vmatpush3.bf16.msra.mxu1 %v721_v19  ;;  %646 = vmatprep.subr.bf16.mxu0 %v722_v20 }
  0x16   :  { %668 = vmatprep.subr.bf16.mxu1 %v723_v21 }
  0x18   :  { %647 = vmatpush3.bf16.msra.mxu0 %v724_v22 }
  0x19   :  { %669 = vmatpush3.bf16.msra.mxu1 %v725_v23  ;;  %648 = vmatprep.subr.bf16.mxu0 %v726_v24 }
  0x1a   :  { %670 = vmatprep.subr.bf16.mxu1 %v727_v25 }
  0x1c   :  { %649 = vmatpush3.bf16.msra.mxu0 %v728_v26 }
  0x1d   :  { %671 = vmatpush3.bf16.msra.mxu1 %v729_v27  ;;  %650 = vmatprep.subr.bf16.mxu0 %v730_v28 }
  0x1e   :  { %672 = vmatprep.subr.bf16.mxu1 %v731_v29 }
  0x20   :  { %651 = vmatpush3.bf16.msra.mxu0 %v732_v30 }
  0x21   :  { %673 = vmatpush3.bf16.msra.mxu1 %v733_v31  ;;  %680 = vmatprep.subr.bf16.mxu0 %v738_v38 }
  0x23   :  { %465 = vmatmul.mubr.bf16.vlgmr.msra.gmra.mrb[0].mxu0 %v580_v34 }
  0x24   :  { %505 = vmatmul.mubr.bf16.vlgmr.msra.gmra.mrb[0].mxu1 %v582_v36  ;;  %681 = vmatpush3.bf16.msra.mxu0 %v739_v39 }
  0x25   :  { %682 = vmatprep.subr.bf16.mxu0 %v740_v40  ;;  %544 = vmatprep.mubr.bf16.mxu0 %v585_v48 }
  0x28   :  { %683 = vmatpush3.bf16.msra.mxu0 %v741_v41 }
  0x29   :  { %684 = vmatprep.subr.bf16.mxu0 %v742_v42 }
  0x2c   :  { %685 = vmatpush3.bf16.msra.mxu0 %v743_v43 }
  0x2d   :  { %686 = vmatprep.subr.bf16.mxu0 %v744_v44 }
  0x30   :  { %687 = vmatpush3.bf16.msra.mxu0 %v745_v45 }
  0x31   :  { %688 = vmatprep.subr.bf16.mxu0 %v746_v46 }
  0x34   :  { %689 = vmatpush3.bf16.msra.mxu0 %v747_v49 }
  0x35   :  { %690 = vmatprep.subr.bf16.mxu0 %v748_v50 }
  0x38   :  { %691 = vmatpush3.bf16.msra.mxu0 %v749_v51 }
  0x39   :  { %692 = vmatprep.subr.bf16.mxu0 %v750_v52 }
  0x3c   :  { %693 = vmatpush3.bf16.msra.mxu0 %v751_v53 }
  0x3d   :  { %694 = vmatprep.subr.bf16.mxu0 %v752_v54 }
  0x40   :  { %695 = vmatpush3.bf16.msra.mxu0 %v753_v55 }
  0x43   :  { %545 = vmatmul.mubr.bf16.vlgmr.msra.gmra.mrb[4].mxu0 %v584_v56 }
  0xf6   :  { %v652_v57 = vpop.f32.mrb[0].mxu0 }
  0xf7   :  { %v674_v58 = vpop.f32.mrb[0].mxu1  ;;  %v653_v59 = vpop.f32.mrb[1].mxu0 }
  0xf8   :  { %v675_v60 = vpop.f32.mrb[1].mxu1  ;;  %v654_v61 = vadd.f32 %v653_v59, %v652_v57  ;;  %v655_v63 = vpop.f32.mrb[2].mxu0 }
  0xf9   :  { %v676_v62 = vadd.f32 %v675_v60, %v674_v58  ;;  %v677_v0 = vpop.f32.mrb[2].mxu1  ;;  %v656_v1 = vpop.f32.mrb[3].mxu0 }
  0xfa   :  { %v678_v2 = vpop.f32.mrb[3].mxu1 }
  0xfb   :  { %v507_v3 = vadd.f32 %v676_v62, %v654_v61 }
 0x116   :  { %v696_v4 = vpop.f32.mrb[4].mxu0 }
 0x117   :  { %v697_v5 = vpop.f32.mrb[5].mxu0 }
 0x118   :  { %v698_v6 = vadd.f32 %v697_v5, %v696_v4  ;;  %v699_v7 = vpop.f32.mrb[6].mxu0 }
 0x119   :  { %v700_v9 = vpop.f32.mrb[7].mxu0 }
 0x11a   :  { %v547_v10 = vadd.f32 %v698_v6, %v507_v3 }
 0x11c   :  { %v565_v12 = vmul.f32 %v634_v8, %v547_v10 }
 0x11e   :  { %v573_v13 = vadd.f32 %v635_v11, %v565_v12 }
 0x120   :  { %v574_v14 = vpack.c.bf16 %v573_v13, %v573_v13 }
 0x122   :  { %575 = vst [vmem:[%s947_s4] sm:$0xf] %v574_v14 }

// kernel: _lambda_.52
= control target key start
LH: loop header
LB: loop body
LE: loop exit
PB: predicated region body
PF: predicated region fallthrough
CT: control target
= control target key end

     0   :  { %v446_v1 = vmov 0.0   ;;  %vm447_vm0 = vmmov 0   ;;  %s560_s1 = inlined_call_operand.vmem [shape: bf16[384,128], index: 1, kind: input, shape index: {}]   ;;  %s561_s0 = inlined_call_operand.vmem [shape: bf16[8,384], index: 0, kind: input, shape index: {}]   ;;  %s562_s2 = inlined_call_operand.vmem [shape: f32[1,128], index: 2, kind: input, shape index: {}]   ;;  %s563_s3 = inlined_call_operand.vmem [shape: f32[1,128], index: 3, kind: input, shape index: {}]   ;;  %s564_s4 = inlined_call_operand.vmem [shape: bf16[8,128], index: 4, kind: output, shape index: {}]  }
   0x1   :  { %v419_v0 = vld [vmem:[%s560_s1 + $0x40] sm:$0xff]   ;;  %397 = vmatprep.subr.bf16.mxu1 %v446_v1  ;;  %413 = vmatprep.mubr.msk.bf16.mxu1 %vm447_vm0, %v446_v1  ;;  %v422_v4 = vld [vmem:[%s560_s1 + $0x48] sm:$0xff]   ;;  %v425_v7 = vld [vmem:[%s560_s1 + $0x50] sm:$0xff]  }
   0x2   :  { %v420_v2 = vld [vmem:[%s560_s1] sm:$0xff]   ;;  %366 = vmatprep.subr.bf16.mxu0 %v419_v0  ;;  %v423_v5 = vld [vmem:[%s560_s1 + $0x8] sm:$0xff]   ;;  %v426_v8 = vld [vmem:[%s560_s1 + $0x10] sm:$0xff]  }
   0x3   :  { %v421_v3 = vld [vmem:[%s560_s1 + $0x80] sm:$0xff]   ;;  %367 = vmatpush3.bf16.msra.mxu0 %v420_v2  ;;  %v424_v6 = vld [vmem:[%s560_s1 + $0x88] sm:$0xff]   ;;  %v427_v9 = vld [vmem:[%s560_s1 + $0x90] sm:$0xff]  }
   0x4   :  { %398 = vmatpush3.bf16.msra.mxu1 %v421_v3  ;;  %368 = vmatprep.subr.bf16.mxu0 %v422_v4  ;;  %v428_v10 = vld [vmem:[%s560_s1 + $0x58] sm:$0xff]   ;;  %v431_v13 = vld [vmem:[%s560_s1 + $0x60] sm:$0xff]   ;;  %v434_v16 = vld [vmem:[%s560_s1 + $0x68] sm:$0xff]  }
   0x5   :  { %399 = vmatprep.subr.bf16.mxu1 %v446_v1  ;;  %v429_v11 = vld [vmem:[%s560_s1 + $0x18] sm:$0xff]   ;;  %v432_v14 = vld [vmem:[%s560_s1 + $0x20] sm:$0xff]   ;;  %v435_v17 = vld [vmem:[%s560_s1 + $0x28] sm:$0xff]  }
   0x6   :  { %v430_v12 = vld [vmem:[%s560_s1 + $0x98] sm:$0xff]   ;;  %v433_v15 = vld [vmem:[%s560_s1 + $0xa0] sm:$0xff]   ;;  %v436_v18 = vld [vmem:[%s560_s1 + $0xa8] sm:$0xff]  }
   0x7   :  { %369 = vmatpush3.bf16.msra.mxu0 %v423_v5  ;;  %v437_v19 = vld [vmem:[%s560_s1 + $0x70] sm:$0xff]   ;;  %v440_v22 = vld [vmem:[%s560_s1 + $0x78] sm:$0xff]   ;;  %v24_v23 = vld [vmem:[%s561_s0] sm:$0xff] }
   0x8   :  { %400 = vmatpush3.bf16.msra.mxu1 %v424_v6  ;;  %370 = vmatprep.subr.bf16.mxu0 %v425_v7  ;;  %v438_v20 = vld [vmem:[%s560_s1 + $0x30] sm:$0xff]   ;;  %v338_v24 = vcombine.high %v24_v23, %v24_v23  ;;  %v441_v25 = vld [vmem:[%s560_s1 + $0x38] sm:$0xff]   ;;  %v337_v27 = vcombine.low %v24_v23, %v24_v23  ;;  %v445_v28 = vld [vmem:[%s561_s0 + $0x8] ss:$0 sps:$4 sm:$0xff]  }
   0x9   :  { %401 = vmatprep.subr.bf16.mxu1 %v446_v1  ;;  %v439_v21 = vld [vmem:[%s560_s1 + $0xb0] sm:$0xff]   ;;  %v442_v26 = vld [vmem:[%s560_s1 + $0xb8] sm:$0xff]   ;;  %v364_v35 = vld [vmem:[%s562_s2] ss:$0 sm:$0xff] }
   0xa   :  { %261 = vmatprep.mubr.bf16.mxu0 %v338_v24  ;;  %v365_v40 = vld [vmem:[%s563_s3] ss:$0 sm:$0xff] }
   0xb   :  { %371 = vmatpush3.bf16.msra.mxu0 %v426_v8 }
   0xc   :  { %402 = vmatpush3.bf16.msra.mxu1 %v427_v9  ;;  %372 = vmatprep.subr.bf16.mxu0 %v428_v10 }
   0xd   :  { %403 = vmatprep.subr.bf16.mxu1 %v446_v1 }
   0xf   :  { %373 = vmatpush3.bf16.msra.mxu0 %v429_v11 }
  0x10   :  { %404 = vmatpush3.bf16.msra.mxu1 %v430_v12  ;;  %374 = vmatprep.subr.bf16.mxu0 %v431_v13 }
  0x11   :  { %405 = vmatprep.subr.bf16.mxu1 %v446_v1 }
  0x13   :  { %375 = vmatpush3.bf16.msra.mxu0 %v432_v14 }
  0x14   :  { %406 = vmatpush3.bf16.msra.mxu1 %v433_v15  ;;  %376 = vmatprep.subr.bf16.mxu0 %v434_v16 }
  0x15   :  { %407 = vmatprep.subr.bf16.mxu1 %v446_v1 }
  0x17   :  { %377 = vmatpush3.bf16.msra.mxu0 %v435_v17 }
  0x18   :  { %408 = vmatpush3.bf16.msra.mxu1 %v436_v18  ;;  %378 = vmatprep.subr.bf16.mxu0 %v437_v19 }
  0x19   :  { %409 = vmatprep.subr.bf16.mxu1 %v446_v1 }
  0x1b   :  { %379 = vmatpush3.bf16.msra.mxu0 %v438_v20 }
  0x1c   :  { %410 = vmatpush3.bf16.msra.mxu1 %v439_v21  ;;  %380 = vmatprep.subr.bf16.mxu0 %v440_v22 }
  0x1d   :  { %411 = vmatprep.subr.bf16.mxu1 %v446_v1 }
  0x1f   :  { %381 = vmatpush3.bf16.msra.mxu0 %v441_v25 }
  0x20   :  { %412 = vmatpush3.bf16.msra.mxu1 %v442_v26 }
  0x22   :  { %262 = vmatmul.mubr.bf16.vlgmr.msra.gmra.mrb[0].mxu0 %v337_v27 }
  0x23   :  { %414 = vmatmul.mubr.bf16.vlgmr.msra.gmra.mrb[0].mxu1 %v445_v28 }
  0xf5   :  { %v382_v29 = vpop.f32.mrb[0].mxu0 }
  0xf6   :  { %v303_v30 = vpop.f32.mrb[0].mxu1  ;;  %v383_v31 = vpop.f32.mrb[1].mxu0 }
  0xf7   :  { %v384_v32 = vadd.f32 %v383_v31, %v382_v29  ;;  %v415_v33 = vpop.f32.mrb[1].mxu1  ;;  %v385_v34 = vpop.f32.mrb[2].mxu0 }
  0xf8   :  { %v306_v36 = vpop.f32.mrb[2].mxu1  ;;  %v386_v37 = vpop.f32.mrb[3].mxu0 }
  0xf9   :  { %v304_v38 = vadd.f32 %v384_v32, %v303_v30  ;;  %v416_v39 = vpop.f32.mrb[3].mxu1 }
  0xfb   :  { %v322_v41 = vmul.f32 %v364_v35, %v304_v38 }
  0xfd   :  { %v330_v42 = vadd.f32 %v365_v40, %v322_v41 }
  0xff   :  { %v331_v43 = vpack.c.bf16 %v330_v42, %v330_v42 }
 0x101   :  { %332 = vst [vmem:[%s564_s4] sm:$0xf] %v331_v43 }

// kernel: _lambda_.55
= control target key start
LH: loop header
LB: loop body
LE: loop exit
PB: predicated region body
PF: predicated region fallthrough
CT: control target
= control target key end

     0   :  { %vm1156_vm0 = vmmov 0   ;;  %s1430_s1 = inlined_call_operand.vmem [shape: bf16[1152,128], index: 1, kind: input, shape index: {}]   ;;  %s1431_s0 = inlined_call_operand.vmem [shape: bf16[8,1152], index: 0, kind: input, shape index: {}]   ;;  %s1432_s2 = inlined_call_operand.vmem [shape: f32[1,128], index: 2, kind: input, shape index: {}]   ;;  %s1433_s4 = inlined_call_operand.vmem [shape: bf16[8,128], index: 4, kind: input, shape index: {}]   ;;  %s1434_s3 = inlined_call_operand.vmem [shape: f32[1,128], index: 3, kind: input, shape index: {}]   ;;  %s1435_s5 = inlined_call_operand.vmem [shape: bf16[8,128], index: 5, kind: output, shape index: {}]  }
   0x1   :  { %v1074_v0 = vld [vmem:[%s1430_s1 + $0x40] sm:$0xff]   ;;  %v1078_v4 = vld [vmem:[%s1430_s1 + $0x48] sm:$0xff]   ;;  %v1082_v8 = vld [vmem:[%s1430_s1 + $0x50] sm:$0xff]  }
   0x2   :  { %v1075_v1 = vld [vmem:[%s1430_s1 + $0xc0] sm:$0xff]   ;;  %955 = vmatprep.subr.bf16.mxu0 %v1074_v0  ;;  %v1079_v5 = vld [vmem:[%s1430_s1 + $0xc8] sm:$0xff]   ;;  %v1083_v9 = vld [vmem:[%s1430_s1 + $0xd0] sm:$0xff]  }
   0x3   :  { %v1076_v2 = vld [vmem:[%s1430_s1] sm:$0xff]   ;;  %977 = vmatprep.subr.bf16.mxu1 %v1075_v1  ;;  %v1080_v6 = vld [vmem:[%s1430_s1 + $0x8] sm:$0xff]   ;;  %v1084_v10 = vld [vmem:[%s1430_s1 + $0x10] sm:$0xff]  }
   0x4   :  { %v1077_v3 = vld [vmem:[%s1430_s1 + $0x80] sm:$0xff]   ;;  %956 = vmatpush3.bf16.msra.mxu0 %v1076_v2  ;;  %v1081_v7 = vld [vmem:[%s1430_s1 + $0x88] sm:$0xff]   ;;  %v1085_v11 = vld [vmem:[%s1430_s1 + $0x90] sm:$0xff]  }
   0x5   :  { %978 = vmatpush3.bf16.msra.mxu1 %v1077_v3  ;;  %957 = vmatprep.subr.bf16.mxu0 %v1078_v4  ;;  %v1086_v12 = vld [vmem:[%s1430_s1 + $0x58] sm:$0xff]   ;;  %v1090_v16 = vld [vmem:[%s1430_s1 + $0x60] sm:$0xff]   ;;  %v1094_v20 = vld [vmem:[%s1430_s1 + $0x68] sm:$0xff]  }
   0x6   :  { %979 = vmatprep.subr.bf16.mxu1 %v1079_v5  ;;  %v1087_v13 = vld [vmem:[%s1430_s1 + $0xd8] sm:$0xff]   ;;  %v1091_v17 = vld [vmem:[%s1430_s1 + $0xe0] sm:$0xff]   ;;  %v1095_v21 = vld [vmem:[%s1430_s1 + $0xe8] sm:$0xff]  }
   0x7   :  { %v1088_v14 = vld [vmem:[%s1430_s1 + $0x18] sm:$0xff]   ;;  %v1092_v18 = vld [vmem:[%s1430_s1 + $0x20] sm:$0xff]   ;;  %v1096_v22 = vld [vmem:[%s1430_s1 + $0x28] sm:$0xff]  }
   0x8   :  { %958 = vmatpush3.bf16.msra.mxu0 %v1080_v6  ;;  %v1089_v15 = vld [vmem:[%s1430_s1 + $0x98] sm:$0xff]   ;;  %v1093_v19 = vld [vmem:[%s1430_s1 + $0xa0] sm:$0xff]   ;;  %v1097_v23 = vld [vmem:[%s1430_s1 + $0xa8] sm:$0xff]  }
   0x9   :  { %980 = vmatpush3.bf16.msra.mxu1 %v1081_v7  ;;  %959 = vmatprep.subr.bf16.mxu0 %v1082_v8  ;;  %v1098_v24 = vld [vmem:[%s1430_s1 + $0x70] sm:$0xff]   ;;  %v1102_v28 = vld [vmem:[%s1430_s1 + $0x78] sm:$0xff]   ;;  %v27_v32 = vld [vmem:[%s1431_s0] sm:$0xff] }
   0xa   :  { %981 = vmatprep.subr.bf16.mxu1 %v1083_v9  ;;  %v1099_v25 = vld [vmem:[%s1430_s1 + $0xf0] sm:$0xff]   ;;  %v1103_v29 = vld [vmem:[%s1430_s1 + $0xf8] sm:$0xff]   ;;  %v28_v33 = vld [vmem:[%s1431_s0 + $0x8] sm:$0xff]  ;;  %v872_v34 = vcombine.low %v27_v32, %v27_v32  ;;  %v873_v35 = vcombine.high %v27_v32, %v27_v32 }
   0xb   :  { %v1100_v26 = vld [vmem:[%s1430_s1 + $0x30] sm:$0xff]   ;;  %v1104_v30 = vld [vmem:[%s1430_s1 + $0x38] sm:$0xff]   ;;  %v874_v36 = vcombine.low %v28_v33, %v28_v33  ;;  %v875_v37 = vcombine.high %v28_v33, %v28_v33  ;;  %v1110_v38 = vld [vmem:[%s1430_s1 + $0x140] sm:$0xff]  }
   0xc   :  { %960 = vmatpush3.bf16.msra.mxu0 %v1084_v10  ;;  %v1101_v27 = vld [vmem:[%s1430_s1 + $0xb0] sm:$0xff]   ;;  %v1105_v31 = vld [vmem:[%s1430_s1 + $0xb8] sm:$0xff]   ;;  %v1111_v39 = vld [vmem:[%s1430_s1 + $0x100] sm:$0xff]   ;;  %672 = vmatprep.mubr.bf16.mxu0 %v873_v35 }
   0xd   :  { %982 = vmatpush3.bf16.msra.mxu1 %v1085_v11  ;;  %961 = vmatprep.subr.bf16.mxu0 %v1086_v12  ;;  %v1112_v40 = vld [vmem:[%s1430_s1 + $0x1c0] sm:$0xff]   ;;  %v1114_v42 = vld [vmem:[%s1430_s1 + $0x148] sm:$0xff]   ;;  %v1118_v46 = vld [vmem:[%s1430_s1 + $0x150] sm:$0xff]  }
   0xe   :  { %983 = vmatprep.subr.bf16.mxu1 %v1087_v13  ;;  %712 = vmatprep.mubr.bf16.mxu1 %v875_v37  ;;  %v1113_v41 = vld [vmem:[%s1430_s1 + $0x180] sm:$0xff]   ;;  %v1115_v43 = vld [vmem:[%s1430_s1 + $0x108] sm:$0xff]   ;;  %v1119_v47 = vld [vmem:[%s1430_s1 + $0x110] sm:$0xff]   ;;  %v1155_v13 = vmov 0.0  }
   0xf   :  { %v1116_v44 = vld [vmem:[%s1430_s1 + $0x1c8] sm:$0xff]   ;;  %v1120_v48 = vld [vmem:[%s1430_s1 + $0x1d0] sm:$0xff]   ;;  %v1122_v50 = vld [vmem:[%s1430_s1 + $0x158] sm:$0xff]  }
  0x10   :  { %962 = vmatpush3.bf16.msra.mxu0 %v1088_v14  ;;  %v1117_v45 = vld [vmem:[%s1430_s1 + $0x188] sm:$0xff]   ;;  %v1121_v49 = vld [vmem:[%s1430_s1 + $0x190] sm:$0xff]   ;;  %v1123_v51 = vld [vmem:[%s1430_s1 + $0x118] sm:$0xff]  }
  0x11   :  { %984 = vmatpush3.bf16.msra.mxu1 %v1089_v15  ;;  %963 = vmatprep.subr.bf16.mxu0 %v1090_v16  ;;  %v1124_v52 = vld [vmem:[%s1430_s1 + $0x1d8] sm:$0xff]   ;;  %v1126_v54 = vld [vmem:[%s1430_s1 + $0x160] sm:$0xff]   ;;  %v1130_v58 = vld [vmem:[%s1430_s1 + $0x168] sm:$0xff]  }
  0x12   :  { %985 = vmatprep.subr.bf16.mxu1 %v1091_v17  ;;  %v1125_v53 = vld [vmem:[%s1430_s1 + $0x198] sm:$0xff]   ;;  %v1127_v55 = vld [vmem:[%s1430_s1 + $0x120] sm:$0xff]   ;;  %v1131_v59 = vld [vmem:[%s1430_s1 + $0x128] sm:$0xff]  }
  0x13   :  { %v1128_v56 = vld [vmem:[%s1430_s1 + $0x1e0] sm:$0xff]   ;;  %v1132_v60 = vld [vmem:[%s1430_s1 + $0x1e8] sm:$0xff]   ;;  %v1134_v62 = vld [vmem:[%s1430_s1 + $0x170] sm:$0xff]  }
  0x14   :  { %964 = vmatpush3.bf16.msra.mxu0 %v1092_v18  ;;  %v1129_v57 = vld [vmem:[%s1430_s1 + $0x1a0] sm:$0xff]   ;;  %v1133_v61 = vld [vmem:[%s1430_s1 + $0x1a8] sm:$0xff]   ;;  %v1135_v63 = vld [vmem:[%s1430_s1 + $0x130] sm:$0xff]  }
  0x15   :  { %986 = vmatpush3.bf16.msra.mxu1 %v1093_v19  ;;  %965 = vmatprep.subr.bf16.mxu0 %v1094_v20  ;;  %v1136_v0 = vld [vmem:[%s1430_s1 + $0x1f0] sm:$0xff]   ;;  %v1138_v2 = vld [vmem:[%s1430_s1 + $0x178] sm:$0xff]   ;;  %v1146_v12 = vld [vmem:[%s1430_s1 + $0x200] sm:$0xff]  }
  0x16   :  { %987 = vmatprep.subr.bf16.mxu1 %v1095_v21  ;;  %v1137_v1 = vld [vmem:[%s1430_s1 + $0x1b0] sm:$0xff]   ;;  %v1139_v3 = vld [vmem:[%s1430_s1 + $0x138] sm:$0xff]   ;;  %v1147_v14 = vld [vmem:[%s1430_s1 + $0x208] sm:$0xff]  }
  0x17   :  { %v1140_v4 = vld [vmem:[%s1430_s1 + $0x1f8] sm:$0xff]   ;;  %v29_v5 = vld [vmem:[%s1431_s0 + $0x10] sm:$0xff]  ;;  %v1150_v17 = vld [vmem:[%s1430_s1 + $0x220] sm:$0xff]  }
  0x18   :  { %966 = vmatpush3.bf16.msra.mxu0 %v1096_v22  ;;  %v877_v6 = vcombine.high %v29_v5, %v29_v5  ;;  %v1143_v7 = vld [vmem:[%s1430_s1 + $0x1b8] sm:$0xff]   ;;  %v876_v8 = vcombine.low %v29_v5, %v29_v5  ;;  %v1148_v15 = vld [vmem:[%s1430_s1 + $0x210] sm:$0xff]   ;;  %v1151_v18 = vld [vmem:[%s1430_s1 + $0x228] sm:$0xff]  }
  0x19   :  { %988 = vmatpush3.bf16.msra.mxu1 %v1097_v23  ;;  %967 = vmatprep.subr.bf16.mxu0 %v1098_v24  ;;  %v30_v9 = vld [vmem:[%s1431_s0 + $0x18] sm:$0xff]  ;;  %v1152_v19 = vld [vmem:[%s1430_s1 + $0x230] sm:$0xff]   ;;  %v1154_v21 = vld [vmem:[%s1431_s0 + $0x20] ss:$0 sps:$4 sm:$0xff]  }
  0x1a   :  { %989 = vmatprep.subr.bf16.mxu1 %v1099_v25  ;;  %v878_v10 = vcombine.low %v30_v9, %v30_v9  ;;  %v879_v11 = vcombine.high %v30_v9, %v30_v9  ;;  %v1149_v16 = vld [vmem:[%s1430_s1 + $0x218] sm:$0xff]  }
  0x1b   :  { %v1153_v20 = vld [vmem:[%s1430_s1 + $0x238] sm:$0xff]  }
  0x1c   :  { %968 = vmatpush3.bf16.msra.mxu0 %v1100_v26 }
  0x1d   :  { %990 = vmatpush3.bf16.msra.mxu1 %v1101_v27  ;;  %969 = vmatprep.subr.bf16.mxu0 %v1102_v28 }
  0x1e   :  { %991 = vmatprep.subr.bf16.mxu1 %v1103_v29 }
  0x20   :  { %970 = vmatpush3.bf16.msra.mxu0 %v1104_v30 }
  0x21   :  { %992 = vmatpush3.bf16.msra.mxu1 %v1105_v31  ;;  %999 = vmatprep.subr.bf16.mxu0 %v1110_v38 }
  0x22   :  { %1021 = vmatprep.subr.bf16.mxu1 %v1112_v40 }
  0x23   :  { %673 = vmatmul.mubr.bf16.vlgmr.msra.gmra.mrb[0].mxu0 %v872_v34 }
  0x24   :  { %713 = vmatmul.mubr.bf16.vlgmr.msra.gmra.mrb[0].mxu1 %v874_v36  ;;  %1000 = vmatpush3.bf16.msra.mxu0 %v1111_v39 }
  0x25   :  { %1022 = vmatpush3.bf16.msra.mxu1 %v1113_v41  ;;  %1001 = vmatprep.subr.bf16.mxu0 %v1114_v42 }
  0x26   :  { %1023 = vmatprep.subr.bf16.mxu1 %v1116_v44  ;;  %752 = vmatprep.mubr.bf16.mxu0 %v877_v6 }
  0x27   :  { %792 = vmatprep.mubr.bf16.mxu1 %v879_v11 }
  0x28   :  { %1002 = vmatpush3.bf16.msra.mxu0 %v1115_v43 }
  0x29   :  { %1024 = vmatpush3.bf16.msra.mxu1 %v1117_v45  ;;  %1003 = vmatprep.subr.bf16.mxu0 %v1118_v46  ;;  %v953_v46 = vld [vmem:[%s1432_s2] ss:$0 sm:$0xff] }
  0x2a   :  { %1025 = vmatprep.subr.bf16.mxu1 %v1120_v48 }
  0x2c   :  { %1004 = vmatpush3.bf16.msra.mxu0 %v1119_v47  ;;  %v862_v47 = vld [vmem:[%s1433_s4] sm:$0xf] }
  0x2d   :  { %1026 = vmatpush3.bf16.msra.mxu1 %v1121_v49  ;;  %1005 = vmatprep.subr.bf16.mxu0 %v1122_v50  ;;  %v954_v50 = vld [vmem:[%s1434_s3] ss:$0 sm:$0xff] }
  0x2e   :  { %1027 = vmatprep.subr.bf16.mxu1 %v1124_v52 }
  0x30   :  { %1006 = vmatpush3.bf16.msra.mxu0 %v1123_v51 }
  0x31   :  { %1028 = vmatpush3.bf16.msra.mxu1 %v1125_v53  ;;  %1007 = vmatprep.subr.bf16.mxu0 %v1126_v54  ;;  %v863_v53 = vunpack.c.l.bf16 %v862_v47 }
  0x32   :  { %1029 = vmatprep.subr.bf16.mxu1 %v1128_v56 }
  0x34   :  { %1008 = vmatpush3.bf16.msra.mxu0 %v1127_v55 }
  0x35   :  { %1030 = vmatpush3.bf16.msra.mxu1 %v1129_v57  ;;  %1009 = vmatprep.subr.bf16.mxu0 %v1130_v58 }
  0x36   :  { %1031 = vmatprep.subr.bf16.mxu1 %v1132_v60 }
  0x38   :  { %1010 = vmatpush3.bf16.msra.mxu0 %v1131_v59 }
  0x39   :  { %1032 = vmatpush3.bf16.msra.mxu1 %v1133_v61  ;;  %1011 = vmatprep.subr.bf16.mxu0 %v1134_v62 }
  0x3a   :  { %1033 = vmatprep.subr.bf16.mxu1 %v1136_v0 }
  0x3c   :  { %1012 = vmatpush3.bf16.msra.mxu0 %v1135_v63 }
  0x3d   :  { %1034 = vmatpush3.bf16.msra.mxu1 %v1137_v1  ;;  %1013 = vmatprep.subr.bf16.mxu0 %v1138_v2 }
  0x3e   :  { %1035 = vmatprep.subr.bf16.mxu1 %v1140_v4 }
  0x40   :  { %1014 = vmatpush3.bf16.msra.mxu0 %v1139_v3 }
  0x41   :  { %1036 = vmatpush3.bf16.msra.mxu1 %v1143_v7  ;;  %1052 = vmatprep.subr.bf16.mxu0 %v1155_v13 }
  0x43   :  { %753 = vmatmul.mubr.bf16.vlgmr.msra.gmra.mrb[4].mxu0 %v876_v8 }
  0x44   :  { %1053 = vmatpush3.bf16.msra.mxu0 %v1146_v12  ;;  %793 = vmatmul.mubr.bf16.vlgmr.msra.gmra.mrb[4].mxu1 %v878_v10 }
  0x45   :  { %1054 = vmatprep.subr.bf16.mxu0 %v1155_v13  ;;  %1068 = vmatprep.mubr.msk.bf16.mxu0 %vm1156_vm0, %v1155_v13 }
  0x48   :  { %1055 = vmatpush3.bf16.msra.mxu0 %v1147_v14 }
  0x49   :  { %1056 = vmatprep.subr.bf16.mxu0 %v1155_v13 }
  0x4c   :  { %1057 = vmatpush3.bf16.msra.mxu0 %v1148_v15 }
  0x4d   :  { %1058 = vmatprep.subr.bf16.mxu0 %v1155_v13 }
  0x50   :  { %1059 = vmatpush3.bf16.msra.mxu0 %v1149_v16 }
  0x51   :  { %1060 = vmatprep.subr.bf16.mxu0 %v1155_v13 }
  0x54   :  { %1061 = vmatpush3.bf16.msra.mxu0 %v1150_v17 }
  0x55   :  { %1062 = vmatprep.subr.bf16.mxu0 %v1155_v13 }
  0x58   :  { %1063 = vmatpush3.bf16.msra.mxu0 %v1151_v18 }
  0x59   :  { %1064 = vmatprep.subr.bf16.mxu0 %v1155_v13 }
  0x5c   :  { %1065 = vmatpush3.bf16.msra.mxu0 %v1152_v19 }
  0x5d   :  { %1066 = vmatprep.subr.bf16.mxu0 %v1155_v13 }
  0x60   :  { %1067 = vmatpush3.bf16.msra.mxu0 %v1153_v20 }
  0x63   :  { %1069 = vmatmul.mubr.bf16.vlgmr.msra.gmra.mrb[8].mxu0 %v1154_v21 }
  0xf6   :  { %v971_v22 = vpop.f32.mrb[0].mxu0 }
  0xf7   :  { %v993_v23 = vpop.f32.mrb[0].mxu1  ;;  %v972_v24 = vpop.f32.mrb[1].mxu0 }
  0xf8   :  { %v994_v25 = vpop.f32.mrb[1].mxu1  ;;  %v973_v26 = vadd.f32 %v972_v24, %v971_v22  ;;  %v974_v28 = vpop.f32.mrb[2].mxu0 }
  0xf9   :  { %v995_v27 = vadd.f32 %v994_v25, %v993_v23  ;;  %v996_v29 = vpop.f32.mrb[2].mxu1  ;;  %v975_v30 = vpop.f32.mrb[3].mxu0 }
  0xfa   :  { %v997_v31 = vpop.f32.mrb[3].mxu1 }
  0xfb   :  { %v715_v32 = vadd.f32 %v995_v27, %v973_v26 }
 0x116   :  { %v1015_v33 = vpop.f32.mrb[4].mxu0 }
 0x117   :  { %v1016_v34 = vpop.f32.mrb[5].mxu0  ;;  %v1037_v35 = vpop.f32.mrb[4].mxu1 }
 0x118   :  { %v1017_v36 = vadd.f32 %v1016_v34, %v1015_v33  ;;  %v1018_v37 = vpop.f32.mrb[6].mxu0  ;;  %v1038_v38 = vpop.f32.mrb[5].mxu1 }
 0x119   :  { %v1019_v39 = vpop.f32.mrb[7].mxu0  ;;  %v1039_v40 = vadd.f32 %v1038_v38, %v1037_v35  ;;  %v1040_v41 = vpop.f32.mrb[6].mxu1 }
 0x11a   :  { %v755_v42 = vadd.f32 %v1017_v36, %v715_v32  ;;  %v1041_v43 = vpop.f32.mrb[7].mxu1 }
 0x11c   :  { %v795_v44 = vadd.f32 %v1039_v40, %v755_v42 }
 0x136   :  { %v834_v45 = vpop.f32.mrb[8].mxu0 }
 0x137   :  { %v835_v48 = vadd.f32 %v834_v45, %v795_v44  ;;  %v1070_v49 = vpop.f32.mrb[9].mxu0 }
 0x138   :  { %v837_v51 = vpop.f32.mrb[10].mxu0 }
 0x139   :  { %v853_v52 = vmul.f32 %v953_v46, %v835_v48  ;;  %v1071_v54 = vpop.f32.mrb[11].mxu0 }
 0x13b   :  { %v861_v55 = vadd.f32 %v954_v50, %v853_v52 }
 0x13d   :  { %v864_v56 = vadd.f32 %v863_v53, %v861_v55 }
 0x13f   :  { %v865_v57 = vmax.f32 %v864_v56, 0.0 }
 0x141   :  { %v866_v58 = vpack.c.bf16 %v865_v57, %v865_v57 }
 0x143   :  { %867 = vst [vmem:[%s1435_s5] sm:$0xf] %v866_v58 }

// kernel: _lambda_.36
= control target key start
LH: loop header
LB: loop body
LE: loop exit
PB: predicated region body
PF: predicated region fallthrough
CT: control target
= control target key end

     0   :  { %s1696_s15 = smov 0   ;;  %s1698_s16 = smov 0   ;;  %s1918_s0 = inlined_call_operand.vmem [shape: bf16[128,768], index: 0, kind: input, shape index: {}]   ;;  %s1919_s1 = inlined_call_operand.vmem [shape: bf16[768,128], index: 1, kind: input, shape index: {}]   ;;  %s1920_s2 = inlined_call_operand.vmem [shape: f32[1,128], index: 2, kind: input, shape index: {}]   ;;  %s1921_s3 = inlined_call_operand.vmem [shape: f32[1,128], index: 3, kind: input, shape index: {}]   ;;  %s1922_s4 = inlined_call_operand.vmem [shape: bf16[128,128], index: 4, kind: output, shape index: {}]  }
   0x1   :  { %s1700_s17 = smov 0  }
   0x2 LB: > { %s33_s18 = sadd.s32 1, %s1665_s16  ;;  %p1282_p0 = scmp.ge.s32.totalorder %s1669_s17, 1  ;;  %s1669_s17 = sphi %s1700_s17, %s14_s17   ;;  %s1665_s16 = sphi %s1698_s16, %s1924_s16   ;;  %s1661_s15 = sphi %s1696_s15, %s1923_s15  }
   0x3   : > { %p35_p1 = scmp.ge.s32.totalorder %s33_s18, 2  ;;  %p224_p2 = scmp.lt.s32.totalorder %s1669_s17, 3 }
   0x5   : > { %s1926_s18 = smov (%p35_p1, %s33_s18), 0  ;;  %p225_p3 = pnand %p1282_p0, %p224_p2 }
   0x6   : > { %v1563_v0 = vld [vmem:[%s1919_s1 + $0x40] sm:$0xff] (!%p225_p3)   ;;  %v1567_v4 = vld [vmem:[%s1919_s1 + $0x48] sm:$0xff] (!%p225_p3)   ;;  %v1571_v8 = vld [vmem:[%s1919_s1 + $0x50] sm:$0xff] (!%p225_p3)   ;;  %s1283_s27 = sshll.u32 (!%p225_p3), %s1661_s15, 3 }
   0x7   : > { %228 = sbr.rel (%p225_p3) target bundleno = 308 (0x134), region = 36  ;;  %v1564_v1 = vld [vmem:[%s1919_s1 + $0xc0] sm:$0xff] (!%p225_p3)   ;;  %1402 = vmatprep.subr.bf16.mxu0 (!%p225_p3), %v1563_v0  ;;  %v1568_v5 = vld [vmem:[%s1919_s1 + $0xc8] sm:$0xff] (!%p225_p3)   ;;  %v1572_v9 = vld [vmem:[%s1919_s1 + $0xd0] sm:$0xff] (!%p225_p3)   ;;  %p274_p4 = scmp.lt.s32.totalorder (!%p225_p3), %s1283_s27, 15 }
   0x8   : > { %v1565_v2 = vld [vmem:[%s1919_s1] sm:$0xff] (!%p225_p3)   ;;  %1442 = vmatprep.subr.bf16.mxu1 (!%p225_p3), %v1564_v1  ;;  %v1569_v6 = vld [vmem:[%s1919_s1 + $0x8] sm:$0xff] (!%p225_p3)   ;;  %v1573_v10 = vld [vmem:[%s1919_s1 + $0x10] sm:$0xff] (!%p225_p3)  }
   0x9   : > { %v1566_v3 = vld [vmem:[%s1919_s1 + $0x80] sm:$0xff] (!%p225_p3)   ;;  %1403 = vmatpush3.bf16.msra.mxu0 (!%p225_p3), %v1565_v2  ;;  %v1570_v7 = vld [vmem:[%s1919_s1 + $0x88] sm:$0xff] (!%p225_p3)   ;;  %v1574_v11 = vld [vmem:[%s1919_s1 + $0x90] sm:$0xff] (!%p225_p3)  }
   0xa   : > { %1443 = vmatpush3.bf16.msra.mxu1 (!%p225_p3), %v1566_v3  ;;  %1404 = vmatprep.subr.bf16.mxu0 (!%p225_p3), %v1567_v4  ;;  %v1575_v12 = vld [vmem:[%s1919_s1 + $0x58] sm:$0xff] (!%p225_p3)   ;;  %v1579_v16 = vld [vmem:[%s1919_s1 + $0x60] sm:$0xff] (!%p225_p3)   ;;  %v1583_v20 = vld [vmem:[%s1919_s1 + $0x68] sm:$0xff] (!%p225_p3)  }
   0xb   : > { %1444 = vmatprep.subr.bf16.mxu1 (!%p225_p3), %v1568_v5  ;;  %v1576_v13 = vld [vmem:[%s1919_s1 + $0xd8] sm:$0xff] (!%p225_p3)   ;;  %v1580_v17 = vld [vmem:[%s1919_s1 + $0xe0] sm:$0xff] (!%p225_p3)   ;;  %v1584_v21 = vld [vmem:[%s1919_s1 + $0xe8] sm:$0xff] (!%p225_p3)  }
   0xc   : > { %v1577_v14 = vld [vmem:[%s1919_s1 + $0x18] sm:$0xff] (!%p225_p3)   ;;  %v1581_v18 = vld [vmem:[%s1919_s1 + $0x20] sm:$0xff] (!%p225_p3)   ;;  %v1585_v22 = vld [vmem:[%s1919_s1 + $0x28] sm:$0xff] (!%p225_p3)  }
   0xd   : > { %1405 = vmatpush3.bf16.msra.mxu0 (!%p225_p3), %v1569_v6  ;;  %v1578_v15 = vld [vmem:[%s1919_s1 + $0x98] sm:$0xff] (!%p225_p3)   ;;  %v1582_v19 = vld [vmem:[%s1919_s1 + $0xa0] sm:$0xff] (!%p225_p3)   ;;  %v1586_v23 = vld [vmem:[%s1919_s1 + $0xa8] sm:$0xff] (!%p225_p3)  }
   0xe   : > { %1445 = vmatpush3.bf16.msra.mxu1 %v1570_v7  ;;  %1406 = vmatprep.subr.bf16.mxu0 %v1571_v8  ;;  %s1928_s27 = smov (!%p274_p4, %s1283_s27), 15  ;;  %v1587_v24 = vld [vmem:[%s1919_s1 + $0x70] sm:$0xff]   ;;  %v1591_v28 = vld [vmem:[%s1919_s1 + $0x78] sm:$0xff]   ;;  %v1601_v36 = vld [vmem:[%s1919_s1 + $0x140] sm:$0xff]  }
   0xf   : > { %1446 = vmatprep.subr.bf16.mxu1 %v1572_v9  ;;  %v1588_v25 = vld [vmem:[%s1919_s1 + $0xf0] sm:$0xff]   ;;  %s1538_s28 = smul.u32 24, %s1928_s27  ;;  %v1592_v29 = vld [vmem:[%s1919_s1 + $0xf8] sm:$0xff]   ;;  %v1602_v37 = vld [vmem:[%s1919_s1 + $0x100] sm:$0xff]   ;;  %s1286_s15 = sshll.u32 %s1928_s27, 2 }
  0x10   : > { %v1589_v26 = vld [vmem:[%s1919_s1 + $0x30] sm:$0xff]   ;;  %v1593_v30 = vld [vmem:[%s1919_s1 + $0x38] sm:$0xff]   ;;  %v1603_v38 = vld [vmem:[%s1919_s1 + $0x148] sm:$0xff]   ;;  %s306_s13 = scalar_lea.vmem %s1922_s4, %s1286_s15 }
  0x11   : > { %1407 = vmatpush3.bf16.msra.mxu0 %v1573_v10  ;;  %v1590_v27 = vld [vmem:[%s1919_s1 + $0xb0] sm:$0xff]   ;;  %s1813_s12 = scalar_lea.vmem %s1918_s0, %s1538_s28  ;;  %v1594_v31 = vld [vmem:[%s1919_s1 + $0xb8] sm:$0xff]   ;;  %v1604_v39 = vld [vmem:[%s1919_s1 + $0x108] sm:$0xff]  }
  0x12   : > { %1447 = vmatpush3.bf16.msra.mxu1 %v1574_v11  ;;  %1408 = vmatprep.subr.bf16.mxu0 %v1575_v12  ;;  %v1595_v32 = vld [vmem:[%s1813_s12] ss:$24 sps:$4 sm:$0xff]   ;;  %v1597_v33 = vld [vmem:[%s1813_s12 + $0x4] ss:$24 sps:$4 sm:$0xff]   ;;  %v1605_v40 = vld [vmem:[%s1813_s12 + $0x34] ss:$24 sps:$4 sm:$0xff]  }
  0x13   : > { %1448 = vmatprep.subr.bf16.mxu1 %v1576_v13  ;;  %v1598_v34 = vld [vmem:[%s1813_s12 + $0x8] ss:$24 sps:$4 sm:$0xff]   ;;  %v1600_v35 = vld [vmem:[%s1813_s12 + $0xc] ss:$24 sps:$4 sm:$0xff]   ;;  %889 = vmatprep.mubr.bf16.mxu0 %v1597_v33  ;;  %v1607_v41 = vld [vmem:[%s1813_s12 + $0x3c] ss:$24 sps:$4 sm:$0xff]  }
  0x14   : > { %954 = vmatprep.mubr.bf16.mxu1 %v1600_v35  ;;  %v1609_v42 = vld [vmem:[%s1813_s12 + $0x30] ss:$24 sps:$4 sm:$0xff]   ;;  %v1613_v46 = vld [vmem:[%s1919_s1 + $0x158] sm:$0xff]   ;;  %v1617_v49 = vld [vmem:[%s1813_s12 + $0x6c] ss:$24 sps:$4 sm:$0xff]  }
  0x15   : > { %1409 = vmatpush3.bf16.msra.mxu0 %v1577_v14  ;;  %v1610_v43 = vld [vmem:[%s1813_s12 + $0x38] ss:$24 sps:$4 sm:$0xff]   ;;  %v1615_v48 = vld [vmem:[%s1813_s12 + $0x64] ss:$24 sps:$4 sm:$0xff]   ;;  %v1620_v52 = vld [vmem:[%s1813_s12 + $0x68] ss:$24 sps:$4 sm:$0xff]  }
  0x16   : > { %1449 = vmatpush3.bf16.msra.mxu1 %v1578_v15  ;;  %1410 = vmatprep.subr.bf16.mxu0 %v1579_v16  ;;  %v1611_v44 = vld [vmem:[%s1919_s1 + $0x150] sm:$0xff]   ;;  %v1614_v47 = vld [vmem:[%s1919_s1 + $0x118] sm:$0xff]   ;;  %v1621_v51 = vld [vmem:[%s1919_s1 + $0x160] sm:$0xff]  }
  0x17   : > { %1450 = vmatprep.subr.bf16.mxu1 %v1580_v17  ;;  %v1612_v45 = vld [vmem:[%s1919_s1 + $0x110] sm:$0xff]   ;;  %v1619_v50 = vld [vmem:[%s1813_s12 + $0x60] ss:$24 sps:$4 sm:$0xff]   ;;  %v1623_v54 = vld [vmem:[%s1919_s1 + $0x168] sm:$0xff]  }
  0x18   : > { %v1622_v53 = vld [vmem:[%s1919_s1 + $0x120] sm:$0xff]   ;;  %v1625_v55 = vld [vmem:[%s1813_s12 + $0x94] ss:$24 sps:$4 sm:$0xff]   ;;  %v1629_v59 = vld [vmem:[%s1813_s12 + $0x90] ss:$24 sps:$4 sm:$0xff]  }
  0x19   : > { %1411 = vmatpush3.bf16.msra.mxu0 %v1581_v18  ;;  %v1627_v56 = vld [vmem:[%s1813_s12 + $0x9c] ss:$24 sps:$4 sm:$0xff]   ;;  %v1624_v57 = vld [vmem:[%s1919_s1 + $0x128] sm:$0xff]   ;;  %v1630_v60 = vld [vmem:[%s1813_s12 + $0x98] ss:$24 sps:$4 sm:$0xff]  }
  0x1a   : > { %1451 = vmatpush3.bf16.msra.mxu1 %v1582_v19  ;;  %1412 = vmatprep.subr.bf16.mxu0 %v1583_v20  ;;  %v1631_v58 = vld [vmem:[%s1919_s1 + $0x170] sm:$0xff]   ;;  %v1633_v62 = vld [vmem:[%s1919_s1 + $0x178] sm:$0xff]  }
  0x1b   : > { %1452 = vmatprep.subr.bf16.mxu1 %v1584_v21  ;;  %v1632_v61 = vld [vmem:[%s1919_s1 + $0x130] sm:$0xff]   ;;  %v1634_v1 = vld [vmem:[%s1919_s1 + $0x138] sm:$0xff]  }
  0x1c   : > { %v1637_v63 = vld [vmem:[%s1813_s12 + $0x14] ss:$24 sps:$4 sm:$0xff]   ;;  %v1635_v2 = vld [vmem:[%s1813_s12 + $0x10] ss:$24 sps:$4 sm:$0xff]   ;;  %v1641_v4 = vld [vmem:[%s1813_s12 + $0x44] ss:$24 sps:$4 sm:$0xff]  }
  0x1d   : > { %1413 = vmatpush3.bf16.msra.mxu0 %v1585_v22  ;;  %v1640_v0 = vld [vmem:[%s1813_s12 + $0x74] ss:$24 sps:$4 sm:$0xff]   ;;  %v1638_v3 = vld [vmem:[%s1813_s12 + $0x70] ss:$24 sps:$4 sm:$0xff]   ;;  %v1643_v5 = vld [vmem:[%s1813_s12 + $0xa4] ss:$24 sps:$4 sm:$0xff]  }
  0x1e   : > { %1453 = vmatpush3.bf16.msra.mxu1 %v1586_v23  ;;  %1414 = vmatprep.subr.bf16.mxu0 %v1587_v24  ;;  %v1645_v6 = vld [vmem:[%s1813_s12 + $0x40] ss:$24 sps:$4 sm:$0xff]  }
  0x1f   : > { %1454 = vmatprep.subr.bf16.mxu1 %v1588_v25  ;;  %v1646_v7 = vld [vmem:[%s1813_s12 + $0xa0] ss:$24 sps:$4 sm:$0xff]  }
  0x21   : > { %1415 = vmatpush3.bf16.msra.mxu0 %v1589_v26 }
  0x22   : > { %1455 = vmatpush3.bf16.msra.mxu1 %v1590_v27  ;;  %1416 = vmatprep.subr.bf16.mxu0 %v1591_v28 }
  0x23   : > { %1456 = vmatprep.subr.bf16.mxu1 %v1592_v29 }
  0x25   : > { %1417 = vmatpush3.bf16.msra.mxu0 %v1593_v30 }
  0x26   : > { %1457 = vmatpush3.bf16.msra.mxu1 %v1594_v31  ;;  %1482 = vmatprep.subr.bf16.mxu0 %v1601_v36 }
  0x27   : > { %1522 = vmatprep.subr.bf16.mxu1 %v1601_v36 }
  0x28   : > { %890 = vmatmul.mubr.bf16.vlgmr.msra.gmra.mrb[0].mxu0 %v1595_v32 }
  0x29   : > { %955 = vmatmul.mubr.bf16.vlgmr.msra.gmra.mrb[0].mxu1 %v1598_v34  ;;  %1483 = vmatpush3.bf16.msra.mxu0 %v1602_v37 }
  0x2a   : > { %1530 = vmatpush3.bf16.msra.mxu1 %v1602_v37  ;;  %1484 = vmatprep.subr.bf16.mxu0 %v1603_v38 }
  0x2b   : > { %1523 = vmatprep.subr.bf16.mxu1 %v1603_v38  ;;  %897 = vmatprep.mubr.bf16.mxu0 %v1605_v40 }
  0x2c   : > { %962 = vmatprep.mubr.bf16.mxu1 %v1607_v41 }
  0x2d   : > { %1485 = vmatpush3.bf16.msra.mxu0 %v1604_v39 }
  0x2e   : > { %1531 = vmatpush3.bf16.msra.mxu1 %v1604_v39  ;;  %1486 = vmatprep.subr.bf16.mxu0 %v1611_v44 }
  0x2f   : > { %1524 = vmatprep.subr.bf16.mxu1 %v1611_v44 }
  0x30   : > { %898 = vmatmul.mubr.bf16.gmra.mrb[4].mxu0 %v1609_v42 }
  0x31   : > { %963 = vmatmul.mubr.bf16.gmra.mrb[4].mxu1 %v1610_v43  ;;  %1487 = vmatpush3.bf16.msra.mxu0 %v1612_v45 }
  0x32   : > { %1532 = vmatpush3.bf16.msra.mxu1 %v1612_v45  ;;  %1488 = vmatprep.subr.bf16.mxu0 %v1613_v46 }
  0x33   : > { %1525 = vmatprep.subr.bf16.mxu1 %v1613_v46  ;;  %905 = vmatprep.mubr.bf16.mxu0 %v1615_v48 }
  0x34   : > { %970 = vmatprep.mubr.bf16.mxu1 %v1617_v49 }
  0x35   : > { %1489 = vmatpush3.bf16.msra.mxu0 %v1614_v47 }
  0x36   : > { %1533 = vmatpush3.bf16.msra.mxu1 %v1614_v47  ;;  %1490 = vmatprep.subr.bf16.mxu0 %v1621_v51 }
  0x37   : > { %1526 = vmatprep.subr.bf16.mxu1 %v1621_v51 }
  0x38   : > { %906 = vmatmul.mubr.bf16.gmra.mrb[8].mxu0 %v1619_v50 }
  0x39   : > { %971 = vmatmul.mubr.bf16.gmra.mrb[8].mxu1 %v1620_v52  ;;  %1491 = vmatpush3.bf16.msra.mxu0 %v1622_v53 }
  0x3a   : > { %913 = vmatprep.mubr.bf16.mxu0 %v1625_v55  ;;  %1534 = vmatpush3.bf16.msra.mxu1 %v1622_v53 }
  0x3b   : > { %1492 = vmatprep.subr.bf16.mxu0 %v1623_v54  ;;  %1527 = vmatprep.subr.bf16.mxu1 %v1623_v54 }
  0x3c   : > { %978 = vmatprep.mubr.bf16.mxu1 %v1627_v56 }
  0x3d   : > { %1493 = vmatpush3.bf16.msra.mxu0 %v1624_v57 }
  0x3e   : > { %1535 = vmatpush3.bf16.msra.mxu1 %v1624_v57  ;;  %1494 = vmatprep.subr.bf16.mxu0 %v1631_v58 }
  0x3f   : > { %1528 = vmatprep.subr.bf16.mxu1 %v1631_v58 }
  0x40   : > { %914 = vmatmul.mubr.bf16.gmra.mrb[12].mxu0 %v1629_v59 }
  0x41   : > { %979 = vmatmul.mubr.bf16.gmra.mrb[12].mxu1 %v1630_v60  ;;  %1019 = vmatprep.mubr.bf16.mxu0 %v1637_v63 }
  0x42   : > { %1495 = vmatpush3.bf16.msra.mxu0 %v1632_v61  ;;  %1536 = vmatpush3.bf16.msra.mxu1 %v1632_v61 }
  0x43   : > { %1496 = vmatprep.subr.bf16.mxu0 %v1633_v62  ;;  %1529 = vmatprep.subr.bf16.mxu1 %v1633_v62 }
  0x44   : > { %1035 = vmatprep.mubr.bf16.mxu1 %v1640_v0 }
  0x46   : > { %1497 = vmatpush3.bf16.msra.mxu0 %v1634_v1  ;;  %1537 = vmatpush3.bf16.msra.mxu1 %v1634_v1 }
  0x49   : > { %1020 = vmatmul.mubr.bf16.vlgmr.msra.gmra.mrb[16].mxu0 %v1635_v2  ;;  %1036 = vmatmul.mubr.bf16.vlgmr.msra.gmra.mrb[16].mxu1 %v1638_v3 }
  0x4a   : > { %1027 = vmatprep.mubr.bf16.mxu0 %v1641_v4  ;;  %1043 = vmatprep.mubr.bf16.mxu1 %v1643_v5 }
  0x51   : > { %1028 = vmatmul.mubr.bf16.gmra.mrb[20].mxu0 %v1645_v6  ;;  %1044 = vmatmul.mubr.bf16.gmra.mrb[20].mxu1 %v1646_v7  ;;  %v1359_v6 = vld [vmem:[%s1920_s2] ss:$0 sm:$0xff] }
  0xfb   : > { %v1418_v8 = vpop.f32.mrb[0].mxu0 }
  0xfc   : > { %v1458_v9 = vpop.f32.mrb[0].mxu1  ;;  %v1419_v10 = vpop.f32.mrb[1].mxu0 }
  0xfd   : > { %v1420_v11 = vadd.f32 %v1419_v10, %v1418_v8  ;;  %v1459_v12 = vpop.f32.mrb[1].mxu1  ;;  %v1421_v13 = vpop.f32.mrb[2].mxu0 }
  0xfe   : > { %v1460_v14 = vadd.f32 %v1459_v12, %v1458_v9  ;;  %v1461_v15 = vpop.f32.mrb[2].mxu1  ;;  %v1422_v16 = vpop.f32.mrb[3].mxu0 }
  0xff   : > { %v1423_v17 = vadd.f32 %v1422_v16, %v1421_v13  ;;  %v1462_v18 = vpop.f32.mrb[3].mxu1 }
 0x100   : > { %v957_v19 = vadd.f32 %v1460_v14, %v1420_v11  ;;  %v1463_v20 = vadd.f32 %v1462_v18, %v1461_v15 }
 0x102   : > { %v960_v21 = vadd.f32 %v1463_v20, %v1423_v17  ;;  %v1360_v17 = vld [vmem:[%s1921_s3] ss:$0 sm:$0xff] }
 0x103   : > { %v1424_v22 = vpop.f32.mrb[4].mxu0 }
 0x104   : > { %v1464_v23 = vpop.f32.mrb[4].mxu1  ;;  %v1425_v24 = vpop.f32.mrb[5].mxu0 }
 0x105   : > { %v1426_v25 = vadd.f32 %v1425_v24, %v1424_v22  ;;  %v1465_v26 = vpop.f32.mrb[5].mxu1  ;;  %v1427_v27 = vpop.f32.mrb[6].mxu0 }
 0x106   : > { %v1466_v28 = vadd.f32 %v1465_v26, %v1464_v23  ;;  %v1467_v29 = vpop.f32.mrb[6].mxu1  ;;  %v1428_v30 = vpop.f32.mrb[7].mxu0 }
 0x107   : > { %v1429_v31 = vadd.f32 %v1428_v30, %v1427_v27  ;;  %v1468_v32 = vpop.f32.mrb[7].mxu1 }
 0x108   : > { %v1893_v33 = vadd.f32 %v1466_v28, %v1426_v25  ;;  %v1469_v34 = vadd.f32 %v1468_v32, %v1467_v29 }
 0x10a   : > { %v1895_v35 = vadd.f32 %v1469_v34, %v1429_v31 }
 0x10b   : > { %v1430_v36 = vpop.f32.mrb[8].mxu0 }
 0x10c   : > { %v1470_v37 = vpop.f32.mrb[8].mxu1  ;;  %v1431_v38 = vpop.f32.mrb[9].mxu0 }
 0x10d   : > { %v1432_v39 = vadd.f32 %v1431_v38, %v1430_v36  ;;  %v1471_v40 = vpop.f32.mrb[9].mxu1  ;;  %v1433_v41 = vpop.f32.mrb[10].mxu0 }
 0x10e   : > { %v1472_v42 = vadd.f32 %v1471_v40, %v1470_v37  ;;  %v1473_v43 = vpop.f32.mrb[10].mxu1  ;;  %v1434_v44 = vpop.f32.mrb[11].mxu0 }
 0x10f   : > { %v1435_v45 = vadd.f32 %v1434_v44, %v1433_v41  ;;  %v1474_v46 = vpop.f32.mrb[11].mxu1 }
 0x110   : > { %v973_v47 = vadd.f32 %v1472_v42, %v1432_v39  ;;  %v1475_v48 = vadd.f32 %v1474_v46, %v1473_v43 }
 0x112   : > { %v976_v49 = vadd.f32 %v1475_v48, %v1435_v45 }
 0x113   : > { %v1436_v50 = vpop.f32.mrb[12].mxu0 }
 0x114   : > { %v1476_v51 = vpop.f32.mrb[12].mxu1  ;;  %v1437_v52 = vpop.f32.mrb[13].mxu0 }
 0x115   : > { %v1438_v53 = vadd.f32 %v1437_v52, %v1436_v50  ;;  %v1477_v54 = vpop.f32.mrb[13].mxu1  ;;  %v1439_v55 = vpop.f32.mrb[14].mxu0 }
 0x116   : > { %v1478_v56 = vadd.f32 %v1477_v54, %v1476_v51  ;;  %v1479_v57 = vpop.f32.mrb[14].mxu1  ;;  %v1440_v58 = vpop.f32.mrb[15].mxu0 }
 0x117   : > { %v1441_v59 = vadd.f32 %v1440_v58, %v1439_v55  ;;  %v1480_v60 = vpop.f32.mrb[15].mxu1 }
 0x118   : > { %v981_v61 = vadd.f32 %v1478_v56, %v1438_v53  ;;  %v1481_v62 = vadd.f32 %v1480_v60, %v1479_v57 }
 0x11a   : > { %v984_v63 = vadd.f32 %v1481_v62, %v1441_v59 }
 0x11c   : > { %v1498_v0 = vpop.f32.mrb[16].mxu0  ;;  %v1510_v1 = vpop.f32.mrb[16].mxu1 }
 0x11d   : > { %v1499_v2 = vpop.f32.mrb[17].mxu0  ;;  %v1511_v4 = vpop.f32.mrb[17].mxu1 }
 0x11e   : > { %v1500_v3 = vadd.f32 %v1499_v2, %v1498_v0  ;;  %v1501_v5 = vpop.f32.mrb[18].mxu0  ;;  %v1512_v7 = vadd.f32 %v1511_v4, %v1510_v1  ;;  %v1513_v8 = vpop.f32.mrb[18].mxu1 }
 0x11f   : > { %v1502_v9 = vpop.f32.mrb[19].mxu0  ;;  %v1514_v12 = vpop.f32.mrb[19].mxu1 }
 0x120   : > { %v1022_v10 = vadd.f32 %v1500_v3, %v957_v19  ;;  %v1503_v11 = vadd.f32 %v1502_v9, %v1501_v5  ;;  %v1038_v13 = vadd.f32 %v1512_v7, %v973_v47  ;;  %v1515_v14 = vadd.f32 %v1514_v12, %v1513_v8 }
 0x122   : > { %v1086_v15 = vmul.f32 %v1359_v6, %v1022_v10  ;;  %v1025_v16 = vadd.f32 %v1503_v11, %v960_v21  ;;  %v1090_v18 = vmul.f32 %v1359_v6, %v1038_v13  ;;  %v1041_v20 = vadd.f32 %v1515_v14, %v976_v49 }
 0x124   : > { %v1087_v22 = vmul.f32 %v1359_v6, %v1025_v16  ;;  %v1504_v23 = vpop.f32.mrb[20].mxu0  ;;  %v1091_v24 = vmul.f32 %v1359_v6, %v1041_v20  ;;  %v1516_v25 = vpop.f32.mrb[20].mxu1  ;;  %v1101_v27 = vadd.f32 %v1360_v17, %v1086_v15  ;;  %v1105_v31 = vadd.f32 %v1360_v17, %v1090_v18 }
 0x125   : > { %v1505_v26 = vpop.f32.mrb[21].mxu0  ;;  %v1517_v29 = vpop.f32.mrb[21].mxu1 }
 0x126   : > { %v1102_v19 = vadd.f32 %v1360_v17, %v1087_v22  ;;  %v1506_v28 = vadd.f32 %v1505_v26, %v1504_v23  ;;  %v1507_v30 = vpop.f32.mrb[22].mxu0  ;;  %v1106_v21 = vadd.f32 %v1360_v17, %v1091_v24  ;;  %v1518_v32 = vadd.f32 %v1517_v29, %v1516_v25  ;;  %v1519_v34 = vpop.f32.mrb[22].mxu1 }
 0x127   : > { %v1508_v36 = vpop.f32.mrb[23].mxu0  ;;  %v1520_v40 = vpop.f32.mrb[23].mxu1 }
 0x128   : > { %v1382_v37 = vpack.c.bf16 %v1102_v19, %v1101_v27  ;;  %v1030_v38 = vadd.f32 %v1506_v28, %v1893_v33  ;;  %v1509_v39 = vadd.f32 %v1508_v36, %v1507_v30  ;;  %v1392_v41 = vpack.c.bf16 %v1106_v21, %v1105_v31 }
 0x129   : > { %v1046_v42 = vadd.f32 %v1518_v32, %v981_v61  ;;  %v1521_v43 = vadd.f32 %v1520_v40, %v1519_v34 }
 0x12a   : > { %1383 = vst [vmem:[%s306_s13] sm:$0xff] %v1382_v37   ;;  %v1088_v44 = vmul.f32 %v1359_v6, %v1030_v38  ;;  %v1033_v45 = vadd.f32 %v1509_v39, %v1895_v35  ;;  %1400 = vst [vmem:[%s306_s13 + $0x10] sm:$0xff] %v1392_v41  }
 0x12b   : > { %v1092_v46 = vmul.f32 %v1359_v6, %v1046_v42  ;;  %v1049_v47 = vadd.f32 %v1521_v43, %v984_v63 }
 0x12c   : > { %v1089_v48 = vmul.f32 %v1359_v6, %v1033_v45  ;;  %v1103_v50 = vadd.f32 %v1360_v17, %v1088_v44 }
 0x12d   : > { %v1093_v49 = vmul.f32 %v1359_v6, %v1049_v47  ;;  %v1107_v52 = vadd.f32 %v1360_v17, %v1092_v46 }
 0x12e   : > { %v1104_v51 = vadd.f32 %v1360_v17, %v1089_v48 }
 0x12f   : > { %v1108_v53 = vadd.f32 %v1360_v17, %v1093_v49 }
 0x130   : > { %v1387_v54 = vpack.c.bf16 %v1104_v51, %v1103_v50 }
 0x131   : > { %v1397_v33 = vpack.c.bf16 %v1108_v53, %v1107_v52 }
 0x132   : > { %1399 = vst [vmem:[%s306_s13 + $0x8] sm:$0xff] %v1387_v54  }
 0x133   : > { %1401 = vst [vmem:[%s306_s13 + $0x18] sm:$0xff] %v1397_v33  }
 0x134 PF: > { %s14_s17 = sadd.s32 1, %s1669_s17   ;;  %s1923_s15 = smov %s1665_s16 }
 0x135   : > { %p11_p5 = scmp.ge.s32.totalorder %s14_s17, 4   ;;  %s1924_s16 = smov %s1926_s18 }
 0x137   :  { %13 = sbr.rel (!%p11_p5) target bundleno = 2 (0x2), region = 83 }

// kernel: _lambda_.38
= control target key start
LH: loop header
LB: loop body
LE: loop exit
PB: predicated region body
PF: predicated region fallthrough
CT: control target
= control target key end

     0   :  { %s1235_s15 = smov 0   ;;  %s1237_s16 = smov 0   ;;  %s1373_s0 = inlined_call_operand.vmem [shape: bf16[128,384], index: 0, kind: input, shape index: {}]   ;;  %s1374_s1 = inlined_call_operand.vmem [shape: bf16[384,128], index: 1, kind: input, shape index: {}]   ;;  %s1375_s2 = inlined_call_operand.vmem [shape: f32[1,128], index: 2, kind: input, shape index: {}]   ;;  %s1376_s3 = inlined_call_operand.vmem [shape: f32[1,128], index: 3, kind: input, shape index: {}]   ;;  %s1377_s4 = inlined_call_operand.vmem [shape: bf16[128,128], index: 4, kind: output, shape index: {}]  }
   0x1   :  { %s1239_s17 = smov 0  }
   0x2 LB: > { %s33_s18 = sadd.s32 1, %s1204_s16  ;;  %p961_p0 = scmp.ge.s32.totalorder %s1208_s17, 1  ;;  %s1208_s17 = sphi %s1239_s17, %s14_s17   ;;  %s1204_s16 = sphi %s1237_s16, %s1379_s16   ;;  %s1200_s15 = sphi %s1235_s15, %s1378_s15  }
   0x3   : > { %p35_p1 = scmp.ge.s32.totalorder %s33_s18, 2  ;;  %p224_p2 = scmp.lt.s32.totalorder %s1208_s17, 3 }
   0x5   : > { %s1381_s18 = smov (%p35_p1, %s33_s18), 0  ;;  %p225_p3 = pnand %p961_p0, %p224_p2 }
   0x6   : > { %v1146_v0 = vld [vmem:[%s1374_s1 + $0x40] sm:$0xff] (!%p225_p3)   ;;  %v1149_v3 = vld [vmem:[%s1374_s1 + $0x48] sm:$0xff] (!%p225_p3)   ;;  %v1152_v6 = vld [vmem:[%s1374_s1 + $0x50] sm:$0xff] (!%p225_p3)   ;;  %s962_s9 = sshll.u32 (!%p225_p3), %s1200_s15, 3 }
   0x7   : > { %228 = sbr.rel (%p225_p3) target bundleno = 289 (0x121), region = 36  ;;  %v1147_v1 = vld [vmem:[%s1374_s1] sm:$0xff] (!%p225_p3)   ;;  %1045 = vmatprep.subr.bf16.mxu0 (!%p225_p3), %v1146_v0  ;;  %v1150_v4 = vld [vmem:[%s1374_s1 + $0x8] sm:$0xff] (!%p225_p3)   ;;  %v1153_v7 = vld [vmem:[%s1374_s1 + $0x10] sm:$0xff] (!%p225_p3)   ;;  %p274_p4 = scmp.lt.s32.totalorder (!%p225_p3), %s962_s9, 15 }
   0x8   : > { %v1148_v2 = vld [vmem:[%s1374_s1 + $0x80] sm:$0xff] (!%p225_p3)   ;;  %1046 = vmatpush3.bf16.msra.mxu0 (!%p225_p3), %v1147_v1  ;;  %v1151_v5 = vld [vmem:[%s1374_s1 + $0x88] sm:$0xff] (!%p225_p3)   ;;  %v1154_v8 = vld [vmem:[%s1374_s1 + $0x90] sm:$0xff] (!%p225_p3)  }
   0x9   : > { %1097 = vmatprep.subr.bf16.mxu1 (!%p225_p3), %v1148_v2  ;;  %1047 = vmatprep.subr.bf16.mxu0 (!%p225_p3), %v1149_v3  ;;  %v1155_v9 = vld [vmem:[%s1374_s1 + $0x58] sm:$0xff] (!%p225_p3)   ;;  %v1158_v12 = vld [vmem:[%s1374_s1 + $0x60] sm:$0xff] (!%p225_p3)   ;;  %v1161_v15 = vld [vmem:[%s1374_s1 + $0x68] sm:$0xff] (!%p225_p3)  }
   0xa   : > { %1098 = vmatpush3.bf16.msra.mxu1 (!%p225_p3), %v1148_v2  ;;  %v1156_v10 = vld [vmem:[%s1374_s1 + $0x18] sm:$0xff] (!%p225_p3)   ;;  %v1160_v13 = vld [vmem:[%s1374_s1 + $0xa0] sm:$0xff] (!%p225_p3)   ;;  %v1163_v16 = vld [vmem:[%s1374_s1 + $0xa8] sm:$0xff] (!%p225_p3)  }
   0xb   : > { %1099 = vmatprep.subr.bf16.mxu1 (!%p225_p3), %v1151_v5  ;;  %v1157_v11 = vld [vmem:[%s1374_s1 + $0x98] sm:$0xff] (!%p225_p3)   ;;  %v1159_v14 = vld [vmem:[%s1374_s1 + $0x20] sm:$0xff] (!%p225_p3)   ;;  %v1162_v17 = vld [vmem:[%s1374_s1 + $0x28] sm:$0xff] (!%p225_p3)  }
   0xc   : > { %1048 = vmatpush3.bf16.msra.mxu0 (!%p225_p3), %v1150_v4  ;;  %v1164_v18 = vld [vmem:[%s1374_s1 + $0x70] sm:$0xff] (!%p225_p3)   ;;  %v1167_v21 = vld [vmem:[%s1374_s1 + $0x78] sm:$0xff] (!%p225_p3)   ;;  %v1002_v43 = vld [vmem:[%s1375_s2] ss:$0 sm:$0xff] (!%p225_p3) }
   0xd   : > { %1049 = vmatprep.subr.bf16.mxu0 (!%p225_p3), %v1152_v6  ;;  %v1165_v19 = vld [vmem:[%s1374_s1 + $0x30] sm:$0xff] (!%p225_p3)   ;;  %v1169_v22 = vld [vmem:[%s1374_s1 + $0xb8] sm:$0xff] (!%p225_p3)   ;;  %v1003_v50 = vld [vmem:[%s1376_s3] ss:$0 sm:$0xff] (!%p225_p3) }
   0xe   : > { %1100 = vmatpush3.bf16.msra.mxu1 %v1151_v5  ;;  %s1383_s9 = smov (!%p274_p4, %s962_s9), 15  ;;  %v1166_v20 = vld [vmem:[%s1374_s1 + $0xb0] sm:$0xff]   ;;  %v1168_v25 = vld [vmem:[%s1374_s1 + $0x38] sm:$0xff]  }
   0xf   : > { %1101 = vmatprep.subr.bf16.mxu1 %v1154_v8  ;;  %s1121_s5 = smul.u32 12, %s1383_s9 }
  0x10   : > { %1050 = vmatpush3.bf16.msra.mxu0 %v1153_v7 }
  0x11   : > { %1051 = vmatprep.subr.bf16.mxu0 %v1155_v9  ;;  %s1325_s21 = scalar_lea.vmem %s1373_s0, %s1121_s5  ;;  %s965_s5 = sshll.u32 %s1383_s9, 2 }
  0x12   : > { %1102 = vmatpush3.bf16.msra.mxu1 %v1154_v8  ;;  %v1172_v23 = vld [vmem:[%s1325_s21 + $0x4] ss:$12 sps:$4 sm:$0xff]   ;;  %v1173_v24 = vld [vmem:[%s1325_s21 + $0x8] ss:$12 sps:$4 sm:$0xff]   ;;  %v1170_v26 = vld [vmem:[%s1325_s21] ss:$12 sps:$4 sm:$0xff]   ;;  %s1358_s8 = scalar_lea.vmem %s1377_s4, %s965_s5 }
  0x13   : > { %1103 = vmatprep.subr.bf16.mxu1 %v1157_v11  ;;  %633 = vmatprep.mubr.bf16.mxu0 %v1172_v23  ;;  %v1175_v27 = vld [vmem:[%s1325_s21 + $0x1c] ss:$12 sps:$4 sm:$0xff]   ;;  %v1174_v28 = vld [vmem:[%s1325_s21 + $0x20] ss:$12 sps:$4 sm:$0xff]   ;;  %v1181_v29 = vld [vmem:[%s1325_s21 + $0x38] ss:$12 sps:$4 sm:$0xff]  }
  0x14   : > { %1052 = vmatpush3.bf16.msra.mxu0 %v1156_v10  ;;  %1113 = vmatprep.mubr.bf16.mxu1 %v1173_v24  ;;  %v1177_v30 = vld [vmem:[%s1325_s21 + $0x18] ss:$12 sps:$4 sm:$0xff]   ;;  %v1178_v31 = vld [vmem:[%s1325_s21 + $0x34] ss:$12 sps:$4 sm:$0xff]   ;;  %v1182_v32 = vld [vmem:[%s1325_s21 + $0x50] ss:$12 sps:$4 sm:$0xff]  }
  0x15   : > { %1053 = vmatprep.subr.bf16.mxu0 %v1158_v12  ;;  %v1180_v33 = vld [vmem:[%s1325_s21 + $0x30] ss:$12 sps:$4 sm:$0xff]   ;;  %v1183_v34 = vld [vmem:[%s1325_s21 + $0x4c] ss:$12 sps:$4 sm:$0xff]   ;;  %v1185_v35 = vld [vmem:[%s1325_s21 + $0x48] ss:$12 sps:$4 sm:$0xff]  }
  0x16   : > { %1104 = vmatpush3.bf16.msra.mxu1 %v1157_v11 }
  0x17   : > { %1105 = vmatprep.subr.bf16.mxu1 %v1160_v13 }
  0x18   : > { %1054 = vmatpush3.bf16.msra.mxu0 %v1159_v14 }
  0x19   : > { %1055 = vmatprep.subr.bf16.mxu0 %v1161_v15 }
  0x1a   : > { %1106 = vmatpush3.bf16.msra.mxu1 %v1160_v13 }
  0x1b   : > { %1107 = vmatprep.subr.bf16.mxu1 %v1163_v16 }
  0x1c   : > { %1056 = vmatpush3.bf16.msra.mxu0 %v1162_v17 }
  0x1d   : > { %1057 = vmatprep.subr.bf16.mxu0 %v1164_v18 }
  0x1e   : > { %1108 = vmatpush3.bf16.msra.mxu1 %v1163_v16 }
  0x1f   : > { %1109 = vmatprep.subr.bf16.mxu1 %v1166_v20 }
  0x20   : > { %1058 = vmatpush3.bf16.msra.mxu0 %v1165_v19 }
  0x21   : > { %1059 = vmatprep.subr.bf16.mxu0 %v1167_v21 }
  0x22   : > { %1110 = vmatpush3.bf16.msra.mxu1 %v1166_v20 }
  0x23   : > { %1111 = vmatprep.subr.bf16.mxu1 %v1169_v22 }
  0x24   : > { %1060 = vmatpush3.bf16.msra.mxu0 %v1168_v25 }
  0x26   : > { %1112 = vmatpush3.bf16.msra.mxu1 %v1169_v22 }
  0x27   : > { %634 = vmatmul.mubr.bf16.vlgmr.msra.gmra.mrb[0].mxu0 %v1170_v26 }
  0x28   : > { %641 = vmatprep.mubr.bf16.mxu0 %v1175_v27 }
  0x29   : > { %1114 = vmatmul.mubr.bf16.vlgmr.msra.gmra.mrb[0].mxu1 %v1174_v28 }
  0x2a   : > { %1117 = vmatprep.mubr.bf16.mxu1 %v1181_v29 }
  0x2f   : > { %642 = vmatmul.mubr.bf16.gmra.mrb[4].mxu0 %v1177_v30 }
  0x30   : > { %649 = vmatprep.mubr.bf16.mxu0 %v1178_v31 }
  0x31   : > { %1118 = vmatmul.mubr.bf16.gmra.mrb[4].mxu1 %v1182_v32 }
  0x37   : > { %650 = vmatmul.mubr.bf16.gmra.mrb[8].mxu0 %v1180_v33 }
  0x38   : > { %657 = vmatprep.mubr.bf16.mxu0 %v1183_v34 }
  0x3f   : > { %658 = vmatmul.mubr.bf16.gmra.mrb[12].mxu0 %v1185_v35 }
  0xfa   : > { %v1061_v36 = vpop.f32.mrb[0].mxu0 }
  0xfb   : > { %v1062_v37 = vpop.f32.mrb[1].mxu0 }
  0xfc   : > { %v1063_v38 = vadd.f32 %v1062_v37, %v1061_v36  ;;  %v1064_v39 = vpop.f32.mrb[2].mxu0  ;;  %v1115_v40 = vpop.f32.mrb[0].mxu1 }
  0xfd   : > { %v1065_v41 = vpop.f32.mrb[3].mxu0  ;;  %v700_v42 = vpop.f32.mrb[1].mxu1 }
  0xfe   : > { %v1066_v44 = vadd.f32 %v1065_v41, %v1064_v39  ;;  %v701_v45 = vadd.f32 %v1063_v38, %v700_v42  ;;  %v1116_v46 = vpop.f32.mrb[2].mxu1 }
  0xff   : > { %v703_v47 = vpop.f32.mrb[3].mxu1 }
 0x100   : > { %v765_v48 = vmul.f32 %v1002_v43, %v701_v45  ;;  %v704_v49 = vadd.f32 %v1066_v44, %v703_v47 }
 0x102   : > { %v766_v51 = vmul.f32 %v1002_v43, %v704_v49  ;;  %v1067_v52 = vpop.f32.mrb[4].mxu0  ;;  %v780_v54 = vadd.f32 %v1003_v50, %v765_v48 }
 0x103   : > { %v1068_v53 = vpop.f32.mrb[5].mxu0 }
 0x104   : > { %v781_v55 = vadd.f32 %v1003_v50, %v766_v51  ;;  %v1069_v56 = vadd.f32 %v1068_v53, %v1067_v52  ;;  %v1070_v57 = vpop.f32.mrb[6].mxu0  ;;  %v1119_v58 = vpop.f32.mrb[4].mxu1 }
 0x105   : > { %v1071_v59 = vpop.f32.mrb[7].mxu0  ;;  %v716_v60 = vpop.f32.mrb[5].mxu1 }
 0x106   : > { %v1025_v61 = vpack.c.bf16 %v781_v55, %v780_v54  ;;  %v709_v62 = vadd.f32 %v1115_v40, %v1069_v56  ;;  %v1072_v63 = vadd.f32 %v1071_v59, %v1070_v57  ;;  %v1120_v0 = vpop.f32.mrb[6].mxu1 }
 0x107   : > { %v719_v1 = vpop.f32.mrb[7].mxu1 }
 0x108   : > { %1026 = vst [vmem:[%s1358_s8] sm:$0xff] %v1025_v61   ;;  %v767_v2 = vmul.f32 %v1002_v43, %v709_v62  ;;  %v712_v3 = vadd.f32 %v1116_v46, %v1072_v63 }
 0x10a   : > { %v768_v4 = vmul.f32 %v1002_v43, %v712_v3  ;;  %v1073_v5 = vpop.f32.mrb[8].mxu0  ;;  %v782_v7 = vadd.f32 %v1003_v50, %v767_v2 }
 0x10b   : > { %v1074_v6 = vpop.f32.mrb[9].mxu0 }
 0x10c   : > { %v783_v8 = vadd.f32 %v1003_v50, %v768_v4  ;;  %v1075_v9 = vadd.f32 %v1074_v6, %v1073_v5  ;;  %v1076_v10 = vpop.f32.mrb[10].mxu0 }
 0x10d   : > { %v1077_v11 = vpop.f32.mrb[11].mxu0 }
 0x10e   : > { %v1030_v12 = vpack.c.bf16 %v783_v8, %v782_v7  ;;  %v1078_v13 = vadd.f32 %v1077_v11, %v1076_v10  ;;  %v717_v14 = vadd.f32 %v1075_v9, %v716_v60 }
 0x110   : > { %1042 = vst [vmem:[%s1358_s8 + $0x8] sm:$0xff] %v1030_v12   ;;  %v769_v15 = vmul.f32 %v1002_v43, %v717_v14  ;;  %v720_v16 = vadd.f32 %v1078_v13, %v719_v1 }
 0x112   : > { %v770_v17 = vmul.f32 %v1002_v43, %v720_v16  ;;  %v1079_v18 = vpop.f32.mrb[12].mxu0  ;;  %v784_v20 = vadd.f32 %v1003_v50, %v769_v15 }
 0x113   : > { %v1080_v19 = vpop.f32.mrb[13].mxu0 }
 0x114   : > { %v785_v21 = vadd.f32 %v1003_v50, %v770_v17  ;;  %v1081_v22 = vadd.f32 %v1080_v19, %v1079_v18  ;;  %v1082_v23 = vpop.f32.mrb[14].mxu0 }
 0x115   : > { %v1083_v24 = vpop.f32.mrb[15].mxu0 }
 0x116   : > { %v1035_v25 = vpack.c.bf16 %v785_v21, %v784_v20  ;;  %v725_v26 = vadd.f32 %v1119_v58, %v1081_v22  ;;  %v1084_v27 = vadd.f32 %v1083_v24, %v1082_v23 }
 0x118   : > { %1043 = vst [vmem:[%s1358_s8 + $0x10] sm:$0xff] %v1035_v25   ;;  %v771_v28 = vmul.f32 %v1002_v43, %v725_v26  ;;  %v728_v29 = vadd.f32 %v1120_v0, %v1084_v27 }
 0x11a   : > { %v772_v30 = vmul.f32 %v1002_v43, %v728_v29  ;;  %v786_v31 = vadd.f32 %v1003_v50, %v771_v28 }
 0x11c   : > { %v787_v32 = vadd.f32 %v1003_v50, %v772_v30 }
 0x11e   : > { %v1040_v33 = vpack.c.bf16 %v787_v32, %v786_v31 }
 0x120   : > { %1044 = vst [vmem:[%s1358_s8 + $0x18] sm:$0xff] %v1040_v33  }
 0x121 PF: > { %s14_s17 = sadd.s32 1, %s1208_s17   ;;  %s1378_s15 = smov %s1204_s16 }
 0x122   : > { %p11_p5 = scmp.ge.s32.totalorder %s14_s17, 4   ;;  %s1379_s16 = smov %s1381_s18 }
 0x124   :  { %13 = sbr.rel (!%p11_p5) target bundleno = 2 (0x2), region = 83 }

// kernel: _lambda_.43
= control target key start
LH: loop header
LB: loop body
LE: loop exit
PB: predicated region body
PF: predicated region fallthrough
CT: control target
= control target key end

     0   :  { %s1299_s15 = smov 0   ;;  %s1301_s16 = smov 0   ;;  %s1497_s0 = inlined_call_operand.vmem [shape: bf16[32,768], index: 0, kind: input, shape index: {}]   ;;  %s1498_s1 = inlined_call_operand.vmem [shape: bf16[768,128], index: 1, kind: input, shape index: {}]   ;;  %s1499_s2 = inlined_call_operand.vmem [shape: f32[1,128], index: 2, kind: input, shape index: {}]   ;;  %s1500_s3 = inlined_call_operand.vmem [shape: f32[1,128], index: 3, kind: input, shape index: {}]   ;;  %s1501_s4 = inlined_call_operand.vmem [shape: bf16[32,128], index: 4, kind: output, shape index: {}]  }
   0x1   :  { %s1303_s17 = smov 0  }
   0x2 LB: > { %s33_s18 = sadd.s32 1, %s1268_s16  ;;  %p1030_p0 = scmp.ge.s32.totalorder %s1272_s17, 1  ;;  %s1272_s17 = sphi %s1303_s17, %s14_s17   ;;  %s1268_s16 = sphi %s1301_s16, %s1503_s16   ;;  %s1264_s15 = sphi %s1299_s15, %s1502_s15  }
   0x3   : > { %p35_p1 = scmp.ge.s32.totalorder %s33_s18, 2  ;;  %p224_p2 = scmp.lt.s32.totalorder %s1272_s17, 3 }
   0x5   : > { %s1505_s18 = smov (%p35_p1, %s33_s18), 0  ;;  %p225_p3 = pnand %p1030_p0, %p224_p2 }
   0x6   : > { %v1193_v0 = vld [vmem:[%s1498_s1 + $0x40] sm:$0xff] (!%p225_p3)   ;;  %v1197_v4 = vld [vmem:[%s1498_s1 + $0x48] sm:$0xff] (!%p225_p3)   ;;  %v1201_v8 = vld [vmem:[%s1498_s1 + $0x50] sm:$0xff] (!%p225_p3)   ;;  %s1031_s27 = sshll.u32 (!%p225_p3), %s1264_s15, 1 }
   0x7   : > { %228 = sbr.rel (%p225_p3) target bundleno = 298 (0x12a), region = 36  ;;  %v1194_v1 = vld [vmem:[%s1498_s1 + $0xc0] sm:$0xff] (!%p225_p3)   ;;  %1102 = vmatprep.subr.bf16.mxu0 (!%p225_p3), %v1193_v0  ;;  %v1198_v5 = vld [vmem:[%s1498_s1 + $0xc8] sm:$0xff] (!%p225_p3)   ;;  %v1202_v9 = vld [vmem:[%s1498_s1 + $0xd0] sm:$0xff] (!%p225_p3)   ;;  %p274_p4 = scmp.lt.s32.totalorder (!%p225_p3), %s1031_s27, 3 }
   0x8   : > { %v1195_v2 = vld [vmem:[%s1498_s1] sm:$0xff] (!%p225_p3)   ;;  %1124 = vmatprep.subr.bf16.mxu1 (!%p225_p3), %v1194_v1  ;;  %v1199_v6 = vld [vmem:[%s1498_s1 + $0x8] sm:$0xff] (!%p225_p3)   ;;  %v1203_v10 = vld [vmem:[%s1498_s1 + $0x10] sm:$0xff] (!%p225_p3)  }
   0x9   : > { %v1196_v3 = vld [vmem:[%s1498_s1 + $0x80] sm:$0xff] (!%p225_p3)   ;;  %1103 = vmatpush3.bf16.msra.mxu0 (!%p225_p3), %v1195_v2  ;;  %v1200_v7 = vld [vmem:[%s1498_s1 + $0x88] sm:$0xff] (!%p225_p3)   ;;  %v1204_v11 = vld [vmem:[%s1498_s1 + $0x90] sm:$0xff] (!%p225_p3)  }
   0xa   : > { %1125 = vmatpush3.bf16.msra.mxu1 (!%p225_p3), %v1196_v3  ;;  %1104 = vmatprep.subr.bf16.mxu0 (!%p225_p3), %v1197_v4  ;;  %v1205_v12 = vld [vmem:[%s1498_s1 + $0x58] sm:$0xff] (!%p225_p3)   ;;  %v1209_v16 = vld [vmem:[%s1498_s1 + $0x60] sm:$0xff] (!%p225_p3)   ;;  %v1213_v20 = vld [vmem:[%s1498_s1 + $0x68] sm:$0xff] (!%p225_p3)  }
   0xb   : > { %1126 = vmatprep.subr.bf16.mxu1 (!%p225_p3), %v1198_v5  ;;  %v1206_v13 = vld [vmem:[%s1498_s1 + $0xd8] sm:$0xff] (!%p225_p3)   ;;  %v1210_v17 = vld [vmem:[%s1498_s1 + $0xe0] sm:$0xff] (!%p225_p3)   ;;  %v1214_v21 = vld [vmem:[%s1498_s1 + $0xe8] sm:$0xff] (!%p225_p3)  }
   0xc   : > { %v1207_v14 = vld [vmem:[%s1498_s1 + $0x18] sm:$0xff] (!%p225_p3)   ;;  %v1211_v18 = vld [vmem:[%s1498_s1 + $0x20] sm:$0xff] (!%p225_p3)   ;;  %v1215_v22 = vld [vmem:[%s1498_s1 + $0x28] sm:$0xff] (!%p225_p3)  }
   0xd   : > { %1105 = vmatpush3.bf16.msra.mxu0 (!%p225_p3), %v1199_v6  ;;  %v1208_v15 = vld [vmem:[%s1498_s1 + $0x98] sm:$0xff] (!%p225_p3)   ;;  %v1212_v19 = vld [vmem:[%s1498_s1 + $0xa0] sm:$0xff] (!%p225_p3)   ;;  %v1216_v23 = vld [vmem:[%s1498_s1 + $0xa8] sm:$0xff] (!%p225_p3)  }
   0xe   : > { %1127 = vmatpush3.bf16.msra.mxu1 %v1200_v7  ;;  %1106 = vmatprep.subr.bf16.mxu0 %v1201_v8  ;;  %s1507_s27 = smov (!%p274_p4, %s1031_s27), 3  ;;  %v1217_v24 = vld [vmem:[%s1498_s1 + $0x70] sm:$0xff]   ;;  %v1221_v28 = vld [vmem:[%s1498_s1 + $0x78] sm:$0xff]   ;;  %v1231_v36 = vld [vmem:[%s1498_s1 + $0x140] sm:$0xff]  }
   0xf   : > { %1128 = vmatprep.subr.bf16.mxu1 %v1202_v9  ;;  %v1218_v25 = vld [vmem:[%s1498_s1 + $0xf0] sm:$0xff]   ;;  %s1168_s28 = smul.u32 24, %s1507_s27  ;;  %v1222_v29 = vld [vmem:[%s1498_s1 + $0xf8] sm:$0xff]   ;;  %v1232_v37 = vld [vmem:[%s1498_s1 + $0x100] sm:$0xff]   ;;  %s1034_s15 = sshll.u32 %s1507_s27, 2 }
  0x10   : > { %v1219_v26 = vld [vmem:[%s1498_s1 + $0x30] sm:$0xff]   ;;  %v1223_v30 = vld [vmem:[%s1498_s1 + $0x38] sm:$0xff]   ;;  %v1233_v38 = vld [vmem:[%s1498_s1 + $0x148] sm:$0xff]   ;;  %s306_s13 = scalar_lea.vmem %s1501_s4, %s1034_s15 }
  0x11   : > { %1107 = vmatpush3.bf16.msra.mxu0 %v1203_v10  ;;  %v1220_v27 = vld [vmem:[%s1498_s1 + $0xb0] sm:$0xff]   ;;  %s1416_s12 = scalar_lea.vmem %s1497_s0, %s1168_s28  ;;  %v1224_v31 = vld [vmem:[%s1498_s1 + $0xb8] sm:$0xff]   ;;  %v1234_v39 = vld [vmem:[%s1498_s1 + $0x108] sm:$0xff]  }
  0x12   : > { %1129 = vmatpush3.bf16.msra.mxu1 %v1204_v11  ;;  %1108 = vmatprep.subr.bf16.mxu0 %v1205_v12  ;;  %v1225_v32 = vld [vmem:[%s1416_s12] ss:$24 sps:$4 sm:$0xff]   ;;  %v1227_v33 = vld [vmem:[%s1416_s12 + $0x4] ss:$24 sps:$4 sm:$0xff]   ;;  %v1235_v40 = vld [vmem:[%s1498_s1 + $0x150] sm:$0xff]  }
  0x13   : > { %1130 = vmatprep.subr.bf16.mxu1 %v1206_v13  ;;  %v1228_v34 = vld [vmem:[%s1416_s12 + $0x8] ss:$24 sps:$4 sm:$0xff]   ;;  %v1230_v35 = vld [vmem:[%s1416_s12 + $0xc] ss:$24 sps:$4 sm:$0xff]   ;;  %769 = vmatprep.mubr.bf16.mxu0 %v1227_v33  ;;  %v1236_v41 = vld [vmem:[%s1498_s1 + $0x110] sm:$0xff]  }
  0x14   : > { %810 = vmatprep.mubr.bf16.mxu1 %v1230_v35  ;;  %v1237_v42 = vld [vmem:[%s1498_s1 + $0x158] sm:$0xff]   ;;  %v1239_v44 = vld [vmem:[%s1498_s1 + $0x160] sm:$0xff]   ;;  %v1241_v46 = vld [vmem:[%s1498_s1 + $0x168] sm:$0xff]  }
  0x15   : > { %1109 = vmatpush3.bf16.msra.mxu0 %v1207_v14  ;;  %v1238_v43 = vld [vmem:[%s1498_s1 + $0x118] sm:$0xff]   ;;  %v1240_v45 = vld [vmem:[%s1498_s1 + $0x120] sm:$0xff]   ;;  %v1249_v47 = vld [vmem:[%s1416_s12 + $0x14] ss:$24 sps:$4 sm:$0xff]  }
  0x16   : > { %1131 = vmatpush3.bf16.msra.mxu1 %v1208_v15  ;;  %1110 = vmatprep.subr.bf16.mxu0 %v1209_v16  ;;  %v1242_v48 = vld [vmem:[%s1498_s1 + $0x128] sm:$0xff]   ;;  %v1243_v49 = vld [vmem:[%s1498_s1 + $0x170] sm:$0xff]   ;;  %v1245_v51 = vld [vmem:[%s1498_s1 + $0x178] sm:$0xff]  }
  0x17   : > { %1132 = vmatprep.subr.bf16.mxu1 %v1210_v17  ;;  %v1244_v50 = vld [vmem:[%s1498_s1 + $0x130] sm:$0xff]   ;;  %v1246_v52 = vld [vmem:[%s1498_s1 + $0x138] sm:$0xff]   ;;  %v1089_v8 = vld [vmem:[%s1499_s2] ss:$0 sm:$0xff] }
  0x18   : > { %v1247_v53 = vld [vmem:[%s1416_s12 + $0x10] ss:$24 sps:$4 sm:$0xff]   ;;  %v1090_v14 = vld [vmem:[%s1500_s3] ss:$0 sm:$0xff] }
  0x19   : > { %1111 = vmatpush3.bf16.msra.mxu0 %v1211_v18 }
  0x1a   : > { %1133 = vmatpush3.bf16.msra.mxu1 %v1212_v19  ;;  %1112 = vmatprep.subr.bf16.mxu0 %v1213_v20 }
  0x1b   : > { %1134 = vmatprep.subr.bf16.mxu1 %v1214_v21 }
  0x1d   : > { %1113 = vmatpush3.bf16.msra.mxu0 %v1215_v22 }
  0x1e   : > { %1135 = vmatpush3.bf16.msra.mxu1 %v1216_v23  ;;  %1114 = vmatprep.subr.bf16.mxu0 %v1217_v24 }
  0x1f   : > { %1136 = vmatprep.subr.bf16.mxu1 %v1218_v25 }
  0x21   : > { %1115 = vmatpush3.bf16.msra.mxu0 %v1219_v26 }
  0x22   : > { %1137 = vmatpush3.bf16.msra.mxu1 %v1220_v27  ;;  %1116 = vmatprep.subr.bf16.mxu0 %v1221_v28 }
  0x23   : > { %1138 = vmatprep.subr.bf16.mxu1 %v1222_v29 }
  0x25   : > { %1117 = vmatpush3.bf16.msra.mxu0 %v1223_v30 }
  0x26   : > { %1139 = vmatpush3.bf16.msra.mxu1 %v1224_v31  ;;  %1146 = vmatprep.subr.bf16.mxu0 %v1231_v36 }
  0x28   : > { %770 = vmatmul.mubr.bf16.vlgmr.msra.gmra.mrb[0].mxu0 %v1225_v32 }
  0x29   : > { %811 = vmatmul.mubr.bf16.vlgmr.msra.gmra.mrb[0].mxu1 %v1228_v34  ;;  %1147 = vmatpush3.bf16.msra.mxu0 %v1232_v37 }
  0x2a   : > { %1148 = vmatprep.subr.bf16.mxu0 %v1233_v38  ;;  %851 = vmatprep.mubr.bf16.mxu0 %v1249_v47 }
  0x2d   : > { %1149 = vmatpush3.bf16.msra.mxu0 %v1234_v39 }
  0x2e   : > { %1150 = vmatprep.subr.bf16.mxu0 %v1235_v40 }
  0x31   : > { %1151 = vmatpush3.bf16.msra.mxu0 %v1236_v41 }
  0x32   : > { %1152 = vmatprep.subr.bf16.mxu0 %v1237_v42 }
  0x35   : > { %1153 = vmatpush3.bf16.msra.mxu0 %v1238_v43 }
  0x36   : > { %1154 = vmatprep.subr.bf16.mxu0 %v1239_v44 }
  0x39   : > { %1155 = vmatpush3.bf16.msra.mxu0 %v1240_v45 }
  0x3a   : > { %1156 = vmatprep.subr.bf16.mxu0 %v1241_v46 }
  0x3d   : > { %1157 = vmatpush3.bf16.msra.mxu0 %v1242_v48 }
  0x3e   : > { %1158 = vmatprep.subr.bf16.mxu0 %v1243_v49 }
  0x41   : > { %1159 = vmatpush3.bf16.msra.mxu0 %v1244_v50 }
  0x42   : > { %1160 = vmatprep.subr.bf16.mxu0 %v1245_v51 }
  0x45   : > { %1161 = vmatpush3.bf16.msra.mxu0 %v1246_v52 }
  0x48   : > { %852 = vmatmul.mubr.bf16.vlgmr.msra.gmra.mrb[4].mxu0 %v1247_v53 }
  0xfb   : > { %v1118_v54 = vpop.f32.mrb[0].mxu0 }
  0xfc   : > { %v1140_v55 = vpop.f32.mrb[0].mxu1  ;;  %v1119_v56 = vpop.f32.mrb[1].mxu0 }
  0xfd   : > { %v1120_v57 = vadd.f32 %v1119_v56, %v1118_v54  ;;  %v1141_v58 = vpop.f32.mrb[1].mxu1  ;;  %v1121_v59 = vpop.f32.mrb[2].mxu0 }
  0xfe   : > { %v1142_v60 = vadd.f32 %v1141_v58, %v1140_v55  ;;  %v1143_v61 = vpop.f32.mrb[2].mxu1  ;;  %v1122_v62 = vpop.f32.mrb[3].mxu0 }
  0xff   : > { %v1123_v63 = vadd.f32 %v1122_v62, %v1121_v59  ;;  %v1144_v0 = vpop.f32.mrb[3].mxu1 }
 0x100   : > { %v813_v1 = vadd.f32 %v1142_v60, %v1120_v57  ;;  %v1145_v2 = vadd.f32 %v1144_v0, %v1143_v61 }
 0x102   : > { %v816_v3 = vadd.f32 %v1145_v2, %v1123_v63 }
 0x11b   : > { %v1162_v4 = vpop.f32.mrb[4].mxu0 }
 0x11c   : > { %v1163_v5 = vpop.f32.mrb[5].mxu0 }
 0x11d   : > { %v1164_v6 = vadd.f32 %v1163_v5, %v1162_v4  ;;  %v1165_v7 = vpop.f32.mrb[6].mxu0 }
 0x11e   : > { %v1166_v9 = vpop.f32.mrb[7].mxu0 }
 0x11f   : > { %v854_v10 = vadd.f32 %v1164_v6, %v813_v1  ;;  %v1167_v11 = vadd.f32 %v1166_v9, %v1165_v7 }
 0x121   : > { %v876_v12 = vmul.f32 %v1089_v8, %v854_v10  ;;  %v857_v13 = vadd.f32 %v1167_v11, %v816_v3 }
 0x123   : > { %v877_v15 = vmul.f32 %v1089_v8, %v857_v13  ;;  %v885_v16 = vadd.f32 %v1090_v14, %v876_v12 }
 0x125   : > { %v886_v17 = vadd.f32 %v1090_v14, %v877_v15 }
 0x127   : > { %v1100_v18 = vpack.c.bf16 %v886_v17, %v885_v16 }
 0x129   : > { %1101 = vst [vmem:[%s306_s13] sm:$0xff] %v1100_v18  }
 0x12a PF: > { %s14_s17 = sadd.s32 1, %s1272_s17   ;;  %s1502_s15 = smov %s1268_s16 }
 0x12b   : > { %p11_p5 = scmp.ge.s32.totalorder %s14_s17, 4   ;;  %s1503_s16 = smov %s1505_s18 }
 0x12d   :  { %13 = sbr.rel (!%p11_p5) target bundleno = 2 (0x2), region = 83 }

// kernel: _lambda_.45
= control target key start
LH: loop header
LB: loop body
LE: loop exit
PB: predicated region body
PF: predicated region fallthrough
CT: control target
= control target key end

     0   :  { %s983_s15 = smov 0   ;;  %s985_s16 = smov 0   ;;  %s1101_s0 = inlined_call_operand.vmem [shape: bf16[32,384], index: 0, kind: input, shape index: {}]   ;;  %s1102_s1 = inlined_call_operand.vmem [shape: bf16[384,128], index: 1, kind: input, shape index: {}]   ;;  %s1103_s2 = inlined_call_operand.vmem [shape: f32[1,128], index: 2, kind: input, shape index: {}]   ;;  %s1104_s3 = inlined_call_operand.vmem [shape: f32[1,128], index: 3, kind: input, shape index: {}]   ;;  %s1105_s4 = inlined_call_operand.vmem [shape: bf16[32,128], index: 4, kind: output, shape index: {}]  }
   0x1   :  { %s987_s17 = smov 0  }
   0x2 LB: > { %s33_s18 = sadd.s32 1, %s950_s16  ;;  %p781_p0 = scmp.ge.s32.totalorder %s954_s17, 1  ;;  %s954_s17 = sphi %s987_s17, %s14_s17   ;;  %s950_s16 = sphi %s985_s16, %s1107_s16   ;;  %s946_s15 = sphi %s983_s15, %s1106_s15  }
   0x3   : > { %p35_p1 = scmp.ge.s32.totalorder %s33_s18, 2  ;;  %p224_p2 = scmp.lt.s32.totalorder %s954_s17, 3 }
   0x5   : > { %s1109_s18 = smov (%p35_p1, %s33_s18), 0  ;;  %p225_p3 = pnand %p781_p0, %p224_p2 }
   0x6   : > { %v904_v0 = vld [vmem:[%s1102_s1 + $0x40] sm:$0xff] (!%p225_p3)   ;;  %v956_v1 = vmov (!%p225_p3), 0.0   ;;  %v907_v4 = vld [vmem:[%s1102_s1 + $0x48] sm:$0xff] (!%p225_p3)   ;;  %vm957_vm0 = vmmov (!%p225_p3), 0   ;;  %v910_v7 = vld [vmem:[%s1102_s1 + $0x50] sm:$0xff] (!%p225_p3)   ;;  %s782_s9 = sshll.u32 (!%p225_p3), %s946_s15, 1 }
   0x7   : > { %228 = sbr.rel (%p225_p3) target bundleno = 265 (0x109), region = 36  ;;  %857 = vmatprep.subr.bf16.mxu1 (!%p225_p3), %v956_v1  ;;  %v905_v2 = vld [vmem:[%s1102_s1] sm:$0xff] (!%p225_p3)   ;;  %826 = vmatprep.subr.bf16.mxu0 (!%p225_p3), %v904_v0  ;;  %v908_v5 = vld [vmem:[%s1102_s1 + $0x8] sm:$0xff] (!%p225_p3)   ;;  %v911_v8 = vld [vmem:[%s1102_s1 + $0x10] sm:$0xff] (!%p225_p3)   ;;  %p274_p4 = scmp.lt.s32.totalorder (!%p225_p3), %s782_s9, 3 }
   0x8   : > { %v906_v3 = vld [vmem:[%s1102_s1 + $0x80] sm:$0xff] (!%p225_p3)   ;;  %827 = vmatpush3.bf16.msra.mxu0 (!%p225_p3), %v905_v2  ;;  %873 = vmatprep.mubr.msk.bf16.mxu1 (!%p225_p3), %vm957_vm0, %v956_v1  ;;  %v909_v6 = vld [vmem:[%s1102_s1 + $0x88] sm:$0xff] (!%p225_p3)   ;;  %v912_v9 = vld [vmem:[%s1102_s1 + $0x90] sm:$0xff] (!%p225_p3)  }
   0x9   : > { %858 = vmatpush3.bf16.msra.mxu1 (!%p225_p3), %v906_v3  ;;  %828 = vmatprep.subr.bf16.mxu0 (!%p225_p3), %v907_v4  ;;  %v913_v10 = vld [vmem:[%s1102_s1 + $0x58] sm:$0xff] (!%p225_p3)   ;;  %v916_v13 = vld [vmem:[%s1102_s1 + $0x60] sm:$0xff] (!%p225_p3)   ;;  %v919_v16 = vld [vmem:[%s1102_s1 + $0x68] sm:$0xff] (!%p225_p3)  }
   0xa   : > { %859 = vmatprep.subr.bf16.mxu1 (!%p225_p3), %v956_v1  ;;  %v914_v11 = vld [vmem:[%s1102_s1 + $0x18] sm:$0xff] (!%p225_p3)   ;;  %v917_v14 = vld [vmem:[%s1102_s1 + $0x20] sm:$0xff] (!%p225_p3)   ;;  %v920_v17 = vld [vmem:[%s1102_s1 + $0x28] sm:$0xff] (!%p225_p3)  }
   0xb   : > { %v915_v12 = vld [vmem:[%s1102_s1 + $0x98] sm:$0xff] (!%p225_p3)   ;;  %v918_v15 = vld [vmem:[%s1102_s1 + $0xa0] sm:$0xff] (!%p225_p3)   ;;  %v921_v18 = vld [vmem:[%s1102_s1 + $0xa8] sm:$0xff] (!%p225_p3)  }
   0xc   : > { %829 = vmatpush3.bf16.msra.mxu0 (!%p225_p3), %v908_v5  ;;  %v922_v19 = vld [vmem:[%s1102_s1 + $0x70] sm:$0xff] (!%p225_p3)   ;;  %v925_v22 = vld [vmem:[%s1102_s1 + $0x78] sm:$0xff] (!%p225_p3)   ;;  %v813_v34 = vld [vmem:[%s1103_s2] ss:$0 sm:$0xff] (!%p225_p3) }
   0xd   : > { %860 = vmatpush3.bf16.msra.mxu1 (!%p225_p3), %v909_v6  ;;  %830 = vmatprep.subr.bf16.mxu0 (!%p225_p3), %v910_v7  ;;  %v923_v20 = vld [vmem:[%s1102_s1 + $0x30] sm:$0xff] (!%p225_p3)   ;;  %v926_v24 = vld [vmem:[%s1102_s1 + $0x38] sm:$0xff] (!%p225_p3)   ;;  %v814_v42 = vld [vmem:[%s1104_s3] ss:$0 sm:$0xff] (!%p225_p3) }
   0xe   : > { %861 = vmatprep.subr.bf16.mxu1 %v956_v1  ;;  %s1111_s9 = smov (!%p274_p4, %s782_s9), 3  ;;  %v924_v21 = vld [vmem:[%s1102_s1 + $0xb0] sm:$0xff]   ;;  %v927_v25 = vld [vmem:[%s1102_s1 + $0xb8] sm:$0xff]  }
   0xf   : > { %s877_s5 = smul.u32 12, %s1111_s9 }
  0x10   : > { %831 = vmatpush3.bf16.msra.mxu0 %v911_v8 }
  0x11   : > { %862 = vmatpush3.bf16.msra.mxu1 %v912_v9  ;;  %832 = vmatprep.subr.bf16.mxu0 %v913_v10  ;;  %s281_s19 = scalar_lea.vmem %s1101_s0, %s877_s5  ;;  %s785_s5 = sshll.u32 %s1111_s9, 2 }
  0x12   : > { %863 = vmatprep.subr.bf16.mxu1 %v956_v1  ;;  %v930_v23 = vld [vmem:[%s281_s19 + $0x4] ss:$12 sps:$4 sm:$0xff]   ;;  %v928_v26 = vld [vmem:[%s281_s19] ss:$12 sps:$4 sm:$0xff]   ;;  %v931_v27 = vld [vmem:[%s281_s19 + $0x8] ss:$12 sps:$4 sm:$0xff]   ;;  %s306_s8 = scalar_lea.vmem %s1105_s4, %s785_s5 }
  0x13   : > { %561 = vmatprep.mubr.bf16.mxu0 %v930_v23 }
  0x14   : > { %833 = vmatpush3.bf16.msra.mxu0 %v914_v11 }
  0x15   : > { %864 = vmatpush3.bf16.msra.mxu1 %v915_v12  ;;  %834 = vmatprep.subr.bf16.mxu0 %v916_v13 }
  0x16   : > { %865 = vmatprep.subr.bf16.mxu1 %v956_v1 }
  0x18   : > { %835 = vmatpush3.bf16.msra.mxu0 %v917_v14 }
  0x19   : > { %866 = vmatpush3.bf16.msra.mxu1 %v918_v15  ;;  %836 = vmatprep.subr.bf16.mxu0 %v919_v16 }
  0x1a   : > { %867 = vmatprep.subr.bf16.mxu1 %v956_v1 }
  0x1c   : > { %837 = vmatpush3.bf16.msra.mxu0 %v920_v17 }
  0x1d   : > { %868 = vmatpush3.bf16.msra.mxu1 %v921_v18  ;;  %838 = vmatprep.subr.bf16.mxu0 %v922_v19 }
  0x1e   : > { %869 = vmatprep.subr.bf16.mxu1 %v956_v1 }
  0x20   : > { %839 = vmatpush3.bf16.msra.mxu0 %v923_v20 }
  0x21   : > { %870 = vmatpush3.bf16.msra.mxu1 %v924_v21  ;;  %840 = vmatprep.subr.bf16.mxu0 %v925_v22 }
  0x22   : > { %871 = vmatprep.subr.bf16.mxu1 %v956_v1 }
  0x24   : > { %841 = vmatpush3.bf16.msra.mxu0 %v926_v24 }
  0x25   : > { %872 = vmatpush3.bf16.msra.mxu1 %v927_v25 }
  0x27   : > { %562 = vmatmul.mubr.bf16.vlgmr.msra.gmra.mrb[0].mxu0 %v928_v26 }
  0x28   : > { %874 = vmatmul.mubr.bf16.vlgmr.msra.gmra.mrb[0].mxu1 %v931_v27 }
  0xfa   : > { %v842_v28 = vpop.f32.mrb[0].mxu0 }
  0xfb   : > { %v604_v29 = vpop.f32.mrb[0].mxu1  ;;  %v843_v30 = vpop.f32.mrb[1].mxu0 }
  0xfc   : > { %v844_v31 = vadd.f32 %v843_v30, %v842_v28  ;;  %v875_v32 = vpop.f32.mrb[1].mxu1  ;;  %v845_v33 = vpop.f32.mrb[2].mxu0 }
  0xfd   : > { %v607_v35 = vpop.f32.mrb[2].mxu1  ;;  %v846_v36 = vpop.f32.mrb[3].mxu0 }
  0xfe   : > { %v605_v37 = vadd.f32 %v844_v31, %v604_v29  ;;  %v847_v38 = vadd.f32 %v846_v36, %v845_v33  ;;  %v876_v39 = vpop.f32.mrb[3].mxu1 }
 0x100   : > { %v627_v40 = vmul.f32 %v813_v34, %v605_v37  ;;  %v608_v41 = vadd.f32 %v847_v38, %v607_v35 }
 0x102   : > { %v628_v43 = vmul.f32 %v813_v34, %v608_v41  ;;  %v636_v44 = vadd.f32 %v814_v42, %v627_v40 }
 0x104   : > { %v637_v45 = vadd.f32 %v814_v42, %v628_v43 }
 0x106   : > { %v824_v46 = vpack.c.bf16 %v637_v45, %v636_v44 }
 0x108   : > { %825 = vst [vmem:[%s306_s8] sm:$0xff] %v824_v46  }
 0x109 PF: > { %s14_s17 = sadd.s32 1, %s954_s17   ;;  %s1106_s15 = smov %s950_s16 }
 0x10a   : > { %p11_p5 = scmp.ge.s32.totalorder %s14_s17, 4   ;;  %s1107_s16 = smov %s1109_s18 }
 0x10c   :  { %13 = sbr.rel (!%p11_p5) target bundleno = 2 (0x2), region = 83 }

// kernel: _lambda_.48
= control target key start
LH: loop header
LB: loop body
LE: loop exit
PB: predicated region body
PF: predicated region fallthrough
CT: control target
= control target key end

     0   :  { %s1797_s18 = smov 0   ;;  %s1799_s19 = smov 0   ;;  %s2073_s0 = inlined_call_operand.vmem [shape: bf16[32,1152], index: 0, kind: input, shape index: {}]   ;;  %s2074_s1 = inlined_call_operand.vmem [shape: bf16[1152,128], index: 1, kind: input, shape index: {}]   ;;  %s2075_s2 = inlined_call_operand.vmem [shape: f32[1,128], index: 2, kind: input, shape index: {}]   ;;  %s2076_s3 = inlined_call_operand.vmem [shape: f32[1,128], index: 3, kind: input, shape index: {}]   ;;  %s2077_s4 = inlined_call_operand.vmem [shape: bf16[32,128], index: 4, kind: input, shape index: {}]   ;;  %s2078_s5 = inlined_call_operand.vmem [shape: bf16[32,128], index: 5, kind: output, shape index: {}]  }
   0x1   :  { %s1801_s20 = smov 0  }
   0x2 LB: > { %s34_s21 = sadd.s32 1, %s1759_s19  ;;  %p1407_p0 = scmp.ge.s32.totalorder %s1763_s20, 1  ;;  %s1763_s20 = sphi %s1801_s20, %s15_s20   ;;  %s1759_s19 = sphi %s1799_s19, %s2080_s19   ;;  %s1755_s18 = sphi %s1797_s18, %s2079_s18  }
   0x3   : > { %p36_p1 = scmp.ge.s32.totalorder %s34_s21, 2  ;;  %p265_p2 = scmp.lt.s32.totalorder %s1763_s20, 3 }
   0x5   : > { %s2082_s21 = smov (%p36_p1, %s34_s21), 0  ;;  %p266_p3 = pnand %p1407_p0, %p265_p2 }
   0x6   : > { %v1656_v0 = vld [vmem:[%s2074_s1 + $0x40] sm:$0xff] (!%p266_p3)   ;;  %v1660_v4 = vld [vmem:[%s2074_s1 + $0x48] sm:$0xff] (!%p266_p3)   ;;  %v1664_v8 = vld [vmem:[%s2074_s1 + $0x50] sm:$0xff] (!%p266_p3)   ;;  %s1408_s6 = sshll.u32 (!%p266_p3), %s1755_s18, 1  ;;  %vm1766_vm0 = vmmov (!%p266_p3), 0  }
   0x7   : > { %269 = sbr.rel (%p266_p3) target bundleno = 331 (0x14b), region = 40  ;;  %v1657_v1 = vld [vmem:[%s2074_s1 + $0xc0] sm:$0xff] (!%p266_p3)   ;;  %1512 = vmatprep.subr.bf16.mxu0 (!%p266_p3), %v1656_v0  ;;  %v1661_v5 = vld [vmem:[%s2074_s1 + $0xc8] sm:$0xff] (!%p266_p3)   ;;  %v1665_v9 = vld [vmem:[%s2074_s1 + $0xd0] sm:$0xff] (!%p266_p3)   ;;  %p325_p4 = scmp.lt.s32.totalorder (!%p266_p3), %s1408_s6, 3 }
   0x8   : > { %v1658_v2 = vld [vmem:[%s2074_s1] sm:$0xff] (!%p266_p3)   ;;  %1534 = vmatprep.subr.bf16.mxu1 (!%p266_p3), %v1657_v1  ;;  %v1662_v6 = vld [vmem:[%s2074_s1 + $0x8] sm:$0xff] (!%p266_p3)   ;;  %v1666_v10 = vld [vmem:[%s2074_s1 + $0x10] sm:$0xff] (!%p266_p3)  }
   0x9   : > { %v1659_v3 = vld [vmem:[%s2074_s1 + $0x80] sm:$0xff] (!%p266_p3)   ;;  %1513 = vmatpush3.bf16.msra.mxu0 (!%p266_p3), %v1658_v2  ;;  %v1663_v7 = vld [vmem:[%s2074_s1 + $0x88] sm:$0xff] (!%p266_p3)   ;;  %v1667_v11 = vld [vmem:[%s2074_s1 + $0x90] sm:$0xff] (!%p266_p3)  }
   0xa   : > { %1535 = vmatpush3.bf16.msra.mxu1 (!%p266_p3), %v1659_v3  ;;  %1514 = vmatprep.subr.bf16.mxu0 (!%p266_p3), %v1660_v4  ;;  %v1668_v12 = vld [vmem:[%s2074_s1 + $0x58] sm:$0xff] (!%p266_p3)   ;;  %v1672_v16 = vld [vmem:[%s2074_s1 + $0x60] sm:$0xff] (!%p266_p3)   ;;  %v1676_v20 = vld [vmem:[%s2074_s1 + $0x68] sm:$0xff] (!%p266_p3)  }
   0xb   : > { %1536 = vmatprep.subr.bf16.mxu1 (!%p266_p3), %v1661_v5  ;;  %v1669_v13 = vld [vmem:[%s2074_s1 + $0xd8] sm:$0xff] (!%p266_p3)   ;;  %v1673_v17 = vld [vmem:[%s2074_s1 + $0xe0] sm:$0xff] (!%p266_p3)   ;;  %v1677_v21 = vld [vmem:[%s2074_s1 + $0xe8] sm:$0xff] (!%p266_p3)  }
   0xc   : > { %v1670_v14 = vld [vmem:[%s2074_s1 + $0x18] sm:$0xff] (!%p266_p3)   ;;  %v1674_v18 = vld [vmem:[%s2074_s1 + $0x20] sm:$0xff] (!%p266_p3)   ;;  %v1678_v22 = vld [vmem:[%s2074_s1 + $0x28] sm:$0xff] (!%p266_p3)  }
   0xd   : > { %1515 = vmatpush3.bf16.msra.mxu0 (!%p266_p3), %v1662_v6  ;;  %v1671_v15 = vld [vmem:[%s2074_s1 + $0x98] sm:$0xff] (!%p266_p3)   ;;  %v1675_v19 = vld [vmem:[%s2074_s1 + $0xa0] sm:$0xff] (!%p266_p3)   ;;  %v1679_v23 = vld [vmem:[%s2074_s1 + $0xa8] sm:$0xff] (!%p266_p3)   ;;  %v1765_v6 = vmov (!%p266_p3), 0.0  }
   0xe   : > { %1537 = vmatpush3.bf16.msra.mxu1 %v1663_v7  ;;  %1516 = vmatprep.subr.bf16.mxu0 %v1664_v8  ;;  %s2084_s6 = smov (!%p325_p4, %s1408_s6), 3  ;;  %v1680_v24 = vld [vmem:[%s2074_s1 + $0x70] sm:$0xff]   ;;  %v1684_v28 = vld [vmem:[%s2074_s1 + $0x78] sm:$0xff]   ;;  %v1694_v36 = vld [vmem:[%s2074_s1 + $0x140] sm:$0xff]  }
   0xf   : > { %1538 = vmatprep.subr.bf16.mxu1 %v1665_v9  ;;  %v1681_v25 = vld [vmem:[%s2074_s1 + $0xf0] sm:$0xff]   ;;  %s1629_s8 = smul.u32 36, %s2084_s6  ;;  %v1685_v29 = vld [vmem:[%s2074_s1 + $0xf8] sm:$0xff]   ;;  %v1695_v37 = vld [vmem:[%s2074_s1 + $0x100] sm:$0xff]  }
  0x10   : > { %v1682_v26 = vld [vmem:[%s2074_s1 + $0x30] sm:$0xff]   ;;  %v1686_v30 = vld [vmem:[%s2074_s1 + $0x38] sm:$0xff]   ;;  %v1696_v38 = vld [vmem:[%s2074_s1 + $0x1c0] sm:$0xff]  }
  0x11   : > { %1517 = vmatpush3.bf16.msra.mxu0 %v1666_v10  ;;  %v1683_v27 = vld [vmem:[%s2074_s1 + $0xb0] sm:$0xff]   ;;  %s1914_s22 = scalar_lea.vmem %s2073_s0, %s1629_s8  ;;  %v1687_v31 = vld [vmem:[%s2074_s1 + $0xb8] sm:$0xff]   ;;  %v1697_v39 = vld [vmem:[%s2074_s1 + $0x180] sm:$0xff]  }
  0x12   : > { %1539 = vmatpush3.bf16.msra.mxu1 %v1667_v11  ;;  %1518 = vmatprep.subr.bf16.mxu0 %v1668_v12  ;;  %v1688_v32 = vld [vmem:[%s1914_s22] ss:$36 sps:$4 sm:$0xff]   ;;  %v1691_v34 = vld [vmem:[%s1914_s22 + $0x8] ss:$36 sps:$4 sm:$0xff]   ;;  %v1702_v44 = vld [vmem:[%s2074_s1 + $0x150] sm:$0xff]  }
  0x13   : > { %1540 = vmatprep.subr.bf16.mxu1 %v1669_v13  ;;  %v1690_v33 = vld [vmem:[%s1914_s22 + $0x4] ss:$36 sps:$4 sm:$0xff]   ;;  %v1693_v35 = vld [vmem:[%s1914_s22 + $0xc] ss:$36 sps:$4 sm:$0xff]   ;;  %v1706_v48 = vld [vmem:[%s2074_s1 + $0x158] sm:$0xff]  }
  0x14   : > { %1041 = vmatprep.mubr.bf16.mxu0 %v1690_v33  ;;  %1082 = vmatprep.mubr.bf16.mxu1 %v1693_v35  ;;  %v1698_v40 = vld [vmem:[%s2074_s1 + $0x148] sm:$0xff]   ;;  %v1703_v45 = vld [vmem:[%s2074_s1 + $0x110] sm:$0xff]   ;;  %v1707_v49 = vld [vmem:[%s2074_s1 + $0x118] sm:$0xff]  }
  0x15   : > { %1519 = vmatpush3.bf16.msra.mxu0 %v1670_v14  ;;  %v1699_v41 = vld [vmem:[%s2074_s1 + $0x108] sm:$0xff]   ;;  %v1704_v46 = vld [vmem:[%s2074_s1 + $0x1d0] sm:$0xff]   ;;  %v1708_v50 = vld [vmem:[%s2074_s1 + $0x1d8] sm:$0xff]  }
  0x16   : > { %1541 = vmatpush3.bf16.msra.mxu1 %v1671_v15  ;;  %1520 = vmatprep.subr.bf16.mxu0 %v1672_v16  ;;  %v1700_v42 = vld [vmem:[%s2074_s1 + $0x1c8] sm:$0xff]   ;;  %v1705_v47 = vld [vmem:[%s2074_s1 + $0x190] sm:$0xff]   ;;  %v1709_v51 = vld [vmem:[%s2074_s1 + $0x198] sm:$0xff]  }
  0x17   : > { %1542 = vmatprep.subr.bf16.mxu1 %v1673_v17  ;;  %v1701_v43 = vld [vmem:[%s2074_s1 + $0x188] sm:$0xff]   ;;  %v1710_v52 = vld [vmem:[%s2074_s1 + $0x160] sm:$0xff]   ;;  %v1718_v60 = vld [vmem:[%s2074_s1 + $0x170] sm:$0xff]  }
  0x18   : > { %v1711_v53 = vld [vmem:[%s2074_s1 + $0x120] sm:$0xff]   ;;  %v1714_v56 = vld [vmem:[%s2074_s1 + $0x168] sm:$0xff]   ;;  %v1719_v61 = vld [vmem:[%s2074_s1 + $0x130] sm:$0xff]  }
  0x19   : > { %1521 = vmatpush3.bf16.msra.mxu0 %v1674_v18  ;;  %v1712_v54 = vld [vmem:[%s2074_s1 + $0x1e0] sm:$0xff]   ;;  %v1715_v57 = vld [vmem:[%s2074_s1 + $0x128] sm:$0xff]   ;;  %v1720_v62 = vld [vmem:[%s2074_s1 + $0x1f0] sm:$0xff]  }
  0x1a   : > { %1543 = vmatpush3.bf16.msra.mxu1 %v1675_v19  ;;  %1522 = vmatprep.subr.bf16.mxu0 %v1676_v20  ;;  %v1713_v55 = vld [vmem:[%s2074_s1 + $0x1a0] sm:$0xff]   ;;  %v1716_v58 = vld [vmem:[%s2074_s1 + $0x1e8] sm:$0xff]   ;;  %v1721_v63 = vld [vmem:[%s2074_s1 + $0x1b0] sm:$0xff]  }
  0x1b   : > { %1544 = vmatprep.subr.bf16.mxu1 %v1677_v21  ;;  %v1717_v59 = vld [vmem:[%s2074_s1 + $0x1a8] sm:$0xff]   ;;  %v1722_v0 = vld [vmem:[%s2074_s1 + $0x178] sm:$0xff]   ;;  %v1725_v3 = vld [vmem:[%s1914_s22 + $0x10] ss:$36 sps:$4 sm:$0xff]  }
  0x1c   : > { %v1723_v1 = vld [vmem:[%s2074_s1 + $0x138] sm:$0xff]   ;;  %v1732_v9 = vld [vmem:[%s2074_s1 + $0x200] sm:$0xff]   ;;  %v1733_v10 = vld [vmem:[%s2074_s1 + $0x208] sm:$0xff]  }
  0x1d   : > { %1523 = vmatpush3.bf16.msra.mxu0 %v1678_v22  ;;  %v1724_v2 = vld [vmem:[%s2074_s1 + $0x1f8] sm:$0xff]   ;;  %v1734_v11 = vld [vmem:[%s2074_s1 + $0x210] sm:$0xff]   ;;  %v1736_v13 = vld [vmem:[%s2074_s1 + $0x220] sm:$0xff]  }
  0x1e   : > { %1545 = vmatpush3.bf16.msra.mxu1 %v1679_v23  ;;  %1524 = vmatprep.subr.bf16.mxu0 %v1680_v24  ;;  %v1727_v4 = vld [vmem:[%s1914_s22 + $0x14] ss:$36 sps:$4 sm:$0xff]   ;;  %v1731_v8 = vld [vmem:[%s1914_s22 + $0x1c] ss:$36 sps:$4 sm:$0xff]   ;;  %v1737_v14 = vld [vmem:[%s2074_s1 + $0x228] sm:$0xff]  }
  0x1f   : > { %1546 = vmatprep.subr.bf16.mxu1 %v1681_v25  ;;  %v1728_v5 = vld [vmem:[%s2074_s1 + $0x1b8] sm:$0xff]   ;;  %v1738_v15 = vld [vmem:[%s2074_s1 + $0x230] sm:$0xff]   ;;  %v1740_v17 = vld [vmem:[%s1914_s22 + $0x20] ss:$36 sps:$4 sm:$0xff]  }
  0x20   : > { %v1729_v7 = vld [vmem:[%s1914_s22 + $0x18] ss:$36 sps:$4 sm:$0xff]   ;;  %s1411_s22 = sshll.u32 %s2084_s6, 2 }
  0x21   : > { %1525 = vmatpush3.bf16.msra.mxu0 %v1682_v26  ;;  %v1735_v12 = vld [vmem:[%s2074_s1 + $0x218] sm:$0xff]   ;;  %s357_s29 = scalar_lea.vmem %s2077_s4, %s1411_s22  ;;  %s366_s11 = scalar_lea.vmem %s2078_s5, %s1411_s22 }
  0x22   : > { %1547 = vmatpush3.bf16.msra.mxu1 %v1683_v27  ;;  %1526 = vmatprep.subr.bf16.mxu0 %v1684_v28  ;;  %v1739_v16 = vld [vmem:[%s2074_s1 + $0x238] sm:$0xff]  }
  0x23   : > { %1548 = vmatprep.subr.bf16.mxu1 %v1685_v29 }
  0x25   : > { %1527 = vmatpush3.bf16.msra.mxu0 %v1686_v30 }
  0x26   : > { %1549 = vmatpush3.bf16.msra.mxu1 %v1687_v31  ;;  %1556 = vmatprep.subr.bf16.mxu0 %v1694_v36 }
  0x27   : > { %1578 = vmatprep.subr.bf16.mxu1 %v1696_v38 }
  0x28   : > { %1042 = vmatmul.mubr.bf16.vlgmr.msra.gmra.mrb[0].mxu0 %v1688_v32 }
  0x29   : > { %1083 = vmatmul.mubr.bf16.vlgmr.msra.gmra.mrb[0].mxu1 %v1691_v34  ;;  %1557 = vmatpush3.bf16.msra.mxu0 %v1695_v37 }
  0x2a   : > { %1579 = vmatpush3.bf16.msra.mxu1 %v1697_v39  ;;  %1558 = vmatprep.subr.bf16.mxu0 %v1698_v40 }
  0x2b   : > { %1580 = vmatprep.subr.bf16.mxu1 %v1700_v42  ;;  %1123 = vmatprep.mubr.bf16.mxu0 %v1727_v4 }
  0x2c   : > { %1164 = vmatprep.mubr.bf16.mxu1 %v1731_v8 }
  0x2d   : > { %1559 = vmatpush3.bf16.msra.mxu0 %v1699_v41 }
  0x2e   : > { %1581 = vmatpush3.bf16.msra.mxu1 %v1701_v43  ;;  %1560 = vmatprep.subr.bf16.mxu0 %v1702_v44 }
  0x2f   : > { %1582 = vmatprep.subr.bf16.mxu1 %v1704_v46 }
  0x31   : > { %1561 = vmatpush3.bf16.msra.mxu0 %v1703_v45 }
  0x32   : > { %1583 = vmatpush3.bf16.msra.mxu1 %v1705_v47  ;;  %1562 = vmatprep.subr.bf16.mxu0 %v1706_v48 }
  0x33   : > { %1584 = vmatprep.subr.bf16.mxu1 %v1708_v50  ;;  %v1504_v50 = vld [vmem:[%s357_s29] sm:$0xff]  }
  0x35   : > { %1563 = vmatpush3.bf16.msra.mxu0 %v1707_v49  ;;  %v1495_v49 = vld [vmem:[%s2075_s2] ss:$0 sm:$0xff] }
  0x36   : > { %1585 = vmatpush3.bf16.msra.mxu1 %v1709_v51  ;;  %1564 = vmatprep.subr.bf16.mxu0 %v1710_v52 }
  0x37   : > { %1586 = vmatprep.subr.bf16.mxu1 %v1712_v54 }
  0x39   : > { %1565 = vmatpush3.bf16.msra.mxu0 %v1711_v53  ;;  %v1496_v53 = vld [vmem:[%s2076_s3] ss:$0 sm:$0xff] }
  0x3a   : > { %1587 = vmatpush3.bf16.msra.mxu1 %v1713_v55  ;;  %1566 = vmatprep.subr.bf16.mxu0 %v1714_v56  ;;  %v1505_v56 = vunpack.c.l.bf16 %v1504_v50 }
  0x3b   : > { %1588 = vmatprep.subr.bf16.mxu1 %v1716_v58 }
  0x3d   : > { %1567 = vmatpush3.bf16.msra.mxu0 %v1715_v57 }
  0x3e   : > { %1589 = vmatpush3.bf16.msra.mxu1 %v1717_v59  ;;  %1568 = vmatprep.subr.bf16.mxu0 %v1718_v60 }
  0x3f   : > { %1590 = vmatprep.subr.bf16.mxu1 %v1720_v62 }
  0x41   : > { %1569 = vmatpush3.bf16.msra.mxu0 %v1719_v61  ;;  %v1506_v61 = vunpack.c.h.bf16 %v1504_v50 }
  0x42   : > { %1591 = vmatpush3.bf16.msra.mxu1 %v1721_v63  ;;  %1570 = vmatprep.subr.bf16.mxu0 %v1722_v0 }
  0x43   : > { %1592 = vmatprep.subr.bf16.mxu1 %v1724_v2 }
  0x45   : > { %1571 = vmatpush3.bf16.msra.mxu0 %v1723_v1 }
  0x46   : > { %1609 = vmatprep.subr.bf16.mxu0 %v1765_v6  ;;  %1593 = vmatpush3.bf16.msra.mxu1 %v1728_v5 }
  0x48   : > { %1124 = vmatmul.mubr.bf16.vlgmr.msra.gmra.mrb[4].mxu0 %v1725_v3 }
  0x49   : > { %1625 = vmatprep.mubr.msk.bf16.mxu0 %vm1766_vm0, %v1765_v6  ;;  %1610 = vmatpush3.bf16.msra.mxu0 %v1732_v9 }
  0x4a   : > { %1165 = vmatmul.mubr.bf16.vlgmr.msra.gmra.mrb[4].mxu1 %v1729_v7  ;;  %1611 = vmatprep.subr.bf16.mxu0 %v1765_v6 }
  0x4d   : > { %1612 = vmatpush3.bf16.msra.mxu0 %v1733_v10 }
  0x4e   : > { %1613 = vmatprep.subr.bf16.mxu0 %v1765_v6 }
  0x51   : > { %1614 = vmatpush3.bf16.msra.mxu0 %v1734_v11 }
  0x52   : > { %1615 = vmatprep.subr.bf16.mxu0 %v1765_v6 }
  0x55   : > { %1616 = vmatpush3.bf16.msra.mxu0 %v1735_v12 }
  0x56   : > { %1617 = vmatprep.subr.bf16.mxu0 %v1765_v6 }
  0x59   : > { %1618 = vmatpush3.bf16.msra.mxu0 %v1736_v13 }
  0x5a   : > { %1619 = vmatprep.subr.bf16.mxu0 %v1765_v6 }
  0x5d   : > { %1620 = vmatpush3.bf16.msra.mxu0 %v1737_v14 }
  0x5e   : > { %1621 = vmatprep.subr.bf16.mxu0 %v1765_v6 }
  0x61   : > { %1622 = vmatpush3.bf16.msra.mxu0 %v1738_v15 }
  0x62   : > { %1623 = vmatprep.subr.bf16.mxu0 %v1765_v6 }
  0x65   : > { %1624 = vmatpush3.bf16.msra.mxu0 %v1739_v16 }
  0x68   : > { %1626 = vmatmul.mubr.bf16.vlgmr.msra.gmra.mrb[8].mxu0 %v1740_v17 }
  0xfb   : > { %v1528_v18 = vpop.f32.mrb[0].mxu0 }
  0xfc   : > { %v1550_v19 = vpop.f32.mrb[0].mxu1  ;;  %v1529_v20 = vpop.f32.mrb[1].mxu0 }
  0xfd   : > { %v1530_v21 = vadd.f32 %v1529_v20, %v1528_v18  ;;  %v1551_v22 = vpop.f32.mrb[1].mxu1  ;;  %v1531_v23 = vpop.f32.mrb[2].mxu0 }
  0xfe   : > { %v1552_v24 = vadd.f32 %v1551_v22, %v1550_v19  ;;  %v1553_v25 = vpop.f32.mrb[2].mxu1  ;;  %v1532_v26 = vpop.f32.mrb[3].mxu0 }
  0xff   : > { %v1533_v27 = vadd.f32 %v1532_v26, %v1531_v23  ;;  %v1554_v28 = vpop.f32.mrb[3].mxu1 }
 0x100   : > { %v1085_v29 = vadd.f32 %v1552_v24, %v1530_v21  ;;  %v1555_v30 = vadd.f32 %v1554_v28, %v1553_v25 }
 0x102   : > { %v1088_v31 = vadd.f32 %v1555_v30, %v1533_v27 }
 0x11b   : > { %v1572_v32 = vpop.f32.mrb[4].mxu0 }
 0x11c   : > { %v1573_v33 = vpop.f32.mrb[5].mxu0 }
 0x11d   : > { %v1574_v34 = vadd.f32 %v1573_v33, %v1572_v32  ;;  %v1575_v35 = vpop.f32.mrb[6].mxu0  ;;  %v1594_v36 = vpop.f32.mrb[4].mxu1 }
 0x11e   : > { %v1576_v37 = vpop.f32.mrb[7].mxu0  ;;  %v1595_v40 = vpop.f32.mrb[5].mxu1 }
 0x11f   : > { %v1126_v38 = vadd.f32 %v1574_v34, %v1085_v29  ;;  %v1577_v39 = vadd.f32 %v1576_v37, %v1575_v35  ;;  %v1596_v41 = vadd.f32 %v1595_v40, %v1594_v36  ;;  %v1597_v42 = vpop.f32.mrb[6].mxu1 }
 0x120   : > { %v1598_v44 = vpop.f32.mrb[7].mxu1 }
 0x121   : > { %v1129_v43 = vadd.f32 %v1577_v39, %v1088_v31  ;;  %v1599_v45 = vadd.f32 %v1598_v44, %v1597_v42  ;;  %v1167_v46 = vadd.f32 %v1596_v41, %v1126_v38 }
 0x123   : > { %v1170_v47 = vadd.f32 %v1599_v45, %v1129_v43 }
 0x13b   : > { %v1207_v48 = vpop.f32.mrb[8].mxu0 }
 0x13c   : > { %v1208_v51 = vadd.f32 %v1207_v48, %v1167_v46  ;;  %v1627_v52 = vpop.f32.mrb[9].mxu0 }
 0x13d   : > { %v1210_v54 = vpop.f32.mrb[10].mxu0 }
 0x13e   : > { %v1230_v55 = vmul.f32 %v1495_v49, %v1208_v51  ;;  %v1211_v57 = vadd.f32 %v1210_v54, %v1170_v47  ;;  %v1628_v58 = vpop.f32.mrb[11].mxu0 }
 0x140   : > { %v1239_v59 = vadd.f32 %v1496_v53, %v1230_v55  ;;  %v1231_v60 = vmul.f32 %v1495_v49, %v1211_v57 }
 0x142   : > { %v1245_v62 = vadd.f32 %v1505_v56, %v1239_v59  ;;  %v1240_v63 = vadd.f32 %v1496_v53, %v1231_v60 }
 0x144   : > { %v1246_v0 = vadd.f32 %v1506_v61, %v1240_v63  ;;  %v1247_v1 = vmax.f32 %v1245_v62, 0.0 }
 0x146   : > { %v1248_v2 = vmax.f32 %v1246_v0, 0.0 }
 0x148   : > { %v1510_v3 = vpack.c.bf16 %v1248_v2, %v1247_v1 }
 0x14a   : > { %1511 = vst [vmem:[%s366_s11] sm:$0xff] %v1510_v3  }
 0x14b PF: > { %s15_s20 = sadd.s32 1, %s1763_s20   ;;  %s2079_s18 = smov %s1759_s19 }
 0x14c   : > { %p12_p5 = scmp.ge.s32.totalorder %s15_s20, 4   ;;  %s2080_s19 = smov %s2082_s21 }
 0x14e   :  { %14 = sbr.rel (!%p12_p5) target bundleno = 2 (0x2), region = 90 }

// kernel: _lambda_.59
= control target key start
LH: loop header
LB: loop body
LE: loop exit
PB: predicated region body
PF: predicated region fallthrough
CT: control target
= control target key end

     0   :  { %s1223_s15 = smov 0   ;;  %s1225_s16 = smov 0   ;;  %s1396_s0 = inlined_call_operand.vmem [shape: bf16[32,640], index: 0, kind: input, shape index: {}]   ;;  %s1397_s1 = inlined_call_operand.vmem [shape: bf16[640,128], index: 1, kind: input, shape index: {}]   ;;  %s1398_s2 = inlined_call_operand.vmem [shape: f32[1,128], index: 2, kind: input, shape index: {}]   ;;  %s1399_s3 = inlined_call_operand.vmem [shape: f32[1,128], index: 3, kind: input, shape index: {}]   ;;  %s1400_s4 = inlined_call_operand.vmem [shape: bf16[32,128], index: 4, kind: output, shape index: {}]  }
   0x1   :  { %s1227_s17 = smov 0  }
   0x2 LB: > { %s33_s18 = sadd.s32 1, %s1190_s16  ;;  %p962_p0 = scmp.ge.s32.totalorder %s1194_s17, 1  ;;  %s1194_s17 = sphi %s1227_s17, %s14_s17   ;;  %s1190_s16 = sphi %s1225_s16, %s1402_s16   ;;  %s1186_s15 = sphi %s1223_s15, %s1401_s15  }
   0x3   : > { %p35_p1 = scmp.ge.s32.totalorder %s33_s18, 2  ;;  %p224_p2 = scmp.lt.s32.totalorder %s1194_s17, 3 }
   0x5   : > { %s1404_s18 = smov (%p35_p1, %s33_s18), 0  ;;  %p225_p3 = pnand %p962_p0, %p224_p2 }
   0x6   : > { %v1125_v0 = vld [vmem:[%s1397_s1 + $0x40] sm:$0xff] (!%p225_p3)   ;;  %v1129_v4 = vld [vmem:[%s1397_s1 + $0x48] sm:$0xff] (!%p225_p3)   ;;  %v1133_v8 = vld [vmem:[%s1397_s1 + $0x50] sm:$0xff] (!%p225_p3)   ;;  %s963_s27 = sshll.u32 (!%p225_p3), %s1186_s15, 1  ;;  %v1196_v34 = vmov (!%p225_p3), 0.0   ;;  %vm1197_vm0 = vmmov (!%p225_p3), 0  }
   0x7   : > { %228 = sbr.rel (%p225_p3) target bundleno = 295 (0x127), region = 36  ;;  %v1126_v1 = vld [vmem:[%s1397_s1 + $0xc0] sm:$0xff] (!%p225_p3)   ;;  %1025 = vmatprep.subr.bf16.mxu0 (!%p225_p3), %v1125_v0  ;;  %v1130_v5 = vld [vmem:[%s1397_s1 + $0xc8] sm:$0xff] (!%p225_p3)   ;;  %v1134_v9 = vld [vmem:[%s1397_s1 + $0xd0] sm:$0xff] (!%p225_p3)   ;;  %p274_p4 = scmp.lt.s32.totalorder (!%p225_p3), %s963_s27, 3 }
   0x8   : > { %v1127_v2 = vld [vmem:[%s1397_s1] sm:$0xff] (!%p225_p3)   ;;  %1047 = vmatprep.subr.bf16.mxu1 (!%p225_p3), %v1126_v1  ;;  %v1131_v6 = vld [vmem:[%s1397_s1 + $0x8] sm:$0xff] (!%p225_p3)   ;;  %v1135_v10 = vld [vmem:[%s1397_s1 + $0x10] sm:$0xff] (!%p225_p3)  }
   0x9   : > { %v1128_v3 = vld [vmem:[%s1397_s1 + $0x80] sm:$0xff] (!%p225_p3)   ;;  %1026 = vmatpush3.bf16.msra.mxu0 (!%p225_p3), %v1127_v2  ;;  %v1132_v7 = vld [vmem:[%s1397_s1 + $0x88] sm:$0xff] (!%p225_p3)   ;;  %v1136_v11 = vld [vmem:[%s1397_s1 + $0x90] sm:$0xff] (!%p225_p3)  }
   0xa   : > { %1048 = vmatpush3.bf16.msra.mxu1 (!%p225_p3), %v1128_v3  ;;  %1027 = vmatprep.subr.bf16.mxu0 (!%p225_p3), %v1129_v4  ;;  %v1137_v12 = vld [vmem:[%s1397_s1 + $0x58] sm:$0xff] (!%p225_p3)   ;;  %v1141_v16 = vld [vmem:[%s1397_s1 + $0x60] sm:$0xff] (!%p225_p3)   ;;  %v1145_v20 = vld [vmem:[%s1397_s1 + $0x68] sm:$0xff] (!%p225_p3)  }
   0xb   : > { %1049 = vmatprep.subr.bf16.mxu1 (!%p225_p3), %v1130_v5  ;;  %v1138_v13 = vld [vmem:[%s1397_s1 + $0xd8] sm:$0xff] (!%p225_p3)   ;;  %v1142_v17 = vld [vmem:[%s1397_s1 + $0xe0] sm:$0xff] (!%p225_p3)   ;;  %v1146_v21 = vld [vmem:[%s1397_s1 + $0xe8] sm:$0xff] (!%p225_p3)  }
   0xc   : > { %v1139_v14 = vld [vmem:[%s1397_s1 + $0x18] sm:$0xff] (!%p225_p3)   ;;  %v1143_v18 = vld [vmem:[%s1397_s1 + $0x20] sm:$0xff] (!%p225_p3)   ;;  %v1147_v22 = vld [vmem:[%s1397_s1 + $0x28] sm:$0xff] (!%p225_p3)  }
   0xd   : > { %1028 = vmatpush3.bf16.msra.mxu0 (!%p225_p3), %v1131_v6  ;;  %v1140_v15 = vld [vmem:[%s1397_s1 + $0x98] sm:$0xff] (!%p225_p3)   ;;  %v1144_v19 = vld [vmem:[%s1397_s1 + $0xa0] sm:$0xff] (!%p225_p3)   ;;  %v1148_v23 = vld [vmem:[%s1397_s1 + $0xa8] sm:$0xff] (!%p225_p3)  }
   0xe   : > { %1050 = vmatpush3.bf16.msra.mxu1 %v1132_v7  ;;  %1029 = vmatprep.subr.bf16.mxu0 %v1133_v8  ;;  %s1406_s27 = smov (!%p274_p4, %s963_s27), 3  ;;  %v1149_v24 = vld [vmem:[%s1397_s1 + $0x70] sm:$0xff]   ;;  %v1153_v28 = vld [vmem:[%s1397_s1 + $0x78] sm:$0xff]   ;;  %v1163_v37 = vld [vmem:[%s1397_s1 + $0x100] sm:$0xff]  }
   0xf   : > { %1051 = vmatprep.subr.bf16.mxu1 %v1134_v9  ;;  %v1150_v25 = vld [vmem:[%s1397_s1 + $0xf0] sm:$0xff]   ;;  %s1098_s28 = smul.u32 20, %s1406_s27  ;;  %v1154_v29 = vld [vmem:[%s1397_s1 + $0xf8] sm:$0xff]   ;;  %v1164_v38 = vld [vmem:[%s1397_s1 + $0x108] sm:$0xff]   ;;  %s966_s19 = sshll.u32 %s1406_s27, 2 }
  0x10   : > { %v1151_v26 = vld [vmem:[%s1397_s1 + $0x30] sm:$0xff]   ;;  %v1155_v30 = vld [vmem:[%s1397_s1 + $0x38] sm:$0xff]   ;;  %v1167_v41 = vld [vmem:[%s1397_s1 + $0x120] sm:$0xff]   ;;  %s306_s22 = scalar_lea.vmem %s1400_s4, %s966_s19 }
  0x11   : > { %1030 = vmatpush3.bf16.msra.mxu0 %v1135_v10  ;;  %v1152_v27 = vld [vmem:[%s1397_s1 + $0xb0] sm:$0xff]   ;;  %s1340_s12 = scalar_lea.vmem %s1396_s0, %s1098_s28  ;;  %v1156_v31 = vld [vmem:[%s1397_s1 + $0xb8] sm:$0xff]   ;;  %v1168_v42 = vld [vmem:[%s1397_s1 + $0x128] sm:$0xff]  }
  0x12   : > { %1052 = vmatpush3.bf16.msra.mxu1 %v1136_v11  ;;  %1031 = vmatprep.subr.bf16.mxu0 %v1137_v12  ;;  %v1157_v32 = vld [vmem:[%s1340_s12] ss:$20 sps:$4 sm:$0xff]   ;;  %v1159_v33 = vld [vmem:[%s1340_s12 + $0x4] ss:$20 sps:$4 sm:$0xff]   ;;  %v1160_v35 = vld [vmem:[%s1340_s12 + $0x8] ss:$20 sps:$4 sm:$0xff]  }
  0x13   : > { %1053 = vmatprep.subr.bf16.mxu1 %v1138_v13  ;;  %v1162_v36 = vld [vmem:[%s1340_s12 + $0xc] ss:$20 sps:$4 sm:$0xff]   ;;  %701 = vmatprep.mubr.bf16.mxu0 %v1159_v33  ;;  %v1165_v39 = vld [vmem:[%s1397_s1 + $0x110] sm:$0xff]   ;;  %v1166_v40 = vld [vmem:[%s1397_s1 + $0x118] sm:$0xff]  }
  0x14   : > { %742 = vmatprep.mubr.bf16.mxu1 %v1162_v36  ;;  %v1169_v43 = vld [vmem:[%s1397_s1 + $0x130] sm:$0xff]   ;;  %v1170_v44 = vld [vmem:[%s1397_s1 + $0x138] sm:$0xff]   ;;  %v1012_v61 = vld [vmem:[%s1398_s2] ss:$0 sm:$0xff] }
  0x15   : > { %1032 = vmatpush3.bf16.msra.mxu0 %v1139_v14  ;;  %v1171_v45 = vld [vmem:[%s1340_s12 + $0x10] ss:$20 sps:$4 sm:$0xff]   ;;  %v1013_v4 = vld [vmem:[%s1399_s3] ss:$0 sm:$0xff] }
  0x16   : > { %1054 = vmatpush3.bf16.msra.mxu1 %v1140_v15  ;;  %1033 = vmatprep.subr.bf16.mxu0 %v1141_v16 }
  0x17   : > { %1055 = vmatprep.subr.bf16.mxu1 %v1142_v17 }
  0x19   : > { %1034 = vmatpush3.bf16.msra.mxu0 %v1143_v18 }
  0x1a   : > { %1056 = vmatpush3.bf16.msra.mxu1 %v1144_v19  ;;  %1035 = vmatprep.subr.bf16.mxu0 %v1145_v20 }
  0x1b   : > { %1057 = vmatprep.subr.bf16.mxu1 %v1146_v21 }
  0x1d   : > { %1036 = vmatpush3.bf16.msra.mxu0 %v1147_v22 }
  0x1e   : > { %1058 = vmatpush3.bf16.msra.mxu1 %v1148_v23  ;;  %1037 = vmatprep.subr.bf16.mxu0 %v1149_v24 }
  0x1f   : > { %1059 = vmatprep.subr.bf16.mxu1 %v1150_v25 }
  0x21   : > { %1038 = vmatpush3.bf16.msra.mxu0 %v1151_v26 }
  0x22   : > { %1060 = vmatpush3.bf16.msra.mxu1 %v1152_v27  ;;  %1039 = vmatprep.subr.bf16.mxu0 %v1153_v28 }
  0x23   : > { %1061 = vmatprep.subr.bf16.mxu1 %v1154_v29 }
  0x25   : > { %1040 = vmatpush3.bf16.msra.mxu0 %v1155_v30 }
  0x26   : > { %1062 = vmatpush3.bf16.msra.mxu1 %v1156_v31  ;;  %1078 = vmatprep.subr.bf16.mxu0 %v1196_v34 }
  0x28   : > { %702 = vmatmul.mubr.bf16.vlgmr.msra.gmra.mrb[0].mxu0 %v1157_v32 }
  0x29   : > { %743 = vmatmul.mubr.bf16.vlgmr.msra.gmra.mrb[0].mxu1 %v1160_v35  ;;  %1079 = vmatpush3.bf16.msra.mxu0 %v1163_v37 }
  0x2a   : > { %1080 = vmatprep.subr.bf16.mxu0 %v1196_v34  ;;  %1094 = vmatprep.mubr.msk.bf16.mxu0 %vm1197_vm0, %v1196_v34 }
  0x2d   : > { %1081 = vmatpush3.bf16.msra.mxu0 %v1164_v38 }
  0x2e   : > { %1082 = vmatprep.subr.bf16.mxu0 %v1196_v34 }
  0x31   : > { %1083 = vmatpush3.bf16.msra.mxu0 %v1165_v39 }
  0x32   : > { %1084 = vmatprep.subr.bf16.mxu0 %v1196_v34 }
  0x35   : > { %1085 = vmatpush3.bf16.msra.mxu0 %v1166_v40 }
  0x36   : > { %1086 = vmatprep.subr.bf16.mxu0 %v1196_v34 }
  0x39   : > { %1087 = vmatpush3.bf16.msra.mxu0 %v1167_v41 }
  0x3a   : > { %1088 = vmatprep.subr.bf16.mxu0 %v1196_v34 }
  0x3d   : > { %1089 = vmatpush3.bf16.msra.mxu0 %v1168_v42 }
  0x3e   : > { %1090 = vmatprep.subr.bf16.mxu0 %v1196_v34 }
  0x41   : > { %1091 = vmatpush3.bf16.msra.mxu0 %v1169_v43 }
  0x42   : > { %1092 = vmatprep.subr.bf16.mxu0 %v1196_v34 }
  0x45   : > { %1093 = vmatpush3.bf16.msra.mxu0 %v1170_v44 }
  0x48   : > { %1095 = vmatmul.mubr.bf16.vlgmr.msra.gmra.mrb[4].mxu0 %v1171_v45 }
  0xfb   : > { %v1041_v46 = vpop.f32.mrb[0].mxu0 }
  0xfc   : > { %v1063_v47 = vpop.f32.mrb[0].mxu1  ;;  %v1042_v48 = vpop.f32.mrb[1].mxu0 }
  0xfd   : > { %v1043_v49 = vadd.f32 %v1042_v48, %v1041_v46  ;;  %v1064_v50 = vpop.f32.mrb[1].mxu1  ;;  %v1044_v51 = vpop.f32.mrb[2].mxu0 }
  0xfe   : > { %v1065_v52 = vadd.f32 %v1064_v50, %v1063_v47  ;;  %v1066_v53 = vpop.f32.mrb[2].mxu1  ;;  %v1045_v54 = vpop.f32.mrb[3].mxu0 }
  0xff   : > { %v1046_v55 = vadd.f32 %v1045_v54, %v1044_v51  ;;  %v1067_v56 = vpop.f32.mrb[3].mxu1 }
 0x100   : > { %v1068_v57 = vadd.f32 %v1067_v56, %v1066_v53  ;;  %v745_v58 = vadd.f32 %v1065_v52, %v1043_v49 }
 0x102   : > { %v748_v59 = vadd.f32 %v1068_v57, %v1046_v55 }
 0x11b   : > { %v785_v60 = vpop.f32.mrb[4].mxu0 }
 0x11c   : > { %v786_v62 = vadd.f32 %v785_v60, %v745_v58  ;;  %v1096_v63 = vpop.f32.mrb[5].mxu0 }
 0x11d   : > { %v788_v0 = vpop.f32.mrb[6].mxu0 }
 0x11e   : > { %v808_v1 = vmul.f32 %v1012_v61, %v786_v62  ;;  %v789_v2 = vadd.f32 %v788_v0, %v748_v59  ;;  %v1097_v3 = vpop.f32.mrb[7].mxu0 }
 0x120   : > { %v809_v5 = vmul.f32 %v1012_v61, %v789_v2  ;;  %v817_v6 = vadd.f32 %v1013_v4, %v808_v1 }
 0x122   : > { %v818_v7 = vadd.f32 %v1013_v4, %v809_v5 }
 0x124   : > { %v1023_v8 = vpack.c.bf16 %v818_v7, %v817_v6 }
 0x126   : > { %1024 = vst [vmem:[%s306_s22] sm:$0xff] %v1023_v8  }
 0x127 PF: > { %s14_s17 = sadd.s32 1, %s1194_s17   ;;  %s1401_s15 = smov %s1190_s16 }
 0x128   : > { %p11_p5 = scmp.ge.s32.totalorder %s14_s17, 4   ;;  %s1402_s16 = smov %s1404_s18 }
 0x12a   :  { %13 = sbr.rel (!%p11_p5) target bundleno = 2 (0x2), region = 83 }

// kernel: _lambda_.60
= control target key start
LH: loop header
LB: loop body
LE: loop exit
PB: predicated region body
PF: predicated region fallthrough
CT: control target
= control target key end

     0   :  { %s1584_s15 = smov 0   ;;  %s1586_s16 = smov 0   ;;  %s1772_s0 = inlined_call_operand.vmem [shape: bf16[128,640], index: 0, kind: input, shape index: {}]   ;;  %s1773_s1 = inlined_call_operand.vmem [shape: bf16[640,128], index: 1, kind: input, shape index: {}]   ;;  %s1774_s2 = inlined_call_operand.vmem [shape: f32[1,128], index: 2, kind: input, shape index: {}]   ;;  %s1775_s3 = inlined_call_operand.vmem [shape: f32[1,128], index: 3, kind: input, shape index: {}]   ;;  %s1776_s4 = inlined_call_operand.vmem [shape: bf16[128,128], index: 4, kind: output, shape index: {}]  }
   0x1   :  { %s1588_s17 = smov 0  }
   0x2 LB: > { %s33_s18 = sadd.s32 1, %s1553_s16  ;;  %p1202_p0 = scmp.ge.s32.totalorder %s1557_s17, 1  ;;  %s1557_s17 = sphi %s1588_s17, %s14_s17   ;;  %s1553_s16 = sphi %s1586_s16, %s1778_s16   ;;  %s1549_s15 = sphi %s1584_s15, %s1777_s15  }
   0x3   : > { %p35_p1 = scmp.ge.s32.totalorder %s33_s18, 2  ;;  %p224_p2 = scmp.lt.s32.totalorder %s1557_s17, 3 }
   0x5   : > { %s1780_s18 = smov (%p35_p1, %s33_s18), 0  ;;  %p225_p3 = pnand %p1202_p0, %p224_p2 }
   0x6   : > { %v1467_v0 = vld [vmem:[%s1773_s1 + $0x40] sm:$0xff] (!%p225_p3)   ;;  %v1471_v4 = vld [vmem:[%s1773_s1 + $0x48] sm:$0xff] (!%p225_p3)   ;;  %v1475_v8 = vld [vmem:[%s1773_s1 + $0x50] sm:$0xff] (!%p225_p3)   ;;  %s1203_s27 = sshll.u32 (!%p225_p3), %s1549_s15, 3 }
   0x7   : > { %228 = sbr.rel (%p225_p3) target bundleno = 298 (0x12a), region = 36  ;;  %v1468_v1 = vld [vmem:[%s1773_s1 + $0xc0] sm:$0xff] (!%p225_p3)   ;;  %1310 = vmatprep.subr.bf16.mxu0 (!%p225_p3), %v1467_v0  ;;  %v1472_v5 = vld [vmem:[%s1773_s1 + $0xc8] sm:$0xff] (!%p225_p3)   ;;  %v1476_v9 = vld [vmem:[%s1773_s1 + $0xd0] sm:$0xff] (!%p225_p3)   ;;  %p274_p4 = scmp.lt.s32.totalorder (!%p225_p3), %s1203_s27, 15 }
   0x8   : > { %v1469_v2 = vld [vmem:[%s1773_s1] sm:$0xff] (!%p225_p3)   ;;  %1350 = vmatprep.subr.bf16.mxu1 (!%p225_p3), %v1468_v1  ;;  %v1473_v6 = vld [vmem:[%s1773_s1 + $0x8] sm:$0xff] (!%p225_p3)   ;;  %v1477_v10 = vld [vmem:[%s1773_s1 + $0x10] sm:$0xff] (!%p225_p3)  }
   0x9   : > { %v1470_v3 = vld [vmem:[%s1773_s1 + $0x80] sm:$0xff] (!%p225_p3)   ;;  %1311 = vmatpush3.bf16.msra.mxu0 (!%p225_p3), %v1469_v2  ;;  %v1474_v7 = vld [vmem:[%s1773_s1 + $0x88] sm:$0xff] (!%p225_p3)   ;;  %v1478_v11 = vld [vmem:[%s1773_s1 + $0x90] sm:$0xff] (!%p225_p3)  }
   0xa   : > { %1351 = vmatpush3.bf16.msra.mxu1 (!%p225_p3), %v1470_v3  ;;  %1312 = vmatprep.subr.bf16.mxu0 (!%p225_p3), %v1471_v4  ;;  %v1479_v12 = vld [vmem:[%s1773_s1 + $0x58] sm:$0xff] (!%p225_p3)   ;;  %v1483_v16 = vld [vmem:[%s1773_s1 + $0x60] sm:$0xff] (!%p225_p3)   ;;  %v1487_v20 = vld [vmem:[%s1773_s1 + $0x68] sm:$0xff] (!%p225_p3)  }
   0xb   : > { %1352 = vmatprep.subr.bf16.mxu1 (!%p225_p3), %v1472_v5  ;;  %v1480_v13 = vld [vmem:[%s1773_s1 + $0xd8] sm:$0xff] (!%p225_p3)   ;;  %v1484_v17 = vld [vmem:[%s1773_s1 + $0xe0] sm:$0xff] (!%p225_p3)   ;;  %v1488_v21 = vld [vmem:[%s1773_s1 + $0xe8] sm:$0xff] (!%p225_p3)  }
   0xc   : > { %v1481_v14 = vld [vmem:[%s1773_s1 + $0x18] sm:$0xff] (!%p225_p3)   ;;  %v1485_v18 = vld [vmem:[%s1773_s1 + $0x20] sm:$0xff] (!%p225_p3)   ;;  %v1489_v22 = vld [vmem:[%s1773_s1 + $0x28] sm:$0xff] (!%p225_p3)  }
   0xd   : > { %1313 = vmatpush3.bf16.msra.mxu0 (!%p225_p3), %v1473_v6  ;;  %v1482_v15 = vld [vmem:[%s1773_s1 + $0x98] sm:$0xff] (!%p225_p3)   ;;  %v1486_v19 = vld [vmem:[%s1773_s1 + $0xa0] sm:$0xff] (!%p225_p3)   ;;  %v1490_v23 = vld [vmem:[%s1773_s1 + $0xa8] sm:$0xff] (!%p225_p3)  }
   0xe   : > { %1353 = vmatpush3.bf16.msra.mxu1 %v1474_v7  ;;  %1314 = vmatprep.subr.bf16.mxu0 %v1475_v8  ;;  %s1782_s27 = smov (!%p274_p4, %s1203_s27), 15  ;;  %v1491_v24 = vld [vmem:[%s1773_s1 + $0x70] sm:$0xff]   ;;  %v1495_v28 = vld [vmem:[%s1773_s1 + $0x78] sm:$0xff]   ;;  %v1505_v36 = vld [vmem:[%s1773_s1 + $0x100] sm:$0xff]  }
   0xf   : > { %1354 = vmatprep.subr.bf16.mxu1 %v1476_v9  ;;  %v1492_v25 = vld [vmem:[%s1773_s1 + $0xf0] sm:$0xff]   ;;  %s1442_s28 = smul.u32 20, %s1782_s27  ;;  %v1496_v29 = vld [vmem:[%s1773_s1 + $0xf8] sm:$0xff]   ;;  %v1506_v37 = vld [vmem:[%s1773_s1 + $0x108] sm:$0xff]   ;;  %s1206_s19 = sshll.u32 %s1782_s27, 2 }
  0x10   : > { %v1493_v26 = vld [vmem:[%s1773_s1 + $0x30] sm:$0xff]   ;;  %v1497_v30 = vld [vmem:[%s1773_s1 + $0x38] sm:$0xff]   ;;  %v1521_v46 = vld [vmem:[%s1773_s1 + $0x120] sm:$0xff]   ;;  %s306_s22 = scalar_lea.vmem %s1776_s4, %s1206_s19 }
  0x11   : > { %1315 = vmatpush3.bf16.msra.mxu0 %v1477_v10  ;;  %v1494_v27 = vld [vmem:[%s1773_s1 + $0xb0] sm:$0xff]   ;;  %s1701_s12 = scalar_lea.vmem %s1772_s0, %s1442_s28  ;;  %v1498_v31 = vld [vmem:[%s1773_s1 + $0xb8] sm:$0xff]   ;;  %v1522_v51 = vld [vmem:[%s1773_s1 + $0x128] sm:$0xff]  }
  0x12   : > { %1355 = vmatpush3.bf16.msra.mxu1 %v1478_v11  ;;  %1316 = vmatprep.subr.bf16.mxu0 %v1479_v12  ;;  %v1499_v32 = vld [vmem:[%s1701_s12] ss:$20 sps:$4 sm:$0xff]   ;;  %v1501_v33 = vld [vmem:[%s1701_s12 + $0x4] ss:$20 sps:$4 sm:$0xff]   ;;  %v1502_v34 = vld [vmem:[%s1701_s12 + $0x8] ss:$20 sps:$4 sm:$0xff]  }
  0x13   : > { %1356 = vmatprep.subr.bf16.mxu1 %v1480_v13  ;;  %v1504_v35 = vld [vmem:[%s1701_s12 + $0xc] ss:$20 sps:$4 sm:$0xff]   ;;  %809 = vmatprep.mubr.bf16.mxu0 %v1501_v33  ;;  %v1509_v39 = vld [vmem:[%s1701_s12 + $0x34] ss:$20 sps:$4 sm:$0xff]   ;;  %v1512_v42 = vld [vmem:[%s1701_s12 + $0x30] ss:$20 sps:$4 sm:$0xff]  }
  0x14   : > { %874 = vmatprep.mubr.bf16.mxu1 %v1504_v35  ;;  %v1507_v38 = vld [vmem:[%s1701_s12 + $0x2c] ss:$20 sps:$4 sm:$0xff]   ;;  %v1511_v40 = vld [vmem:[%s1701_s12 + $0x28] ss:$20 sps:$4 sm:$0xff]   ;;  %v1513_v41 = vld [vmem:[%s1773_s1 + $0x110] sm:$0xff]  }
  0x15   : > { %1317 = vmatpush3.bf16.msra.mxu0 %v1481_v14  ;;  %v1515_v43 = vld [vmem:[%s1701_s12 + $0x54] ss:$20 sps:$4 sm:$0xff]   ;;  %v1514_v44 = vld [vmem:[%s1773_s1 + $0x118] sm:$0xff]   ;;  %v1519_v47 = vld [vmem:[%s1701_s12 + $0x50] ss:$20 sps:$4 sm:$0xff]  }
  0x16   : > { %1357 = vmatpush3.bf16.msra.mxu1 %v1482_v15  ;;  %1318 = vmatprep.subr.bf16.mxu0 %v1483_v16  ;;  %v1517_v45 = vld [vmem:[%s1701_s12 + $0x5c] ss:$20 sps:$4 sm:$0xff]   ;;  %v1520_v48 = vld [vmem:[%s1701_s12 + $0x58] ss:$20 sps:$4 sm:$0xff]   ;;  %v1528_v54 = vld [vmem:[%s1701_s12 + $0x80] ss:$20 sps:$4 sm:$0xff]  }
  0x17   : > { %1358 = vmatprep.subr.bf16.mxu1 %v1484_v17  ;;  %v1523_v49 = vld [vmem:[%s1701_s12 + $0x7c] ss:$20 sps:$4 sm:$0xff]   ;;  %v1525_v50 = vld [vmem:[%s1701_s12 + $0x84] ss:$20 sps:$4 sm:$0xff]   ;;  %v1532_v56 = vld [vmem:[%s1701_s12 + $0x60] ss:$20 sps:$4 sm:$0xff]  }
  0x18   : > { %v1529_v52 = vld [vmem:[%s1773_s1 + $0x130] sm:$0xff]   ;;  %v1527_v53 = vld [vmem:[%s1701_s12 + $0x78] ss:$20 sps:$4 sm:$0xff]   ;;  %v1534_v59 = vld [vmem:[%s1701_s12 + $0x88] ss:$20 sps:$4 sm:$0xff]  }
  0x19   : > { %1319 = vmatpush3.bf16.msra.mxu0 %v1485_v18  ;;  %v1531_v55 = vld [vmem:[%s1701_s12 + $0x10] ss:$20 sps:$4 sm:$0xff]   ;;  %v1530_v57 = vld [vmem:[%s1773_s1 + $0x138] sm:$0xff]  }
  0x1a   : > { %1359 = vmatpush3.bf16.msra.mxu1 %v1486_v19  ;;  %1320 = vmatprep.subr.bf16.mxu0 %v1487_v20  ;;  %v1533_v58 = vld [vmem:[%s1701_s12 + $0x38] ss:$20 sps:$4 sm:$0xff]  }
  0x1b   : > { %1360 = vmatprep.subr.bf16.mxu1 %v1488_v21 }
  0x1d   : > { %1321 = vmatpush3.bf16.msra.mxu0 %v1489_v22 }
  0x1e   : > { %1361 = vmatpush3.bf16.msra.mxu1 %v1490_v23  ;;  %1322 = vmatprep.subr.bf16.mxu0 %v1491_v24 }
  0x1f   : > { %1362 = vmatprep.subr.bf16.mxu1 %v1492_v25 }
  0x21   : > { %1323 = vmatpush3.bf16.msra.mxu0 %v1493_v26 }
  0x22   : > { %1363 = vmatpush3.bf16.msra.mxu1 %v1494_v27  ;;  %1324 = vmatprep.subr.bf16.mxu0 %v1495_v28 }
  0x23   : > { %1364 = vmatprep.subr.bf16.mxu1 %v1496_v29 }
  0x25   : > { %1325 = vmatpush3.bf16.msra.mxu0 %v1497_v30 }
  0x26   : > { %1365 = vmatpush3.bf16.msra.mxu1 %v1498_v31  ;;  %1402 = vmatprep.subr.bf16.mxu0 %v1505_v36 }
  0x27   : > { %1426 = vmatprep.subr.bf16.mxu1 %v1505_v36 }
  0x28   : > { %810 = vmatmul.mubr.bf16.vlgmr.msra.gmra.mrb[0].mxu0 %v1499_v32 }
  0x29   : > { %875 = vmatmul.mubr.bf16.vlgmr.msra.gmra.mrb[0].mxu1 %v1502_v34  ;;  %1403 = vmatpush3.bf16.msra.mxu0 %v1505_v36 }
  0x2a   : > { %1434 = vmatpush3.bf16.msra.mxu1 %v1505_v36  ;;  %1404 = vmatprep.subr.bf16.mxu0 %v1506_v37 }
  0x2b   : > { %1427 = vmatprep.subr.bf16.mxu1 %v1506_v37  ;;  %817 = vmatprep.mubr.bf16.mxu0 %v1507_v38 }
  0x2c   : > { %882 = vmatprep.mubr.bf16.mxu1 %v1509_v39 }
  0x2d   : > { %1405 = vmatpush3.bf16.msra.mxu0 %v1506_v37 }
  0x2e   : > { %1435 = vmatpush3.bf16.msra.mxu1 %v1506_v37  ;;  %1406 = vmatprep.subr.bf16.mxu0 %v1513_v41 }
  0x2f   : > { %1428 = vmatprep.subr.bf16.mxu1 %v1513_v41 }
  0x30   : > { %818 = vmatmul.mubr.bf16.gmra.mrb[4].mxu0 %v1511_v40 }
  0x31   : > { %883 = vmatmul.mubr.bf16.gmra.mrb[4].mxu1 %v1512_v42  ;;  %825 = vmatprep.mubr.bf16.mxu0 %v1515_v43 }
  0x32   : > { %1407 = vmatpush3.bf16.msra.mxu0 %v1513_v41  ;;  %890 = vmatprep.mubr.bf16.mxu1 %v1517_v45 }
  0x33   : > { %1436 = vmatpush3.bf16.msra.mxu1 %v1513_v41  ;;  %1408 = vmatprep.subr.bf16.mxu0 %v1514_v44 }
  0x34   : > { %1429 = vmatprep.subr.bf16.mxu1 %v1514_v44 }
  0x36   : > { %1409 = vmatpush3.bf16.msra.mxu0 %v1514_v44 }
  0x37   : > { %1437 = vmatpush3.bf16.msra.mxu1 %v1514_v44  ;;  %1410 = vmatprep.subr.bf16.mxu0 %v1521_v46 }
  0x38   : > { %826 = vmatmul.mubr.bf16.gmra.mrb[8].mxu0 %v1519_v47  ;;  %1430 = vmatprep.subr.bf16.mxu1 %v1521_v46 }
  0x39   : > { %891 = vmatmul.mubr.bf16.gmra.mrb[8].mxu1 %v1520_v48  ;;  %833 = vmatprep.mubr.bf16.mxu0 %v1523_v49 }
  0x3a   : > { %1411 = vmatpush3.bf16.msra.mxu0 %v1521_v46  ;;  %898 = vmatprep.mubr.bf16.mxu1 %v1525_v50 }
  0x3b   : > { %1438 = vmatpush3.bf16.msra.mxu1 %v1521_v46  ;;  %1412 = vmatprep.subr.bf16.mxu0 %v1522_v51 }
  0x3c   : > { %1431 = vmatprep.subr.bf16.mxu1 %v1522_v51 }
  0x3e   : > { %1413 = vmatpush3.bf16.msra.mxu0 %v1522_v51 }
  0x3f   : > { %1439 = vmatpush3.bf16.msra.mxu1 %v1522_v51  ;;  %1414 = vmatprep.subr.bf16.mxu0 %v1529_v52 }
  0x40   : > { %834 = vmatmul.mubr.bf16.gmra.mrb[12].mxu0 %v1527_v53  ;;  %1432 = vmatprep.subr.bf16.mxu1 %v1529_v52  ;;  %v1267_v53 = vld [vmem:[%s1774_s2] ss:$0 sm:$0xff] }
  0x41   : > { %899 = vmatmul.mubr.bf16.gmra.mrb[12].mxu1 %v1528_v54  ;;  %1418 = vmatprep.mubr.bf16.mxu0 %v1531_v55 }
  0x42   : > { %1415 = vmatpush3.bf16.msra.mxu0 %v1529_v52  ;;  %1422 = vmatprep.mubr.bf16.mxu1 %v1532_v56 }
  0x43   : > { %1440 = vmatpush3.bf16.msra.mxu1 %v1529_v52  ;;  %1416 = vmatprep.subr.bf16.mxu0 %v1530_v57 }
  0x44   : > { %1433 = vmatprep.subr.bf16.mxu1 %v1530_v57 }
  0x46   : > { %1417 = vmatpush3.bf16.msra.mxu0 %v1530_v57 }
  0x47   : > { %1441 = vmatpush3.bf16.msra.mxu1 %v1530_v57 }
  0x49   : > { %1419 = vmatmul.mubr.bf16.vlgmr.msra.gmra.mrb[16].mxu0 %v1533_v58 }
  0x4a   : > { %1423 = vmatmul.mubr.bf16.vlgmr.msra.gmra.mrb[16].mxu1 %v1534_v59 }
  0xfb   : > { %v1326_v60 = vpop.f32.mrb[0].mxu0 }
  0xfc   : > { %v1366_v61 = vpop.f32.mrb[0].mxu1  ;;  %v1327_v62 = vpop.f32.mrb[1].mxu0 }
  0xfd   : > { %v1328_v63 = vadd.f32 %v1327_v62, %v1326_v60  ;;  %v1367_v0 = vpop.f32.mrb[1].mxu1  ;;  %v1329_v1 = vpop.f32.mrb[2].mxu0 }
  0xfe   : > { %v1368_v2 = vadd.f32 %v1367_v0, %v1366_v61  ;;  %v1369_v3 = vpop.f32.mrb[2].mxu1  ;;  %v1330_v4 = vpop.f32.mrb[3].mxu0 }
  0xff   : > { %v1331_v5 = vadd.f32 %v1330_v4, %v1329_v1  ;;  %v1370_v6 = vpop.f32.mrb[3].mxu1 }
 0x100   : > { %v1371_v7 = vadd.f32 %v1370_v6, %v1369_v3  ;;  %v877_v8 = vadd.f32 %v1368_v2, %v1328_v63  ;;  %v1268_v2 = vld [vmem:[%s1775_s3] ss:$0 sm:$0xff] }
 0x102   : > { %v880_v9 = vadd.f32 %v1371_v7, %v1331_v5 }
 0x103   : > { %v1332_v10 = vpop.f32.mrb[4].mxu0 }
 0x104   : > { %v1372_v11 = vpop.f32.mrb[4].mxu1  ;;  %v1333_v12 = vpop.f32.mrb[5].mxu0 }
 0x105   : > { %v1334_v13 = vadd.f32 %v1333_v12, %v1332_v10  ;;  %v1373_v14 = vpop.f32.mrb[5].mxu1  ;;  %v1335_v15 = vpop.f32.mrb[6].mxu0 }
 0x106   : > { %v1374_v16 = vadd.f32 %v1373_v14, %v1372_v11  ;;  %v1375_v17 = vpop.f32.mrb[6].mxu1  ;;  %v1336_v18 = vpop.f32.mrb[7].mxu0 }
 0x107   : > { %v1337_v19 = vadd.f32 %v1336_v18, %v1335_v15  ;;  %v1376_v20 = vpop.f32.mrb[7].mxu1 }
 0x108   : > { %v1377_v21 = vadd.f32 %v1376_v20, %v1375_v17  ;;  %v885_v22 = vadd.f32 %v1374_v16, %v1334_v13 }
 0x10a   : > { %v888_v23 = vadd.f32 %v1377_v21, %v1337_v19 }
 0x10b   : > { %v1338_v24 = vpop.f32.mrb[8].mxu0 }
 0x10c   : > { %v1378_v25 = vpop.f32.mrb[8].mxu1  ;;  %v1339_v26 = vpop.f32.mrb[9].mxu0 }
 0x10d   : > { %v1340_v27 = vadd.f32 %v1339_v26, %v1338_v24  ;;  %v1379_v28 = vpop.f32.mrb[9].mxu1  ;;  %v1341_v29 = vpop.f32.mrb[10].mxu0 }
 0x10e   : > { %v1380_v30 = vadd.f32 %v1379_v28, %v1378_v25  ;;  %v1381_v31 = vpop.f32.mrb[10].mxu1  ;;  %v1342_v32 = vpop.f32.mrb[11].mxu0 }
 0x10f   : > { %v1343_v33 = vadd.f32 %v1342_v32, %v1341_v29  ;;  %v1382_v34 = vpop.f32.mrb[11].mxu1 }
 0x110   : > { %v1383_v35 = vadd.f32 %v1382_v34, %v1381_v31  ;;  %v893_v36 = vadd.f32 %v1380_v30, %v1340_v27 }
 0x112   : > { %v896_v37 = vadd.f32 %v1383_v35, %v1343_v33 }
 0x113   : > { %v1344_v38 = vpop.f32.mrb[12].mxu0 }
 0x114   : > { %v1384_v39 = vpop.f32.mrb[12].mxu1  ;;  %v1345_v40 = vpop.f32.mrb[13].mxu0 }
 0x115   : > { %v1346_v41 = vadd.f32 %v1345_v40, %v1344_v38  ;;  %v1385_v42 = vpop.f32.mrb[13].mxu1  ;;  %v1347_v43 = vpop.f32.mrb[14].mxu0 }
 0x116   : > { %v1386_v44 = vadd.f32 %v1385_v42, %v1384_v39  ;;  %v1387_v45 = vpop.f32.mrb[14].mxu1  ;;  %v1348_v46 = vpop.f32.mrb[15].mxu0 }
 0x117   : > { %v1349_v47 = vadd.f32 %v1348_v46, %v1347_v43  ;;  %v1388_v48 = vpop.f32.mrb[15].mxu1 }
 0x118   : > { %v1389_v49 = vadd.f32 %v1388_v48, %v1387_v45  ;;  %v901_v50 = vadd.f32 %v1386_v44, %v1346_v41 }
 0x11a   : > { %v904_v51 = vadd.f32 %v1389_v49, %v1349_v47 }
 0x11c   : > { %v1420_v52 = vpop.f32.mrb[16].mxu0 }
 0x11d   : > { %v950_v54 = vadd.f32 %v1420_v52, %v885_v22  ;;  %v1424_v55 = vpop.f32.mrb[16].mxu1  ;;  %v941_v56 = vpop.f32.mrb[17].mxu0 }
 0x11e   : > { %v966_v57 = vadd.f32 %v1424_v55, %v901_v50  ;;  %v942_v58 = vadd.f32 %v941_v56, %v877_v8  ;;  %v957_v59 = vpop.f32.mrb[17].mxu1  ;;  %v1421_v60 = vpop.f32.mrb[18].mxu0 }
 0x11f   : > { %v1008_v61 = vmul.f32 %v1267_v53, %v950_v54  ;;  %v958_v62 = vadd.f32 %v957_v59, %v893_v36  ;;  %v953_v63 = vadd.f32 %v1421_v60, %v888_v23  ;;  %v1425_v0 = vpop.f32.mrb[18].mxu1  ;;  %v944_v1 = vpop.f32.mrb[19].mxu0 }
 0x120   : > { %v1012_v3 = vmul.f32 %v1267_v53, %v966_v57  ;;  %v1006_v4 = vmul.f32 %v1267_v53, %v942_v58  ;;  %v969_v5 = vadd.f32 %v1425_v0, %v904_v51  ;;  %v945_v6 = vadd.f32 %v944_v1, %v880_v9  ;;  %v960_v7 = vpop.f32.mrb[19].mxu1 }
 0x121   : > { %v1010_v10 = vmul.f32 %v1267_v53, %v958_v62  ;;  %v1009_v11 = vmul.f32 %v1267_v53, %v953_v63  ;;  %v961_v8 = vadd.f32 %v960_v7, %v896_v37  ;;  %v1023_v14 = vadd.f32 %v1268_v2, %v1008_v61 }
 0x122   : > { %v1013_v12 = vmul.f32 %v1267_v53, %v969_v5  ;;  %v1007_v13 = vmul.f32 %v1267_v53, %v945_v6  ;;  %v1027_v17 = vadd.f32 %v1268_v2, %v1012_v3  ;;  %v1021_v18 = vadd.f32 %v1268_v2, %v1006_v4 }
 0x123   : > { %v1024_v15 = vadd.f32 %v1268_v2, %v1009_v11  ;;  %v1011_v16 = vmul.f32 %v1267_v53, %v961_v8  ;;  %v1025_v21 = vadd.f32 %v1268_v2, %v1010_v10 }
 0x124   : > { %v1028_v19 = vadd.f32 %v1268_v2, %v1013_v12  ;;  %v1022_v20 = vadd.f32 %v1268_v2, %v1007_v13 }
 0x125   : > { %v1295_v9 = vpack.c.bf16 %v1024_v15, %v1023_v14  ;;  %v1026_v22 = vadd.f32 %v1268_v2, %v1011_v16 }
 0x126   : > { %v1305_v23 = vpack.c.bf16 %v1028_v19, %v1027_v17  ;;  %v1290_v24 = vpack.c.bf16 %v1022_v20, %v1021_v18 }
 0x127   : > { %1307 = vst [vmem:[%s306_s22 + $0x8] sm:$0xff] %v1295_v9   ;;  %v1300_v25 = vpack.c.bf16 %v1026_v22, %v1025_v21 }
 0x128   : > { %1309 = vst [vmem:[%s306_s22 + $0x18] sm:$0xff] %v1305_v23   ;;  %1291 = vst [vmem:[%s306_s22] sm:$0xff] %v1290_v24  }
 0x129   : > { %1308 = vst [vmem:[%s306_s22 + $0x10] sm:$0xff] %v1300_v25  }
 0x12a PF: > { %s14_s17 = sadd.s32 1, %s1557_s17   ;;  %s1777_s15 = smov %s1553_s16 }
 0x12b   : > { %p11_p5 = scmp.ge.s32.totalorder %s14_s17, 4   ;;  %s1778_s16 = smov %s1780_s18 }
 0x12d   :  { %13 = sbr.rel (!%p11_p5) target bundleno = 2 (0x2), region = 83 }

// kernel: _lambda_.58
= control target key start
LH: loop header
LB: loop body
LE: loop exit
PB: predicated region body
PF: predicated region fallthrough
CT: control target
= control target key end

     0   :  { %s1485_s21 = smov 0   ;;  %s1487_s22 = smov 0   ;;  %s1666_s0 = inlined_call_operand.vmem [shape: bf16[128,384], index: 0, kind: input, shape index: {}]   ;;  %s1667_s1 = inlined_call_operand.vmem [shape: bf16[384,128], index: 1, kind: input, shape index: {}]   ;;  %s1668_s2 = inlined_call_operand.vmem [shape: f32[1,128], index: 2, kind: input, shape index: {}]   ;;  %s1669_s3 = inlined_call_operand.vmem [shape: f32[1,128], index: 3, kind: input, shape index: {}]   ;;  %s1670_s4 = inlined_call_operand.vmem [shape: bf16[128,128], index: 4, kind: input, shape index: {}]   ;;  %s1671_s5 = inlined_call_operand.vmem [shape: bf16[128,128], index: 5, kind: input, shape index: {}]   ;;  %s1672_s6 = inlined_call_operand.vmem [shape: bf16[128,128], index: 6, kind: output, shape index: {}]  }
   0x1   :  { %s1489_s23 = smov 0  }
   0x2 LB: > { %s35_s24 = sadd.s32 1, %s1444_s22  ;;  %p1159_p0 = scmp.ge.s32.totalorder %s1448_s23, 1  ;;  %s1448_s23 = sphi %s1489_s23, %s16_s23   ;;  %s1444_s22 = sphi %s1487_s22, %s1674_s22   ;;  %s1440_s21 = sphi %s1485_s21, %s1673_s21  }
   0x3   : > { %p37_p1 = scmp.ge.s32.totalorder %s35_s24, 2  ;;  %p306_p2 = scmp.lt.s32.totalorder %s1448_s23, 3 }
   0x5   : > { %s1676_s24 = smov (%p37_p1, %s35_s24), 0  ;;  %p307_p3 = pnand %p1159_p0, %p306_p2 }
   0x6   : > { %v1386_v0 = vld [vmem:[%s1667_s1 + $0x40] sm:$0xff] (!%p307_p3)   ;;  %v1389_v3 = vld [vmem:[%s1667_s1 + $0x48] sm:$0xff] (!%p307_p3)   ;;  %v1392_v6 = vld [vmem:[%s1667_s1 + $0x50] sm:$0xff] (!%p307_p3)   ;;  %s1160_s17 = sshll.u32 (!%p307_p3), %s1440_s21, 3 }
   0x7   : > { %310 = sbr.rel (%p307_p3) target bundleno = 293 (0x125), region = 44  ;;  %v1387_v1 = vld [vmem:[%s1667_s1] sm:$0xff] (!%p307_p3)   ;;  %1285 = vmatprep.subr.bf16.mxu0 (!%p307_p3), %v1386_v0  ;;  %v1390_v4 = vld [vmem:[%s1667_s1 + $0x8] sm:$0xff] (!%p307_p3)   ;;  %v1393_v7 = vld [vmem:[%s1667_s1 + $0x10] sm:$0xff] (!%p307_p3)   ;;  %p376_p4 = scmp.lt.s32.totalorder (!%p307_p3), %s1160_s17, 15 }
   0x8   : > { %v1388_v2 = vld [vmem:[%s1667_s1 + $0x80] sm:$0xff] (!%p307_p3)   ;;  %1286 = vmatpush3.bf16.msra.mxu0 (!%p307_p3), %v1387_v1  ;;  %v1391_v5 = vld [vmem:[%s1667_s1 + $0x88] sm:$0xff] (!%p307_p3)   ;;  %v1394_v8 = vld [vmem:[%s1667_s1 + $0x90] sm:$0xff] (!%p307_p3)  }
   0x9   : > { %1337 = vmatprep.subr.bf16.mxu1 (!%p307_p3), %v1388_v2  ;;  %1287 = vmatprep.subr.bf16.mxu0 (!%p307_p3), %v1389_v3  ;;  %v1395_v9 = vld [vmem:[%s1667_s1 + $0x58] sm:$0xff] (!%p307_p3)   ;;  %v1398_v12 = vld [vmem:[%s1667_s1 + $0x60] sm:$0xff] (!%p307_p3)   ;;  %v1401_v15 = vld [vmem:[%s1667_s1 + $0x68] sm:$0xff] (!%p307_p3)  }
   0xa   : > { %1338 = vmatpush3.bf16.msra.mxu1 (!%p307_p3), %v1388_v2  ;;  %v1396_v10 = vld [vmem:[%s1667_s1 + $0x18] sm:$0xff] (!%p307_p3)   ;;  %v1400_v13 = vld [vmem:[%s1667_s1 + $0xa0] sm:$0xff] (!%p307_p3)   ;;  %v1403_v16 = vld [vmem:[%s1667_s1 + $0xa8] sm:$0xff] (!%p307_p3)  }
   0xb   : > { %1339 = vmatprep.subr.bf16.mxu1 (!%p307_p3), %v1391_v5  ;;  %v1397_v11 = vld [vmem:[%s1667_s1 + $0x98] sm:$0xff] (!%p307_p3)   ;;  %v1399_v14 = vld [vmem:[%s1667_s1 + $0x20] sm:$0xff] (!%p307_p3)   ;;  %v1402_v17 = vld [vmem:[%s1667_s1 + $0x28] sm:$0xff] (!%p307_p3)  }
   0xc   : > { %1288 = vmatpush3.bf16.msra.mxu0 (!%p307_p3), %v1390_v4  ;;  %v1404_v18 = vld [vmem:[%s1667_s1 + $0x70] sm:$0xff] (!%p307_p3)   ;;  %v1407_v21 = vld [vmem:[%s1667_s1 + $0x78] sm:$0xff] (!%p307_p3)   ;;  %v1616_v43 = vld [vmem:[%s1668_s2] ss:$0 sm:$0xff] (!%p307_p3) }
   0xd   : > { %1289 = vmatprep.subr.bf16.mxu0 (!%p307_p3), %v1392_v6  ;;  %v1405_v19 = vld [vmem:[%s1667_s1 + $0x30] sm:$0xff] (!%p307_p3)   ;;  %v1409_v22 = vld [vmem:[%s1667_s1 + $0xb8] sm:$0xff] (!%p307_p3)   ;;  %v1622_v48 = vld [vmem:[%s1669_s3] ss:$0 sm:$0xff] (!%p307_p3) }
   0xe   : > { %1340 = vmatpush3.bf16.msra.mxu1 %v1391_v5  ;;  %s1678_s17 = smov (!%p376_p4, %s1160_s17), 15  ;;  %v1406_v20 = vld [vmem:[%s1667_s1 + $0xb0] sm:$0xff]   ;;  %v1408_v25 = vld [vmem:[%s1667_s1 + $0x38] sm:$0xff]  }
   0xf   : > { %1341 = vmatprep.subr.bf16.mxu1 %v1394_v8  ;;  %s1361_s15 = smul.u32 12, %s1678_s17  ;;  %s1599_s13 = sshll.u32 %s1678_s17, 2 }
  0x10   : > { %1290 = vmatpush3.bf16.msra.mxu0 %v1393_v7  ;;  %s1605_s16 = scalar_lea.vmem %s1670_s4, %s1599_s13  ;;  %s1611_s20 = scalar_lea.vmem %s1671_s5, %s1599_s13 }
  0x11   : > { %1291 = vmatprep.subr.bf16.mxu0 %v1395_v9  ;;  %s1575_s30 = scalar_lea.vmem %s1666_s0, %s1361_s15  ;;  %v1225_v44 = vld [vmem:[%s1605_s16] sm:$0xff]   ;;  %v1276_v0 = vld [vmem:[%s1605_s16 + $0x8] sm:$0xff]   ;;  %s1636_s21 = scalar_lea.vmem %s1672_s6, %s1599_s13 }
  0x12   : > { %1342 = vmatpush3.bf16.msra.mxu1 %v1394_v8  ;;  %v1412_v23 = vld [vmem:[%s1575_s30 + $0x4] ss:$12 sps:$4 sm:$0xff]   ;;  %v1413_v24 = vld [vmem:[%s1575_s30 + $0x8] ss:$12 sps:$4 sm:$0xff]   ;;  %v1410_v26 = vld [vmem:[%s1575_s30] ss:$12 sps:$4 sm:$0xff]   ;;  %v1226_v51 = vunpack.c.l.bf16 %v1225_v44  ;;  %v1227_v56 = vunpack.c.h.bf16 %v1225_v44  ;;  %v1230_v9 = vunpack.c.l.bf16 %v1276_v0 }
  0x13   : > { %1343 = vmatprep.subr.bf16.mxu1 %v1397_v11  ;;  %753 = vmatprep.mubr.bf16.mxu0 %v1412_v23  ;;  %v1415_v27 = vld [vmem:[%s1575_s30 + $0x1c] ss:$12 sps:$4 sm:$0xff]   ;;  %v1414_v28 = vld [vmem:[%s1575_s30 + $0x20] ss:$12 sps:$4 sm:$0xff]   ;;  %v1421_v29 = vld [vmem:[%s1575_s30 + $0x38] ss:$12 sps:$4 sm:$0xff]  }
  0x14   : > { %1292 = vmatpush3.bf16.msra.mxu0 %v1396_v10  ;;  %1353 = vmatprep.mubr.bf16.mxu1 %v1413_v24  ;;  %v1417_v30 = vld [vmem:[%s1575_s30 + $0x18] ss:$12 sps:$4 sm:$0xff]   ;;  %v1418_v31 = vld [vmem:[%s1575_s30 + $0x34] ss:$12 sps:$4 sm:$0xff]   ;;  %v1422_v32 = vld [vmem:[%s1575_s30 + $0x50] ss:$12 sps:$4 sm:$0xff]  }
  0x15   : > { %1293 = vmatprep.subr.bf16.mxu0 %v1398_v12  ;;  %v1420_v33 = vld [vmem:[%s1575_s30 + $0x30] ss:$12 sps:$4 sm:$0xff]   ;;  %v1423_v34 = vld [vmem:[%s1575_s30 + $0x4c] ss:$12 sps:$4 sm:$0xff]   ;;  %v1425_v35 = vld [vmem:[%s1575_s30 + $0x48] ss:$12 sps:$4 sm:$0xff]  }
  0x16   : > { %1344 = vmatpush3.bf16.msra.mxu1 %v1397_v11  ;;  %v1241_v52 = vld [vmem:[%s1611_s20] sm:$0xff]  }
  0x17   : > { %1345 = vmatprep.subr.bf16.mxu1 %v1400_v13  ;;  %v1242_v58 = vunpack.c.l.bf16 %v1241_v52  ;;  %v1243_v62 = vunpack.c.h.bf16 %v1241_v52  ;;  %v1278_v52 = vld [vmem:[%s1605_s16 + $0x18] sm:$0xff]  }
  0x18   : > { %1294 = vmatpush3.bf16.msra.mxu0 %v1399_v14  ;;  %v1279_v14 = vld [vmem:[%s1611_s20 + $0x8] sm:$0xff]  }
  0x19   : > { %1295 = vmatprep.subr.bf16.mxu0 %v1401_v15 }
  0x1a   : > { %1346 = vmatpush3.bf16.msra.mxu1 %v1400_v13 }
  0x1b   : > { %1347 = vmatprep.subr.bf16.mxu1 %v1403_v16 }
  0x1c   : > { %1296 = vmatpush3.bf16.msra.mxu0 %v1402_v17 }
  0x1d   : > { %1297 = vmatprep.subr.bf16.mxu0 %v1404_v18 }
  0x1e   : > { %1348 = vmatpush3.bf16.msra.mxu1 %v1403_v16 }
  0x1f   : > { %1349 = vmatprep.subr.bf16.mxu1 %v1406_v20 }
  0x20   : > { %1298 = vmatpush3.bf16.msra.mxu0 %v1405_v19  ;;  %v1231_v19 = vunpack.c.h.bf16 %v1276_v0 }
  0x21   : > { %1299 = vmatprep.subr.bf16.mxu0 %v1407_v21  ;;  %v1246_v21 = vunpack.c.l.bf16 %v1279_v14 }
  0x22   : > { %1350 = vmatpush3.bf16.msra.mxu1 %v1406_v20 }
  0x23   : > { %1351 = vmatprep.subr.bf16.mxu1 %v1409_v22 }
  0x24   : > { %1300 = vmatpush3.bf16.msra.mxu0 %v1408_v25  ;;  %v1247_v25 = vunpack.c.h.bf16 %v1279_v14 }
  0x26   : > { %1352 = vmatpush3.bf16.msra.mxu1 %v1409_v22 }
  0x27   : > { %754 = vmatmul.mubr.bf16.vlgmr.msra.gmra.mrb[0].mxu0 %v1410_v26 }
  0x28   : > { %761 = vmatprep.mubr.bf16.mxu0 %v1415_v27 }
  0x29   : > { %1354 = vmatmul.mubr.bf16.vlgmr.msra.gmra.mrb[0].mxu1 %v1414_v28  ;;  %v1277_v28 = vld [vmem:[%s1605_s16 + $0x10] sm:$0xff]  }
  0x2a   : > { %1357 = vmatprep.mubr.bf16.mxu1 %v1421_v29 }
  0x2f   : > { %762 = vmatmul.mubr.bf16.gmra.mrb[4].mxu0 %v1417_v30 }
  0x30   : > { %769 = vmatprep.mubr.bf16.mxu0 %v1418_v31 }
  0x31   : > { %1358 = vmatmul.mubr.bf16.gmra.mrb[4].mxu1 %v1422_v32 }
  0x37   : > { %770 = vmatmul.mubr.bf16.gmra.mrb[8].mxu0 %v1420_v33  ;;  %v1234_v33 = vunpack.c.l.bf16 %v1277_v28 }
  0x38   : > { %777 = vmatprep.mubr.bf16.mxu0 %v1423_v34 }
  0x3f   : > { %778 = vmatmul.mubr.bf16.gmra.mrb[12].mxu0 %v1425_v35 }
  0xfa   : > { %v1301_v36 = vpop.f32.mrb[0].mxu0 }
  0xfb   : > { %v1302_v37 = vpop.f32.mrb[1].mxu0 }
  0xfc   : > { %v1303_v38 = vadd.f32 %v1302_v37, %v1301_v36  ;;  %v1304_v39 = vpop.f32.mrb[2].mxu0  ;;  %v1355_v40 = vpop.f32.mrb[0].mxu1  ;;  %v1280_v37 = vld [vmem:[%s1611_s20 + $0x10] sm:$0xff]  }
  0xfd   : > { %v1305_v41 = vpop.f32.mrb[3].mxu0  ;;  %v820_v42 = vpop.f32.mrb[1].mxu1 }
  0xfe   : > { %v1306_v45 = vadd.f32 %v1305_v41, %v1304_v39  ;;  %v821_v46 = vadd.f32 %v1303_v38, %v820_v42  ;;  %v1356_v47 = vpop.f32.mrb[2].mxu1  ;;  %v1235_v42 = vunpack.c.h.bf16 %v1277_v28 }
  0xff   : > { %v823_v49 = vpop.f32.mrb[3].mxu1 }
 0x100   : > { %v885_v50 = vmul.f32 %v1616_v43, %v821_v46  ;;  %v824_v53 = vadd.f32 %v1306_v45, %v823_v49  ;;  %v1250_v45 = vunpack.c.l.bf16 %v1280_v37 }
 0x102   : > { %v900_v54 = vadd.f32 %v1622_v48, %v885_v50  ;;  %v886_v55 = vmul.f32 %v1616_v43, %v824_v53  ;;  %v1307_v57 = vpop.f32.mrb[4].mxu0  ;;  %v1251_v50 = vunpack.c.h.bf16 %v1280_v37 }
 0x103   : > { %v1308_v59 = vpop.f32.mrb[5].mxu0 }
 0x104   : > { %v924_v60 = vmul.f32 %v1226_v51, %v900_v54  ;;  %v901_v61 = vadd.f32 %v1622_v48, %v886_v55  ;;  %v1309_v63 = vadd.f32 %v1308_v59, %v1307_v57  ;;  %v1310_v1 = vpop.f32.mrb[6].mxu0  ;;  %v1359_v2 = vpop.f32.mrb[4].mxu1 }
 0x105   : > { %v1311_v3 = vpop.f32.mrb[7].mxu0  ;;  %v836_v4 = vpop.f32.mrb[5].mxu1 }
 0x106   : > { %v925_v5 = vmul.f32 %v1227_v56, %v901_v61  ;;  %v829_v6 = vadd.f32 %v1355_v40, %v1309_v63  ;;  %v1312_v7 = vadd.f32 %v1311_v3, %v1310_v1  ;;  %v1360_v8 = vpop.f32.mrb[6].mxu1  ;;  %v948_v11 = vmul.f32 %v1242_v58, %v924_v60  ;;  %v1281_v63 = vld [vmem:[%s1611_s20 + $0x18] sm:$0xff]  }
 0x107   : > { %v839_v10 = vpop.f32.mrb[7].mxu1  ;;  %v1238_v58 = vunpack.c.l.bf16 %v1278_v52 }
 0x108   : > { %v949_v12 = vmul.f32 %v1243_v62, %v925_v5  ;;  %v887_v13 = vmul.f32 %v1616_v43, %v829_v6  ;;  %v832_v15 = vadd.f32 %v1356_v47, %v1312_v7  ;;  %v1254_v6 = vunpack.c.l.bf16 %v1281_v63 }
 0x109   : > { %v1255_v7 = vunpack.c.h.bf16 %v1281_v63 }
 0x10a   : > { %v1259_v16 = vpack.c.bf16 %v949_v12, %v948_v11  ;;  %v902_v17 = vadd.f32 %v1622_v48, %v887_v13  ;;  %v888_v18 = vmul.f32 %v1616_v43, %v832_v15  ;;  %v1313_v20 = vpop.f32.mrb[8].mxu0 }
 0x10b   : > { %v1314_v22 = vpop.f32.mrb[9].mxu0 }
 0x10c   : > { %1260 = vst [vmem:[%s1636_s21] sm:$0xff] %v1259_v16   ;;  %v926_v23 = vmul.f32 %v1230_v9, %v902_v17  ;;  %v903_v24 = vadd.f32 %v1622_v48, %v888_v18  ;;  %v1315_v26 = vadd.f32 %v1314_v22, %v1313_v20  ;;  %v1316_v27 = vpop.f32.mrb[10].mxu0 }
 0x10d   : > { %v1317_v29 = vpop.f32.mrb[11].mxu0 }
 0x10e   : > { %v927_v30 = vmul.f32 %v1231_v19, %v903_v24  ;;  %v1318_v31 = vadd.f32 %v1317_v29, %v1316_v27  ;;  %v837_v32 = vadd.f32 %v1315_v26, %v836_v4  ;;  %v950_v34 = vmul.f32 %v1246_v21, %v926_v23 }
 0x10f   : > { %v1239_v4 = vunpack.c.h.bf16 %v1278_v52 }
 0x110   : > { %v951_v35 = vmul.f32 %v1247_v25, %v927_v30  ;;  %v889_v36 = vmul.f32 %v1616_v43, %v837_v32  ;;  %v840_v38 = vadd.f32 %v1318_v31, %v839_v10 }
 0x112   : > { %v1264_v39 = vpack.c.bf16 %v951_v35, %v950_v34  ;;  %v904_v40 = vadd.f32 %v1622_v48, %v889_v36  ;;  %v890_v41 = vmul.f32 %v1616_v43, %v840_v38  ;;  %v1319_v44 = vpop.f32.mrb[12].mxu0 }
 0x113   : > { %v1320_v46 = vpop.f32.mrb[13].mxu0 }
 0x114   : > { %1282 = vst [vmem:[%s1636_s21 + $0x8] sm:$0xff] %v1264_v39   ;;  %v928_v47 = vmul.f32 %v1234_v33, %v904_v40  ;;  %v905_v49 = vadd.f32 %v1622_v48, %v890_v41  ;;  %v1321_v51 = vadd.f32 %v1320_v46, %v1319_v44  ;;  %v1322_v53 = vpop.f32.mrb[14].mxu0 }
 0x115   : > { %v1323_v54 = vpop.f32.mrb[15].mxu0 }
 0x116   : > { %v929_v55 = vmul.f32 %v1235_v42, %v905_v49  ;;  %v845_v56 = vadd.f32 %v1359_v2, %v1321_v51  ;;  %v1324_v57 = vadd.f32 %v1323_v54, %v1322_v53  ;;  %v952_v59 = vmul.f32 %v1250_v45, %v928_v47 }
 0x118   : > { %v953_v60 = vmul.f32 %v1251_v50, %v929_v55  ;;  %v891_v61 = vmul.f32 %v1616_v43, %v845_v56  ;;  %v848_v62 = vadd.f32 %v1360_v8, %v1324_v57 }
 0x11a   : > { %v1269_v0 = vpack.c.bf16 %v953_v60, %v952_v59  ;;  %v906_v1 = vadd.f32 %v1622_v48, %v891_v61  ;;  %v892_v3 = vmul.f32 %v1616_v43, %v848_v62 }
 0x11c   : > { %1283 = vst [vmem:[%s1636_s21 + $0x10] sm:$0xff] %v1269_v0   ;;  %v930_v5 = vmul.f32 %v1238_v58, %v906_v1  ;;  %v907_v2 = vadd.f32 %v1622_v48, %v892_v3 }
 0x11e   : > { %v931_v9 = vmul.f32 %v1239_v4, %v907_v2  ;;  %v954_v10 = vmul.f32 %v1254_v6, %v930_v5 }
 0x120   : > { %v955_v11 = vmul.f32 %v1255_v7, %v931_v9 }
 0x122   : > { %v1274_v12 = vpack.c.bf16 %v955_v11, %v954_v10 }
 0x124   : > { %1284 = vst [vmem:[%s1636_s21 + $0x18] sm:$0xff] %v1274_v12  }
 0x125 PF: > { %s16_s23 = sadd.s32 1, %s1448_s23   ;;  %s1673_s21 = smov %s1444_s22 }
 0x126   : > { %p13_p5 = scmp.ge.s32.totalorder %s16_s23, 4   ;;  %s1674_s22 = smov %s1676_s24 }
 0x128   :  { %15 = sbr.rel (!%p13_p5) target bundleno = 2 (0x2), region = 97 }

// kernel: _lambda_.41
= control target key start
LH: loop header
LB: loop body
LE: loop exit
PB: predicated region body
PF: predicated region fallthrough
CT: control target
= control target key end

     0   :  { %s2383_s18 = smov 0   ;;  %s2385_s19 = smov 0   ;;  %s2699_s0 = inlined_call_operand.vmem [shape: bf16[128,1152], index: 0, kind: input, shape index: {}]   ;;  %s2700_s1 = inlined_call_operand.vmem [shape: bf16[1152,128], index: 1, kind: input, shape index: {}]   ;;  %s2701_s2 = inlined_call_operand.vmem [shape: f32[1,128], index: 2, kind: input, shape index: {}]   ;;  %s2702_s3 = inlined_call_operand.vmem [shape: f32[1,128], index: 3, kind: input, shape index: {}]   ;;  %s2703_s4 = inlined_call_operand.vmem [shape: bf16[128,128], index: 4, kind: input, shape index: {}]   ;;  %s2704_s5 = inlined_call_operand.vmem [shape: bf16[128,128], index: 5, kind: output, shape index: {}]  }
   0x1   :  { %s2387_s20 = smov 0  }
   0x2 LB: > { %s34_s21 = sadd.s32 1, %s2347_s19  ;;  %p1791_p0 = scmp.ge.s32.totalorder %s2351_s20, 1  ;;  %s2351_s20 = sphi %s2387_s20, %s15_s20   ;;  %s2347_s19 = sphi %s2385_s19, %s2706_s19   ;;  %s2343_s18 = sphi %s2383_s18, %s2705_s18  }
   0x3   : > { %p36_p1 = scmp.ge.s32.totalorder %s34_s21, 2  ;;  %p265_p2 = scmp.lt.s32.totalorder %s2351_s20, 3 }
   0x5   : > { %s2708_s21 = smov (%p36_p1, %s34_s21), 0  ;;  %p266_p3 = pnand %p1791_p0, %p265_p2 }
   0x6   : > { %v2205_v0 = vld [vmem:[%s2700_s1 + $0x40] sm:$0xff] (!%p266_p3)   ;;  %v2209_v4 = vld [vmem:[%s2700_s1 + $0x48] sm:$0xff] (!%p266_p3)   ;;  %v2213_v8 = vld [vmem:[%s2700_s1 + $0x50] sm:$0xff] (!%p266_p3)   ;;  %s1792_s6 = sshll.u32 (!%p266_p3), %s2343_s18, 3 }
   0x7   : > { %269 = sbr.rel (%p266_p3) target bundleno = 334 (0x14e), region = 40  ;;  %v2206_v1 = vld [vmem:[%s2700_s1 + $0xc0] sm:$0xff] (!%p266_p3)   ;;  %1968 = vmatprep.subr.bf16.mxu0 (!%p266_p3), %v2205_v0  ;;  %v2210_v5 = vld [vmem:[%s2700_s1 + $0xc8] sm:$0xff] (!%p266_p3)   ;;  %v2214_v9 = vld [vmem:[%s2700_s1 + $0xd0] sm:$0xff] (!%p266_p3)   ;;  %p325_p4 = scmp.lt.s32.totalorder (!%p266_p3), %s1792_s6, 15 }
   0x8   : > { %v2207_v2 = vld [vmem:[%s2700_s1] sm:$0xff] (!%p266_p3)   ;;  %2008 = vmatprep.subr.bf16.mxu1 (!%p266_p3), %v2206_v1  ;;  %v2211_v6 = vld [vmem:[%s2700_s1 + $0x8] sm:$0xff] (!%p266_p3)   ;;  %v2215_v10 = vld [vmem:[%s2700_s1 + $0x10] sm:$0xff] (!%p266_p3)  }
   0x9   : > { %v2208_v3 = vld [vmem:[%s2700_s1 + $0x80] sm:$0xff] (!%p266_p3)   ;;  %1969 = vmatpush3.bf16.msra.mxu0 (!%p266_p3), %v2207_v2  ;;  %v2212_v7 = vld [vmem:[%s2700_s1 + $0x88] sm:$0xff] (!%p266_p3)   ;;  %v2216_v11 = vld [vmem:[%s2700_s1 + $0x90] sm:$0xff] (!%p266_p3)  }
   0xa   : > { %2009 = vmatpush3.bf16.msra.mxu1 (!%p266_p3), %v2208_v3  ;;  %1970 = vmatprep.subr.bf16.mxu0 (!%p266_p3), %v2209_v4  ;;  %v2217_v12 = vld [vmem:[%s2700_s1 + $0x58] sm:$0xff] (!%p266_p3)   ;;  %v2221_v16 = vld [vmem:[%s2700_s1 + $0x60] sm:$0xff] (!%p266_p3)   ;;  %v2225_v20 = vld [vmem:[%s2700_s1 + $0x68] sm:$0xff] (!%p266_p3)  }
   0xb   : > { %2010 = vmatprep.subr.bf16.mxu1 (!%p266_p3), %v2210_v5  ;;  %v2218_v13 = vld [vmem:[%s2700_s1 + $0xd8] sm:$0xff] (!%p266_p3)   ;;  %v2222_v17 = vld [vmem:[%s2700_s1 + $0xe0] sm:$0xff] (!%p266_p3)   ;;  %v2226_v21 = vld [vmem:[%s2700_s1 + $0xe8] sm:$0xff] (!%p266_p3)  }
   0xc   : > { %v2219_v14 = vld [vmem:[%s2700_s1 + $0x18] sm:$0xff] (!%p266_p3)   ;;  %v2223_v18 = vld [vmem:[%s2700_s1 + $0x20] sm:$0xff] (!%p266_p3)   ;;  %v2227_v22 = vld [vmem:[%s2700_s1 + $0x28] sm:$0xff] (!%p266_p3)  }
   0xd   : > { %1971 = vmatpush3.bf16.msra.mxu0 (!%p266_p3), %v2211_v6  ;;  %v2220_v15 = vld [vmem:[%s2700_s1 + $0x98] sm:$0xff] (!%p266_p3)   ;;  %v2224_v19 = vld [vmem:[%s2700_s1 + $0xa0] sm:$0xff] (!%p266_p3)   ;;  %v2228_v23 = vld [vmem:[%s2700_s1 + $0xa8] sm:$0xff] (!%p266_p3)  }
   0xe   : > { %2011 = vmatpush3.bf16.msra.mxu1 %v2212_v7  ;;  %1972 = vmatprep.subr.bf16.mxu0 %v2213_v8  ;;  %s2710_s6 = smov (!%p325_p4, %s1792_s6), 15  ;;  %v2229_v24 = vld [vmem:[%s2700_s1 + $0x70] sm:$0xff]   ;;  %v2233_v28 = vld [vmem:[%s2700_s1 + $0x78] sm:$0xff]   ;;  %v2243_v36 = vld [vmem:[%s2700_s1 + $0x140] sm:$0xff]  }
   0xf   : > { %2012 = vmatprep.subr.bf16.mxu1 %v2214_v9  ;;  %v2230_v25 = vld [vmem:[%s2700_s1 + $0xf0] sm:$0xff]   ;;  %s2180_s8 = smul.u32 36, %s2710_s6  ;;  %v2234_v29 = vld [vmem:[%s2700_s1 + $0xf8] sm:$0xff]   ;;  %v2244_v37 = vld [vmem:[%s2700_s1 + $0x1c0] sm:$0xff]  }
  0x10   : > { %v2231_v26 = vld [vmem:[%s2700_s1 + $0x30] sm:$0xff]   ;;  %v2235_v30 = vld [vmem:[%s2700_s1 + $0x38] sm:$0xff]   ;;  %v2245_v38 = vld [vmem:[%s2700_s1 + $0x100] sm:$0xff]  }
  0x11   : > { %1973 = vmatpush3.bf16.msra.mxu0 %v2215_v10  ;;  %v2232_v27 = vld [vmem:[%s2700_s1 + $0xb0] sm:$0xff]   ;;  %s2500_s22 = scalar_lea.vmem %s2699_s0, %s2180_s8  ;;  %v2236_v31 = vld [vmem:[%s2700_s1 + $0xb8] sm:$0xff]   ;;  %v2246_v39 = vld [vmem:[%s2700_s1 + $0x180] sm:$0xff]  }
  0x12   : > { %2013 = vmatpush3.bf16.msra.mxu1 %v2216_v11  ;;  %1974 = vmatprep.subr.bf16.mxu0 %v2217_v12  ;;  %v2237_v32 = vld [vmem:[%s2500_s22] ss:$36 sps:$4 sm:$0xff]   ;;  %v2240_v34 = vld [vmem:[%s2500_s22 + $0x8] ss:$36 sps:$4 sm:$0xff]   ;;  %v2253_v45 = vld [vmem:[%s2500_s22 + $0x54] ss:$36 sps:$4 sm:$0xff]  }
  0x13   : > { %2014 = vmatprep.subr.bf16.mxu1 %v2218_v13  ;;  %v2239_v33 = vld [vmem:[%s2500_s22 + $0x4] ss:$36 sps:$4 sm:$0xff]   ;;  %v2242_v35 = vld [vmem:[%s2500_s22 + $0xc] ss:$36 sps:$4 sm:$0xff]   ;;  %v2261_v52 = vld [vmem:[%s2700_s1 + $0x158] sm:$0xff]  }
  0x14   : > { %1221 = vmatprep.mubr.bf16.mxu0 %v2239_v33  ;;  %1286 = vmatprep.mubr.bf16.mxu1 %v2242_v35  ;;  %v2247_v40 = vld [vmem:[%s2700_s1 + $0x148] sm:$0xff]   ;;  %v2256_v47 = vld [vmem:[%s2500_s22 + $0x50] ss:$36 sps:$4 sm:$0xff]   ;;  %v2262_v53 = vld [vmem:[%s2700_s1 + $0x1d8] sm:$0xff]  }
  0x15   : > { %1975 = vmatpush3.bf16.msra.mxu0 %v2219_v14  ;;  %v2248_v41 = vld [vmem:[%s2700_s1 + $0x1c8] sm:$0xff]   ;;  %v2257_v48 = vld [vmem:[%s2700_s1 + $0x150] sm:$0xff]   ;;  %v2263_v54 = vld [vmem:[%s2700_s1 + $0x118] sm:$0xff]  }
  0x16   : > { %2015 = vmatpush3.bf16.msra.mxu1 %v2220_v15  ;;  %1976 = vmatprep.subr.bf16.mxu0 %v2221_v16  ;;  %v2249_v42 = vld [vmem:[%s2700_s1 + $0x108] sm:$0xff]   ;;  %v2258_v49 = vld [vmem:[%s2700_s1 + $0x1d0] sm:$0xff]   ;;  %v2264_v55 = vld [vmem:[%s2700_s1 + $0x198] sm:$0xff]  }
  0x17   : > { %2016 = vmatprep.subr.bf16.mxu1 %v2222_v17  ;;  %v2250_v43 = vld [vmem:[%s2700_s1 + $0x188] sm:$0xff]   ;;  %v2259_v50 = vld [vmem:[%s2700_s1 + $0x110] sm:$0xff]   ;;  %v2267_v57 = vld [vmem:[%s2500_s22 + $0x9c] ss:$36 sps:$4 sm:$0xff]  }
  0x18   : > { %v2251_v44 = vld [vmem:[%s2500_s22 + $0x4c] ss:$36 sps:$4 sm:$0xff]   ;;  %v2265_v56 = vld [vmem:[%s2500_s22 + $0x94] ss:$36 sps:$4 sm:$0xff]   ;;  %v2271_v60 = vld [vmem:[%s2700_s1 + $0x160] sm:$0xff]  }
  0x19   : > { %1977 = vmatpush3.bf16.msra.mxu0 %v2223_v18  ;;  %v2255_v46 = vld [vmem:[%s2500_s22 + $0x48] ss:$36 sps:$4 sm:$0xff]   ;;  %v2260_v51 = vld [vmem:[%s2700_s1 + $0x190] sm:$0xff]   ;;  %v2270_v59 = vld [vmem:[%s2500_s22 + $0x98] ss:$36 sps:$4 sm:$0xff]  }
  0x1a   : > { %2017 = vmatpush3.bf16.msra.mxu1 %v2224_v19  ;;  %1978 = vmatprep.subr.bf16.mxu0 %v2225_v20  ;;  %v2269_v58 = vld [vmem:[%s2500_s22 + $0x90] ss:$36 sps:$4 sm:$0xff]   ;;  %v2272_v61 = vld [vmem:[%s2700_s1 + $0x1e0] sm:$0xff]   ;;  %v2275_v0 = vld [vmem:[%s2700_s1 + $0x168] sm:$0xff]  }
  0x1b   : > { %2018 = vmatprep.subr.bf16.mxu1 %v2226_v21  ;;  %v2273_v62 = vld [vmem:[%s2700_s1 + $0x120] sm:$0xff]   ;;  %v2276_v1 = vld [vmem:[%s2700_s1 + $0x1e8] sm:$0xff]   ;;  %v2283_v6 = vld [vmem:[%s2500_s22 + $0xd8] ss:$36 sps:$4 sm:$0xff]  }
  0x1c   : > { %v2274_v63 = vld [vmem:[%s2700_s1 + $0x1a0] sm:$0xff]   ;;  %v2277_v2 = vld [vmem:[%s2700_s1 + $0x128] sm:$0xff]   ;;  %v2285_v8 = vld [vmem:[%s2700_s1 + $0x170] sm:$0xff]  }
  0x1d   : > { %1979 = vmatpush3.bf16.msra.mxu0 %v2227_v22  ;;  %v2278_v3 = vld [vmem:[%s2700_s1 + $0x1a8] sm:$0xff]   ;;  %v2279_v4 = vld [vmem:[%s2500_s22 + $0xdc] ss:$36 sps:$4 sm:$0xff]   ;;  %v2286_v9 = vld [vmem:[%s2700_s1 + $0x1f0] sm:$0xff]  }
  0x1e   : > { %2019 = vmatpush3.bf16.msra.mxu1 %v2228_v23  ;;  %1980 = vmatprep.subr.bf16.mxu0 %v2229_v24  ;;  %v2281_v5 = vld [vmem:[%s2500_s22 + $0xe4] ss:$36 sps:$4 sm:$0xff]   ;;  %v2287_v10 = vld [vmem:[%s2700_s1 + $0x130] sm:$0xff]   ;;  %v2289_v12 = vld [vmem:[%s2700_s1 + $0x178] sm:$0xff]  }
  0x1f   : > { %2020 = vmatprep.subr.bf16.mxu1 %v2230_v25  ;;  %v2284_v7 = vld [vmem:[%s2500_s22 + $0xe0] ss:$36 sps:$4 sm:$0xff]   ;;  %v2288_v11 = vld [vmem:[%s2700_s1 + $0x1b0] sm:$0xff]   ;;  %v2290_v13 = vld [vmem:[%s2700_s1 + $0x1f8] sm:$0xff]  }
  0x20   : > { %v2291_v14 = vld [vmem:[%s2700_s1 + $0x138] sm:$0xff]   ;;  %v2293_v16 = vld [vmem:[%s2500_s22 + $0x10] ss:$36 sps:$4 sm:$0xff]   ;;  %v2299_v20 = vld [vmem:[%s2700_s1 + $0x200] sm:$0xff]  }
  0x21   : > { %1981 = vmatpush3.bf16.msra.mxu0 %v2231_v26  ;;  %v2292_v15 = vld [vmem:[%s2700_s1 + $0x1b8] sm:$0xff]   ;;  %v2300_v21 = vld [vmem:[%s2700_s1 + $0x208] sm:$0xff]   ;;  %v2306_v25 = vld [vmem:[%s2500_s22 + $0x60] ss:$36 sps:$4 sm:$0xff]  }
  0x22   : > { %2021 = vmatpush3.bf16.msra.mxu1 %v2232_v27  ;;  %1982 = vmatprep.subr.bf16.mxu0 %v2233_v28  ;;  %v2295_v17 = vld [vmem:[%s2500_s22 + $0x14] ss:$36 sps:$4 sm:$0xff]   ;;  %v2298_v19 = vld [vmem:[%s2500_s22 + $0x1c] ss:$36 sps:$4 sm:$0xff]   ;;  %v2303_v23 = vld [vmem:[%s2500_s22 + $0x64] ss:$36 sps:$4 sm:$0xff]  }
  0x23   : > { %2022 = vmatprep.subr.bf16.mxu1 %v2234_v29  ;;  %v2296_v18 = vld [vmem:[%s2500_s22 + $0x18] ss:$36 sps:$4 sm:$0xff]   ;;  %v2307_v26 = vld [vmem:[%s2700_s1 + $0x210] sm:$0xff]   ;;  %v2309_v27 = vld [vmem:[%s2500_s22 + $0xa4] ss:$36 sps:$4 sm:$0xff]  }
  0x24   : > { %v2301_v22 = vld [vmem:[%s2500_s22 + $0x5c] ss:$36 sps:$4 sm:$0xff]   ;;  %v2311_v28 = vld [vmem:[%s2500_s22 + $0xac] ss:$36 sps:$4 sm:$0xff]  }
  0x25   : > { %1983 = vmatpush3.bf16.msra.mxu0 %v2235_v30  ;;  %v2305_v24 = vld [vmem:[%s2500_s22 + $0x58] ss:$36 sps:$4 sm:$0xff]   ;;  %v2313_v30 = vld [vmem:[%s2500_s22 + $0xa0] ss:$36 sps:$4 sm:$0xff]   ;;  %v2317_v33 = vld [vmem:[%s2500_s22 + $0xec] ss:$36 sps:$4 sm:$0xff]  }
  0x26   : > { %2023 = vmatpush3.bf16.msra.mxu1 %v2236_v31  ;;  %2048 = vmatprep.subr.bf16.mxu0 %v2243_v36  ;;  %v2308_v29 = vld [vmem:[%s2700_s1 + $0x218] sm:$0xff]   ;;  %v2314_v31 = vld [vmem:[%s2500_s22 + $0xa8] ss:$36 sps:$4 sm:$0xff]  }
  0x27   : > { %2088 = vmatprep.subr.bf16.mxu1 %v2244_v37  ;;  %v2316_v35 = vld [vmem:[%s2700_s1 + $0x228] sm:$0xff]   ;;  %v2323_v37 = vld [vmem:[%s2700_s1 + $0x230] sm:$0xff]  }
  0x28   : > { %1222 = vmatmul.mubr.bf16.vlgmr.msra.gmra.mrb[0].mxu0 %v2237_v32  ;;  %v2315_v32 = vld [vmem:[%s2700_s1 + $0x220] sm:$0xff]   ;;  %v2321_v36 = vld [vmem:[%s2500_s22 + $0xe8] ss:$36 sps:$4 sm:$0xff]  }
  0x29   : > { %1287 = vmatmul.mubr.bf16.vlgmr.msra.gmra.mrb[0].mxu1 %v2240_v34  ;;  %2049 = vmatpush3.bf16.msra.mxu0 %v2245_v38  ;;  %v2319_v34 = vld [vmem:[%s2500_s22 + $0xf4] ss:$36 sps:$4 sm:$0xff]  }
  0x2a   : > { %2089 = vmatpush3.bf16.msra.mxu1 %v2246_v39  ;;  %2050 = vmatprep.subr.bf16.mxu0 %v2247_v40  ;;  %v2322_v38 = vld [vmem:[%s2500_s22 + $0xf0] ss:$36 sps:$4 sm:$0xff]   ;;  %v2325_v39 = vld [vmem:[%s2500_s22 + $0x20] ss:$36 sps:$4 sm:$0xff]  }
  0x2b   : > { %2090 = vmatprep.subr.bf16.mxu1 %v2248_v41  ;;  %1229 = vmatprep.mubr.bf16.mxu0 %v2251_v44  ;;  %v2326_v40 = vld [vmem:[%s2500_s22 + $0xb0] ss:$36 sps:$4 sm:$0xff]   ;;  %v2324_v41 = vld [vmem:[%s2700_s1 + $0x238] sm:$0xff]  }
  0x2c   : > { %1294 = vmatprep.mubr.bf16.mxu1 %v2253_v45 }
  0x2d   : > { %2051 = vmatpush3.bf16.msra.mxu0 %v2249_v42  ;;  %v2327_v42 = vld [vmem:[%s2500_s22 + $0x68] ss:$36 sps:$4 sm:$0xff]  }
  0x2e   : > { %2091 = vmatpush3.bf16.msra.mxu1 %v2250_v43  ;;  %2052 = vmatprep.subr.bf16.mxu0 %v2257_v48  ;;  %v2328_v43 = vld [vmem:[%s2500_s22 + $0xf8] ss:$36 sps:$4 sm:$0xff]   ;;  %s1795_s22 = sshll.u32 %s2710_s6, 2 }
  0x2f   : > { %2092 = vmatprep.subr.bf16.mxu1 %v2258_v49  ;;  %s357_s29 = scalar_lea.vmem %s2703_s4, %s1795_s22  ;;  %s366_s12 = scalar_lea.vmem %s2704_s5, %s1795_s22 }
  0x30   : > { %1230 = vmatmul.mubr.bf16.gmra.mrb[4].mxu0 %v2255_v46 }
  0x31   : > { %1295 = vmatmul.mubr.bf16.gmra.mrb[4].mxu1 %v2256_v47  ;;  %2053 = vmatpush3.bf16.msra.mxu0 %v2259_v50 }
  0x32   : > { %2093 = vmatpush3.bf16.msra.mxu1 %v2260_v51  ;;  %2054 = vmatprep.subr.bf16.mxu0 %v2261_v52 }
  0x33   : > { %2094 = vmatprep.subr.bf16.mxu1 %v2262_v53  ;;  %1237 = vmatprep.mubr.bf16.mxu0 %v2265_v56 }
  0x34   : > { %1302 = vmatprep.mubr.bf16.mxu1 %v2267_v57 }
  0x35   : > { %2055 = vmatpush3.bf16.msra.mxu0 %v2263_v54 }
  0x36   : > { %2095 = vmatpush3.bf16.msra.mxu1 %v2264_v55  ;;  %2056 = vmatprep.subr.bf16.mxu0 %v2271_v60 }
  0x37   : > { %2096 = vmatprep.subr.bf16.mxu1 %v2272_v61 }
  0x38   : > { %1238 = vmatmul.mubr.bf16.gmra.mrb[8].mxu0 %v2269_v58 }
  0x39   : > { %1303 = vmatmul.mubr.bf16.gmra.mrb[8].mxu1 %v2270_v59  ;;  %2057 = vmatpush3.bf16.msra.mxu0 %v2273_v62 }
  0x3a   : > { %2097 = vmatpush3.bf16.msra.mxu1 %v2274_v63  ;;  %2058 = vmatprep.subr.bf16.mxu0 %v2275_v0 }
  0x3b   : > { %2098 = vmatprep.subr.bf16.mxu1 %v2276_v1  ;;  %1245 = vmatprep.mubr.bf16.mxu0 %v2279_v4 }
  0x3c   : > { %1310 = vmatprep.mubr.bf16.mxu1 %v2281_v5 }
  0x3d   : > { %2059 = vmatpush3.bf16.msra.mxu0 %v2277_v2 }
  0x3e   : > { %2099 = vmatpush3.bf16.msra.mxu1 %v2278_v3  ;;  %2060 = vmatprep.subr.bf16.mxu0 %v2285_v8 }
  0x3f   : > { %2100 = vmatprep.subr.bf16.mxu1 %v2286_v9 }
  0x40   : > { %1246 = vmatmul.mubr.bf16.gmra.mrb[12].mxu0 %v2283_v6 }
  0x41   : > { %1311 = vmatmul.mubr.bf16.gmra.mrb[12].mxu1 %v2284_v7  ;;  %2061 = vmatpush3.bf16.msra.mxu0 %v2287_v10 }
  0x42   : > { %2101 = vmatpush3.bf16.msra.mxu1 %v2288_v11  ;;  %2062 = vmatprep.subr.bf16.mxu0 %v2289_v12 }
  0x43   : > { %2102 = vmatprep.subr.bf16.mxu1 %v2290_v13  ;;  %1351 = vmatprep.mubr.bf16.mxu0 %v2295_v17 }
  0x44   : > { %1416 = vmatprep.mubr.bf16.mxu1 %v2298_v19 }
  0x45   : > { %2063 = vmatpush3.bf16.msra.mxu0 %v2291_v14 }
  0x46   : > { %2103 = vmatpush3.bf16.msra.mxu1 %v2292_v15  ;;  %2140 = vmatprep.subr.bf16.mxu0 %v2299_v20 }
  0x47   : > { %2164 = vmatprep.subr.bf16.mxu1 %v2299_v20 }
  0x48   : > { %1352 = vmatmul.mubr.bf16.vlgmr.msra.gmra.mrb[16].mxu0 %v2293_v16 }
  0x49   : > { %1417 = vmatmul.mubr.bf16.vlgmr.msra.gmra.mrb[16].mxu1 %v2296_v18  ;;  %2141 = vmatpush3.bf16.msra.mxu0 %v2299_v20 }
  0x4a   : > { %2172 = vmatpush3.bf16.msra.mxu1 %v2299_v20  ;;  %2142 = vmatprep.subr.bf16.mxu0 %v2300_v21 }
  0x4b   : > { %2165 = vmatprep.subr.bf16.mxu1 %v2300_v21  ;;  %1359 = vmatprep.mubr.bf16.mxu0 %v2301_v22 }
  0x4c   : > { %1424 = vmatprep.mubr.bf16.mxu1 %v2303_v23 }
  0x4d   : > { %2143 = vmatpush3.bf16.msra.mxu0 %v2300_v21 }
  0x4e   : > { %2173 = vmatpush3.bf16.msra.mxu1 %v2300_v21  ;;  %2144 = vmatprep.subr.bf16.mxu0 %v2307_v26 }
  0x4f   : > { %2166 = vmatprep.subr.bf16.mxu1 %v2307_v26 }
  0x50   : > { %1360 = vmatmul.mubr.bf16.gmra.mrb[20].mxu0 %v2305_v24 }
  0x51   : > { %1425 = vmatmul.mubr.bf16.gmra.mrb[20].mxu1 %v2306_v25  ;;  %1367 = vmatprep.mubr.bf16.mxu0 %v2309_v27 }
  0x52   : > { %2145 = vmatpush3.bf16.msra.mxu0 %v2307_v26  ;;  %1432 = vmatprep.mubr.bf16.mxu1 %v2311_v28 }
  0x53   : > { %2174 = vmatpush3.bf16.msra.mxu1 %v2307_v26  ;;  %2146 = vmatprep.subr.bf16.mxu0 %v2308_v29 }
  0x54   : > { %2167 = vmatprep.subr.bf16.mxu1 %v2308_v29 }
  0x56   : > { %2147 = vmatpush3.bf16.msra.mxu0 %v2308_v29 }
  0x57   : > { %2175 = vmatpush3.bf16.msra.mxu1 %v2308_v29  ;;  %2148 = vmatprep.subr.bf16.mxu0 %v2315_v32 }
  0x58   : > { %1368 = vmatmul.mubr.bf16.gmra.mrb[24].mxu0 %v2313_v30  ;;  %2168 = vmatprep.subr.bf16.mxu1 %v2315_v32 }
  0x59   : > { %1433 = vmatmul.mubr.bf16.gmra.mrb[24].mxu1 %v2314_v31  ;;  %1375 = vmatprep.mubr.bf16.mxu0 %v2317_v33 }
  0x5a   : > { %2149 = vmatpush3.bf16.msra.mxu0 %v2315_v32  ;;  %1440 = vmatprep.mubr.bf16.mxu1 %v2319_v34 }
  0x5b   : > { %2176 = vmatpush3.bf16.msra.mxu1 %v2315_v32  ;;  %2150 = vmatprep.subr.bf16.mxu0 %v2316_v35 }
  0x5c   : > { %2169 = vmatprep.subr.bf16.mxu1 %v2316_v35 }
  0x5e   : > { %2151 = vmatpush3.bf16.msra.mxu0 %v2316_v35 }
  0x5f   : > { %2177 = vmatpush3.bf16.msra.mxu1 %v2316_v35  ;;  %2152 = vmatprep.subr.bf16.mxu0 %v2323_v37 }
  0x60   : > { %1376 = vmatmul.mubr.bf16.gmra.mrb[28].mxu0 %v2321_v36  ;;  %2170 = vmatprep.subr.bf16.mxu1 %v2323_v37 }
  0x61   : > { %1441 = vmatmul.mubr.bf16.gmra.mrb[28].mxu1 %v2322_v38  ;;  %2156 = vmatprep.mubr.bf16.mxu0 %v2325_v39 }
  0x62   : > { %2153 = vmatpush3.bf16.msra.mxu0 %v2323_v37  ;;  %2160 = vmatprep.mubr.bf16.mxu1 %v2326_v40 }
  0x63   : > { %2178 = vmatpush3.bf16.msra.mxu1 %v2323_v37  ;;  %2154 = vmatprep.subr.bf16.mxu0 %v2324_v41 }
  0x64   : > { %2171 = vmatprep.subr.bf16.mxu1 %v2324_v41 }
  0x66   : > { %2155 = vmatpush3.bf16.msra.mxu0 %v2324_v41 }
  0x67   : > { %2179 = vmatpush3.bf16.msra.mxu1 %v2324_v41 }
  0x69   : > { %2157 = vmatmul.mubr.bf16.vlgmr.msra.gmra.mrb[32].mxu0 %v2327_v42 }
  0x6a   : > { %2161 = vmatmul.mubr.bf16.vlgmr.msra.gmra.mrb[32].mxu1 %v2328_v43 }
  0xfb   : > { %v1984_v44 = vpop.f32.mrb[0].mxu0 }
  0xfc   : > { %v2024_v45 = vpop.f32.mrb[0].mxu1  ;;  %v1985_v46 = vpop.f32.mrb[1].mxu0 }
  0xfd   : > { %v1986_v47 = vadd.f32 %v1985_v46, %v1984_v44  ;;  %v2025_v48 = vpop.f32.mrb[1].mxu1  ;;  %v1987_v49 = vpop.f32.mrb[2].mxu0 }
  0xfe   : > { %v2026_v50 = vadd.f32 %v2025_v48, %v2024_v45  ;;  %v2027_v51 = vpop.f32.mrb[2].mxu1  ;;  %v1988_v52 = vpop.f32.mrb[3].mxu0 }
  0xff   : > { %v1989_v53 = vadd.f32 %v1988_v52, %v1987_v49  ;;  %v2028_v54 = vpop.f32.mrb[3].mxu1 }
 0x100   : > { %v1289_v55 = vadd.f32 %v2026_v50, %v1986_v47  ;;  %v2029_v56 = vadd.f32 %v2028_v54, %v2027_v51 }
 0x102   : > { %v1292_v57 = vadd.f32 %v2029_v56, %v1989_v53 }
 0x103   : > { %v1990_v58 = vpop.f32.mrb[4].mxu0 }
 0x104   : > { %v2030_v59 = vpop.f32.mrb[4].mxu1  ;;  %v1991_v60 = vpop.f32.mrb[5].mxu0 }
 0x105   : > { %v1992_v61 = vadd.f32 %v1991_v60, %v1990_v58  ;;  %v2031_v62 = vpop.f32.mrb[5].mxu1  ;;  %v1993_v63 = vpop.f32.mrb[6].mxu0 }
 0x106   : > { %v2032_v0 = vadd.f32 %v2031_v62, %v2030_v59  ;;  %v2033_v1 = vpop.f32.mrb[6].mxu1  ;;  %v1994_v2 = vpop.f32.mrb[7].mxu0 }
 0x107   : > { %v1995_v3 = vadd.f32 %v1994_v2, %v1993_v63  ;;  %v2034_v4 = vpop.f32.mrb[7].mxu1 }
 0x108   : > { %v1297_v5 = vadd.f32 %v2032_v0, %v1992_v61  ;;  %v2035_v6 = vadd.f32 %v2034_v4, %v2033_v1 }
 0x10a   : > { %v1300_v7 = vadd.f32 %v2035_v6, %v1995_v3 }
 0x10b   : > { %v1996_v8 = vpop.f32.mrb[8].mxu0 }
 0x10c   : > { %v2036_v9 = vpop.f32.mrb[8].mxu1  ;;  %v1997_v10 = vpop.f32.mrb[9].mxu0 }
 0x10d   : > { %v1998_v11 = vadd.f32 %v1997_v10, %v1996_v8  ;;  %v2037_v12 = vpop.f32.mrb[9].mxu1  ;;  %v1999_v13 = vpop.f32.mrb[10].mxu0 }
 0x10e   : > { %v2038_v14 = vadd.f32 %v2037_v12, %v2036_v9  ;;  %v2039_v15 = vpop.f32.mrb[10].mxu1  ;;  %v2000_v16 = vpop.f32.mrb[11].mxu0 }
 0x10f   : > { %v2001_v17 = vadd.f32 %v2000_v16, %v1999_v13  ;;  %v2040_v18 = vpop.f32.mrb[11].mxu1 }
 0x110   : > { %v1305_v19 = vadd.f32 %v2038_v14, %v1998_v11  ;;  %v2041_v20 = vadd.f32 %v2040_v18, %v2039_v15 }
 0x112   : > { %v1308_v21 = vadd.f32 %v2041_v20, %v2001_v17 }
 0x113   : > { %v2002_v22 = vpop.f32.mrb[12].mxu0 }
 0x114   : > { %v2042_v23 = vpop.f32.mrb[12].mxu1  ;;  %v2003_v24 = vpop.f32.mrb[13].mxu0 }
 0x115   : > { %v2043_v25 = vpop.f32.mrb[13].mxu1  ;;  %v2004_v26 = vadd.f32 %v2003_v24, %v2002_v22  ;;  %v2005_v28 = vpop.f32.mrb[14].mxu0 }
 0x116   : > { %v2044_v27 = vadd.f32 %v2043_v25, %v2042_v23  ;;  %v2045_v29 = vpop.f32.mrb[14].mxu1  ;;  %v2006_v30 = vpop.f32.mrb[15].mxu0 }
 0x117   : > { %v2046_v31 = vpop.f32.mrb[15].mxu1  ;;  %v2007_v33 = vadd.f32 %v2006_v30, %v2005_v28 }
 0x118   : > { %v1313_v32 = vadd.f32 %v2044_v27, %v2004_v26  ;;  %v2047_v34 = vadd.f32 %v2046_v31, %v2045_v29 }
 0x11a   : > { %v2664_v35 = vadd.f32 %v2047_v34, %v2007_v33 }
 0x11b   : > { %v2064_v36 = vpop.f32.mrb[16].mxu0 }
 0x11c   : > { %v2065_v37 = vpop.f32.mrb[17].mxu0  ;;  %v2104_v38 = vpop.f32.mrb[16].mxu1 }
 0x11d   : > { %v2066_v39 = vadd.f32 %v2065_v37, %v2064_v36  ;;  %v2067_v40 = vpop.f32.mrb[18].mxu0  ;;  %v2105_v41 = vpop.f32.mrb[17].mxu1  ;;  %v1962_v37 = vld [vmem:[%s357_s29 + $0x8] sm:$0xff]  }
 0x11e   : > { %v2068_v42 = vpop.f32.mrb[19].mxu0  ;;  %v2106_v44 = vadd.f32 %v2105_v41, %v2104_v38  ;;  %v2107_v45 = vpop.f32.mrb[18].mxu1  ;;  %v1964_v38 = vld [vmem:[%s357_s29 + $0x18] sm:$0xff]  }
 0x11f   : > { %v1354_v43 = vadd.f32 %v2066_v39, %v1289_v55  ;;  %v2069_v46 = vadd.f32 %v2068_v42, %v2067_v40  ;;  %v2108_v47 = vpop.f32.mrb[19].mxu1  ;;  %v1927_v39 = vld [vmem:[%s357_s29] sm:$0xff]   ;;  %v1963_v40 = vld [vmem:[%s357_s29 + $0x10] sm:$0xff]  }
 0x120   : > { %v2109_v49 = vadd.f32 %v2108_v47, %v2107_v45 }
 0x121   : > { %v1357_v48 = vadd.f32 %v2069_v46, %v1292_v57  ;;  %v2666_v50 = vadd.f32 %v2106_v44, %v1354_v43  ;;  %v1932_v43 = vunpack.c.l.bf16 %v1962_v37  ;;  %v1940_v44 = vunpack.c.l.bf16 %v1964_v38 }
 0x123   : > { %v2070_v51 = vpop.f32.mrb[20].mxu0  ;;  %v2668_v52 = vadd.f32 %v2109_v49, %v1357_v48  ;;  %v1928_v48 = vunpack.c.l.bf16 %v1927_v39  ;;  %v1936_v49 = vunpack.c.l.bf16 %v1963_v40 }
 0x124   : > { %v2071_v53 = vpop.f32.mrb[21].mxu0  ;;  %v2110_v54 = vpop.f32.mrb[20].mxu1 }
 0x125   : > { %v2072_v56 = vadd.f32 %v2071_v53, %v2070_v51  ;;  %v2073_v58 = vpop.f32.mrb[22].mxu0  ;;  %v2111_v59 = vpop.f32.mrb[21].mxu1  ;;  %v1907_v51 = vld [vmem:[%s2702_s3] ss:$0 sm:$0xff] }
 0x126   : > { %v2074_v60 = vpop.f32.mrb[23].mxu0  ;;  %v2112_v62 = vadd.f32 %v2111_v59, %v2110_v54  ;;  %v2113_v55 = vpop.f32.mrb[22].mxu1  ;;  %v1941_v59 = vunpack.c.h.bf16 %v1964_v38 }
 0x127   : > { %v1362_v61 = vadd.f32 %v2072_v56, %v1297_v5  ;;  %v2075_v63 = vadd.f32 %v2074_v60, %v2073_v58  ;;  %v2114_v0 = vpop.f32.mrb[23].mxu1  ;;  %v1929_v60 = vunpack.c.h.bf16 %v1927_v39 }
 0x128   : > { %v2115_v2 = vadd.f32 %v2114_v0, %v2113_v55 }
 0x129   : > { %v1365_v1 = vadd.f32 %v2075_v63, %v1300_v7  ;;  %v1427_v57 = vadd.f32 %v2112_v62, %v1362_v61 }
 0x12b   : > { %v2076_v3 = vpop.f32.mrb[24].mxu0  ;;  %v1430_v4 = vadd.f32 %v2115_v2, %v1365_v1  ;;  %v1937_v1 = vunpack.c.h.bf16 %v1963_v40 }
 0x12c   : > { %v2077_v6 = vpop.f32.mrb[25].mxu0  ;;  %v2116_v8 = vpop.f32.mrb[24].mxu1 }
 0x12d   : > { %v2078_v9 = vadd.f32 %v2077_v6, %v2076_v3  ;;  %v2079_v10 = vpop.f32.mrb[26].mxu0  ;;  %v2117_v11 = vpop.f32.mrb[25].mxu1 }
 0x12e   : > { %v2080_v12 = vpop.f32.mrb[27].mxu0  ;;  %v2118_v14 = vadd.f32 %v2117_v11, %v2116_v8  ;;  %v2119_v15 = vpop.f32.mrb[26].mxu1 }
 0x12f   : > { %v1370_v13 = vadd.f32 %v2078_v9, %v1305_v19  ;;  %v2081_v5 = vadd.f32 %v2080_v12, %v2079_v10  ;;  %v2120_v16 = vpop.f32.mrb[27].mxu1 }
 0x130   : > { %v2121_v18 = vadd.f32 %v2120_v16, %v2119_v15 }
 0x131   : > { %v1373_v17 = vadd.f32 %v2081_v5, %v1308_v21  ;;  %v1435_v7 = vadd.f32 %v2118_v14, %v1370_v13 }
 0x133   : > { %v2082_v20 = vpop.f32.mrb[28].mxu0  ;;  %v1438_v22 = vadd.f32 %v2121_v18, %v1373_v17 }
 0x134   : > { %v2083_v23 = vpop.f32.mrb[29].mxu0  ;;  %v2122_v24 = vpop.f32.mrb[28].mxu1 }
 0x135   : > { %v2084_v25 = vadd.f32 %v2083_v23, %v2082_v20  ;;  %v2085_v26 = vpop.f32.mrb[30].mxu0  ;;  %v2123_v27 = vpop.f32.mrb[29].mxu1 }
 0x136   : > { %v2086_v28 = vpop.f32.mrb[31].mxu0  ;;  %v2124_v30 = vadd.f32 %v2123_v27, %v2122_v24  ;;  %v2125_v19 = vpop.f32.mrb[30].mxu1 }
 0x137   : > { %v1378_v29 = vadd.f32 %v2084_v25, %v1313_v32  ;;  %v2087_v31 = vadd.f32 %v2086_v28, %v2085_v26  ;;  %v2126_v21 = vpop.f32.mrb[31].mxu1  ;;  %v1906_v32 = vld [vmem:[%s2701_s2] ss:$0 sm:$0xff] }
 0x138   : > { %v2127_v34 = vadd.f32 %v2126_v21, %v2125_v19 }
 0x139   : > { %v1381_v33 = vadd.f32 %v2087_v31, %v2664_v35  ;;  %v1443_v36 = vadd.f32 %v2124_v30, %v1378_v29  ;;  %v1933_v35 = vunpack.c.h.bf16 %v1962_v37 }
 0x13b   : > { %v1446_v41 = vadd.f32 %v2127_v34, %v1381_v33 }
 0x13c   : > { %v2158_v42 = vpop.f32.mrb[32].mxu0 }
 0x13d   : > { %v1492_v45 = vadd.f32 %v2158_v42, %v1427_v57  ;;  %v2162_v46 = vpop.f32.mrb[32].mxu1  ;;  %v1483_v47 = vpop.f32.mrb[33].mxu0 }
 0x13e   : > { %v1508_v53 = vadd.f32 %v2162_v46, %v1443_v36  ;;  %v1484_v54 = vadd.f32 %v1483_v47, %v2666_v50  ;;  %v1499_v56 = vpop.f32.mrb[33].mxu1  ;;  %v2159_v58 = vpop.f32.mrb[34].mxu0 }
 0x13f   : > { %v1550_v61 = vmul.f32 %v1906_v32, %v1492_v45  ;;  %v1500_v62 = vadd.f32 %v1499_v56, %v1435_v7  ;;  %v1495_v55 = vadd.f32 %v2159_v58, %v1430_v4  ;;  %v2163_v63 = vpop.f32.mrb[34].mxu1  ;;  %v1486_v0 = vpop.f32.mrb[35].mxu0 }
 0x140   : > { %v1554_v2 = vmul.f32 %v1906_v32, %v1508_v53  ;;  %v1548_v57 = vmul.f32 %v1906_v32, %v1484_v54  ;;  %v1511_v3 = vadd.f32 %v2163_v63, %v1446_v41  ;;  %v1487_v6 = vadd.f32 %v1486_v0, %v2668_v52  ;;  %v1502_v8 = vpop.f32.mrb[35].mxu1 }
 0x141   : > { %v1565_v9 = vadd.f32 %v1907_v51, %v1550_v61  ;;  %v1552_v10 = vmul.f32 %v1906_v32, %v1500_v62  ;;  %v1551_v11 = vmul.f32 %v1906_v32, %v1495_v55  ;;  %v1503_v50 = vadd.f32 %v1502_v8, %v1438_v22 }
 0x142   : > { %v1569_v12 = vadd.f32 %v1907_v51, %v1554_v2  ;;  %v1563_v13 = vadd.f32 %v1907_v51, %v1548_v57  ;;  %v1555_v14 = vmul.f32 %v1906_v32, %v1511_v3  ;;  %v1549_v15 = vmul.f32 %v1906_v32, %v1487_v6 }
 0x143   : > { %v1589_v5 = vadd.f32 %v1932_v43, %v1565_v9  ;;  %v1567_v16 = vadd.f32 %v1907_v51, %v1552_v10  ;;  %v1566_v4 = vadd.f32 %v1907_v51, %v1551_v11  ;;  %v1553_v17 = vmul.f32 %v1906_v32, %v1503_v50 }
 0x144   : > { %v1593_v18 = vadd.f32 %v1940_v44, %v1569_v12  ;;  %v1587_v7 = vadd.f32 %v1928_v48, %v1563_v13  ;;  %v1570_v20 = vadd.f32 %v1907_v51, %v1555_v14  ;;  %v1564_v23 = vadd.f32 %v1907_v51, %v1549_v15 }
 0x145   : > { %v1591_v24 = vadd.f32 %v1936_v49, %v1567_v16  ;;  %v1590_v52 = vadd.f32 %v1933_v35, %v1566_v4  ;;  %v1568_v25 = vadd.f32 %v1907_v51, %v1553_v17  ;;  %v1597_v28 = vmax.f32 %v1589_v5, 0.0 }
 0x146   : > { %v1594_v26 = vadd.f32 %v1941_v59, %v1570_v20  ;;  %v1588_v27 = vadd.f32 %v1929_v60, %v1564_v23  ;;  %v1601_v30 = vmax.f32 %v1593_v18, 0.0  ;;  %v1595_v19 = vmax.f32 %v1587_v7, 0.0 }
 0x147   : > { %v1598_v22 = vmax.f32 %v1590_v52, 0.0  ;;  %v1592_v29 = vadd.f32 %v1937_v1, %v1568_v25  ;;  %v1599_v33 = vmax.f32 %v1591_v24, 0.0 }
 0x148   : > { %v1602_v31 = vmax.f32 %v1594_v26, 0.0  ;;  %v1596_v21 = vmax.f32 %v1588_v27, 0.0 }
 0x149   : > { %v1950_v34 = vpack.c.bf16 %v1598_v22, %v1597_v28  ;;  %v1600_v36 = vmax.f32 %v1592_v29, 0.0 }
 0x14a   : > { %v1960_v37 = vpack.c.bf16 %v1602_v31, %v1601_v30  ;;  %v1945_v38 = vpack.c.bf16 %v1596_v21, %v1595_v19 }
 0x14b   : > { %1965 = vst [vmem:[%s366_s12 + $0x8] sm:$0xff] %v1950_v34   ;;  %v1955_v39 = vpack.c.bf16 %v1600_v36, %v1599_v33 }
 0x14c   : > { %1967 = vst [vmem:[%s366_s12 + $0x18] sm:$0xff] %v1960_v37   ;;  %1946 = vst [vmem:[%s366_s12] sm:$0xff] %v1945_v38  }
 0x14d   : > { %1966 = vst [vmem:[%s366_s12 + $0x10] sm:$0xff] %v1955_v39  }
 0x14e PF: > { %s15_s20 = sadd.s32 1, %s2351_s20   ;;  %s2705_s18 = smov %s2347_s19 }
 0x14f   : > { %p12_p5 = scmp.ge.s32.totalorder %s15_s20, 4   ;;  %s2706_s19 = smov %s2708_s21 }
 0x151   :  { %14 = sbr.rel (!%p12_p5) target bundleno = 2 (0x2), region = 90 }

// kernel: _lambda_.61
= control target key start
LH: loop header
LB: loop body
LE: loop exit
PB: predicated region body
PF: predicated region fallthrough
CT: control target
= control target key end

     0   :  { %s1901_s15 = smov 0   ;;  %s1903_s16 = smov 0   ;;  %s2163_s0 = inlined_call_operand.vmem [shape: bf16[128,896], index: 0, kind: input, shape index: {}]   ;;  %s2164_s1 = inlined_call_operand.vmem [shape: bf16[896,128], index: 1, kind: input, shape index: {}]   ;;  %s2165_s2 = inlined_call_operand.vmem [shape: f32[1,128], index: 2, kind: input, shape index: {}]   ;;  %s2166_s3 = inlined_call_operand.vmem [shape: f32[1,128], index: 3, kind: input, shape index: {}]   ;;  %s2167_s4 = inlined_call_operand.vmem [shape: bf16[128,128], index: 4, kind: output, shape index: {}]  }
   0x1   :  { %s1905_s17 = smov 0  }
   0x2 LB: > { %s33_s18 = sadd.s32 1, %s1870_s16  ;;  %p1443_p0 = scmp.ge.s32.totalorder %s1874_s17, 1  ;;  %s1874_s17 = sphi %s1905_s17, %s14_s17   ;;  %s1870_s16 = sphi %s1903_s16, %s2169_s16   ;;  %s1866_s15 = sphi %s1901_s15, %s2168_s15  }
   0x3   : > { %p35_p1 = scmp.ge.s32.totalorder %s33_s18, 2  ;;  %p224_p2 = scmp.lt.s32.totalorder %s1874_s17, 3 }
   0x5   : > { %s2171_s18 = smov (%p35_p1, %s33_s18), 0  ;;  %p225_p3 = pnand %p1443_p0, %p224_p2 }
   0x6   : > { %v1756_v0 = vld [vmem:[%s2164_s1 + $0x40] sm:$0xff] (!%p225_p3)   ;;  %v1760_v4 = vld [vmem:[%s2164_s1 + $0x48] sm:$0xff] (!%p225_p3)   ;;  %v1764_v8 = vld [vmem:[%s2164_s1 + $0x50] sm:$0xff] (!%p225_p3)   ;;  %s1444_s27 = sshll.u32 (!%p225_p3), %s1866_s15, 3 }
   0x7   : > { %228 = sbr.rel (%p225_p3) target bundleno = 324 (0x144), region = 36  ;;  %v1757_v1 = vld [vmem:[%s2164_s1 + $0xc0] sm:$0xff] (!%p225_p3)   ;;  %1575 = vmatprep.subr.bf16.mxu0 (!%p225_p3), %v1756_v0  ;;  %v1761_v5 = vld [vmem:[%s2164_s1 + $0xc8] sm:$0xff] (!%p225_p3)   ;;  %v1765_v9 = vld [vmem:[%s2164_s1 + $0xd0] sm:$0xff] (!%p225_p3)   ;;  %p274_p4 = scmp.lt.s32.totalorder (!%p225_p3), %s1444_s27, 15 }
   0x8   : > { %v1758_v2 = vld [vmem:[%s2164_s1] sm:$0xff] (!%p225_p3)   ;;  %1615 = vmatprep.subr.bf16.mxu1 (!%p225_p3), %v1757_v1  ;;  %v1762_v6 = vld [vmem:[%s2164_s1 + $0x8] sm:$0xff] (!%p225_p3)   ;;  %v1766_v10 = vld [vmem:[%s2164_s1 + $0x10] sm:$0xff] (!%p225_p3)  }
   0x9   : > { %v1759_v3 = vld [vmem:[%s2164_s1 + $0x80] sm:$0xff] (!%p225_p3)   ;;  %1576 = vmatpush3.bf16.msra.mxu0 (!%p225_p3), %v1758_v2  ;;  %v1763_v7 = vld [vmem:[%s2164_s1 + $0x88] sm:$0xff] (!%p225_p3)   ;;  %v1767_v11 = vld [vmem:[%s2164_s1 + $0x90] sm:$0xff] (!%p225_p3)  }
   0xa   : > { %1616 = vmatpush3.bf16.msra.mxu1 (!%p225_p3), %v1759_v3  ;;  %1577 = vmatprep.subr.bf16.mxu0 (!%p225_p3), %v1760_v4  ;;  %v1768_v12 = vld [vmem:[%s2164_s1 + $0x58] sm:$0xff] (!%p225_p3)   ;;  %v1772_v16 = vld [vmem:[%s2164_s1 + $0x60] sm:$0xff] (!%p225_p3)   ;;  %v1776_v20 = vld [vmem:[%s2164_s1 + $0x68] sm:$0xff] (!%p225_p3)  }
   0xb   : > { %1617 = vmatprep.subr.bf16.mxu1 (!%p225_p3), %v1761_v5  ;;  %v1769_v13 = vld [vmem:[%s2164_s1 + $0xd8] sm:$0xff] (!%p225_p3)   ;;  %v1773_v17 = vld [vmem:[%s2164_s1 + $0xe0] sm:$0xff] (!%p225_p3)   ;;  %v1777_v21 = vld [vmem:[%s2164_s1 + $0xe8] sm:$0xff] (!%p225_p3)  }
   0xc   : > { %v1770_v14 = vld [vmem:[%s2164_s1 + $0x18] sm:$0xff] (!%p225_p3)   ;;  %v1774_v18 = vld [vmem:[%s2164_s1 + $0x20] sm:$0xff] (!%p225_p3)   ;;  %v1778_v22 = vld [vmem:[%s2164_s1 + $0x28] sm:$0xff] (!%p225_p3)  }
   0xd   : > { %1578 = vmatpush3.bf16.msra.mxu0 (!%p225_p3), %v1762_v6  ;;  %v1771_v15 = vld [vmem:[%s2164_s1 + $0x98] sm:$0xff] (!%p225_p3)   ;;  %v1775_v19 = vld [vmem:[%s2164_s1 + $0xa0] sm:$0xff] (!%p225_p3)   ;;  %v1779_v23 = vld [vmem:[%s2164_s1 + $0xa8] sm:$0xff] (!%p225_p3)  }
   0xe   : > { %1618 = vmatpush3.bf16.msra.mxu1 %v1763_v7  ;;  %1579 = vmatprep.subr.bf16.mxu0 %v1764_v8  ;;  %s2173_s27 = smov (!%p274_p4, %s1444_s27), 15  ;;  %v1780_v24 = vld [vmem:[%s2164_s1 + $0x70] sm:$0xff]   ;;  %v1784_v28 = vld [vmem:[%s2164_s1 + $0x78] sm:$0xff]   ;;  %v1794_v36 = vld [vmem:[%s2164_s1 + $0x140] sm:$0xff]  }
   0xf   : > { %1619 = vmatprep.subr.bf16.mxu1 %v1765_v9  ;;  %v1781_v25 = vld [vmem:[%s2164_s1 + $0xf0] sm:$0xff]   ;;  %s1731_s28 = smul.u32 28, %s2173_s27  ;;  %v1785_v29 = vld [vmem:[%s2164_s1 + $0xf8] sm:$0xff]   ;;  %v1795_v37 = vld [vmem:[%s2164_s1 + $0x100] sm:$0xff]   ;;  %s1447_s5 = sshll.u32 %s2173_s27, 2 }
  0x10   : > { %v1782_v26 = vld [vmem:[%s2164_s1 + $0x30] sm:$0xff]   ;;  %v1786_v30 = vld [vmem:[%s2164_s1 + $0x38] sm:$0xff]   ;;  %v1796_v38 = vld [vmem:[%s2164_s1 + $0x148] sm:$0xff]   ;;  %s2144_s8 = scalar_lea.vmem %s2167_s4, %s1447_s5 }
  0x11   : > { %1580 = vmatpush3.bf16.msra.mxu0 %v1766_v10  ;;  %v1783_v27 = vld [vmem:[%s2164_s1 + $0xb0] sm:$0xff]   ;;  %s2018_s12 = scalar_lea.vmem %s2163_s0, %s1731_s28  ;;  %v1787_v31 = vld [vmem:[%s2164_s1 + $0xb8] sm:$0xff]   ;;  %v1797_v39 = vld [vmem:[%s2164_s1 + $0x180] sm:$0xff]  }
  0x12   : > { %1620 = vmatpush3.bf16.msra.mxu1 %v1767_v11  ;;  %1581 = vmatprep.subr.bf16.mxu0 %v1768_v12  ;;  %v1788_v32 = vld [vmem:[%s2018_s12] ss:$28 sps:$4 sm:$0xff]   ;;  %v1791_v34 = vld [vmem:[%s2018_s12 + $0x8] ss:$28 sps:$4 sm:$0xff]   ;;  %v1803_v43 = vld [vmem:[%s2018_s12 + $0x38] ss:$28 sps:$4 sm:$0xff]  }
  0x13   : > { %1621 = vmatprep.subr.bf16.mxu1 %v1769_v13  ;;  %v1790_v33 = vld [vmem:[%s2018_s12 + $0x4] ss:$28 sps:$4 sm:$0xff]   ;;  %v1793_v35 = vld [vmem:[%s2018_s12 + $0xc] ss:$28 sps:$4 sm:$0xff]   ;;  %v1799_v41 = vld [vmem:[%s2018_s12 + $0x3c] ss:$28 sps:$4 sm:$0xff]  }
  0x14   : > { %985 = vmatprep.mubr.bf16.mxu0 %v1790_v33  ;;  %1050 = vmatprep.mubr.bf16.mxu1 %v1793_v35  ;;  %v1798_v40 = vld [vmem:[%s2164_s1 + $0x108] sm:$0xff]   ;;  %v1801_v42 = vld [vmem:[%s2018_s12 + $0x44] ss:$28 sps:$4 sm:$0xff]   ;;  %v1805_v45 = vld [vmem:[%s2164_s1 + $0x150] sm:$0xff]  }
  0x15   : > { %1582 = vmatpush3.bf16.msra.mxu0 %v1770_v14  ;;  %v1804_v44 = vld [vmem:[%s2018_s12 + $0x40] ss:$28 sps:$4 sm:$0xff]   ;;  %v1806_v46 = vld [vmem:[%s2164_s1 + $0x188] sm:$0xff]   ;;  %v1807_v47 = vld [vmem:[%s2164_s1 + $0x110] sm:$0xff]  }
  0x16   : > { %1622 = vmatpush3.bf16.msra.mxu1 %v1771_v15  ;;  %1583 = vmatprep.subr.bf16.mxu0 %v1772_v16  ;;  %v1808_v48 = vld [vmem:[%s2164_s1 + $0x158] sm:$0xff]   ;;  %v1809_v49 = vld [vmem:[%s2164_s1 + $0x190] sm:$0xff]   ;;  %v1817_v55 = vld [vmem:[%s2164_s1 + $0x160] sm:$0xff]  }
  0x17   : > { %1623 = vmatprep.subr.bf16.mxu1 %v1773_v17  ;;  %v1810_v50 = vld [vmem:[%s2164_s1 + $0x118] sm:$0xff]   ;;  %v1811_v51 = vld [vmem:[%s2018_s12 + $0x74] ss:$28 sps:$4 sm:$0xff]   ;;  %v1819_v57 = vld [vmem:[%s2164_s1 + $0x120] sm:$0xff]  }
  0x18   : > { %v1813_v52 = vld [vmem:[%s2018_s12 + $0x7c] ss:$28 sps:$4 sm:$0xff]   ;;  %v1815_v53 = vld [vmem:[%s2018_s12 + $0x70] ss:$28 sps:$4 sm:$0xff]   ;;  %v1821_v59 = vld [vmem:[%s2164_s1 + $0x1a0] sm:$0xff]  }
  0x19   : > { %1584 = vmatpush3.bf16.msra.mxu0 %v1774_v18  ;;  %v1816_v54 = vld [vmem:[%s2018_s12 + $0x78] ss:$28 sps:$4 sm:$0xff]   ;;  %v1820_v58 = vld [vmem:[%s2164_s1 + $0x168] sm:$0xff]   ;;  %v1844_v15 = vld [vmem:[%s2018_s12 + $0x84] ss:$28 sps:$4 sm:$0xff]  }
  0x1a   : > { %1624 = vmatpush3.bf16.msra.mxu1 %v1775_v19  ;;  %1585 = vmatprep.subr.bf16.mxu0 %v1776_v20  ;;  %v1818_v56 = vld [vmem:[%s2164_s1 + $0x198] sm:$0xff]   ;;  %v1822_v60 = vld [vmem:[%s2164_s1 + $0x128] sm:$0xff]   ;;  %v1825_v62 = vld [vmem:[%s2018_s12 + $0xb4] ss:$28 sps:$4 sm:$0xff]  }
  0x1b   : > { %1625 = vmatprep.subr.bf16.mxu1 %v1777_v21  ;;  %v1823_v61 = vld [vmem:[%s2018_s12 + $0xac] ss:$28 sps:$4 sm:$0xff]   ;;  %v1829_v1 = vld [vmem:[%s2164_s1 + $0x170] sm:$0xff]   ;;  %v1832_v4 = vld [vmem:[%s2164_s1 + $0x178] sm:$0xff]  }
  0x1c   : > { %v1827_v63 = vld [vmem:[%s2018_s12 + $0xa8] ss:$28 sps:$4 sm:$0xff]   ;;  %v1828_v0 = vld [vmem:[%s2018_s12 + $0xb0] ss:$28 sps:$4 sm:$0xff]   ;;  %v1834_v6 = vld [vmem:[%s2164_s1 + $0x138] sm:$0xff]  }
  0x1d   : > { %1586 = vmatpush3.bf16.msra.mxu0 %v1778_v22  ;;  %v1830_v2 = vld [vmem:[%s2164_s1 + $0x1a8] sm:$0xff]   ;;  %v1831_v3 = vld [vmem:[%s2164_s1 + $0x130] sm:$0xff]   ;;  %v1838_v9 = vld [vmem:[%s2164_s1 + $0x1b8] sm:$0xff]  }
  0x1e   : > { %1626 = vmatpush3.bf16.msra.mxu1 %v1779_v23  ;;  %1587 = vmatprep.subr.bf16.mxu0 %v1780_v24  ;;  %v1833_v5 = vld [vmem:[%s2164_s1 + $0x1b0] sm:$0xff]   ;;  %v1841_v11 = vld [vmem:[%s2018_s12 + $0x4c] ss:$28 sps:$4 sm:$0xff]   ;;  %v1848_v16 = vld [vmem:[%s2018_s12 + $0xc0] ss:$28 sps:$4 sm:$0xff]  }
  0x1f   : > { %1627 = vmatprep.subr.bf16.mxu1 %v1781_v25  ;;  %v1835_v7 = vld [vmem:[%s2018_s12 + $0x10] ss:$28 sps:$4 sm:$0xff]   ;;  %v1839_v10 = vld [vmem:[%s2018_s12 + $0x18] ss:$28 sps:$4 sm:$0xff]   ;;  %v1847_v13 = vld [vmem:[%s2018_s12 + $0x88] ss:$28 sps:$4 sm:$0xff]  }
  0x20   : > { %v1837_v8 = vld [vmem:[%s2018_s12 + $0x14] ss:$28 sps:$4 sm:$0xff]   ;;  %v1843_v14 = vld [vmem:[%s2018_s12 + $0x48] ss:$28 sps:$4 sm:$0xff]   ;;  %v1846_v17 = vld [vmem:[%s2018_s12 + $0x80] ss:$28 sps:$4 sm:$0xff]  }
  0x21   : > { %1588 = vmatpush3.bf16.msra.mxu0 %v1782_v26  ;;  %v1840_v12 = vld [vmem:[%s2018_s12 + $0x50] ss:$28 sps:$4 sm:$0xff]   ;;  %v1849_v18 = vld [vmem:[%s2018_s12 + $0xbc] ss:$28 sps:$4 sm:$0xff]  }
  0x22   : > { %1628 = vmatpush3.bf16.msra.mxu1 %v1783_v27  ;;  %1589 = vmatprep.subr.bf16.mxu0 %v1784_v28  ;;  %v1851_v19 = vld [vmem:[%s2018_s12 + $0xb8] ss:$28 sps:$4 sm:$0xff]  }
  0x23   : > { %1629 = vmatprep.subr.bf16.mxu1 %v1785_v29 }
  0x25   : > { %1590 = vmatpush3.bf16.msra.mxu0 %v1786_v30 }
  0x26   : > { %1630 = vmatpush3.bf16.msra.mxu1 %v1787_v31  ;;  %1655 = vmatprep.subr.bf16.mxu0 %v1794_v36 }
  0x27   : > { %1707 = vmatprep.subr.bf16.mxu1 %v1797_v39 }
  0x28   : > { %986 = vmatmul.mubr.bf16.vlgmr.msra.gmra.mrb[0].mxu0 %v1788_v32 }
  0x29   : > { %1051 = vmatmul.mubr.bf16.vlgmr.msra.gmra.mrb[0].mxu1 %v1791_v34  ;;  %1656 = vmatpush3.bf16.msra.mxu0 %v1795_v37 }
  0x2a   : > { %1657 = vmatprep.subr.bf16.mxu0 %v1796_v38  ;;  %1708 = vmatpush3.bf16.msra.mxu1 %v1797_v39 }
  0x2b   : > { %993 = vmatprep.mubr.bf16.mxu0 %v1799_v41  ;;  %1058 = vmatprep.mubr.bf16.mxu1 %v1801_v42 }
  0x2c   : > { %1709 = vmatprep.subr.bf16.mxu1 %v1806_v46 }
  0x2d   : > { %1658 = vmatpush3.bf16.msra.mxu0 %v1798_v40 }
  0x2e   : > { %1659 = vmatprep.subr.bf16.mxu0 %v1805_v45  ;;  %1710 = vmatpush3.bf16.msra.mxu1 %v1806_v46 }
  0x2f   : > { %1711 = vmatprep.subr.bf16.mxu1 %v1809_v49 }
  0x30   : > { %994 = vmatmul.mubr.bf16.gmra.mrb[4].mxu0 %v1803_v43 }
  0x31   : > { %1059 = vmatmul.mubr.bf16.gmra.mrb[4].mxu1 %v1804_v44  ;;  %1660 = vmatpush3.bf16.msra.mxu0 %v1807_v47 }
  0x32   : > { %1661 = vmatprep.subr.bf16.mxu0 %v1808_v48  ;;  %1712 = vmatpush3.bf16.msra.mxu1 %v1809_v49 }
  0x33   : > { %1001 = vmatprep.mubr.bf16.mxu0 %v1811_v51  ;;  %1066 = vmatprep.mubr.bf16.mxu1 %v1813_v52 }
  0x34   : > { %1713 = vmatprep.subr.bf16.mxu1 %v1818_v56 }
  0x35   : > { %1662 = vmatpush3.bf16.msra.mxu0 %v1810_v50 }
  0x36   : > { %1663 = vmatprep.subr.bf16.mxu0 %v1817_v55  ;;  %1714 = vmatpush3.bf16.msra.mxu1 %v1818_v56 }
  0x37   : > { %1715 = vmatprep.subr.bf16.mxu1 %v1821_v59 }
  0x38   : > { %1002 = vmatmul.mubr.bf16.gmra.mrb[8].mxu0 %v1815_v53 }
  0x39   : > { %1067 = vmatmul.mubr.bf16.gmra.mrb[8].mxu1 %v1816_v54  ;;  %1664 = vmatpush3.bf16.msra.mxu0 %v1819_v57 }
  0x3a   : > { %1665 = vmatprep.subr.bf16.mxu0 %v1820_v58  ;;  %1716 = vmatpush3.bf16.msra.mxu1 %v1821_v59 }
  0x3b   : > { %1009 = vmatprep.mubr.bf16.mxu0 %v1823_v61  ;;  %1074 = vmatprep.mubr.bf16.mxu1 %v1825_v62 }
  0x3c   : > { %1717 = vmatprep.subr.bf16.mxu1 %v1830_v2 }
  0x3d   : > { %1666 = vmatpush3.bf16.msra.mxu0 %v1822_v60 }
  0x3e   : > { %1667 = vmatprep.subr.bf16.mxu0 %v1829_v1  ;;  %1718 = vmatpush3.bf16.msra.mxu1 %v1830_v2 }
  0x3f   : > { %1719 = vmatprep.subr.bf16.mxu1 %v1833_v5 }
  0x40   : > { %1010 = vmatmul.mubr.bf16.gmra.mrb[12].mxu0 %v1827_v63 }
  0x41   : > { %1075 = vmatmul.mubr.bf16.gmra.mrb[12].mxu1 %v1828_v0  ;;  %1668 = vmatpush3.bf16.msra.mxu0 %v1831_v3 }
  0x42   : > { %1669 = vmatprep.subr.bf16.mxu0 %v1832_v4  ;;  %1720 = vmatpush3.bf16.msra.mxu1 %v1833_v5 }
  0x43   : > { %1115 = vmatprep.mubr.bf16.mxu0 %v1837_v8  ;;  %1721 = vmatprep.subr.bf16.mxu1 %v1838_v9 }
  0x44   : > { %1723 = vmatprep.mubr.bf16.mxu1 %v1839_v10 }
  0x45   : > { %1670 = vmatpush3.bf16.msra.mxu0 %v1834_v6 }
  0x46   : > { %1722 = vmatpush3.bf16.msra.mxu1 %v1838_v9 }
  0x48   : > { %1116 = vmatmul.mubr.bf16.vlgmr.msra.gmra.mrb[16].mxu0 %v1835_v7 }
  0x49   : > { %1123 = vmatprep.mubr.bf16.mxu0 %v1841_v11  ;;  %1724 = vmatmul.mubr.bf16.vlgmr.msra.gmra.mrb[16].mxu1 %v1840_v12 }
  0x4a   : > { %1727 = vmatprep.mubr.bf16.mxu1 %v1847_v13 }
  0x50   : > { %1124 = vmatmul.mubr.bf16.gmra.mrb[20].mxu0 %v1843_v14 }
  0x51   : > { %1131 = vmatprep.mubr.bf16.mxu0 %v1844_v15  ;;  %1728 = vmatmul.mubr.bf16.gmra.mrb[20].mxu1 %v1848_v16 }
  0x58   : > { %1132 = vmatmul.mubr.bf16.gmra.mrb[24].mxu0 %v1846_v17 }
  0x59   : > { %1139 = vmatprep.mubr.bf16.mxu0 %v1849_v18 }
  0x60   : > { %1140 = vmatmul.mubr.bf16.gmra.mrb[28].mxu0 %v1851_v19 }
  0xfb   : > { %v1591_v20 = vpop.f32.mrb[0].mxu0 }
  0xfc   : > { %v1631_v21 = vpop.f32.mrb[0].mxu1  ;;  %v1592_v22 = vpop.f32.mrb[1].mxu0 }
  0xfd   : > { %v1593_v23 = vadd.f32 %v1592_v22, %v1591_v20  ;;  %v1632_v24 = vpop.f32.mrb[1].mxu1  ;;  %v1594_v25 = vpop.f32.mrb[2].mxu0 }
  0xfe   : > { %v1633_v26 = vadd.f32 %v1632_v24, %v1631_v21  ;;  %v1634_v27 = vpop.f32.mrb[2].mxu1  ;;  %v1595_v28 = vpop.f32.mrb[3].mxu0  ;;  %v1532_v21 = vld [vmem:[%s2165_s2] ss:$0 sm:$0xff] }
  0xff   : > { %v1596_v29 = vadd.f32 %v1595_v28, %v1594_v25  ;;  %v1635_v30 = vpop.f32.mrb[3].mxu1 }
 0x100   : > { %v1053_v31 = vadd.f32 %v1633_v26, %v1593_v23  ;;  %v1636_v32 = vadd.f32 %v1635_v30, %v1634_v27 }
 0x102   : > { %v1056_v33 = vadd.f32 %v1636_v32, %v1596_v29  ;;  %v1533_v29 = vld [vmem:[%s2166_s3] ss:$0 sm:$0xff] }
 0x103   : > { %v1597_v34 = vpop.f32.mrb[4].mxu0 }
 0x104   : > { %v1637_v35 = vpop.f32.mrb[4].mxu1  ;;  %v1598_v36 = vpop.f32.mrb[5].mxu0 }
 0x105   : > { %v1599_v37 = vadd.f32 %v1598_v36, %v1597_v34  ;;  %v1638_v38 = vpop.f32.mrb[5].mxu1  ;;  %v1600_v39 = vpop.f32.mrb[6].mxu0 }
 0x106   : > { %v1639_v40 = vadd.f32 %v1638_v38, %v1637_v35  ;;  %v1640_v41 = vpop.f32.mrb[6].mxu1  ;;  %v1601_v42 = vpop.f32.mrb[7].mxu0 }
 0x107   : > { %v1602_v43 = vadd.f32 %v1601_v42, %v1600_v39  ;;  %v1641_v44 = vpop.f32.mrb[7].mxu1 }
 0x108   : > { %v1061_v45 = vadd.f32 %v1639_v40, %v1599_v37  ;;  %v1642_v46 = vadd.f32 %v1641_v44, %v1640_v41 }
 0x10a   : > { %v1064_v47 = vadd.f32 %v1642_v46, %v1602_v43 }
 0x10b   : > { %v1603_v48 = vpop.f32.mrb[8].mxu0 }
 0x10c   : > { %v1643_v49 = vpop.f32.mrb[8].mxu1  ;;  %v1604_v50 = vpop.f32.mrb[9].mxu0 }
 0x10d   : > { %v1644_v51 = vpop.f32.mrb[9].mxu1  ;;  %v1605_v52 = vadd.f32 %v1604_v50, %v1603_v48  ;;  %v1606_v54 = vpop.f32.mrb[10].mxu0 }
 0x10e   : > { %v1645_v53 = vadd.f32 %v1644_v51, %v1643_v49  ;;  %v1646_v55 = vpop.f32.mrb[10].mxu1  ;;  %v1607_v56 = vpop.f32.mrb[11].mxu0 }
 0x10f   : > { %v1647_v57 = vpop.f32.mrb[11].mxu1  ;;  %v1608_v59 = vadd.f32 %v1607_v56, %v1606_v54 }
 0x110   : > { %v2126_v58 = vadd.f32 %v1645_v53, %v1605_v52  ;;  %v1648_v60 = vadd.f32 %v1647_v57, %v1646_v55 }
 0x112   : > { %v2128_v61 = vadd.f32 %v1648_v60, %v1608_v59 }
 0x113   : > { %v1609_v62 = vpop.f32.mrb[12].mxu0 }
 0x114   : > { %v1649_v63 = vpop.f32.mrb[12].mxu1  ;;  %v1610_v0 = vpop.f32.mrb[13].mxu0 }
 0x115   : > { %v1650_v1 = vpop.f32.mrb[13].mxu1  ;;  %v1611_v2 = vadd.f32 %v1610_v0, %v1609_v62  ;;  %v1612_v4 = vpop.f32.mrb[14].mxu0 }
 0x116   : > { %v1651_v3 = vadd.f32 %v1650_v1, %v1649_v63  ;;  %v1652_v5 = vpop.f32.mrb[14].mxu1  ;;  %v1613_v6 = vpop.f32.mrb[15].mxu0 }
 0x117   : > { %v1653_v7 = vpop.f32.mrb[15].mxu1  ;;  %v1614_v9 = vadd.f32 %v1613_v6, %v1612_v4 }
 0x118   : > { %v2130_v8 = vadd.f32 %v1651_v3, %v1611_v2  ;;  %v1654_v10 = vadd.f32 %v1653_v7, %v1652_v5 }
 0x11a   : > { %v2132_v11 = vadd.f32 %v1654_v10, %v1614_v9 }
 0x11b   : > { %v1671_v12 = vpop.f32.mrb[16].mxu0 }
 0x11c   : > { %v1672_v13 = vpop.f32.mrb[17].mxu0  ;;  %v1725_v18 = vpop.f32.mrb[16].mxu1 }
 0x11d   : > { %v1673_v14 = vadd.f32 %v1672_v13, %v1671_v12  ;;  %v1674_v15 = vpop.f32.mrb[18].mxu0  ;;  %v1182_v20 = vpop.f32.mrb[17].mxu1 }
 0x11e   : > { %v1675_v16 = vpop.f32.mrb[19].mxu0  ;;  %v1726_v23 = vpop.f32.mrb[18].mxu1 }
 0x11f   : > { %v1676_v17 = vadd.f32 %v1675_v16, %v1674_v15  ;;  %v1118_v19 = vadd.f32 %v1673_v14, %v1053_v31  ;;  %v1185_v25 = vpop.f32.mrb[19].mxu1 }
 0x121   : > { %v1183_v22 = vadd.f32 %v1182_v20, %v1118_v19  ;;  %v1121_v24 = vadd.f32 %v1676_v17, %v1056_v33 }
 0x123   : > { %v1247_v26 = vmul.f32 %v1532_v21, %v1183_v22  ;;  %v1186_v27 = vadd.f32 %v1185_v25, %v1121_v24  ;;  %v1677_v28 = vpop.f32.mrb[20].mxu0 }
 0x124   : > { %v1678_v30 = vpop.f32.mrb[21].mxu0  ;;  %v1729_v40 = vpop.f32.mrb[20].mxu1 }
 0x125   : > { %v1248_v32 = vmul.f32 %v1532_v21, %v1186_v27  ;;  %v1679_v31 = vadd.f32 %v1678_v30, %v1677_v28  ;;  %v1680_v34 = vpop.f32.mrb[22].mxu0  ;;  %v1262_v36 = vadd.f32 %v1533_v29, %v1247_v26  ;;  %v1198_v33 = vpop.f32.mrb[21].mxu1 }
 0x126   : > { %v1681_v35 = vpop.f32.mrb[23].mxu0  ;;  %v1730_v44 = vpop.f32.mrb[22].mxu1 }
 0x127   : > { %v1263_v37 = vadd.f32 %v1533_v29, %v1248_v32  ;;  %v1126_v38 = vadd.f32 %v1679_v31, %v1061_v45  ;;  %v1682_v39 = vadd.f32 %v1681_v35, %v1680_v34  ;;  %v1201_v46 = vpop.f32.mrb[23].mxu1 }
 0x129   : > { %v1555_v41 = vpack.c.bf16 %v1263_v37, %v1262_v36  ;;  %v1191_v42 = vadd.f32 %v1725_v18, %v1126_v38  ;;  %v1129_v43 = vadd.f32 %v1682_v39, %v1064_v47 }
 0x12b   : > { %1556 = vst [vmem:[%s2144_s8] sm:$0xff] %v1555_v41   ;;  %v1249_v48 = vmul.f32 %v1532_v21, %v1191_v42  ;;  %v1194_v49 = vadd.f32 %v1726_v23, %v1129_v43  ;;  %v1683_v50 = vpop.f32.mrb[24].mxu0 }
 0x12c   : > { %v1684_v45 = vpop.f32.mrb[25].mxu0 }
 0x12d   : > { %v1250_v51 = vmul.f32 %v1532_v21, %v1194_v49  ;;  %v1685_v52 = vadd.f32 %v1684_v45, %v1683_v50  ;;  %v1686_v53 = vpop.f32.mrb[26].mxu0  ;;  %v1264_v55 = vadd.f32 %v1533_v29, %v1249_v48 }
 0x12e   : > { %v1687_v54 = vpop.f32.mrb[27].mxu0 }
 0x12f   : > { %v1265_v56 = vadd.f32 %v1533_v29, %v1250_v51  ;;  %v1688_v57 = vadd.f32 %v1687_v54, %v1686_v53  ;;  %v1134_v59 = vadd.f32 %v1685_v52, %v2126_v58 }
 0x131   : > { %v1560_v60 = vpack.c.bf16 %v1265_v56, %v1264_v55  ;;  %v1199_v62 = vadd.f32 %v1198_v33, %v1134_v59  ;;  %v1137_v47 = vadd.f32 %v1688_v57, %v2128_v61 }
 0x133   : > { %1572 = vst [vmem:[%s2144_s8 + $0x8] sm:$0xff] %v1560_v60   ;;  %v1251_v63 = vmul.f32 %v1532_v21, %v1199_v62  ;;  %v1202_v0 = vadd.f32 %v1201_v46, %v1137_v47  ;;  %v1689_v1 = vpop.f32.mrb[28].mxu0 }
 0x134   : > { %v1690_v2 = vpop.f32.mrb[29].mxu0 }
 0x135   : > { %v1252_v3 = vmul.f32 %v1532_v21, %v1202_v0  ;;  %v1691_v4 = vadd.f32 %v1690_v2, %v1689_v1  ;;  %v1692_v5 = vpop.f32.mrb[30].mxu0  ;;  %v1266_v7 = vadd.f32 %v1533_v29, %v1251_v63 }
 0x136   : > { %v1693_v6 = vpop.f32.mrb[31].mxu0 }
 0x137   : > { %v1267_v9 = vadd.f32 %v1533_v29, %v1252_v3  ;;  %v1142_v10 = vadd.f32 %v1691_v4, %v2130_v8  ;;  %v1694_v58 = vadd.f32 %v1693_v6, %v1692_v5 }
 0x139   : > { %v1565_v12 = vpack.c.bf16 %v1267_v9, %v1266_v7  ;;  %v1207_v13 = vadd.f32 %v1729_v40, %v1142_v10  ;;  %v1145_v61 = vadd.f32 %v1694_v58, %v2132_v11 }
 0x13b   : > { %1573 = vst [vmem:[%s2144_s8 + $0x10] sm:$0xff] %v1565_v12   ;;  %v1253_v14 = vmul.f32 %v1532_v21, %v1207_v13  ;;  %v1210_v15 = vadd.f32 %v1730_v44, %v1145_v61 }
 0x13d   : > { %v1254_v16 = vmul.f32 %v1532_v21, %v1210_v15  ;;  %v1268_v17 = vadd.f32 %v1533_v29, %v1253_v14 }
 0x13f   : > { %v1269_v18 = vadd.f32 %v1533_v29, %v1254_v16 }
 0x141   : > { %v1570_v19 = vpack.c.bf16 %v1269_v18, %v1268_v17 }
 0x143   : > { %1574 = vst [vmem:[%s2144_s8 + $0x18] sm:$0xff] %v1570_v19  }
 0x144 PF: > { %s14_s17 = sadd.s32 1, %s1874_s17   ;;  %s2168_s15 = smov %s1870_s16 }
 0x145   : > { %p11_p5 = scmp.ge.s32.totalorder %s14_s17, 4   ;;  %s2169_s16 = smov %s2171_s18 }
 0x147   :  { %13 = sbr.rel (!%p11_p5) target bundleno = 2 (0x2), region = 83 }

// kernel: _lambda_.63
= control target key start
LH: loop header
LB: loop body
LE: loop exit
PB: predicated region body
PF: predicated region fallthrough
CT: control target
= control target key end

     0   :  { %s906_s15 = smov 0   ;;  %s908_s16 = smov 0   ;;  %s982_s0 = inlined_call_operand.vmem [shape: bf16[128,128], index: 0, kind: input, shape index: {}]   ;;  %s983_s1 = inlined_call_operand.vmem [shape: bf16[128,128], index: 1, kind: input, shape index: {}]   ;;  %s984_s2 = inlined_call_operand.vmem [shape: f32[1,128], index: 2, kind: input, shape index: {}]   ;;  %s985_s3 = inlined_call_operand.vmem [shape: f32[1,128], index: 3, kind: input, shape index: {}]   ;;  %s986_s4 = inlined_call_operand.vmem [shape: bf16[128,128], index: 4, kind: output, shape index: {}]  }
   0x1   :  { %s910_s17 = smov 0  }
   0x2 LB: > { %s33_s18 = sadd.s32 1, %s875_s16  ;;  %p709_p0 = scmp.ge.s32.totalorder %s879_s17, 1  ;;  %s879_s17 = sphi %s910_s17, %s14_s17   ;;  %s875_s16 = sphi %s908_s16, %s988_s16   ;;  %s871_s15 = sphi %s906_s15, %s987_s15  }
   0x3   : > { %p35_p1 = scmp.ge.s32.totalorder %s33_s18, 2  ;;  %p221_p2 = scmp.lt.s32.totalorder %s879_s17, 3 }
   0x5   : > { %s990_s18 = smov (%p35_p1, %s33_s18), 0  ;;  %p222_p3 = pnand %p709_p0, %p221_p2 }
   0x6   : > { %v845_v0 = vld [vmem:[%s983_s1] sm:$0xff] (!%p222_p3)   ;;  %s710_s21 = sshll.u32 (!%p222_p3), %s871_s15, 3  ;;  %v846_v1 = vld [vmem:[%s983_s1 + $0x8] sm:$0xff] (!%p222_p3)   ;;  %v847_v2 = vld [vmem:[%s983_s1 + $0x10] sm:$0xff] (!%p222_p3)  }
   0x7   : > { %225 = sbr.rel (%p222_p3) target bundleno = 261 (0x105), region = 36  ;;  %p268_p4 = scmp.lt.s32.totalorder (!%p222_p3), %s710_s21, 15  ;;  %781 = vmatprep.subr.bf16.mxu0 (!%p222_p3), %v845_v0  ;;  %805 = vmatprep.subr.bf16.mxu1 (!%p222_p3), %v845_v0  ;;  %v848_v3 = vld [vmem:[%s983_s1 + $0x18] sm:$0xff] (!%p222_p3)   ;;  %v849_v6 = vld [vmem:[%s983_s1 + $0x20] sm:$0xff] (!%p222_p3)   ;;  %v850_v7 = vld [vmem:[%s983_s1 + $0x28] sm:$0xff] (!%p222_p3)  }
   0x8   : > { %782 = vmatpush3.bf16.msra.mxu0 (!%p222_p3), %v845_v0  ;;  %813 = vmatpush3.bf16.msra.mxu1 (!%p222_p3), %v845_v0  ;;  %v851_v8 = vld [vmem:[%s983_s1 + $0x30] sm:$0xff] (!%p222_p3)   ;;  %v852_v9 = vld [vmem:[%s983_s1 + $0x38] sm:$0xff] (!%p222_p3)   ;;  %v726_v12 = vld [vmem:[%s984_s2] ss:$0 sm:$0xff] (!%p222_p3) }
   0x9   : > { %783 = vmatprep.subr.bf16.mxu0 (!%p222_p3), %v846_v1  ;;  %806 = vmatprep.subr.bf16.mxu1 (!%p222_p3), %v846_v1  ;;  %v727_v19 = vld [vmem:[%s985_s3] ss:$0 sm:$0xff] (!%p222_p3) }
   0xc   : > { %784 = vmatpush3.bf16.msra.mxu0 (!%p222_p3), %v846_v1  ;;  %814 = vmatpush3.bf16.msra.mxu1 (!%p222_p3), %v846_v1 }
   0xd   : > { %785 = vmatprep.subr.bf16.mxu0 (!%p222_p3), %v847_v2  ;;  %807 = vmatprep.subr.bf16.mxu1 (!%p222_p3), %v847_v2 }
   0xe   : > { %s992_s21 = smov (!%p268_p4, %s710_s21), 15 }
   0xf   : > { %s711_s26 = sshll.u32 %s992_s21, 2 }
  0x10   : > { %s941_s29 = scalar_lea.vmem %s982_s0, %s711_s26  ;;  %786 = vmatpush3.bf16.msra.mxu0 %v847_v2  ;;  %815 = vmatpush3.bf16.msra.mxu1 %v847_v2  ;;  %s298_s24 = scalar_lea.vmem %s986_s4, %s711_s26 }
  0x11   : > { %v853_v4 = vld [vmem:[%s941_s29] sm:$0xff]   ;;  %v854_v5 = vld [vmem:[%s941_s29 + $0x10] sm:$0xff]   ;;  %787 = vmatprep.subr.bf16.mxu0 %v848_v3  ;;  %808 = vmatprep.subr.bf16.mxu1 %v848_v3  ;;  %v855_v10 = vld [vmem:[%s941_s29 + $0x8] sm:$0xff]  }
  0x12   : > { %797 = vmatprep.mubr.bf16.mxu0 %v853_v4  ;;  %801 = vmatprep.mubr.bf16.mxu1 %v854_v5  ;;  %v856_v11 = vld [vmem:[%s941_s29 + $0x18] sm:$0xff]  }
  0x14   : > { %788 = vmatpush3.bf16.msra.mxu0 %v848_v3  ;;  %816 = vmatpush3.bf16.msra.mxu1 %v848_v3 }
  0x15   : > { %789 = vmatprep.subr.bf16.mxu0 %v849_v6  ;;  %809 = vmatprep.subr.bf16.mxu1 %v849_v6 }
  0x18   : > { %790 = vmatpush3.bf16.msra.mxu0 %v849_v6  ;;  %817 = vmatpush3.bf16.msra.mxu1 %v849_v6 }
  0x19   : > { %791 = vmatprep.subr.bf16.mxu0 %v850_v7  ;;  %810 = vmatprep.subr.bf16.mxu1 %v850_v7 }
  0x1c   : > { %792 = vmatpush3.bf16.msra.mxu0 %v850_v7  ;;  %818 = vmatpush3.bf16.msra.mxu1 %v850_v7 }
  0x1d   : > { %793 = vmatprep.subr.bf16.mxu0 %v851_v8  ;;  %811 = vmatprep.subr.bf16.mxu1 %v851_v8 }
  0x20   : > { %794 = vmatpush3.bf16.msra.mxu0 %v851_v8  ;;  %819 = vmatpush3.bf16.msra.mxu1 %v851_v8 }
  0x21   : > { %795 = vmatprep.subr.bf16.mxu0 %v852_v9  ;;  %812 = vmatprep.subr.bf16.mxu1 %v852_v9 }
  0x24   : > { %796 = vmatpush3.bf16.msra.mxu0 %v852_v9  ;;  %820 = vmatpush3.bf16.msra.mxu1 %v852_v9 }
  0x27   : > { %798 = vmatmul.mubr.bf16.vlgmr.msra.gmra.mrb[0].mxu0 %v855_v10  ;;  %802 = vmatmul.mubr.bf16.vlgmr.msra.gmra.mrb[0].mxu1 %v856_v11 }
  0xfa   : > { %v799_v13 = vpop.f32.mrb[0].mxu0  ;;  %v803_v14 = vpop.f32.mrb[0].mxu1 }
  0xfb   : > { %v518_v15 = vmul.f32 %v799_v13, %v726_v12  ;;  %v522_v16 = vmul.f32 %v803_v14, %v726_v12  ;;  %v451_v17 = vpop.f32.mrb[1].mxu0  ;;  %v467_v18 = vpop.f32.mrb[1].mxu1 }
  0xfc   : > { %v516_v20 = vmul.f32 %v726_v12, %v451_v17  ;;  %v520_v21 = vmul.f32 %v726_v12, %v467_v18  ;;  %v800_v22 = vpop.f32.mrb[2].mxu0  ;;  %v804_v23 = vpop.f32.mrb[2].mxu1 }
  0xfd   : > { %v519_v24 = vmul.f32 %v800_v22, %v726_v12  ;;  %v523_v25 = vmul.f32 %v804_v23, %v726_v12  ;;  %v454_v26 = vpop.f32.mrb[3].mxu0  ;;  %v470_v27 = vpop.f32.mrb[3].mxu1  ;;  %v533_v30 = vadd.f32 %v727_v19, %v518_v15  ;;  %v537_v31 = vadd.f32 %v727_v19, %v522_v16 }
  0xfe   : > { %v517_v28 = vmul.f32 %v726_v12, %v454_v26  ;;  %v521_v29 = vmul.f32 %v726_v12, %v470_v27  ;;  %v531_v34 = vadd.f32 %v727_v19, %v516_v20  ;;  %v535_v35 = vadd.f32 %v727_v19, %v520_v21 }
  0xff   : > { %v534_v32 = vadd.f32 %v727_v19, %v519_v24  ;;  %v538_v33 = vadd.f32 %v727_v19, %v523_v25 }
 0x100   : > { %v532_v36 = vadd.f32 %v727_v19, %v517_v28  ;;  %v536_v37 = vadd.f32 %v727_v19, %v521_v29 }
 0x101   : > { %v754_v38 = vpack.c.bf16 %v534_v32, %v533_v30  ;;  %v764_v39 = vpack.c.bf16 %v538_v33, %v537_v31 }
 0x102   : > { %v749_v40 = vpack.c.bf16 %v532_v36, %v531_v34  ;;  %v759_v41 = vpack.c.bf16 %v536_v37, %v535_v35 }
 0x103   : > { %766 = vst [vmem:[%s298_s24 + $0x8] sm:$0xff] %v754_v38   ;;  %768 = vst [vmem:[%s298_s24 + $0x18] sm:$0xff] %v764_v39  }
 0x104   : > { %750 = vst [vmem:[%s298_s24] sm:$0xff] %v749_v40   ;;  %767 = vst [vmem:[%s298_s24 + $0x10] sm:$0xff] %v759_v41  }
 0x105 PF: > { %s14_s17 = sadd.s32 1, %s879_s17   ;;  %s987_s15 = smov %s875_s16 }
 0x106   : > { %p11_p5 = scmp.ge.s32.totalorder %s14_s17, 4   ;;  %s988_s16 = smov %s990_s18 }
 0x108   :  { %13 = sbr.rel (!%p11_p5) target bundleno = 2 (0x2), region = 83 }

</bundles_post_ra>
